<compile_context>
chip_gen: v7x
topology: tpu7x:2x2x1
jax: 0.10.0
libtpu: 0.0.40
codegen_flags: <defaults>
</compile_context>

<pallas_src>
import functools

import numpy as np
import jax
import jax.numpy as jnp
from jax import lax
from jax.experimental import pallas as pl
from jax.experimental.pallas import tpu as pltpu

COUT = 512       # output channels of all three 1x1 convs (from __init__)
CCV_ITERS = 10   # maxIter=10 in forward()
CB = 128         # output-channel block; keep a multiple of 128 (lane-dense).
                 # Per grid step the kernel holds a few f32 (H*W, CB) planes in
                 # VMEM (x2 pipeline buffers); for very large H*W (esp. on
                 # v7x's 64 MiB VMEM) CB stays 128 and H*W is the budget knob.


# --------------------------------------------------------------------------
# Fused Pallas kernel: 1x1 convs + Chan-Vese (CCV stand-in) + sigmoid
# --------------------------------------------------------------------------

def _acm_fused_kernel(dt_ref, lam_ref, g_ref, wg_ref, x_ref, wx_ref,
                      c_ref, wc_ref, o_ref):
    dt = dt_ref[0]
    lam = lam_ref[0]

    # 1x1 convs as per-pixel matmuls; Cin is tiny so these are a negligible,
    # non-bottleneck part of the kernel (MXU handles the small K by padding).
    u = jnp.maximum(
        jnp.dot(g_ref[0], wg_ref[...], preferred_element_type=jnp.float32),
        0.0)
    u = u + jnp.dot(x_ref[0], wx_ref[...], preferred_element_type=jnp.float32)
    phi = jnp.dot(c_ref[0], wc_ref[...], preferred_element_type=jnp.float32)

    # TODO(synk): the `CCV` class is not defined in the reference source; a
    # standard Chan-Vese level-set evolution (initial contour = interpolated
    # contour features, maxIter=10, color=False) is used as a stand-in.
    hw = jnp.float32(u.shape[0])
    sum_u = jnp.sum(u, axis=0, keepdims=True)        # (1, CB), loop-invariant

    def body(_, phi):
        inside = (phi >= 0.0).astype(jnp.float32)
        n_in = jnp.sum(inside, axis=0, keepdims=True)        # (1, CB)
        s_in = jnp.sum(u * inside, axis=0, keepdims=True)    # (1, CB)
        n_out = hw - n_in                                    # hoisted complement
        s_out = sum_u - s_in
        c1 = s_in / jnp.maximum(n_in, 1.0)
        c2 = s_out / jnp.maximum(n_out, 1.0)
        # lam*((u-c2)^2 - (u-c1)^2) == lam*(c1-c2)*(2u - c1 - c2)   (exact)
        force = (lam * (c1 - c2)) * (2.0 * u - (c1 + c2))
        return phi + dt * force

    phi = lax.fori_loop(0, CCV_ITERS, body, phi, unroll=True)

    # sigmoid; reciprocal goes to the (otherwise idle) EUP slot.
    o_ref[0] = pl.reciprocal(1.0 + jnp.exp(-phi), approx=True)


def acm_attention_fused(g_flat, wg, x_flat, wx, c_flat, wc, dt, lam, *, cb=CB):
    """Inputs are channel-last: g_flat/c_flat (N, H*W, C), x_flat (N, H*W, 2C).
    Returns channel-last alpha of shape (N, H*W, COUT)."""
    N, HW, C = g_flat.shape
    C2 = x_flat.shape[-1]
    assert COUT % cb == 0
    return pl.pallas_call(
        _acm_fused_kernel,
        out_shape=jax.ShapeDtypeStruct((N, HW, COUT), jnp.float32),
        grid=(N, COUT // cb),
        in_specs=[
            pl.BlockSpec(memory_space=pltpu.MemorySpace.SMEM),   # dt scalar
            pl.BlockSpec(memory_space=pltpu.MemorySpace.SMEM),   # lambda_ scalar
            pl.BlockSpec((1, HW, C), lambda n, j: (n, 0, 0)),    # g (channel-last)
            pl.BlockSpec((C, cb), lambda n, j: (0, j)),          # Wg column block
            pl.BlockSpec((1, HW, C2), lambda n, j: (n, 0, 0)),   # x (channel-last)
            pl.BlockSpec((C2, cb), lambda n, j: (0, j)),         # Wx column block
            pl.BlockSpec((1, HW, C), lambda n, j: (n, 0, 0)),    # upsampled contour
            pl.BlockSpec((C, cb), lambda n, j: (0, j)),          # Wc column block
        ],
        out_specs=pl.BlockSpec((1, HW, cb), lambda n, j: (n, 0, j)),
        compiler_params=pltpu.CompilerParams(
            dimension_semantics=("parallel", "parallel")),
    )(dt, lam, g_flat, wg, x_flat, wx, c_flat, wc)


# --------------------------------------------------------------------------
# Bicubic resize as dense matrices (PyTorch align_corners=False, A=-0.75)
# --------------------------------------------------------------------------

def _bicubic_matrix(out_size, in_size, A=-0.75):
    """Dense (out, in) resize matrix matching torch's bicubic upsampling."""
    def k1(x):  # |x| <= 1
        return (A + 2.0) * x ** 3 - (A + 3.0) * x ** 2 + 1.0

    def k2(x):  # 1 < |x| < 2
        return A * x ** 3 - 5.0 * A * x ** 2 + 8.0 * A * x - 4.0 * A

    scale = in_size / out_size
    src = (np.arange(out_size, dtype=np.float64) + 0.5) * scale - 0.5
    i0 = np.floor(src)
    t = src - i0
    w = np.stack([k2(t + 1.0), k1(t), k1(1.0 - t), k2(2.0 - t)], axis=-1)
    idx = i0[:, None].astype(np.int64) + np.arange(-1, 3)[None, :]
    idx = np.clip(idx, 0, in_size - 1)                   # replicate border taps
    R = np.zeros((out_size, in_size), np.float64)
    rows = np.repeat(np.arange(out_size), 4)
    np.add.at(R, (rows, idx.reshape(-1)), w.reshape(-1))
    return jnp.asarray(R, jnp.float32)


# --------------------------------------------------------------------------
# ACMAttention forward
# --------------------------------------------------------------------------

def acm_attention_forward(params, contour, g, x, dt, lambda_):
    """contour: (N, C, Hc, Wc), g: (N, C, H, W), x: (N, 2C, H, W)  [NCHW]."""
    N, C, H, W = g.shape
    Nc, _, Hc, Wc = contour.shape

    # Bicubic upsample of the RAW C-channel contour: the linear interpolation
    # commutes with the linear 1x1 contour_conv, so the conv is done inside
    # the fused Pallas kernel on the upsampled contour (same linear operator).
    Rh = _bicubic_matrix(H, Hc)                      # (H, Hc), baked constant
    Rw = _bicubic_matrix(W, Wc)                      # (W, Wc), baked constant
    c_flat = jnp.einsum('hH,ncHW,wW->nhwc', Rh, contour, Rw).reshape(Nc, H * W, C)

    # Channel-last flattening of the small-Cin inputs (cheap: C / 2C channels).
    g_flat = jnp.transpose(g, (0, 2, 3, 1)).reshape(N, H * W, C)
    x_flat = jnp.transpose(x, (0, 2, 3, 1)).reshape(N, H * W, 2 * C)

    alpha_nhwc = acm_attention_fused(
        g_flat, params["wg"], x_flat, params["wx"], c_flat, params["wc"],
        dt, lambda_)

    # Back to NCHW only at the very end, for PyTorch interface parity.
    return alpha_nhwc.reshape(N, H, W, COUT).transpose(0, 3, 1, 2)


# --------------------------------------------------------------------------
# Main
# --------------------------------------------------------------------------

if __name__ == "__main__":
    key = jax.random.PRNGKey(0)
    channels = 4
    N, H, W = 2, 16, 16
    Hc, Wc = 8, 8

    k1, k2, k3, k4, k5, k6 = jax.random.split(key, 6)

    # PyTorch Conv2d default init: U(-1/sqrt(fan_in), 1/sqrt(fan_in)); weights
    # stored here as (Cin, Cout) == torch weight (Cout, Cin, 1, 1) transposed.
    b_g = 1.0 / (channels ** 0.5)
    b_x = 1.0 / ((2 * channels) ** 0.5)
    params = {
        "wg": jax.random.uniform(k1, (channels, COUT), jnp.float32, -b_g, b_g),
        "wx": jax.random.uniform(k2, (2 * channels, COUT), jnp.float32, -b_x, b_x),
        "wc": jax.random.uniform(k3, (channels, COUT), jnp.float32, -b_g, b_g),
    }

    contour = jax.random.normal(k4, (N, channels, Hc, Wc), jnp.float32)
    g = jax.random.normal(k5, (N, channels, H, W), jnp.float32)
    x = jax.random.normal(k6, (N, 2 * channels, H, W), jnp.float32)
    dt = jnp.array([0.1], jnp.float32)        # scalar tensor argument
    lambda_ = jnp.array([1.0], jnp.float32)   # scalar tensor argument

    fwd = jax.jit(functools.partial(acm_attention_forward, params))
    alpha = fwd(contour, g, x, dt, lambda_)
    alpha = jax.block_until_ready(alpha)

    assert alpha.shape == (N, COUT, H, W), alpha.shape
    assert bool(jnp.all(jnp.isfinite(alpha)))
    # sigmoid range (small slack for the EUP approximate reciprocal)
    assert bool(jnp.all((alpha >= -1e-4) & (alpha <= 1.0 + 2e-3)))
    print("KERNEL_OK")
</pallas_src>

<mosaic_0001>
module attributes {stable_mosaic.version = 11 : i64} {
  func.func @_acm_fused_kernel(%arg0: i32, %arg1: i32, %arg2: memref<1xf32, #tpu.memory_space<smem>>, %arg3: memref<1xf32, #tpu.memory_space<smem>>, %arg4: memref<1x256x4xf32, #tpu.memory_space<vmem>>, %arg5: memref<4x128xf32, #tpu.memory_space<vmem>>, %arg6: memref<1x256x8xf32, #tpu.memory_space<vmem>>, %arg7: memref<8x128xf32, #tpu.memory_space<vmem>>, %arg8: memref<1x256x4xf32, #tpu.memory_space<vmem>>, %arg9: memref<4x128xf32, #tpu.memory_space<vmem>>, %arg10: memref<1x256x128xf32, #tpu.memory_space<vmem>>) attributes {dimension_semantics = [#tpu.dimension_semantics<parallel>, #tpu.dimension_semantics<parallel>], iteration_bounds = array<i64: 2, 4>, scalar_prefetch = 0 : i64, scratch_operands = 0 : i64, tpu.core_type = #tpu.core_type<tc>, window_params = [{transform_indices = @transform_0, window_bounds = array<i64: 1>}, {transform_indices = @transform_1, window_bounds = array<i64: 1>}, {transform_indices = @transform_2, window_bounds = array<i64: 1, 256, 4>}, {transform_indices = @transform_3, window_bounds = array<i64: 4, 128>}, {transform_indices = @transform_4, window_bounds = array<i64: 1, 256, 8>}, {transform_indices = @transform_5, window_bounds = array<i64: 8, 128>}, {transform_indices = @transform_6, window_bounds = array<i64: 1, 256, 4>}, {transform_indices = @transform_7, window_bounds = array<i64: 4, 128>}, {transform_indices = @transform_8, window_bounds = array<i64: 1, 256, 128>}]} {
    %c0 = arith.constant 0 : index
    %0 = memref.load %arg2[%c0] : memref<1xf32, #tpu.memory_space<smem>>
    %c0_0 = arith.constant 0 : index
    %1 = memref.load %arg3[%c0_0] : memref<1xf32, #tpu.memory_space<smem>>
    %c0_1 = arith.constant 0 : index
    %c0_2 = arith.constant 0 : index
    %c0_3 = arith.constant 0 : index
    %2 = vector.load %arg4[%c0_1, %c0_2, %c0_3] : memref<1x256x4xf32, #tpu.memory_space<vmem>>, vector<1x256x4xf32>
    %3 = vector.shape_cast %2 : vector<1x256x4xf32> to vector<256x4xf32>
    %c0_4 = arith.constant 0 : index
    %c0_5 = arith.constant 0 : index
    %4 = vector.load %arg5[%c0_4, %c0_5] : memref<4x128xf32, #tpu.memory_space<vmem>>, vector<4x128xf32>
    %cst = arith.constant dense<0.000000e+00> : vector<256x128xf32>
    %5 = tpu.matmul %3, %4, %cst {dimension_numbers = #tpu.dot_dimension_numbers<[1], [0], [0], [1], [0, 0, 1, 1], [], []>} : vector<256x4xf32>, vector<4x128xf32>, vector<256x128xf32> -> vector<256x128xf32>
    %cst_6 = arith.constant 0.000000e+00 : f32
    %6 = vector.broadcast %cst_6 : f32 to vector<256x128xf32>
    %7 = arith.maximumf %5, %6 : vector<256x128xf32>
    %c0_7 = arith.constant 0 : index
    %c0_8 = arith.constant 0 : index
    %c0_9 = arith.constant 0 : index
    %8 = vector.load %arg6[%c0_7, %c0_8, %c0_9] : memref<1x256x8xf32, #tpu.memory_space<vmem>>, vector<1x256x8xf32>
    %9 = vector.shape_cast %8 : vector<1x256x8xf32> to vector<256x8xf32>
    %c0_10 = arith.constant 0 : index
    %c0_11 = arith.constant 0 : index
    %10 = vector.load %arg7[%c0_10, %c0_11] : memref<8x128xf32, #tpu.memory_space<vmem>>, vector<8x128xf32>
    %cst_12 = arith.constant dense<0.000000e+00> : vector<256x128xf32>
    %11 = tpu.matmul %9, %10, %cst_12 {dimension_numbers = #tpu.dot_dimension_numbers<[1], [0], [0], [1], [0, 0, 1, 1], [], []>} : vector<256x8xf32>, vector<8x128xf32>, vector<256x128xf32> -> vector<256x128xf32>
    %12 = arith.addf %7, %11 : vector<256x128xf32>
    %c0_13 = arith.constant 0 : index
    %c0_14 = arith.constant 0 : index
    %c0_15 = arith.constant 0 : index
    %13 = vector.load %arg8[%c0_13, %c0_14, %c0_15] : memref<1x256x4xf32, #tpu.memory_space<vmem>>, vector<1x256x4xf32>
    %14 = vector.shape_cast %13 : vector<1x256x4xf32> to vector<256x4xf32>
    %c0_16 = arith.constant 0 : index
    %c0_17 = arith.constant 0 : index
    %15 = vector.load %arg9[%c0_16, %c0_17] : memref<4x128xf32, #tpu.memory_space<vmem>>, vector<4x128xf32>
    %cst_18 = arith.constant dense<0.000000e+00> : vector<256x128xf32>
    %16 = tpu.matmul %14, %15, %cst_18 {dimension_numbers = #tpu.dot_dimension_numbers<[1], [0], [0], [1], [0, 0, 1, 1], [], []>} : vector<256x4xf32>, vector<4x128xf32>, vector<256x128xf32> -> vector<256x128xf32>
    %cst_19 = arith.constant dense<0.000000e+00> : vector<128xf32>
    %17 = vector.multi_reduction <add>, %12, %cst_19 [0] : vector<256x128xf32> to vector<128xf32>
    %18 = vector.shape_cast %17 : vector<128xf32> to vector<1x128xf32>
    %cst_20 = arith.constant 2.560000e+02 : f32
    %c0_i32 = arith.constant 0 : i32
    %cst_21 = arith.constant 0.000000e+00 : f32
    %19 = vector.broadcast %cst_21 : f32 to vector<256x128xf32>
    %20 = arith.cmpf oge, %16, %19 : vector<256x128xf32>
    %21 = arith.extui %20 : vector<256x128xi1> to vector<256x128xi32>
    %22 = arith.sitofp %21 : vector<256x128xi32> to vector<256x128xf32>
    %cst_22 = arith.constant dense<0.000000e+00> : vector<128xf32>
    %23 = vector.multi_reduction <add>, %22, %cst_22 [0] : vector<256x128xf32> to vector<128xf32>
    %24 = vector.shape_cast %23 : vector<128xf32> to vector<1x128xf32>
    %25 = arith.mulf %12, %22 : vector<256x128xf32>
    %cst_23 = arith.constant dense<0.000000e+00> : vector<128xf32>
    %26 = vector.multi_reduction <add>, %25, %cst_23 [0] : vector<256x128xf32> to vector<128xf32>
    %27 = vector.shape_cast %26 : vector<128xf32> to vector<1x128xf32>
    %28 = vector.broadcast %cst_20 : f32 to vector<1x128xf32>
    %29 = arith.subf %28, %24 : vector<1x128xf32>
    %30 = arith.subf %18, %27 : vector<1x128xf32>
    %cst_24 = arith.constant 1.000000e+00 : f32
    %31 = vector.broadcast %cst_24 : f32 to vector<1x128xf32>
    %32 = arith.maximumf %24, %31 : vector<1x128xf32>
    %33 = arith.divf %27, %32 : vector<1x128xf32>
    %cst_25 = arith.constant 1.000000e+00 : f32
    %34 = vector.broadcast %cst_25 : f32 to vector<1x128xf32>
    %35 = arith.maximumf %29, %34 : vector<1x128xf32>
    %36 = arith.divf %30, %35 : vector<1x128xf32>
    %37 = arith.subf %33, %36 : vector<1x128xf32>
    %38 = vector.broadcast %1 : f32 to vector<1x128xf32>
    %39 = arith.mulf %38, %37 : vector<1x128xf32>
    %cst_26 = arith.constant 2.000000e+00 : f32
    %40 = vector.broadcast %cst_26 : f32 to vector<256x128xf32>
    %41 = arith.mulf %40, %12 : vector<256x128xf32>
    %42 = arith.addf %33, %36 : vector<1x128xf32>
    %43 = vector.broadcast %42 : vector<1x128xf32> to vector<256x128xf32>
    %44 = arith.subf %41, %43 : vector<256x128xf32>
    %45 = vector.broadcast %39 : vector<1x128xf32> to vector<256x128xf32>
    %46 = arith.mulf %45, %44 : vector<256x128xf32>
    %47 = vector.broadcast %0 : f32 to vector<256x128xf32>
    %48 = arith.mulf %47, %46 : vector<256x128xf32>
    %49 = arith.addf %16, %48 : vector<256x128xf32>
    %c1_i32 = arith.constant 1 : i32
    %cst_27 = arith.constant 0.000000e+00 : f32
    %50 = vector.broadcast %cst_27 : f32 to vector<256x128xf32>
    %51 = arith.cmpf oge, %49, %50 : vector<256x128xf32>
    %52 = arith.extui %51 : vector<256x128xi1> to vector<256x128xi32>
    %53 = arith.sitofp %52 : vector<256x128xi32> to vector<256x128xf32>
    %cst_28 = arith.constant dense<0.000000e+00> : vector<128xf32>
    %54 = vector.multi_reduction <add>, %53, %cst_28 [0] : vector<256x128xf32> to vector<128xf32>
    %55 = vector.shape_cast %54 : vector<128xf32> to vector<1x128xf32>
    %56 = arith.mulf %12, %53 : vector<256x128xf32>
    %cst_29 = arith.constant dense<0.000000e+00> : vector<128xf32>
    %57 = vector.multi_reduction <add>, %56, %cst_29 [0] : vector<256x128xf32> to vector<128xf32>
    %58 = vector.shape_cast %57 : vector<128xf32> to vector<1x128xf32>
    %59 = vector.broadcast %cst_20 : f32 to vector<1x128xf32>
    %60 = arith.subf %59, %55 : vector<1x128xf32>
    %61 = arith.subf %18, %58 : vector<1x128xf32>
    %cst_30 = arith.constant 1.000000e+00 : f32
    %62 = vector.broadcast %cst_30 : f32 to vector<1x128xf32>
    %63 = arith.maximumf %55, %62 : vector<1x128xf32>
    %64 = arith.divf %58, %63 : vector<1x128xf32>
    %cst_31 = arith.constant 1.000000e+00 : f32
    %65 = vector.broadcast %cst_31 : f32 to vector<1x128xf32>
    %66 = arith.maximumf %60, %65 : vector<1x128xf32>
    %67 = arith.divf %61, %66 : vector<1x128xf32>
    %68 = arith.subf %64, %67 : vector<1x128xf32>
    %69 = vector.broadcast %1 : f32 to vector<1x128xf32>
    %70 = arith.mulf %69, %68 : vector<1x128xf32>
    %cst_32 = arith.constant 2.000000e+00 : f32
    %71 = vector.broadcast %cst_32 : f32 to vector<256x128xf32>
    %72 = arith.mulf %71, %12 : vector<256x128xf32>
    %73 = arith.addf %64, %67 : vector<1x128xf32>
    %74 = vector.broadcast %73 : vector<1x128xf32> to vector<256x128xf32>
    %75 = arith.subf %72, %74 : vector<256x128xf32>
    %76 = vector.broadcast %70 : vector<1x128xf32> to vector<256x128xf32>
    %77 = arith.mulf %76, %75 : vector<256x128xf32>
    %78 = vector.broadcast %0 : f32 to vector<256x128xf32>
    %79 = arith.mulf %78, %77 : vector<256x128xf32>
    %80 = arith.addf %49, %79 : vector<256x128xf32>
    %c2_i32 = arith.constant 2 : i32
    %cst_33 = arith.constant 0.000000e+00 : f32
    %81 = vector.broadcast %cst_33 : f32 to vector<256x128xf32>
    %82 = arith.cmpf oge, %80, %81 : vector<256x128xf32>
    %83 = arith.extui %82 : vector<256x128xi1> to vector<256x128xi32>
    %84 = arith.sitofp %83 : vector<256x128xi32> to vector<256x128xf32>
    %cst_34 = arith.constant dense<0.000000e+00> : vector<128xf32>
    %85 = vector.multi_reduction <add>, %84, %cst_34 [0] : vector<256x128xf32> to vector<128xf32>
    %86 = vector.shape_cast %85 : vector<128xf32> to vector<1x128xf32>
    %87 = arith.mulf %12, %84 : vector<256x128xf32>
    %cst_35 = arith.constant dense<0.000000e+00> : vector<128xf32>
    %88 = vector.multi_reduction <add>, %87, %cst_35 [0] : vector<256x128xf32> to vector<128xf32>
    %89 = vector.shape_cast %88 : vector<128xf32> to vector<1x128xf32>
    %90 = vector.broadcast %cst_20 : f32 to vector<1x128xf32>
    %91 = arith.subf %90, %86 : vector<1x128xf32>
    %92 = arith.subf %18, %89 : vector<1x128xf32>
    %cst_36 = arith.constant 1.000000e+00 : f32
    %93 = vector.broadcast %cst_36 : f32 to vector<1x128xf32>
    %94 = arith.maximumf %86, %93 : vector<1x128xf32>
    %95 = arith.divf %89, %94 : vector<1x128xf32>
    %cst_37 = arith.constant 1.000000e+00 : f32
    %96 = vector.broadcast %cst_37 : f32 to vector<1x128xf32>
    %97 = arith.maximumf %91, %96 : vector<1x128xf32>
    %98 = arith.divf %92, %97 : vector<1x128xf32>
    %99 = arith.subf %95, %98 : vector<1x128xf32>
    %100 = vector.broadcast %1 : f32 to vector<1x128xf32>
    %101 = arith.mulf %100, %99 : vector<1x128xf32>
    %cst_38 = arith.constant 2.000000e+00 : f32
    %102 = vector.broadcast %cst_38 : f32 to vector<256x128xf32>
    %103 = arith.mulf %102, %12 : vector<256x128xf32>
    %104 = arith.addf %95, %98 : vector<1x128xf32>
    %105 = vector.broadcast %104 : vector<1x128xf32> to vector<256x128xf32>
    %106 = arith.subf %103, %105 : vector<256x128xf32>
    %107 = vector.broadcast %101 : vector<1x128xf32> to vector<256x128xf32>
    %108 = arith.mulf %107, %106 : vector<256x128xf32>
    %109 = vector.broadcast %0 : f32 to vector<256x128xf32>
    %110 = arith.mulf %109, %108 : vector<256x128xf32>
    %111 = arith.addf %80, %110 : vector<256x128xf32>
    %c3_i32 = arith.constant 3 : i32
    %cst_39 = arith.constant 0.000000e+00 : f32
    %112 = vector.broadcast %cst_39 : f32 to vector<256x128xf32>
    %113 = arith.cmpf oge, %111, %112 : vector<256x128xf32>
    %114 = arith.extui %113 : vector<256x128xi1> to vector<256x128xi32>
    %115 = arith.sitofp %114 : vector<256x128xi32> to vector<256x128xf32>
    %cst_40 = arith.constant dense<0.000000e+00> : vector<128xf32>
    %116 = vector.multi_reduction <add>, %115, %cst_40 [0] : vector<256x128xf32> to vector<128xf32>
    %117 = vector.shape_cast %116 : vector<128xf32> to vector<1x128xf32>
    %118 = arith.mulf %12, %115 : vector<256x128xf32>
    %cst_41 = arith.constant dense<0.000000e+00> : vector<128xf32>
    %119 = vector.multi_reduction <add>, %118, %cst_41 [0] : vector<256x128xf32> to vector<128xf32>
    %120 = vector.shape_cast %119 : vector<128xf32> to vector<1x128xf32>
    %121 = vector.broadcast %cst_20 : f32 to vector<1x128xf32>
    %122 = arith.subf %121, %117 : vector<1x128xf32>
    %123 = arith.subf %18, %120 : vector<1x128xf32>
    %cst_42 = arith.constant 1.000000e+00 : f32
    %124 = vector.broadcast %cst_42 : f32 to vector<1x128xf32>
    %125 = arith.maximumf %117, %124 : vector<1x128xf32>
    %126 = arith.divf %120, %125 : vector<1x128xf32>
    %cst_43 = arith.constant 1.000000e+00 : f32
    %127 = vector.broadcast %cst_43 : f32 to vector<1x128xf32>
    %128 = arith.maximumf %122, %127 : vector<1x128xf32>
    %129 = arith.divf %123, %128 : vector<1x128xf32>
    %130 = arith.subf %126, %129 : vector<1x128xf32>
    %131 = vector.broadcast %1 : f32 to vector<1x128xf32>
    %132 = arith.mulf %131, %130 : vector<1x128xf32>
    %cst_44 = arith.constant 2.000000e+00 : f32
    %133 = vector.broadcast %cst_44 : f32 to vector<256x128xf32>
    %134 = arith.mulf %133, %12 : vector<256x128xf32>
    %135 = arith.addf %126, %129 : vector<1x128xf32>
    %136 = vector.broadcast %135 : vector<1x128xf32> to vector<256x128xf32>
    %137 = arith.subf %134, %136 : vector<256x128xf32>
    %138 = vector.broadcast %132 : vector<1x128xf32> to vector<256x128xf32>
    %139 = arith.mulf %138, %137 : vector<256x128xf32>
    %140 = vector.broadcast %0 : f32 to vector<256x128xf32>
    %141 = arith.mulf %140, %139 : vector<256x128xf32>
    %142 = arith.addf %111, %141 : vector<256x128xf32>
    %c4_i32 = arith.constant 4 : i32
    %cst_45 = arith.constant 0.000000e+00 : f32
    %143 = vector.broadcast %cst_45 : f32 to vector<256x128xf32>
    %144 = arith.cmpf oge, %142, %143 : vector<256x128xf32>
    %145 = arith.extui %144 : vector<256x128xi1> to vector<256x128xi32>
    %146 = arith.sitofp %145 : vector<256x128xi32> to vector<256x128xf32>
    %cst_46 = arith.constant dense<0.000000e+00> : vector<128xf32>
    %147 = vector.multi_reduction <add>, %146, %cst_46 [0] : vector<256x128xf32> to vector<128xf32>
    %148 = vector.shape_cast %147 : vector<128xf32> to vector<1x128xf32>
    %149 = arith.mulf %12, %146 : vector<256x128xf32>
    %cst_47 = arith.constant dense<0.000000e+00> : vector<128xf32>
    %150 = vector.multi_reduction <add>, %149, %cst_47 [0] : vector<256x128xf32> to vector<128xf32>
    %151 = vector.shape_cast %150 : vector<128xf32> to vector<1x128xf32>
    %152 = vector.broadcast %cst_20 : f32 to vector<1x128xf32>
    %153 = arith.subf %152, %148 : vector<1x128xf32>
    %154 = arith.subf %18, %151 : vector<1x128xf32>
    %cst_48 = arith.constant 1.000000e+00 : f32
    %155 = vector.broadcast %cst_48 : f32 to vector<1x128xf32>
    %156 = arith.maximumf %148, %155 : vector<1x128xf32>
    %157 = arith.divf %151, %156 : vector<1x128xf32>
    %cst_49 = arith.constant 1.000000e+00 : f32
    %158 = vector.broadcast %cst_49 : f32 to vector<1x128xf32>
    %159 = arith.maximumf %153, %158 : vector<1x128xf32>
    %160 = arith.divf %154, %159 : vector<1x128xf32>
    %161 = arith.subf %157, %160 : vector<1x128xf32>
    %162 = vector.broadcast %1 : f32 to vector<1x128xf32>
    %163 = arith.mulf %162, %161 : vector<1x128xf32>
    %cst_50 = arith.constant 2.000000e+00 : f32
    %164 = vector.broadcast %cst_50 : f32 to vector<256x128xf32>
    %165 = arith.mulf %164, %12 : vector<256x128xf32>
    %166 = arith.addf %157, %160 : vector<1x128xf32>
    %167 = vector.broadcast %166 : vector<1x128xf32> to vector<256x128xf32>
    %168 = arith.subf %165, %167 : vector<256x128xf32>
    %169 = vector.broadcast %163 : vector<1x128xf32> to vector<256x128xf32>
    %170 = arith.mulf %169, %168 : vector<256x128xf32>
    %171 = vector.broadcast %0 : f32 to vector<256x128xf32>
    %172 = arith.mulf %171, %170 : vector<256x128xf32>
    %173 = arith.addf %142, %172 : vector<256x128xf32>
    %c5_i32 = arith.constant 5 : i32
    %cst_51 = arith.constant 0.000000e+00 : f32
    %174 = vector.broadcast %cst_51 : f32 to vector<256x128xf32>
    %175 = arith.cmpf oge, %173, %174 : vector<256x128xf32>
    %176 = arith.extui %175 : vector<256x128xi1> to vector<256x128xi32>
    %177 = arith.sitofp %176 : vector<256x128xi32> to vector<256x128xf32>
    %cst_52 = arith.constant dense<0.000000e+00> : vector<128xf32>
    %178 = vector.multi_reduction <add>, %177, %cst_52 [0] : vector<256x128xf32> to vector<128xf32>
    %179 = vector.shape_cast %178 : vector<128xf32> to vector<1x128xf32>
    %180 = arith.mulf %12, %177 : vector<256x128xf32>
    %cst_53 = arith.constant dense<0.000000e+00> : vector<128xf32>
    %181 = vector.multi_reduction <add>, %180, %cst_53 [0] : vector<256x128xf32> to vector<128xf32>
    %182 = vector.shape_cast %181 : vector<128xf32> to vector<1x128xf32>
    %183 = vector.broadcast %cst_20 : f32 to vector<1x128xf32>
    %184 = arith.subf %183, %179 : vector<1x128xf32>
    %185 = arith.subf %18, %182 : vector<1x128xf32>
    %cst_54 = arith.constant 1.000000e+00 : f32
    %186 = vector.broadcast %cst_54 : f32 to vector<1x128xf32>
    %187 = arith.maximumf %179, %186 : vector<1x128xf32>
    %188 = arith.divf %182, %187 : vector<1x128xf32>
    %cst_55 = arith.constant 1.000000e+00 : f32
    %189 = vector.broadcast %cst_55 : f32 to vector<1x128xf32>
    %190 = arith.maximumf %184, %189 : vector<1x128xf32>
    %191 = arith.divf %185, %190 : vector<1x128xf32>
    %192 = arith.subf %188, %191 : vector<1x128xf32>
    %193 = vector.broadcast %1 : f32 to vector<1x128xf32>
    %194 = arith.mulf %193, %192 : vector<1x128xf32>
    %cst_56 = arith.constant 2.000000e+00 : f32
    %195 = vector.broadcast %cst_56 : f32 to vector<256x128xf32>
    %196 = arith.mulf %195, %12 : vector<256x128xf32>
    %197 = arith.addf %188, %191 : vector<1x128xf32>
    %198 = vector.broadcast %197 : vector<1x128xf32> to vector<256x128xf32>
    %199 = arith.subf %196, %198 : vector<256x128xf32>
    %200 = vector.broadcast %194 : vector<1x128xf32> to vector<256x128xf32>
    %201 = arith.mulf %200, %199 : vector<256x128xf32>
    %202 = vector.broadcast %0 : f32 to vector<256x128xf32>
    %203 = arith.mulf %202, %201 : vector<256x128xf32>
    %204 = arith.addf %173, %203 : vector<256x128xf32>
    %c6_i32 = arith.constant 6 : i32
    %cst_57 = arith.constant 0.000000e+00 : f32
    %205 = vector.broadcast %cst_57 : f32 to vector<256x128xf32>
    %206 = arith.cmpf oge, %204, %205 : vector<256x128xf32>
    %207 = arith.extui %206 : vector<256x128xi1> to vector<256x128xi32>
    %208 = arith.sitofp %207 : vector<256x128xi32> to vector<256x128xf32>
    %cst_58 = arith.constant dense<0.000000e+00> : vector<128xf32>
    %209 = vector.multi_reduction <add>, %208, %cst_58 [0] : vector<256x128xf32> to vector<128xf32>
    %210 = vector.shape_cast %209 : vector<128xf32> to vector<1x128xf32>
    %211 = arith.mulf %12, %208 : vector<256x128xf32>
    %cst_59 = arith.constant dense<0.000000e+00> : vector<128xf32>
    %212 = vector.multi_reduction <add>, %211, %cst_59 [0] : vector<256x128xf32> to vector<128xf32>
    %213 = vector.shape_cast %212 : vector<128xf32> to vector<1x128xf32>
    %214 = vector.broadcast %cst_20 : f32 to vector<1x128xf32>
    %215 = arith.subf %214, %210 : vector<1x128xf32>
    %216 = arith.subf %18, %213 : vector<1x128xf32>
    %cst_60 = arith.constant 1.000000e+00 : f32
    %217 = vector.broadcast %cst_60 : f32 to vector<1x128xf32>
    %218 = arith.maximumf %210, %217 : vector<1x128xf32>
    %219 = arith.divf %213, %218 : vector<1x128xf32>
    %cst_61 = arith.constant 1.000000e+00 : f32
    %220 = vector.broadcast %cst_61 : f32 to vector<1x128xf32>
    %221 = arith.maximumf %215, %220 : vector<1x128xf32>
    %222 = arith.divf %216, %221 : vector<1x128xf32>
    %223 = arith.subf %219, %222 : vector<1x128xf32>
    %224 = vector.broadcast %1 : f32 to vector<1x128xf32>
    %225 = arith.mulf %224, %223 : vector<1x128xf32>
    %cst_62 = arith.constant 2.000000e+00 : f32
    %226 = vector.broadcast %cst_62 : f32 to vector<256x128xf32>
    %227 = arith.mulf %226, %12 : vector<256x128xf32>
    %228 = arith.addf %219, %222 : vector<1x128xf32>
    %229 = vector.broadcast %228 : vector<1x128xf32> to vector<256x128xf32>
    %230 = arith.subf %227, %229 : vector<256x128xf32>
    %231 = vector.broadcast %225 : vector<1x128xf32> to vector<256x128xf32>
    %232 = arith.mulf %231, %230 : vector<256x128xf32>
    %233 = vector.broadcast %0 : f32 to vector<256x128xf32>
    %234 = arith.mulf %233, %232 : vector<256x128xf32>
    %235 = arith.addf %204, %234 : vector<256x128xf32>
    %c7_i32 = arith.constant 7 : i32
    %cst_63 = arith.constant 0.000000e+00 : f32
    %236 = vector.broadcast %cst_63 : f32 to vector<256x128xf32>
    %237 = arith.cmpf oge, %235, %236 : vector<256x128xf32>
    %238 = arith.extui %237 : vector<256x128xi1> to vector<256x128xi32>
    %239 = arith.sitofp %238 : vector<256x128xi32> to vector<256x128xf32>
    %cst_64 = arith.constant dense<0.000000e+00> : vector<128xf32>
    %240 = vector.multi_reduction <add>, %239, %cst_64 [0] : vector<256x128xf32> to vector<128xf32>
    %241 = vector.shape_cast %240 : vector<128xf32> to vector<1x128xf32>
    %242 = arith.mulf %12, %239 : vector<256x128xf32>
    %cst_65 = arith.constant dense<0.000000e+00> : vector<128xf32>
    %243 = vector.multi_reduction <add>, %242, %cst_65 [0] : vector<256x128xf32> to vector<128xf32>
    %244 = vector.shape_cast %243 : vector<128xf32> to vector<1x128xf32>
    %245 = vector.broadcast %cst_20 : f32 to vector<1x128xf32>
    %246 = arith.subf %245, %241 : vector<1x128xf32>
    %247 = arith.subf %18, %244 : vector<1x128xf32>
    %cst_66 = arith.constant 1.000000e+00 : f32
    %248 = vector.broadcast %cst_66 : f32 to vector<1x128xf32>
    %249 = arith.maximumf %241, %248 : vector<1x128xf32>
    %250 = arith.divf %244, %249 : vector<1x128xf32>
    %cst_67 = arith.constant 1.000000e+00 : f32
    %251 = vector.broadcast %cst_67 : f32 to vector<1x128xf32>
    %252 = arith.maximumf %246, %251 : vector<1x128xf32>
    %253 = arith.divf %247, %252 : vector<1x128xf32>
    %254 = arith.subf %250, %253 : vector<1x128xf32>
    %255 = vector.broadcast %1 : f32 to vector<1x128xf32>
    %256 = arith.mulf %255, %254 : vector<1x128xf32>
    %cst_68 = arith.constant 2.000000e+00 : f32
    %257 = vector.broadcast %cst_68 : f32 to vector<256x128xf32>
    %258 = arith.mulf %257, %12 : vector<256x128xf32>
    %259 = arith.addf %250, %253 : vector<1x128xf32>
    %260 = vector.broadcast %259 : vector<1x128xf32> to vector<256x128xf32>
    %261 = arith.subf %258, %260 : vector<256x128xf32>
    %262 = vector.broadcast %256 : vector<1x128xf32> to vector<256x128xf32>
    %263 = arith.mulf %262, %261 : vector<256x128xf32>
    %264 = vector.broadcast %0 : f32 to vector<256x128xf32>
    %265 = arith.mulf %264, %263 : vector<256x128xf32>
    %266 = arith.addf %235, %265 : vector<256x128xf32>
    %c8_i32 = arith.constant 8 : i32
    %cst_69 = arith.constant 0.000000e+00 : f32
    %267 = vector.broadcast %cst_69 : f32 to vector<256x128xf32>
    %268 = arith.cmpf oge, %266, %267 : vector<256x128xf32>
    %269 = arith.extui %268 : vector<256x128xi1> to vector<256x128xi32>
    %270 = arith.sitofp %269 : vector<256x128xi32> to vector<256x128xf32>
    %cst_70 = arith.constant dense<0.000000e+00> : vector<128xf32>
    %271 = vector.multi_reduction <add>, %270, %cst_70 [0] : vector<256x128xf32> to vector<128xf32>
    %272 = vector.shape_cast %271 : vector<128xf32> to vector<1x128xf32>
    %273 = arith.mulf %12, %270 : vector<256x128xf32>
    %cst_71 = arith.constant dense<0.000000e+00> : vector<128xf32>
    %274 = vector.multi_reduction <add>, %273, %cst_71 [0] : vector<256x128xf32> to vector<128xf32>
    %275 = vector.shape_cast %274 : vector<128xf32> to vector<1x128xf32>
    %276 = vector.broadcast %cst_20 : f32 to vector<1x128xf32>
    %277 = arith.subf %276, %272 : vector<1x128xf32>
    %278 = arith.subf %18, %275 : vector<1x128xf32>
    %cst_72 = arith.constant 1.000000e+00 : f32
    %279 = vector.broadcast %cst_72 : f32 to vector<1x128xf32>
    %280 = arith.maximumf %272, %279 : vector<1x128xf32>
    %281 = arith.divf %275, %280 : vector<1x128xf32>
    %cst_73 = arith.constant 1.000000e+00 : f32
    %282 = vector.broadcast %cst_73 : f32 to vector<1x128xf32>
    %283 = arith.maximumf %277, %282 : vector<1x128xf32>
    %284 = arith.divf %278, %283 : vector<1x128xf32>
    %285 = arith.subf %281, %284 : vector<1x128xf32>
    %286 = vector.broadcast %1 : f32 to vector<1x128xf32>
    %287 = arith.mulf %286, %285 : vector<1x128xf32>
    %cst_74 = arith.constant 2.000000e+00 : f32
    %288 = vector.broadcast %cst_74 : f32 to vector<256x128xf32>
    %289 = arith.mulf %288, %12 : vector<256x128xf32>
    %290 = arith.addf %281, %284 : vector<1x128xf32>
    %291 = vector.broadcast %290 : vector<1x128xf32> to vector<256x128xf32>
    %292 = arith.subf %289, %291 : vector<256x128xf32>
    %293 = vector.broadcast %287 : vector<1x128xf32> to vector<256x128xf32>
    %294 = arith.mulf %293, %292 : vector<256x128xf32>
    %295 = vector.broadcast %0 : f32 to vector<256x128xf32>
    %296 = arith.mulf %295, %294 : vector<256x128xf32>
    %297 = arith.addf %266, %296 : vector<256x128xf32>
    %c9_i32 = arith.constant 9 : i32
    %cst_75 = arith.constant 0.000000e+00 : f32
    %298 = vector.broadcast %cst_75 : f32 to vector<256x128xf32>
    %299 = arith.cmpf oge, %297, %298 : vector<256x128xf32>
    %300 = arith.extui %299 : vector<256x128xi1> to vector<256x128xi32>
    %301 = arith.sitofp %300 : vector<256x128xi32> to vector<256x128xf32>
    %cst_76 = arith.constant dense<0.000000e+00> : vector<128xf32>
    %302 = vector.multi_reduction <add>, %301, %cst_76 [0] : vector<256x128xf32> to vector<128xf32>
    %303 = vector.shape_cast %302 : vector<128xf32> to vector<1x128xf32>
    %304 = arith.mulf %12, %301 : vector<256x128xf32>
    %cst_77 = arith.constant dense<0.000000e+00> : vector<128xf32>
    %305 = vector.multi_reduction <add>, %304, %cst_77 [0] : vector<256x128xf32> to vector<128xf32>
    %306 = vector.shape_cast %305 : vector<128xf32> to vector<1x128xf32>
    %307 = vector.broadcast %cst_20 : f32 to vector<1x128xf32>
    %308 = arith.subf %307, %303 : vector<1x128xf32>
    %309 = arith.subf %18, %306 : vector<1x128xf32>
    %cst_78 = arith.constant 1.000000e+00 : f32
    %310 = vector.broadcast %cst_78 : f32 to vector<1x128xf32>
    %311 = arith.maximumf %303, %310 : vector<1x128xf32>
    %312 = arith.divf %306, %311 : vector<1x128xf32>
    %cst_79 = arith.constant 1.000000e+00 : f32
    %313 = vector.broadcast %cst_79 : f32 to vector<1x128xf32>
    %314 = arith.maximumf %308, %313 : vector<1x128xf32>
    %315 = arith.divf %309, %314 : vector<1x128xf32>
    %316 = arith.subf %312, %315 : vector<1x128xf32>
    %317 = vector.broadcast %1 : f32 to vector<1x128xf32>
    %318 = arith.mulf %317, %316 : vector<1x128xf32>
    %cst_80 = arith.constant 2.000000e+00 : f32
    %319 = vector.broadcast %cst_80 : f32 to vector<256x128xf32>
    %320 = arith.mulf %319, %12 : vector<256x128xf32>
    %321 = arith.addf %312, %315 : vector<1x128xf32>
    %322 = vector.broadcast %321 : vector<1x128xf32> to vector<256x128xf32>
    %323 = arith.subf %320, %322 : vector<256x128xf32>
    %324 = vector.broadcast %318 : vector<1x128xf32> to vector<256x128xf32>
    %325 = arith.mulf %324, %323 : vector<256x128xf32>
    %326 = vector.broadcast %0 : f32 to vector<256x128xf32>
    %327 = arith.mulf %326, %325 : vector<256x128xf32>
    %328 = arith.addf %297, %327 : vector<256x128xf32>
    %cst_81 = arith.constant 0.000000e+00 : f32
    %329 = vector.broadcast %cst_81 : f32 to vector<256x128xf32>
    %330 = arith.subf %329, %328 : vector<256x128xf32>
    %331 = math.exp %330 : vector<256x128xf32>
    %cst_82 = arith.constant 1.000000e+00 : f32
    %332 = vector.broadcast %cst_82 : f32 to vector<256x128xf32>
    %333 = arith.addf %332, %331 : vector<256x128xf32>
    %334 = tpu.reciprocal %333 {approx = true} : vector<256x128xf32> -> vector<256x128xf32>
    %c0_83 = arith.constant 0 : index
    %c0_84 = arith.constant 0 : index
    %c0_85 = arith.constant 0 : index
    %335 = vector.load %arg10[%c0_83, %c0_84, %c0_85] : memref<1x256x128xf32, #tpu.memory_space<vmem>>, vector<1x256x128xf32>
    %336 = vector.shape_cast %335 : vector<1x256x128xf32> to vector<256x128xf32>
    %337 = vector.shape_cast %334 : vector<256x128xf32> to vector<1x256x128xf32>
    tpu.vector_store %arg10[%c0_83, %c0_84, %c0_85], %337 {strides = array<i32>} : memref<1x256x128xf32, #tpu.memory_space<vmem>>, vector<1x256x128xf32>,
    return
  }
  func.func @transform_0(%arg0: i32, %arg1: i32) -> i32 {
    %c0_i32 = arith.constant 0 : i32
    %c0_i32_0 = arith.constant 0 : i32
    return %c0_i32 : i32
  }
  func.func @transform_1(%arg0: i32, %arg1: i32) -> i32 {
    %c0_i32 = arith.constant 0 : i32
    %c0_i32_0 = arith.constant 0 : i32
    return %c0_i32 : i32
  }
  func.func @transform_2(%arg0: i32, %arg1: i32) -> (i32, i32, i32) {
    %c0_i32 = arith.constant 0 : i32
    %c0_i32_0 = arith.constant 0 : i32
    %c0_i32_1 = arith.constant 0 : i32
    return %arg0, %c0_i32, %c0_i32_0 : i32, i32, i32
  }
  func.func @transform_3(%arg0: i32, %arg1: i32) -> (i32, i32) {
    %c0_i32 = arith.constant 0 : i32
    %c0_i32_0 = arith.constant 0 : i32
    return %c0_i32, %arg1 : i32, i32
  }
  func.func @transform_4(%arg0: i32, %arg1: i32) -> (i32, i32, i32) {
    %c0_i32 = arith.constant 0 : i32
    %c0_i32_0 = arith.constant 0 : i32
    %c0_i32_1 = arith.constant 0 : i32
    return %arg0, %c0_i32, %c0_i32_0 : i32, i32, i32
  }
  func.func @transform_5(%arg0: i32, %arg1: i32) -> (i32, i32) {
    %c0_i32 = arith.constant 0 : i32
    %c0_i32_0 = arith.constant 0 : i32
    return %c0_i32, %arg1 : i32, i32
  }
  func.func @transform_6(%arg0: i32, %arg1: i32) -> (i32, i32, i32) {
    %c0_i32 = arith.constant 0 : i32
    %c0_i32_0 = arith.constant 0 : i32
    %c0_i32_1 = arith.constant 0 : i32
    return %arg0, %c0_i32, %c0_i32_0 : i32, i32, i32
  }
  func.func @transform_7(%arg0: i32, %arg1: i32) -> (i32, i32) {
    %c0_i32 = arith.constant 0 : i32
    %c0_i32_0 = arith.constant 0 : i32
    return %c0_i32, %arg1 : i32, i32
  }
  func.func @transform_8(%arg0: i32, %arg1: i32) -> (i32, i32, i32) {
    %c0_i32 = arith.constant 0 : i32
    %c0_i32_0 = arith.constant 0 : i32
    return %arg0, %c0_i32, %arg1 : i32, i32, i32
  }
}

</mosaic_0001>

<bundles_post_ra>
// kernel: acm_attention_forward.1
= control target key start
LH: loop header
LB: loop body
LE: loop exit
PB: predicated region body
PF: predicated region fallthrough
CT: control target
= control target key end

     0   :  { %s10946_s0 = inlined_call_operand.<no memory space> [shape: f32[1], index: 0, kind: input, shape index: {}]   ;;  %s10947_s1 = inlined_call_operand.<no memory space> [shape: f32[1], index: 1, kind: input, shape index: {}]   ;;  %s10948_s2 = inlined_call_operand.vmem [shape: f32[2,256,4], index: 2, kind: input, shape index: {}]   ;;  %s10949_s3 = inlined_call_operand.vmem [shape: f32[4,512], index: 3, kind: input, shape index: {}]   ;;  %s10950_s4 = inlined_call_operand.vmem [shape: f32[2,256,8], index: 4, kind: input, shape index: {}]   ;;  %s10951_s5 = inlined_call_operand.vmem [shape: f32[8,512], index: 5, kind: input, shape index: {}]   ;;  %s10952_s6 = inlined_call_operand.vmem [shape: f32[2,256,4], index: 6, kind: input, shape index: {}]   ;;  %s10953_s7 = inlined_call_operand.vmem [shape: f32[4,512], index: 7, kind: input, shape index: {}]   ;;  %s10954_s8 = inlined_call_operand.hbm [shape: f32[2,256,512], index: 8, kind: output, shape index: {}]  }
   0x1   :  { %13 = sst [smem:[#allocation2]] %s10946_s0 }
   0x2   :  { %14 = sst [smem:[#allocation3]] %s10947_s1 }
   0x3   :  { %15 = vsyncpa [#allocation5], 0 }
   0x4   :  { %17 = vsyncpa [#allocation5 + $0x1], 0  ;;  %s6458_s9 = smov 0   ;;  %s6460_s10 = smov 0  }
   0x5   :  { %s6462_s11 = smov 0   ;;  %s6464_s12 = smov 0  }
   0x6   :  { %s6466_s13 = smov 0   ;;  %s6468_s14 = smov 0  }
   0x7   :  { %s6470_s15 = smov 0   ;;  %s6472_s0 = smov 0  }
   0x8 LB: > { %s5371_s1 = sadd.s32 4294967295, %s6400_s0   ;;  %s5372_s16 = sadd.s32 4294967294, %s6400_s0   ;;  %s6400_s0 = sphi %s6472_s0, %s23_s0   ;;  %s6396_s15 = sphi %s6470_s15, %s12285_s15   ;;  %s6392_s14 = sphi %s6468_s14, %s12284_s14   ;;  %s6388_s13 = sphi %s6466_s13, %s12283_s13   ;;  %s6384_s12 = sphi %s6464_s12, %s12282_s12   ;;  %s6380_s11 = sphi %s6462_s11, %s12281_s11   ;;  %s6376_s10 = sphi %s6460_s10, %s12280_s10   ;;  %s6372_s9 = sphi %s6458_s9, %s12279_s9  }
   0x9   : > { %s32_s17 = sadd.s32 1, %s6392_s14  ;;  %s35_s18 = sadd.s32 1, %s6396_s15 }
   0xa   : > { %p33_p0 = scmp.ge.s32.totalorder %s32_s17, 4  ;;  %p252_p1 = scmp.ne.s32.totalorder %s6380_s11, %s6376_s10 }
   0xb   : > { %p253_p2 = scmp.eq.s32.totalorder %s5371_s1, 7  ;;  %p258_p5 = scmp.ne.s32.totalorder %s6376_s10, %s6372_s9 }
   0xc   : > { %s12287_s17 = smov (%p33_p0, %s32_s17), 0  ;;  %s12289_s18 = smov (!%p33_p0, %s35_s18), %s6396_s15 }
   0xd   : > { %s238_s19 = ssub.s32 %s6392_s14, %s12287_s17  ;;  %p6509_p3 = por %p253_p2, %p252_p1 }
   0xe   : > { %p37_p4 = scmp.ge.s32.totalorder %s12289_s18, 2  ;;  %p259_p6 = scmp.eq.s32.totalorder %s5372_s16, 7 }
   0xf   : > { %p5375_p7 = scmp.ge.s32.totalorder %s6400_s0, 1  ;;  %p328_p9 = scmp.lt.s32.totalorder %s6400_s0, 9 }
  0x10   : > { %s12291_s18 = smov (%p37_p4, %s12289_s18), 0  ;;  %p6518_p8 = por %p259_p6, %p258_p5 }
  0x11   : > { %11287 = sst [smem:[#allocation7_spill]] %s12291_s18  ;;  %s237_s22 = ssub.s32 %s6396_s15, %s12291_s18 }
  0x12   : > { %s242_s23 = sadd.s32 1, %s6380_s11  ;;  %s239_s24 = sor.u32 %s238_s19, %s237_s22 }
  0x13   : > { %p329_p10 = pnand %p5375_p7, %p328_p9  ;;  %p240_p11 = scmp.eq.s32.totalorder %s239_s24, 0 }
  0x15   : > { %s6527_s25 = scalar_select %p240_p11, %s6380_s11, %s242_s23  }
  0x16   : > { %332 = sbr.rel (%p329_p10) target bundleno = 1493 (0x5d5), region = 52 }
  0x1d   : > { %p389_p12 = scmp.lt.s32.totalorder %s6384_s12, 3  ;;  %p384_p13 = scmp.lt.s32.totalorder %s6388_s13, 1  ;;  %vm543_vm0 = vcmask 1043456   ;;  %vm446_vm1 = vcmask 31744   ;;  %vm837_vm2 = vcmask 64512  }
  0x1f   : > { %s390_s26 = scalar_select %p389_p12, %s6384_s12, 3 }
  0x20   : > { %s385_s27 = scalar_select %p384_p13, %s6388_s13, 1 }
  0x21   : > { %s5379_s28 = sshll.u32 %s390_s26, 2  ;;  %s5382_s29 = sshll.u32 %s390_s26, 3 }
  0x22   : > { %s392_s16 = scalar_lea.vmem %s10949_s3, %s5379_s28  ;;  %s6536_s19 = sshll.u32 %s385_s27, 8 }
  0x23   : > { %v445_v0 = vld [vmem:[%s392_s16] sm:$0xf]  ;;  %s6542_s24 = scalar_lea.vmem %s10948_s2, %s6536_s19  ;;  %s410_s30 = scalar_lea.vmem %s10953_s7, %s5379_s28 }
  0x24   : > { %5911 = vmatprep.subr.msk.mxu0 %vm543_vm0, %v445_v0  ;;  %6061 = vmatprep.subr.msk.mxu1 %vm543_vm0, %v445_v0  ;;  %v413_v1 = vld [vmem:[%s6542_s24] sm:$0xff]  ;;  %v414_v3 = vld [vmem:[%s6542_s24 + $0x8] sm:$0xff]  ;;  %v415_v6 = vld [vmem:[%s6542_s24 + $0x10] sm:$0xff]  ;;  %s401_s28 = scalar_lea.vmem %s10951_s5, %s5382_s29  ;;  %s6616_s16 = scalar_lea.vmem %s10950_s4, %s6536_s19 }
  0x25   : > { %v429_v2 = vld [vmem:[%s6542_s24 + $0x80] sm:$0xff]  ;;  %5912 = vmatpush3.msk.msra.mxu0 %vm543_vm0, %v445_v0  ;;  %6062 = vmatpush3.msk.msra.mxu1 %vm543_vm0, %v445_v0  ;;  %v430_v4 = vld [vmem:[%s6542_s24 + $0x88] sm:$0xff]  ;;  %v431_v7 = vld [vmem:[%s6542_s24 + $0x90] sm:$0xff]  ;;  %s6622_s26 = scalar_lea.vmem %s10952_s6, %s6536_s19  ;;  %s411_s19 = sld [smem:[#allocation2]] }
  0x26   : > { %v1223_v5 = vld [vmem:[%s410_s30] sm:$0xf]  ;;  %5913 = vmatprep.mubr.msk.f32.mxu0 %vm446_vm1, %v413_v1  ;;  %5937 = vmatprep.mubr.msk.f32.mxu1 %vm446_vm1, %v429_v2  ;;  %v416_v8 = vld [vmem:[%s6542_s24 + $0x18] sm:$0xff]  ;;  %v418_v13 = vld [vmem:[%s6542_s24 + $0x28] sm:$0xff]  ;;  %s381_s30 = sand.u32 1, %s6376_s10  }
  0x27   : > { %5914 = vmatmul.mubr.msk.f32.vlgmr.msra.gmra.mrb[0].mxu0 %vm446_vm1, %v414_v3  ;;  %5938 = vmatmul.mubr.msk.f32.vlgmr.msra.gmra.mrb[0].mxu1 %vm446_vm1, %v430_v4  ;;  %v432_v9 = vld [vmem:[%s6542_s24 + $0x98] sm:$0xff]  ;;  %v417_v10 = vld [vmem:[%s6542_s24 + $0x20] sm:$0xff]  ;;  %v434_v14 = vld [vmem:[%s6542_s24 + $0xa8] sm:$0xff]  ;;  %s5376_s18 = sshll.u32 %s381_s30, 8  ;;  %s10894_s23 = scalar_lea.sflag [#allocation5], %s381_s30 }
  0x28   : > { %6011 = vmatprep.subr.msk.mxu0 %vm543_vm0, %v1223_v5  ;;  %5916 = vmatprep.mubr.msk.f32.mxu0 %vm446_vm1, %v415_v6  ;;  %v433_v11 = vld [vmem:[%s6542_s24 + $0xa0] sm:$0xff]  ;;  %v419_v15 = vld [vmem:[%s6542_s24 + $0x30] sm:$0xff]  ;;  %v420_v17 = vld [vmem:[%s6542_s24 + $0x38] sm:$0xff]  ;;  %s10745_s27 = scalar_lea.vmem [#allocation4], %s5376_s18 }
  0x29   : > { %6012 = vmatpush3.msk.msra.mxu0 %vm543_vm0, %v1223_v5  ;;  %5940 = vmatprep.mubr.msk.f32.mxu1 %vm446_vm1, %v431_v7  ;;  %v836_v12 = vld [vmem:[%s401_s28] sm:$0xff]  ;;  %v435_v16 = vld [vmem:[%s6542_s24 + $0xb0] sm:$0xff]  ;;  %v436_v18 = vld [vmem:[%s6542_s24 + $0xb8] sm:$0xff]  ;;  %s5805_s28 = sshll.u32 %s6388_s13, 7  ;;  %s5236_s1 = sshll.u32 %s10745_s27, 4  ;;  %s10887_s1 = int_to_ptr.vmem [resolvable:$true] %s5236_s1 }
  0x2a   : > { %5961 = vmatprep.subr.mxu1 %v836_v12  ;;  %v421_v19 = vld [vmem:[%s6542_s24 + $0x40] sm:$0xff]  ;;  %v422_v21 = vld [vmem:[%s6542_s24 + $0x48] sm:$0xff]  ;;  %v423_v23 = vld [vmem:[%s6542_s24 + $0x50] sm:$0xff]  ;;  %s5233_s29 = sadd.s32 %s6384_s12, %s5805_s28 }
  0x2b   : > { %5917 = vmatmul.mubr.msk.f32.gmra.mrb[2].mxu0 %vm446_vm1, %v416_v8  ;;  %5941 = vmatmul.mubr.msk.f32.gmra.mrb[2].mxu1 %vm446_vm1, %v432_v9  ;;  %v437_v20 = vld [vmem:[%s6542_s24 + $0xc0] sm:$0xff]  ;;  %v438_v22 = vld [vmem:[%s6542_s24 + $0xc8] sm:$0xff]  ;;  %v439_v24 = vld [vmem:[%s6542_s24 + $0xd0] sm:$0xff]  ;;  %s5806_s13 = sshll.u32 %s5233_s29, 7 }
  0x2c   : > { %5919 = vmatprep.mubr.msk.f32.mxu0 %vm446_vm1, %v417_v10  ;;  %5943 = vmatprep.mubr.msk.f32.mxu1 %vm446_vm1, %v433_v11  ;;  %v424_v25 = vld [vmem:[%s6542_s24 + $0x58] sm:$0xff]  ;;  %v425_v27 = vld [vmem:[%s6542_s24 + $0x60] sm:$0xff]  ;;  %v426_v29 = vld [vmem:[%s6542_s24 + $0x68] sm:$0xff]  ;;  %s10884_s22 = scalar_lea.hbm %s10954_s8, %s5806_s13 }
  0x2d   : > { %5962 = vmatpush3.msra.mxu1 %v836_v12  ;;  %v440_v26 = vld [vmem:[%s6542_s24 + $0xd8] sm:$0xff]  ;;  %v441_v28 = vld [vmem:[%s6542_s24 + $0xe0] sm:$0xff]  ;;  %v442_v30 = vld [vmem:[%s6542_s24 + $0xe8] sm:$0xff] }
  0x2e   : > { %v427_v31 = vld [vmem:[%s6542_s24 + $0x70] sm:$0xff]  ;;  %v428_v33 = vld [vmem:[%s6542_s24 + $0x78] sm:$0xff]  ;;  %v804_v35 = vld [vmem:[%s6616_s16] sm:$0xff] }
  0x2f   : > { %5920 = vmatmul.mubr.msk.f32.gmra.mrb[4].mxu0 %vm446_vm1, %v418_v13  ;;  %5944 = vmatmul.mubr.msk.f32.gmra.mrb[4].mxu1 %vm446_vm1, %v434_v14  ;;  %v443_v32 = vld [vmem:[%s6542_s24 + $0xf0] sm:$0xff]  ;;  %v444_v34 = vld [vmem:[%s6542_s24 + $0xf8] sm:$0xff]  ;;  %v1191_v36 = vld [vmem:[%s6622_s26] sm:$0xff]  ;;  %s412_s24 = sld [smem:[#allocation3]] }
  0x30   : > { %5922 = vmatprep.mubr.msk.f32.mxu0 %vm446_vm1, %v419_v15  ;;  %5946 = vmatprep.mubr.msk.f32.mxu1 %vm446_vm1, %v435_v16  ;;  %v805_v37 = vld [vmem:[%s6616_s16 + $0x8] sm:$0xff]  ;;  %v806_v39 = vld [vmem:[%s6616_s16 + $0x10] sm:$0xff]  ;;  %v807_v41 = vld [vmem:[%s6616_s16 + $0x18] sm:$0xff] }
  0x31   : > { %v1192_v38 = vld [vmem:[%s6622_s26 + $0x8] sm:$0xff]  ;;  %v1193_v40 = vld [vmem:[%s6622_s26 + $0x10] sm:$0xff]  ;;  %v1194_v42 = vld [vmem:[%s6622_s26 + $0x18] sm:$0xff] }
  0x32   : > { %v808_v43 = vld [vmem:[%s6616_s16 + $0x20] sm:$0xff]  ;;  %v809_v45 = vld [vmem:[%s6616_s16 + $0x28] sm:$0xff]  ;;  %v810_v47 = vld [vmem:[%s6616_s16 + $0x30] sm:$0xff] }
  0x33   : > { %5923 = vmatmul.mubr.msk.f32.gmra.mrb[6].mxu0 %vm446_vm1, %v420_v17  ;;  %5947 = vmatmul.mubr.msk.f32.gmra.mrb[6].mxu1 %vm446_vm1, %v436_v18  ;;  %v1195_v44 = vld [vmem:[%s6622_s26 + $0x20] sm:$0xff]  ;;  %v1196_v46 = vld [vmem:[%s6622_s26 + $0x28] sm:$0xff]  ;;  %v1197_v48 = vld [vmem:[%s6622_s26 + $0x30] sm:$0xff] }
  0x34   : > { %5925 = vmatprep.mubr.msk.f32.mxu0 %vm446_vm1, %v421_v19  ;;  %5949 = vmatprep.mubr.msk.f32.mxu1 %vm446_vm1, %v437_v20  ;;  %v811_v49 = vld [vmem:[%s6616_s16 + $0x38] sm:$0xff]  ;;  %v812_v51 = vld [vmem:[%s6616_s16 + $0x40] sm:$0xff]  ;;  %v813_v53 = vld [vmem:[%s6616_s16 + $0x48] sm:$0xff] }
  0x35   : > { %v1198_v50 = vld [vmem:[%s6622_s26 + $0x38] sm:$0xff]  ;;  %v1199_v52 = vld [vmem:[%s6622_s26 + $0x40] sm:$0xff]  ;;  %v1200_v54 = vld [vmem:[%s6622_s26 + $0x48] sm:$0xff] }
  0x36   : > { %v814_v55 = vld [vmem:[%s6616_s16 + $0x50] sm:$0xff]  ;;  %v815_v57 = vld [vmem:[%s6616_s16 + $0x58] sm:$0xff]  ;;  %v816_v59 = vld [vmem:[%s6616_s16 + $0x60] sm:$0xff] }
  0x37   : > { %5926 = vmatmul.mubr.msk.f32.gmra.mrb[8].mxu0 %vm446_vm1, %v422_v21  ;;  %5950 = vmatmul.mubr.msk.f32.gmra.mrb[8].mxu1 %vm446_vm1, %v438_v22  ;;  %v1201_v56 = vld [vmem:[%s6622_s26 + $0x50] sm:$0xff]  ;;  %v1202_v58 = vld [vmem:[%s6622_s26 + $0x58] sm:$0xff]  ;;  %v1203_v60 = vld [vmem:[%s6622_s26 + $0x60] sm:$0xff] }
  0x38   : > { %5928 = vmatprep.mubr.msk.f32.mxu0 %vm446_vm1, %v423_v23  ;;  %5952 = vmatprep.mubr.msk.f32.mxu1 %vm446_vm1, %v439_v24  ;;  %v817_v61 = vld [vmem:[%s6616_s16 + $0x68] sm:$0xff]  ;;  %v818_v63 = vld [vmem:[%s6616_s16 + $0x70] sm:$0xff]  ;;  %v819_v1 = vld [vmem:[%s6616_s16 + $0x78] sm:$0xff] }
  0x39   : > { %v1204_v62 = vld [vmem:[%s6622_s26 + $0x68] sm:$0xff]  ;;  %v1205_v0 = vld [vmem:[%s6622_s26 + $0x70] sm:$0xff]  ;;  %v1206_v2 = vld [vmem:[%s6622_s26 + $0x78] sm:$0xff] }
  0x3a   : > { %v820_v3 = vld [vmem:[%s6616_s16 + $0x80] sm:$0xff]  ;;  %v821_v5 = vld [vmem:[%s6616_s16 + $0x88] sm:$0xff]  ;;  %v822_v7 = vld [vmem:[%s6616_s16 + $0x90] sm:$0xff] }
  0x3b   : > { %5929 = vmatmul.mubr.msk.f32.gmra.mrb[10].mxu0 %vm446_vm1, %v424_v25  ;;  %5953 = vmatmul.mubr.msk.f32.gmra.mrb[10].mxu1 %vm446_vm1, %v440_v26  ;;  %v1207_v4 = vld [vmem:[%s6622_s26 + $0x80] sm:$0xff]  ;;  %v1208_v6 = vld [vmem:[%s6622_s26 + $0x88] sm:$0xff]  ;;  %v1209_v8 = vld [vmem:[%s6622_s26 + $0x90] sm:$0xff] }
  0x3c   : > { %5931 = vmatprep.mubr.msk.f32.mxu0 %vm446_vm1, %v425_v27  ;;  %5955 = vmatprep.mubr.msk.f32.mxu1 %vm446_vm1, %v441_v28  ;;  %v823_v9 = vld [vmem:[%s6616_s16 + $0x98] sm:$0xff]  ;;  %v824_v11 = vld [vmem:[%s6616_s16 + $0xa0] sm:$0xff]  ;;  %v825_v13 = vld [vmem:[%s6616_s16 + $0xa8] sm:$0xff] }
  0x3d   : > { %v1210_v10 = vld [vmem:[%s6622_s26 + $0x98] sm:$0xff]  ;;  %v1211_v12 = vld [vmem:[%s6622_s26 + $0xa0] sm:$0xff]  ;;  %v1212_v14 = vld [vmem:[%s6622_s26 + $0xa8] sm:$0xff] }
  0x3e   : > { %v826_v15 = vld [vmem:[%s6616_s16 + $0xb0] sm:$0xff]  ;;  %v827_v17 = vld [vmem:[%s6616_s16 + $0xb8] sm:$0xff]  ;;  %v828_v19 = vld [vmem:[%s6616_s16 + $0xc0] sm:$0xff] }
  0x3f   : > { %5932 = vmatmul.mubr.msk.f32.gmra.mrb[12].mxu0 %vm446_vm1, %v426_v29  ;;  %5956 = vmatmul.mubr.msk.f32.gmra.mrb[12].mxu1 %vm446_vm1, %v442_v30  ;;  %v1213_v16 = vld [vmem:[%s6622_s26 + $0xb0] sm:$0xff]  ;;  %v1214_v18 = vld [vmem:[%s6622_s26 + $0xb8] sm:$0xff]  ;;  %v1215_v20 = vld [vmem:[%s6622_s26 + $0xc0] sm:$0xff] }
  0x40   : > { %5934 = vmatprep.mubr.msk.f32.mxu0 %vm446_vm1, %v427_v31  ;;  %5958 = vmatprep.mubr.msk.f32.mxu1 %vm446_vm1, %v443_v32  ;;  %v829_v21 = vld [vmem:[%s6616_s16 + $0xc8] sm:$0xff]  ;;  %v830_v23 = vld [vmem:[%s6616_s16 + $0xd0] sm:$0xff]  ;;  %v831_v25 = vld [vmem:[%s6616_s16 + $0xd8] sm:$0xff] }
  0x41   : > { %v1216_v22 = vld [vmem:[%s6622_s26 + $0xc8] sm:$0xff]  ;;  %v1217_v24 = vld [vmem:[%s6622_s26 + $0xd0] sm:$0xff]  ;;  %v1218_v26 = vld [vmem:[%s6622_s26 + $0xd8] sm:$0xff] }
  0x42   : > { %v832_v27 = vld [vmem:[%s6616_s16 + $0xe0] sm:$0xff]  ;;  %v833_v29 = vld [vmem:[%s6616_s16 + $0xe8] sm:$0xff]  ;;  %v834_v31 = vld [vmem:[%s6616_s16 + $0xf0] sm:$0xff] }
  0x43   : > { %5935 = vmatmul.mubr.msk.f32.gmra.mrb[14].mxu0 %vm446_vm1, %v428_v33  ;;  %5959 = vmatmul.mubr.msk.f32.gmra.mrb[14].mxu1 %vm446_vm1, %v444_v34  ;;  %v1219_v28 = vld [vmem:[%s6622_s26 + $0xe0] sm:$0xff]  ;;  %v1220_v30 = vld [vmem:[%s6622_s26 + $0xe8] sm:$0xff]  ;;  %v1221_v32 = vld [vmem:[%s6622_s26 + $0xf0] sm:$0xff] }
  0x44   : > { %5963 = vmatprep.mubr.msk.f32.mxu1 %vm837_vm2, %v804_v35  ;;  %6013 = vmatprep.mubr.msk.f32.mxu0 %vm446_vm1, %v1191_v36  ;;  %v835_v33 = vld [vmem:[%s6616_s16 + $0xf8] sm:$0xff] }
  0x45   : > { %v1222_v34 = vld [vmem:[%s6622_s26 + $0xf8] sm:$0xff]  ;;  %s6306_s26 = scalar_lea.vmem %s10887_s1, 4096 }
  0x46   : > { %p6307_p0 = scmp.ne.s32.totalorder %s10887_s1, %s6306_s26 }
  0x47   : > { %5964 = vmatmul.mubr.msk.f32.vlgmr.msra.gmra.mrb[16].mxu1 %vm837_vm2, %v805_v37  ;;  %6014 = vmatmul.mubr.msk.f32.vlgmr.msra.gmra.mrb[16].mxu0 %vm446_vm1, %v1192_v38 }
  0x48   : > { %5966 = vmatprep.mubr.msk.f32.mxu1 %vm837_vm2, %v806_v39  ;;  %6016 = vmatprep.mubr.msk.f32.mxu0 %vm446_vm1, %v1193_v40  ;;  %p6308_p1 = pnand %p6307_p0, %p6509_p3 }
  0x4a   : > { %p6309_p2 = pneg %p6308_p1 }
  0x4b   : > { %5967 = vmatmul.mubr.msk.f32.gmra.mrb[18].mxu1 %vm837_vm2, %v807_v41  ;;  %6017 = vmatmul.mubr.msk.f32.gmra.mrb[18].mxu0 %vm446_vm1, %v1194_v42 }
  0x4c   : > { %5969 = vmatprep.mubr.msk.f32.mxu1 %vm837_vm2, %v808_v43  ;;  %6019 = vmatprep.mubr.msk.f32.mxu0 %vm446_vm1, %v1195_v44 }
  0x4f   : > { %5970 = vmatmul.mubr.msk.f32.gmra.mrb[20].mxu1 %vm837_vm2, %v809_v45  ;;  %6020 = vmatmul.mubr.msk.f32.gmra.mrb[20].mxu0 %vm446_vm1, %v1196_v46 }
  0x50   : > { %5972 = vmatprep.mubr.msk.f32.mxu1 %vm837_vm2, %v810_v47  ;;  %6022 = vmatprep.mubr.msk.f32.mxu0 %vm446_vm1, %v1197_v48 }
  0x53   : > { %5973 = vmatmul.mubr.msk.f32.gmra.mrb[22].mxu1 %vm837_vm2, %v811_v49  ;;  %6023 = vmatmul.mubr.msk.f32.gmra.mrb[22].mxu0 %vm446_vm1, %v1198_v50 }
  0x54   : > { %5975 = vmatprep.mubr.msk.f32.mxu1 %vm837_vm2, %v812_v51  ;;  %6025 = vmatprep.mubr.msk.f32.mxu0 %vm446_vm1, %v1199_v52 }
  0x57   : > { %5976 = vmatmul.mubr.msk.f32.gmra.mrb[24].mxu1 %vm837_vm2, %v813_v53  ;;  %6026 = vmatmul.mubr.msk.f32.gmra.mrb[24].mxu0 %vm446_vm1, %v1200_v54 }
  0x58   : > { %5978 = vmatprep.mubr.msk.f32.mxu1 %vm837_vm2, %v814_v55  ;;  %6028 = vmatprep.mubr.msk.f32.mxu0 %vm446_vm1, %v1201_v56 }
  0x5b   : > { %5979 = vmatmul.mubr.msk.f32.gmra.mrb[26].mxu1 %vm837_vm2, %v815_v57  ;;  %6029 = vmatmul.mubr.msk.f32.gmra.mrb[26].mxu0 %vm446_vm1, %v1202_v58 }
  0x5c   : > { %5981 = vmatprep.mubr.msk.f32.mxu1 %vm837_vm2, %v816_v59  ;;  %6031 = vmatprep.mubr.msk.f32.mxu0 %vm446_vm1, %v1203_v60 }
  0x5f   : > { %5982 = vmatmul.mubr.msk.f32.gmra.mrb[28].mxu1 %vm837_vm2, %v817_v61  ;;  %6032 = vmatmul.mubr.msk.f32.gmra.mrb[28].mxu0 %vm446_vm1, %v1204_v62 }
  0x60   : > { %5984 = vmatprep.mubr.msk.f32.mxu1 %vm837_vm2, %v818_v63  ;;  %6034 = vmatprep.mubr.msk.f32.mxu0 %vm446_vm1, %v1205_v0 }
  0x63   : > { %5985 = vmatmul.mubr.msk.f32.gmra.mrb[30].mxu1 %vm837_vm2, %v819_v1  ;;  %6035 = vmatmul.mubr.msk.f32.gmra.mrb[30].mxu0 %vm446_vm1, %v1206_v2 }
  0x64   : > { %5987 = vmatprep.mubr.msk.f32.mxu1 %vm837_vm2, %v820_v3  ;;  %6037 = vmatprep.mubr.msk.f32.mxu0 %vm446_vm1, %v1207_v4 }
  0x67   : > { %5988 = vmatmul.mubr.msk.f32.gmra.mrb[32].mxu1 %vm837_vm2, %v821_v5  ;;  %6038 = vmatmul.mubr.msk.f32.gmra.mrb[32].mxu0 %vm446_vm1, %v1208_v6 }
  0x68   : > { %5990 = vmatprep.mubr.msk.f32.mxu1 %vm837_vm2, %v822_v7  ;;  %6040 = vmatprep.mubr.msk.f32.mxu0 %vm446_vm1, %v1209_v8 }
  0x6b   : > { %5991 = vmatmul.mubr.msk.f32.gmra.mrb[34].mxu1 %vm837_vm2, %v823_v9  ;;  %6041 = vmatmul.mubr.msk.f32.gmra.mrb[34].mxu0 %vm446_vm1, %v1210_v10  ;;  %v10956_v10 = vmov 0.0  }
  0x6c   : > { %5993 = vmatprep.mubr.msk.f32.mxu1 %vm837_vm2, %v824_v11  ;;  %6043 = vmatprep.mubr.msk.f32.mxu0 %vm446_vm1, %v1211_v12 }
  0x6f   : > { %5994 = vmatmul.mubr.msk.f32.gmra.mrb[36].mxu1 %vm837_vm2, %v825_v13  ;;  %6044 = vmatmul.mubr.msk.f32.gmra.mrb[36].mxu0 %vm446_vm1, %v1212_v14 }
  0x70   : > { %5996 = vmatprep.mubr.msk.f32.mxu1 %vm837_vm2, %v826_v15  ;;  %6046 = vmatprep.mubr.msk.f32.mxu0 %vm446_vm1, %v1213_v16 }
  0x73   : > { %5997 = vmatmul.mubr.msk.f32.gmra.mrb[38].mxu1 %vm837_vm2, %v827_v17  ;;  %6047 = vmatmul.mubr.msk.f32.gmra.mrb[38].mxu0 %vm446_vm1, %v1214_v18 }
  0x74   : > { %5999 = vmatprep.mubr.msk.f32.mxu1 %vm837_vm2, %v828_v19  ;;  %6049 = vmatprep.mubr.msk.f32.mxu0 %vm446_vm1, %v1215_v20 }
  0x77   : > { %6000 = vmatmul.mubr.msk.f32.gmra.mrb[40].mxu1 %vm837_vm2, %v829_v21  ;;  %6050 = vmatmul.mubr.msk.f32.gmra.mrb[40].mxu0 %vm446_vm1, %v1216_v22 }
  0x78   : > { %6002 = vmatprep.mubr.msk.f32.mxu1 %vm837_vm2, %v830_v23  ;;  %6052 = vmatprep.mubr.msk.f32.mxu0 %vm446_vm1, %v1217_v24 }
  0x7b   : > { %6003 = vmatmul.mubr.msk.f32.gmra.mrb[42].mxu1 %vm837_vm2, %v831_v25  ;;  %6053 = vmatmul.mubr.msk.f32.gmra.mrb[42].mxu0 %vm446_vm1, %v1218_v26 }
  0x7c   : > { %6005 = vmatprep.mubr.msk.f32.mxu1 %vm837_vm2, %v832_v27  ;;  %6055 = vmatprep.mubr.msk.f32.mxu0 %vm446_vm1, %v1219_v28 }
  0x7f   : > { %6006 = vmatmul.mubr.msk.f32.gmra.mrb[44].mxu1 %vm837_vm2, %v833_v29  ;;  %6056 = vmatmul.mubr.msk.f32.gmra.mrb[44].mxu0 %vm446_vm1, %v1220_v30 }
  0x80   : > { %6008 = vmatprep.mubr.msk.f32.mxu1 %vm837_vm2, %v834_v31  ;;  %6058 = vmatprep.mubr.msk.f32.mxu0 %vm446_vm1, %v1221_v32 }
  0x83   : > { %6009 = vmatmul.mubr.msk.f32.gmra.mrb[46].mxu1 %vm837_vm2, %v835_v33  ;;  %6059 = vmatmul.mubr.msk.f32.gmra.mrb[46].mxu0 %vm446_vm1, %v1222_v34 }
  0xfa   : > { %v5915_v35 = vpop.f32.mrb[0].mxu0  ;;  %v6760_v36 = vpop.f32.mrb[0].mxu1 }
  0xfb   : > { %v613_v37 = vpop.f32.mrb[1].mxu0  ;;  %v6762_v38 = vpop.f32.mrb[1].mxu1  ;;  %v773_v3 = vmax.f32 %v5915_v35, 0.0 }
  0xfc   : > { %v772_v4 = vmax.f32 %v613_v37, 0.0 }
  0xfe   : > { %v5918_v39 = vpop.f32.mrb[2].mxu0  ;;  %v6764_v40 = vpop.f32.mrb[2].mxu1 }
  0xff   : > { %v623_v41 = vpop.f32.mrb[3].mxu0  ;;  %v6766_v42 = vpop.f32.mrb[3].mxu1  ;;  %v775_v13 = vmax.f32 %v5918_v39, 0.0 }
 0x100   : > { %v774_v16 = vmax.f32 %v623_v41, 0.0 }
 0x102   : > { %v5921_v43 = vpop.f32.mrb[4].mxu0  ;;  %v6768_v44 = vpop.f32.mrb[4].mxu1 }
 0x103   : > { %v6770_v45 = vpop.f32.mrb[5].mxu0  ;;  %v6772_v46 = vpop.f32.mrb[5].mxu1  ;;  %v777_v27 = vmax.f32 %v5921_v43, 0.0 }
 0x104   : > { %v776_v30 = vmax.f32 %v6770_v45, 0.0 }
 0x106   : > { %v6774_v47 = vpop.f32.mrb[6].mxu0  ;;  %v6776_v48 = vpop.f32.mrb[6].mxu1 }
 0x107   : > { %v6778_v49 = vpop.f32.mrb[7].mxu0  ;;  %v6780_v50 = vpop.f32.mrb[7].mxu1 }
 0x10a   : > { %v6782_v51 = vpop.f32.mrb[8].mxu0  ;;  %v6784_v52 = vpop.f32.mrb[8].mxu1 }
 0x10b   : > { %v6786_v53 = vpop.f32.mrb[9].mxu0  ;;  %v6788_v54 = vpop.f32.mrb[9].mxu1 }
 0x10e   : > { %v6790_v55 = vpop.f32.mrb[10].mxu0  ;;  %v6792_v56 = vpop.f32.mrb[10].mxu1 }
 0x10f   : > { %v6794_v57 = vpop.f32.mrb[11].mxu0  ;;  %v6796_v58 = vpop.f32.mrb[11].mxu1 }
 0x112   : > { %v6798_v59 = vpop.f32.mrb[12].mxu0  ;;  %v6800_v60 = vpop.f32.mrb[12].mxu1 }
 0x113   : > { %v6802_v61 = vpop.f32.mrb[13].mxu0  ;;  %v6804_v62 = vpop.f32.mrb[13].mxu1 }
 0x116   : > { %v6806_v63 = vpop.f32.mrb[14].mxu0  ;;  %v6808_v0 = vpop.f32.mrb[14].mxu1 }
 0x117   : > { %v6810_v1 = vpop.f32.mrb[15].mxu0  ;;  %v6812_v2 = vpop.f32.mrb[15].mxu1 }
 0x11a   : > { %v5965_v5 = vpop.f32.mrb[16].mxu1  ;;  %v6814_v6 = vpop.f32.mrb[16].mxu0 }
 0x11b   : > { %v6816_v7 = vadd.f32 %v5965_v5, %v773_v3  ;;  %vm1586_vm3 = vcmp.ge.f32.partialorder %v6814_v6, 0.0  ;;  %v1000_v8 = vpop.f32.mrb[17].mxu1  ;;  %v6819_v9 = vpop.f32.mrb[17].mxu0  ;;  %v779_v5 = vmax.f32 %v6774_v47, 0.0 }
 0x11c   : > { %v5485_v11 = vsel %vm1586_vm3, 1.0, %v10956_v10  ;;  %v6822_v12 = vadd.f32 %v1000_v8, %v772_v4  ;;  %vm1585_vm4 = vcmp.ge.f32.partialorder %v6819_v9, 0.0  ;;  %v778_v8 = vmax.f32 %v6778_v49, 0.0 }
 0x11d   : > { %11289 = vst [vmem:[#allocation8_spill] sm:$0xff] %v6816_v7  ;;  %v1719_v14 = vmul.f32 %v5485_v11, %v6816_v7  ;;  %v5484_v15 = vsel %vm1585_vm4, 1.0, %v10956_v10 }
 0x11e   : > { %11290 = vst [vmem:[#allocation9_spill] sm:$0xff] %v6822_v12  ;;  %v1681_v17 = vadd.f32 %v5485_v11, %v5484_v15  ;;  %v1718_v18 = vmul.f32 %v5484_v15, %v6822_v12  ;;  %v5968_v19 = vpop.f32.mrb[18].mxu1  ;;  %v6828_v20 = vpop.f32.mrb[18].mxu0  ;;  %v1548_v24 = vadd.f32 %v6816_v7, %v6822_v12 }
 0x11f   : > { %v6830_v21 = vadd.f32 %v5968_v19, %v775_v13  ;;  %vm1588_vm5 = vcmp.ge.f32.partialorder %v6828_v20, 0.0  ;;  %v1010_v22 = vpop.f32.mrb[19].mxu1  ;;  %v6833_v23 = vpop.f32.mrb[19].mxu0 }
 0x120   : > { %v1750_v25 = vadd.f32 %v1719_v14, %v1718_v18  ;;  %v6837_v26 = vadd.f32 %v1010_v22, %v774_v16  ;;  %vm1587_vm6 = vcmp.ge.f32.partialorder %v6833_v23, 0.0  ;;  %v5487_v28 = vsel %vm1588_vm5, 1.0, %v10956_v10 }
 0x121   : > { %11291 = vst [vmem:[#allocation10_spill] sm:$0xff] %v6830_v21  ;;  %v5486_v29 = vsel %vm1587_vm6, 1.0, %v10956_v10  ;;  %v1721_v43 = vmul.f32 %v5487_v28, %v6830_v21 }
 0x122   : > { %11292 = vst [vmem:[#allocation11_spill] sm:$0xff] %v6837_v26  ;;  %v1549_v31 = vadd.f32 %v1548_v24, %v6837_v26  ;;  %v1682_v32 = vadd.f32 %v5486_v29, %v1681_v17  ;;  %v1720_v33 = vmul.f32 %v5486_v29, %v6837_v26  ;;  %v5971_v34 = vpop.f32.mrb[20].mxu1  ;;  %v6845_v35 = vpop.f32.mrb[20].mxu0  ;;  %v780_v29 = vmax.f32 %v6786_v53, 0.0 }
 0x123   : > { %v6847_v37 = vadd.f32 %v5971_v34, %v777_v27  ;;  %vm1590_vm7 = vcmp.ge.f32.partialorder %v6845_v35, 0.0  ;;  %v1020_v39 = vpop.f32.mrb[21].mxu1  ;;  %v6850_v41 = vpop.f32.mrb[21].mxu0 }
 0x124   : > { %v1751_v3 = vadd.f32 %v1750_v25, %v1720_v33  ;;  %v6853_v4 = vadd.f32 %v1020_v39, %v776_v30  ;;  %v1550_v45 = vadd.f32 %v1549_v31, %v6830_v21  ;;  %vm1589_vm8 = vcmp.ge.f32.partialorder %v6850_v41, 0.0 }
 0x125   : > { %11293 = vst [vmem:[#allocation12_spill] sm:$0xff] %v6847_v37  ;;  %v1683_v11 = vadd.f32 %v5487_v28, %v1682_v32  ;;  %v5489_v13 = vsel %vm1590_vm7, 1.0, %v10956_v10  ;;  %v5488_v15 = vsel %vm1589_vm8, 1.0, %v10956_v10  ;;  %v781_v25 = vmax.f32 %v6782_v51, 0.0 }
 0x126   : > { %11294 = vst [vmem:[#allocation13_spill] sm:$0xff] %v6853_v4  ;;  %v1551_v14 = vadd.f32 %v1550_v45, %v6853_v4  ;;  %v1752_v16 = vadd.f32 %v1751_v3, %v1721_v43  ;;  %v5974_v17 = vpop.f32.mrb[22].mxu1  ;;  %v6862_v18 = vpop.f32.mrb[22].mxu0  ;;  %v1722_v22 = vmul.f32 %v5488_v15, %v6853_v4  ;;  %v1723_v30 = vmul.f32 %v5489_v13, %v6847_v37 }
 0x127   : > { %11295 = vst [vmem:[#allocation14_spill] sm:$0xff] %v6862_v18  ;;  %v1684_v19 = vadd.f32 %v5488_v15, %v1683_v11  ;;  %v6865_v24 = vadd.f32 %v5974_v17, %v779_v5  ;;  %vm1592_vm9 = vcmp.ge.f32.partialorder %v6862_v18, 0.0  ;;  %v1030_v47 = vpop.f32.mrb[23].mxu1  ;;  %v6868_v49 = vpop.f32.mrb[23].mxu0  ;;  %v783_v11 = vmax.f32 %v6790_v55, 0.0 }
 0x128   : > { %v6871_v27 = vadd.f32 %v1030_v47, %v778_v8  ;;  %v1552_v28 = vadd.f32 %v1551_v14, %v6847_v37  ;;  %vm1591_vm10 = vcmp.ge.f32.partialorder %v6868_v49, 0.0  ;;  %v1753_v31 = vadd.f32 %v1752_v16, %v1722_v22 }
 0x129   : > { %11296 = vst [vmem:[#allocation15_spill] sm:$0xff] %v6865_v24  ;;  %v5490_v32 = vsel %vm1591_vm10, 1.0, %v10956_v10  ;;  %v5491_v33 = vsel %vm1592_vm9, 1.0, %v10956_v10  ;;  %v1685_v39 = vadd.f32 %v5489_v13, %v1684_v19  ;;  %v782_v16 = vmax.f32 %v6794_v57, 0.0 }
 0x12a   : > { %11297 = vst [vmem:[#allocation16_spill] sm:$0xff] %v6871_v27  ;;  %v1553_v34 = vadd.f32 %v1552_v28, %v6871_v27  ;;  %v1724_v51 = vmul.f32 %v5490_v32, %v6871_v27  ;;  %v5977_v43 = vpop.f32.mrb[24].mxu1  ;;  %v6881_v3 = vpop.f32.mrb[24].mxu0  ;;  %v1754_v45 = vadd.f32 %v1753_v31, %v1723_v30  ;;  %v1725_v17 = vmul.f32 %v5491_v33, %v6865_v24 }
 0x12b   : > { %11298 = vst [vmem:[#allocation17_spill] sm:$0xff] %v6881_v3  ;;  %v6883_v5 = vadd.f32 %v5977_v43, %v781_v25  ;;  %vm1594_vm11 = vcmp.ge.f32.partialorder %v6881_v3, 0.0  ;;  %v1040_v53 = vpop.f32.mrb[25].mxu1  ;;  %v6886_v8 = vpop.f32.mrb[25].mxu0  ;;  %v1686_v14 = vadd.f32 %v5490_v32, %v1685_v39  ;;  %v785_v39 = vmax.f32 %v6798_v59, 0.0 }
 0x12c   : > { %11300 = vst [vmem:[#allocation19_spill] sm:$0xff] %v6886_v8  ;;  %v6889_v15 = vadd.f32 %v1040_v53, %v780_v29  ;;  %v1554_v13 = vadd.f32 %v1553_v34, %v6865_v24  ;;  %v1755_v19 = vadd.f32 %v1754_v45, %v1724_v51  ;;  %vm1593_vm12 = vcmp.ge.f32.partialorder %v6886_v8, 0.0 }
 0x12d   : > { %11299 = vst [vmem:[#allocation18_spill] sm:$0xff] %v6883_v5  ;;  %v5493_v22 = vsel %vm1594_vm11, 1.0, %v10956_v10  ;;  %v5492_v25 = vsel %vm1593_vm12, 1.0, %v10956_v10  ;;  %v1687_v28 = vadd.f32 %v5491_v33, %v1686_v14  ;;  %v784_v45 = vmax.f32 %v6802_v61, 0.0 }
 0x12e   : > { %11301 = vst [vmem:[#allocation20_spill] sm:$0xff] %v6889_v15  ;;  %v1555_v47 = vadd.f32 %v1554_v13, %v6889_v15  ;;  %v5980_v55 = vpop.f32.mrb[26].mxu1  ;;  %v6898_v30 = vpop.f32.mrb[26].mxu0  ;;  %v1726_v29 = vmul.f32 %v5492_v25, %v6889_v15  ;;  %v1756_v31 = vadd.f32 %v1755_v19, %v1725_v17  ;;  %v1727_v53 = vmul.f32 %v5493_v22, %v6883_v5 }
 0x12f   : > { %11302 = vst [vmem:[#allocation21_spill] sm:$0xff] %v6898_v30  ;;  %v6901_v32 = vadd.f32 %v5980_v55, %v783_v11  ;;  %vm1596_vm13 = vcmp.ge.f32.partialorder %v6898_v30, 0.0  ;;  %v1050_v57 = vpop.f32.mrb[27].mxu1  ;;  %v6904_v34 = vpop.f32.mrb[27].mxu0  ;;  %v1688_v51 = vadd.f32 %v5492_v25, %v1687_v28 }
 0x130   : > { %11304 = vst [vmem:[#allocation23_spill] sm:$0xff] %v6904_v34  ;;  %v6907_v43 = vadd.f32 %v1050_v57, %v782_v16  ;;  %v1556_v33 = vadd.f32 %v1555_v47, %v6883_v5  ;;  %v1757_v14 = vadd.f32 %v1756_v31, %v1726_v29  ;;  %vm1595_vm14 = vcmp.ge.f32.partialorder %v6904_v34, 0.0 }
 0x131   : > { %11303 = vst [vmem:[#allocation22_spill] sm:$0xff] %v6901_v32  ;;  %v5495_v11 = vsel %vm1596_vm13, 1.0, %v10956_v10  ;;  %v5494_v17 = vsel %vm1595_vm14, 1.0, %v10956_v10  ;;  %v1689_v19 = vadd.f32 %v5493_v22, %v1688_v51  ;;  %v787_v29 = vmax.f32 %v6806_v63, 0.0 }
 0x132   : > { %11305 = vst [vmem:[#allocation24_spill] sm:$0xff] %v6907_v43  ;;  %v1557_v13 = vadd.f32 %v1556_v33, %v6907_v43  ;;  %v5983_v59 = vpop.f32.mrb[28].mxu1  ;;  %v6916_v25 = vpop.f32.mrb[28].mxu0  ;;  %v1728_v16 = vmul.f32 %v5494_v17, %v6907_v43  ;;  %v1758_v47 = vadd.f32 %v1757_v14, %v1727_v53  ;;  %v786_v51 = vmax.f32 %v6810_v1, 0.0 }
 0x133   : > { %11306 = vst [vmem:[#allocation25_spill] sm:$0xff] %v6916_v25  ;;  %v6919_v28 = vadd.f32 %v5983_v59, %v785_v39  ;;  %vm1598_vm15 = vcmp.ge.f32.partialorder %v6916_v25, 0.0  ;;  %v1060_v61 = vpop.f32.mrb[29].mxu1  ;;  %v6922_v55 = vpop.f32.mrb[29].mxu0  ;;  %v1690_v31 = vadd.f32 %v5494_v17, %v1689_v19  ;;  %v1729_v33 = vmul.f32 %v5495_v11, %v6901_v32 }
 0x134   : > { %11308 = vst [vmem:[#allocation27_spill] sm:$0xff] %v6922_v55  ;;  %v6925_v57 = vadd.f32 %v1060_v61, %v784_v45  ;;  %v1558_v22 = vadd.f32 %v1557_v13, %v6901_v32  ;;  %v1759_v10 = vadd.f32 %v1758_v47, %v1728_v16  ;;  %vm1597_vm0 = vcmp.ge.f32.partialorder %v6922_v55, 0.0 }
 0x135   : > { %11307 = vst [vmem:[#allocation26_spill] sm:$0xff] %v6919_v28  ;;  %v11310_v39 = vmov 0.0   ;;  %v1691_v25 = vadd.f32 %v5495_v11, %v1690_v31  ;;  %v789_v47 = vmax.f32 %v6760_v36, 0.0  ;;  %v788_v31 = vmax.f32 %v6762_v38, 0.0 }
 0x136   : > { %11309 = vst [vmem:[#allocation28_spill] sm:$0xff] %v6925_v57  ;;  %v5497_v53 = vsel %vm1598_vm15, 1.0, %v11310_v39  ;;  %v1559_v14 = vadd.f32 %v1558_v22, %v6925_v57  ;;  %v5496_v59 = vsel %vm1597_vm0, 1.0, %v11310_v39  ;;  %v5986_v63 = vpop.f32.mrb[30].mxu1  ;;  %v6934_v17 = vpop.f32.mrb[30].mxu0  ;;  %v1760_v13 = vadd.f32 %v1759_v10, %v1729_v33 }
 0x137   : > { %11311 = vst [vmem:[#allocation29_spill] sm:$0xff] %v6934_v17  ;;  %v1730_v45 = vmul.f32 %v5496_v59, %v6925_v57  ;;  %v6937_v19 = vadd.f32 %v5986_v63, %v787_v29  ;;  %vm1600_vm1 = vcmp.ge.f32.partialorder %v6934_v17, 0.0  ;;  %v1070_v1 = vpop.f32.mrb[31].mxu1  ;;  %v6940_v16 = vpop.f32.mrb[31].mxu0  ;;  %v1692_v61 = vadd.f32 %v5496_v59, %v1691_v25 }
 0x138   : > { %11313 = vst [vmem:[#allocation31_spill] sm:$0xff] %v6940_v16  ;;  %v6943_v22 = vadd.f32 %v1070_v1, %v786_v51  ;;  %v1560_v11 = vadd.f32 %v1559_v14, %v6919_v28  ;;  %v1731_v55 = vmul.f32 %v5497_v53, %v6919_v28  ;;  %vm1599_vm2 = vcmp.ge.f32.partialorder %v6940_v16, 0.0 }
 0x139   : > { %11312 = vst [vmem:[#allocation30_spill] sm:$0xff] %v6937_v19  ;;  %v1761_v30 = vadd.f32 %v1760_v13, %v1730_v45  ;;  %v5499_v10 = vsel %vm1600_vm1, 1.0, %v11310_v39  ;;  %v5498_v33 = vsel %vm1599_vm2, 1.0, %v11310_v39  ;;  %v1693_v63 = vadd.f32 %v5497_v53, %v1692_v61 }
 0x13a   : > { %11314 = vst [vmem:[#allocation32_spill] sm:$0xff] %v6943_v22  ;;  %v1561_v29 = vadd.f32 %v1560_v11, %v6943_v22  ;;  %v5989_v36 = vpop.f32.mrb[32].mxu1  ;;  %v6952_v25 = vpop.f32.mrb[32].mxu0  ;;  %v1732_v51 = vmul.f32 %v5498_v33, %v6943_v22  ;;  %v791_v13 = vmax.f32 %v6764_v40, 0.0  ;;  %v790_v61 = vmax.f32 %v6766_v42, 0.0 }
 0x13b   : > { %11315 = vst [vmem:[#allocation33_spill] sm:$0xff] %v6952_v25  ;;  %v1762_v14 = vadd.f32 %v1761_v30, %v1731_v55  ;;  %v6955_v59 = vadd.f32 %v5989_v36, %v789_v47  ;;  %vm1602_vm3 = vcmp.ge.f32.partialorder %v6952_v25, 0.0  ;;  %v1080_v38 = vpop.f32.mrb[33].mxu1  ;;  %v6958_v45 = vpop.f32.mrb[33].mxu0  ;;  %v1694_v1 = vadd.f32 %v5498_v33, %v1693_v63 }
 0x13c   : > { %11317 = vst [vmem:[#allocation35_spill] sm:$0xff] %v6958_v45  ;;  %v6961_v11 = vadd.f32 %v1080_v38, %v788_v31  ;;  %v1562_v53 = vadd.f32 %v1561_v29, %v6937_v19  ;;  %v1733_v17 = vmul.f32 %v5499_v10, %v6937_v19  ;;  %vm1601_vm4 = vcmp.ge.f32.partialorder %v6958_v45, 0.0 }
 0x13d   : > { %11316 = vst [vmem:[#allocation34_spill] sm:$0xff] %v6955_v59  ;;  %v1763_v16 = vadd.f32 %v1762_v14, %v1732_v51  ;;  %v5501_v30 = vsel %vm1602_vm3, 1.0, %v11310_v39  ;;  %v5500_v47 = vsel %vm1601_vm4, 1.0, %v11310_v39  ;;  %v1695_v36 = vadd.f32 %v5499_v10, %v1694_v1 }
 0x13e   : > { %11318 = vst [vmem:[#allocation36_spill] sm:$0xff] %v6961_v11  ;;  %v1563_v55 = vadd.f32 %v1562_v53, %v6961_v11  ;;  %v5992_v40 = vpop.f32.mrb[34].mxu1  ;;  %v6970_v33 = vpop.f32.mrb[34].mxu0  ;;  %v1734_v31 = vmul.f32 %v5500_v47, %v6961_v11  ;;  %v793_v14 = vmax.f32 %v6768_v44, 0.0  ;;  %v792_v1 = vmax.f32 %v6772_v46, 0.0 }
 0x13f   : > { %11319 = vst [vmem:[#allocation37_spill] sm:$0xff] %v6970_v33  ;;  %v1764_v29 = vadd.f32 %v1763_v16, %v1733_v17  ;;  %v6973_v63 = vadd.f32 %v5992_v40, %v791_v13  ;;  %vm1604_vm5 = vcmp.ge.f32.partialorder %v6970_v33, 0.0  ;;  %v1090_v42 = vpop.f32.mrb[35].mxu1  ;;  %v6976_v51 = vpop.f32.mrb[35].mxu0  ;;  %v1696_v38 = vadd.f32 %v5500_v47, %v1695_v36 }
 0x140   : > { %11321 = vst [vmem:[#allocation39_spill] sm:$0xff] %v6976_v51  ;;  %v6979_v53 = vadd.f32 %v1090_v42, %v790_v61  ;;  %v1564_v10 = vadd.f32 %v1563_v55, %v6955_v59  ;;  %v1735_v25 = vmul.f32 %v5501_v30, %v6955_v59  ;;  %vm1603_vm6 = vcmp.ge.f32.partialorder %v6976_v51, 0.0 }
 0x141   : > { %11320 = vst [vmem:[#allocation38_spill] sm:$0xff] %v6973_v63  ;;  %v1765_v45 = vadd.f32 %v1764_v29, %v1734_v31  ;;  %v5503_v17 = vsel %vm1604_vm5, 1.0, %v11310_v39  ;;  %v5502_v13 = vsel %vm1603_vm6, 1.0, %v11310_v39  ;;  %v1697_v40 = vadd.f32 %v5501_v30, %v1696_v38 }
 0x142   : > { %11322 = vst [vmem:[#allocation40_spill] sm:$0xff] %v6979_v53  ;;  %v1565_v16 = vadd.f32 %v1564_v10, %v6979_v53  ;;  %v5995_v44 = vpop.f32.mrb[36].mxu1  ;;  %v6988_v47 = vpop.f32.mrb[36].mxu0  ;;  %v1736_v61 = vmul.f32 %v5502_v13, %v6979_v53  ;;  %v795_v29 = vmax.f32 %v6776_v48, 0.0  ;;  %v794_v38 = vmax.f32 %v6780_v50, 0.0 }
 0x143   : > { %11323 = vst [vmem:[#allocation41_spill] sm:$0xff] %v6988_v47  ;;  %v1766_v55 = vadd.f32 %v1765_v45, %v1735_v25  ;;  %v6991_v36 = vadd.f32 %v5995_v44, %v793_v14  ;;  %vm1606_vm7 = vcmp.ge.f32.partialorder %v6988_v47, 0.0  ;;  %v1100_v46 = vpop.f32.mrb[37].mxu1  ;;  %v6994_v31 = vpop.f32.mrb[37].mxu0  ;;  %v1698_v42 = vadd.f32 %v5502_v13, %v1697_v40 }
 0x144   : > { %11325 = vst [vmem:[#allocation43_spill] sm:$0xff] %v6994_v31  ;;  %v6997_v10 = vadd.f32 %v1100_v46, %v792_v1  ;;  %v1566_v30 = vadd.f32 %v1565_v16, %v6973_v63  ;;  %v1737_v33 = vmul.f32 %v5503_v17, %v6973_v63  ;;  %vm1605_vm8 = vcmp.ge.f32.partialorder %v6994_v31, 0.0 }
 0x145   : > { %11324 = vst [vmem:[#allocation42_spill] sm:$0xff] %v6991_v36  ;;  %v1767_v51 = vadd.f32 %v1766_v55, %v1736_v61  ;;  %v5505_v25 = vsel %vm1606_vm7, 1.0, %v11310_v39  ;;  %v5504_v14 = vsel %vm1605_vm8, 1.0, %v11310_v39  ;;  %v1699_v44 = vadd.f32 %v5503_v17, %v1698_v42 }
 0x146   : > { %11326 = vst [vmem:[#allocation44_spill] sm:$0xff] %v6997_v10  ;;  %v1567_v45 = vadd.f32 %v1566_v30, %v6997_v10  ;;  %v5998_v48 = vpop.f32.mrb[38].mxu1  ;;  %v7006_v13 = vpop.f32.mrb[38].mxu0  ;;  %v1738_v1 = vmul.f32 %v5504_v14, %v6997_v10  ;;  %v797_v55 = vmax.f32 %v6784_v52, 0.0  ;;  %v796_v42 = vmax.f32 %v6788_v54, 0.0 }
 0x147   : > { %11327 = vst [vmem:[#allocation45_spill] sm:$0xff] %v7006_v13  ;;  %v1768_v16 = vadd.f32 %v1767_v51, %v1737_v33  ;;  %v7009_v40 = vadd.f32 %v5998_v48, %v795_v29  ;;  %vm1608_vm9 = vcmp.ge.f32.partialorder %v7006_v13, 0.0  ;;  %v1110_v50 = vpop.f32.mrb[39].mxu1  ;;  %v7012_v61 = vpop.f32.mrb[39].mxu0  ;;  %v1700_v46 = vadd.f32 %v5504_v14, %v1699_v44 }
 0x148   : > { %11329 = vst [vmem:[#allocation47_spill] sm:$0xff] %v7012_v61  ;;  %v7015_v30 = vadd.f32 %v1110_v50, %v794_v38  ;;  %v1568_v17 = vadd.f32 %v1567_v45, %v6991_v36  ;;  %v1739_v47 = vmul.f32 %v5505_v25, %v6991_v36  ;;  %vm1607_vm10 = vcmp.ge.f32.partialorder %v7012_v61, 0.0 }
 0x149   : > { %11328 = vst [vmem:[#allocation46_spill] sm:$0xff] %v7009_v40  ;;  %v1769_v31 = vadd.f32 %v1768_v16, %v1738_v1  ;;  %v5507_v33 = vsel %vm1608_vm9, 1.0, %v11310_v39  ;;  %v5506_v29 = vsel %vm1607_vm10, 1.0, %v11310_v39  ;;  %v1701_v48 = vadd.f32 %v5505_v25, %v1700_v46 }
 0x14a   : > { %11330 = vst [vmem:[#allocation48_spill] sm:$0xff] %v7015_v30  ;;  %v1569_v51 = vadd.f32 %v1568_v17, %v7015_v30  ;;  %v6001_v52 = vpop.f32.mrb[40].mxu1  ;;  %v7024_v14 = vpop.f32.mrb[40].mxu0  ;;  %v1740_v38 = vmul.f32 %v5506_v29, %v7015_v30  ;;  %v799_v16 = vmax.f32 %v6792_v56, 0.0  ;;  %v798_v46 = vmax.f32 %v6796_v58, 0.0 }
 0x14b   : > { %11331 = vst [vmem:[#allocation49_spill] sm:$0xff] %v7024_v14  ;;  %v1770_v45 = vadd.f32 %v1769_v31, %v1739_v47  ;;  %v7027_v44 = vadd.f32 %v6001_v52, %v797_v55  ;;  %vm1610_vm11 = vcmp.ge.f32.partialorder %v7024_v14, 0.0  ;;  %v1120_v54 = vpop.f32.mrb[41].mxu1  ;;  %v7030_v1 = vpop.f32.mrb[41].mxu0  ;;  %v1702_v50 = vadd.f32 %v5506_v29, %v1701_v48 }
 0x14c   : > { %11333 = vst [vmem:[#allocation51_spill] sm:$0xff] %v7030_v1  ;;  %v7033_v17 = vadd.f32 %v1120_v54, %v796_v42  ;;  %v1570_v25 = vadd.f32 %v1569_v51, %v7009_v40  ;;  %v1741_v13 = vmul.f32 %v5507_v33, %v7009_v40  ;;  %vm1609_vm12 = vcmp.ge.f32.partialorder %v7030_v1, 0.0 }
 0x14d   : > { %11332 = vst [vmem:[#allocation50_spill] sm:$0xff] %v7027_v44  ;;  %v1771_v61 = vadd.f32 %v1770_v45, %v1740_v38  ;;  %v5509_v47 = vsel %vm1610_vm11, 1.0, %v11310_v39  ;;  %v5508_v55 = vsel %vm1609_vm12, 1.0, %v11310_v39  ;;  %v1703_v52 = vadd.f32 %v5507_v33, %v1702_v50 }
 0x14e   : > { %11334 = vst [vmem:[#allocation52_spill] sm:$0xff] %v7033_v17  ;;  %v1571_v31 = vadd.f32 %v1570_v25, %v7033_v17  ;;  %v6004_v56 = vpop.f32.mrb[42].mxu1  ;;  %v7042_v29 = vpop.f32.mrb[42].mxu0  ;;  %v1742_v42 = vmul.f32 %v5508_v55, %v7033_v17  ;;  %v801_v45 = vmax.f32 %v6800_v60, 0.0  ;;  %v800_v50 = vmax.f32 %v6804_v62, 0.0 }
 0x14f   : > { %11335 = vst [vmem:[#allocation53_spill] sm:$0xff] %v7042_v29  ;;  %v1772_v51 = vadd.f32 %v1771_v61, %v1741_v13  ;;  %v7045_v48 = vadd.f32 %v6004_v56, %v799_v16  ;;  %vm1612_vm13 = vcmp.ge.f32.partialorder %v7042_v29, 0.0  ;;  %v1130_v58 = vpop.f32.mrb[43].mxu1  ;;  %v7048_v38 = vpop.f32.mrb[43].mxu0  ;;  %v1704_v54 = vadd.f32 %v5508_v55, %v1703_v52 }
 0x150   : > { %11337 = vst [vmem:[#allocation55_spill] sm:$0xff] %v7048_v38  ;;  %v7051_v25 = vadd.f32 %v1130_v58, %v798_v46  ;;  %v1572_v33 = vadd.f32 %v1571_v31, %v7027_v44  ;;  %v1743_v14 = vmul.f32 %v5509_v47, %v7027_v44  ;;  %vm1611_vm14 = vcmp.ge.f32.partialorder %v7048_v38, 0.0 }
 0x151   : > { %11336 = vst [vmem:[#allocation54_spill] sm:$0xff] %v7045_v48  ;;  %v1773_v1 = vadd.f32 %v1772_v51, %v1742_v42  ;;  %v5511_v13 = vsel %vm1612_vm13, 1.0, %v11310_v39  ;;  %v5510_v16 = vsel %vm1611_vm14, 1.0, %v11310_v39  ;;  %v1705_v56 = vadd.f32 %v5509_v47, %v1704_v54 }
 0x152   : > { %11338 = vst [vmem:[#allocation56_spill] sm:$0xff] %v7051_v25  ;;  %v1573_v61 = vadd.f32 %v1572_v33, %v7051_v25  ;;  %v6007_v60 = vpop.f32.mrb[44].mxu1  ;;  %v7060_v55 = vpop.f32.mrb[44].mxu0  ;;  %v1744_v46 = vmul.f32 %v5510_v16, %v7051_v25  ;;  %v803_v51 = vmax.f32 %v6808_v0, 0.0  ;;  %v802_v54 = vmax.f32 %v6812_v2, 0.0 }
 0x153   : > { %11339 = vst [vmem:[#allocation57_spill] sm:$0xff] %v7060_v55  ;;  %v1774_v31 = vadd.f32 %v1773_v1, %v1743_v14  ;;  %v7063_v52 = vadd.f32 %v6007_v60, %v801_v45  ;;  %vm1614_vm15 = vcmp.ge.f32.partialorder %v7060_v55, 0.0  ;;  %v1140_v62 = vpop.f32.mrb[45].mxu1  ;;  %v7066_v42 = vpop.f32.mrb[45].mxu0  ;;  %v1706_v58 = vadd.f32 %v5510_v16, %v1705_v56 }
 0x154   : > { %11341 = vst [vmem:[#allocation59_spill] sm:$0xff] %v7066_v42  ;;  %v7069_v33 = vadd.f32 %v1140_v62, %v800_v50  ;;  %v1574_v47 = vadd.f32 %v1573_v61, %v7045_v48  ;;  %v1745_v29 = vmul.f32 %v5511_v13, %v7045_v48  ;;  %vm1613_vm0 = vcmp.ge.f32.partialorder %v7066_v42, 0.0 }
 0x155   : > { %11340 = vst [vmem:[#allocation58_spill] sm:$0xff] %v7063_v52  ;;  %v1775_v38 = vadd.f32 %v1774_v31, %v1744_v46  ;;  %v5513_v14 = vsel %vm1614_vm15, 1.0, %v11310_v39  ;;  %v5512_v45 = vsel %vm1613_vm0, 1.0, %v11310_v39  ;;  %v1707_v60 = vadd.f32 %v5511_v13, %v1706_v58 }
 0x156   : > { %11342 = vst [vmem:[#allocation60_spill] sm:$0xff] %v7069_v33  ;;  %v1575_v1 = vadd.f32 %v1574_v47, %v7069_v33  ;;  %v6010_v0 = vpop.f32.mrb[46].mxu1  ;;  %v7078_v16 = vpop.f32.mrb[46].mxu0  ;;  %v1746_v50 = vmul.f32 %v5512_v45, %v7069_v33  ;;  %v1747_v13 = vmul.f32 %v5513_v14, %v7063_v52 }
 0x157   : > { %11343 = vst [vmem:[#allocation61_spill] sm:$0xff] %v7078_v16  ;;  %v1776_v61 = vadd.f32 %v1775_v38, %v1745_v29  ;;  %v7081_v56 = vadd.f32 %v6010_v0, %v803_v51  ;;  %vm1616_vm1 = vcmp.ge.f32.partialorder %v7078_v16, 0.0  ;;  %v1150_v2 = vpop.f32.mrb[47].mxu1  ;;  %v7084_v46 = vpop.f32.mrb[47].mxu0  ;;  %v1708_v31 = vadd.f32 %v5512_v45, %v1707_v60 }
 0x158   : > { %11345 = vst [vmem:[#allocation63_spill] sm:$0xff] %v7084_v46  ;;  %v7086_v62 = vadd.f32 %v1150_v2, %v802_v54  ;;  %v1576_v47 = vadd.f32 %v1575_v1, %v7063_v52  ;;  %vm1615_vm2 = vcmp.ge.f32.partialorder %v7084_v46, 0.0  ;;  %v5515_v55 = vsel %vm1616_vm1, 1.0, %v11310_v39 }
 0x159   : > { %11344 = vst [vmem:[#allocation62_spill] sm:$0xff] %v7081_v56  ;;  %v1777_v58 = vadd.f32 %v1776_v61, %v1746_v50  ;;  %v5514_v29 = vsel %vm1615_vm2, 1.0, %v11310_v39  ;;  %v1709_v38 = vadd.f32 %v5513_v14, %v1708_v31  ;;  %v1749_v54 = vmul.f32 %v5515_v55, %v7081_v56 }
 0x15a   : > { %11346 = vst [vmem:[#allocation64_spill] sm:$0xff] %v7086_v62  ;;  %v1577_v51 = vadd.f32 %v1576_v47, %v7086_v62  ;;  %v1748_v0 = vmul.f32 %v5514_v29, %v7086_v62 }
 0x15b   : > { %v1778_v16 = vadd.f32 %v1777_v58, %v1747_v13  ;;  %v1710_v45 = vadd.f32 %v5514_v29, %v1709_v38 }
 0x15c   : > { %v1578_v2 = vadd.f32 %v1577_v51, %v7081_v56 }
 0x15d   : > { %v1779_v60 = vadd.f32 %v1778_v16, %v1748_v0  ;;  %v1711_v1 = vadd.f32 %v5515_v55, %v1710_v45  ;;  %v7097_v45 = vstv %s411_s19  ;;  %s6403_s19 = smov [#allocation4]  }
 0x15e   : > { %v1579_v34 = vrot.slane %v1578_v2, 4 }
 0x15f   : > { %v1780_v50 = vadd.f32 %v1779_v60, %v1749_v54  ;;  %v1712_v61 = vrot.slane %v1711_v1, 4  ;;  %v7117_v54 = vmul.f32 2.0, %v6853_v4  ;;  %v7120_v60 = vmul.f32 2.0, %v6865_v24 }
 0x160   : > { %v1580_v31 = vadd.f32 %v1579_v34, %v1578_v2  ;;  %v7103_v34 = vmul.f32 2.0, %v6822_v12  ;;  %v7126_v2 = vmul.f32 2.0, %v6883_v5 }
 0x161   : > { %v1781_v46 = vrot.slane %v1780_v50, 4  ;;  %v1713_v42 = vadd.f32 %v1712_v61, %v1711_v1  ;;  %11353 = vst [vmem:[#allocation71_spill] sm:$0xff] %v7117_v54  ;;  %11354 = vst [vmem:[#allocation72_spill] sm:$0xff] %v7120_v60  ;;  %v7123_v1 = vmul.f32 2.0, %v6871_v27 }
 0x162   : > { %v1581_v13 = vrot.slane %v1580_v31, 2  ;;  %11348 = vst [vmem:[#allocation66_spill] sm:$0xff] %v7103_v34  ;;  %11356 = vst [vmem:[#allocation74_spill] sm:$0xff] %v7126_v2 }
 0x163   : > { %v1714_v3 = vrot.slane %v1713_v42, 2  ;;  %v1782_v39 = vadd.f32 %v1781_v46, %v1780_v50  ;;  %v7105_v46 = vstv %s412_s24  ;;  %11355 = vst [vmem:[#allocation73_spill] sm:$0xff] %v7123_v1  ;;  %s6310_s24 = sshll.u32 %s6403_s19, 4  ;;  %s6311_s24 = int_to_ptr.vmem [resolvable:$false] %s6310_s24 }
 0x164   : > { %v1582_v38 = vadd.f32 %v1581_v13, %v1580_v31  ;;  %11349 = vst [vmem:[#allocation67_spill] sm:$0xff] %v7105_v46  ;;  %v7134_v31 = vmul.f32 2.0, %v6901_v32  ;;  %v7140_v13 = vmul.f32 2.0, %v6919_v28  ;;  %v7156_v32 = vmul.f32 2.0, %v6961_v11  ;;  %s6312_s18 = scalar_lea.vmem %s6311_s24, 8192  ;;  %p6313_p4 = scmp.lt.s32.totalorder %s10887_s1, %s6311_s24 }
 0x165   : > { %v1715_v14 = vadd.f32 %v1714_v3, %v1713_v42  ;;  %v1783_v8 = vrot.slane %v1782_v39, 2  ;;  %v7100_v3 = vmul.f32 2.0, %v6816_v7  ;;  %v7159_v28 = vmul.f32 2.0, %v6973_v63  ;;  %p6314_p5 = scmp.lt.s32.totalorder %s6312_s18, %s6306_s26 }
 0x166   : > { %v1583_v0 = vrot.slane %v1582_v38, 1  ;;  %11359 = vst [vmem:[#allocation77_spill] sm:$0xff] %v7134_v31  ;;  %11361 = vst [vmem:[#allocation79_spill] sm:$0xff] %v7140_v13  ;;  %v7177_v11 = vmul.f32 2.0, %v7027_v44  ;;  %v7180_v63 = vmul.f32 2.0, %v7033_v17  ;;  %v7197_v44 = vmul.f32 2.0, %v7081_v56 }
 0x167   : > { %v1716_v47 = vrot.slane %v1715_v14, 1  ;;  %v1784_v55 = vadd.f32 %v1783_v8, %v1782_v39  ;;  %11347 = vst [vmem:[#allocation65_spill] sm:$0xff] %v7100_v3  ;;  %v7111_v8 = vmul.f32 2.0, %v6837_v26  ;;  %v7114_v39 = vmul.f32 2.0, %v6847_v37  ;;  %11366 = vst [vmem:[#allocation84_spill] sm:$0xff] %v7156_v32  ;;  %p6315_p6 = por %p6314_p5, %p6313_p4 }
 0x168   : > { %v7128_v50 = vadd.f32 %v1583_v0, %v1582_v38  ;;  %v7153_v0 = vmul.f32 2.0, %v6955_v59  ;;  %11367 = vst [vmem:[#allocation85_spill] sm:$0xff] %v7159_v28  ;;  %v7174_v59 = vmul.f32 2.0, %v7015_v30  ;;  %11373 = vst [vmem:[#allocation91_spill] sm:$0xff] %v7177_v11  ;;  %v7200_v17 = vmul.f32 2.0, %v7086_v62 }
 0x169   : > { %v1717_v18 = vadd.f32 %v1716_v47, %v1715_v14  ;;  %v1785_v51 = vrot.slane %v1784_v55, 1  ;;  %11351 = vst [vmem:[#allocation69_spill] sm:$0xff] %v7111_v8  ;;  %11352 = vst [vmem:[#allocation70_spill] sm:$0xff] %v7114_v39  ;;  %v7131_v14 = vmul.f32 2.0, %v6889_v15  ;;  %v7137_v47 = vmul.f32 2.0, %v6907_v43  ;;  %p6316_p7 = pnand %p6315_p6, %p6309_p2 }
 0x16a   : > { %11357 = vst [vmem:[#allocation75_spill] sm:$0xff] %v7128_v50  ;;  %11365 = vst [vmem:[#allocation83_spill] sm:$0xff] %v7153_v0 }
 0x16b   : > { %v1787_v58 = vsub.f32 256.0, %v1717_v18  ;;  %v1789_v29 = vmax.f32 %v1717_v18, 1.0  ;;  %v1786_v42 = vadd.f32 %v1785_v51, %v1784_v55  ;;  %v7108_v18 = vmul.f32 2.0, %v6830_v21  ;;  %11358 = vst [vmem:[#allocation76_spill] sm:$0xff] %v7131_v14  ;;  %11360 = vst [vmem:[#allocation78_spill] sm:$0xff] %v7137_v47 }
 0x16c   : > { %v7150_v51 = vmul.f32 2.0, %v6943_v22  ;;  %11372 = vst [vmem:[#allocation90_spill] sm:$0xff] %v7174_v59  ;;  %11374 = vst [vmem:[#allocation92_spill] sm:$0xff] %v7180_v63 }
 0x16d   : > { %6138 = vrcp.f32 %v1789_v29  ;;  %v1792_v16 = vmax.f32 %v1787_v58, 1.0  ;;  %11350 = vst [vmem:[#allocation68_spill] sm:$0xff] %v7108_v18  ;;  %v7143_v58 = vmul.f32 2.0, %v6925_v57  ;;  %v7146_v29 = vmul.f32 2.0, %v6937_v19  ;;  %11379 = vst [vmem:[#allocation97_spill] sm:$0xff] %v7197_v44 }
 0x16e   : > { %v1788_v55 = vsub.f32 %v7128_v50, %v1786_v42  ;;  %11364 = vst [vmem:[#allocation82_spill] sm:$0xff] %v7150_v51  ;;  %v7162_v57 = vmul.f32 2.0, %v6979_v53  ;;  %v7165_v19 = vmul.f32 2.0, %v6991_v36  ;;  %v7171_v50 = vmul.f32 2.0, %v7009_v40  ;;  %11380 = vst [vmem:[#allocation98_spill] sm:$0xff] %v7200_v17 }
 0x16f   : > { %6140 = vrcp.f32 %v1792_v16  ;;  %11362 = vst [vmem:[#allocation80_spill] sm:$0xff] %v7143_v58  ;;  %11363 = vst [vmem:[#allocation81_spill] sm:$0xff] %v7146_v29  ;;  %v7183_v53 = vmul.f32 2.0, %v7045_v48  ;;  %v7186_v36 = vmul.f32 2.0, %v7051_v25  ;;  %v7194_v40 = vmul.f32 2.0, %v7069_v33 }
 0x170   : > { %11368 = vst [vmem:[#allocation86_spill] sm:$0xff] %v7162_v57  ;;  %11369 = vst [vmem:[#allocation87_spill] sm:$0xff] %v7165_v19 }
 0x171   : > { %11371 = vst [vmem:[#allocation89_spill] sm:$0xff] %v7171_v50  ;;  %11375 = vst [vmem:[#allocation93_spill] sm:$0xff] %v7183_v53 }
 0x172   : > { %11376 = vst [vmem:[#allocation94_spill] sm:$0xff] %v7186_v36  ;;  %11378 = vst [vmem:[#allocation96_spill] sm:$0xff] %v7194_v40 }
 0x177   : > { %v6139_v61 = vpop.eup %6138 }
 0x178   : > { %v1791_v16 = vmul.f32 %v6139_v61, %v1786_v42  ;;  %v7168_v42 = vmul.f32 2.0, %v6997_v10 }
 0x179   : > { %v6141_v38 = vpop.eup %6140 }
 0x17a   : > { %11370 = vst [vmem:[#allocation88_spill] sm:$0xff] %v7168_v42  ;;  %v1794_v61 = vmul.f32 %v6141_v38, %v1788_v55  ;;  %v7191_v38 = vmul.f32 2.0, %v7063_v52 }
 0x17c   : > { %v1795_v10 = vsub.f32 %v1791_v16, %v1794_v61  ;;  %v7188_v55 = vadd.f32 %v1794_v61, %v1791_v16  ;;  %11377 = vst [vmem:[#allocation95_spill] sm:$0xff] %v7191_v38 }
 0x17e   : > { %v7203_v48 = vmul.f32 %v7105_v46, %v1795_v10  ;;  %v1831_v25 = vsub.f32 %v7103_v34, %v7188_v55  ;;  %v1832_v16 = vsub.f32 %v7100_v3, %v7188_v55  ;;  %v1833_v61 = vsub.f32 %v7111_v8, %v7188_v55 }
 0x17f   : > { %v1834_v52 = vsub.f32 %v7108_v18, %v7188_v55  ;;  %v1835_v56 = vsub.f32 %v7117_v54, %v7188_v55  ;;  %v1836_v62 = vsub.f32 %v7114_v39, %v7188_v55  ;;  %v1837_v10 = vsub.f32 %v7123_v1, %v7188_v55 }
 0x180   : > { %v1838_v34 = vsub.f32 %v7120_v60, %v7188_v55  ;;  %v1839_v3 = vsub.f32 %v7131_v14, %v7188_v55  ;;  %v1840_v8 = vsub.f32 %v7126_v2, %v7188_v55  ;;  %v1841_v18 = vsub.f32 %v7137_v47, %v7188_v55 }
 0x181   : > { %v1842_v54 = vsub.f32 %v7134_v31, %v7188_v55  ;;  %v1843_v39 = vsub.f32 %v7143_v58, %v7188_v55  ;;  %v1844_v1 = vsub.f32 %v7140_v13, %v7188_v55  ;;  %v1845_v60 = vsub.f32 %v7150_v51, %v7188_v55 }
 0x182   : > { %v1846_v14 = vsub.f32 %v7146_v29, %v7188_v55  ;;  %v1847_v2 = vsub.f32 %v7156_v32, %v7188_v55  ;;  %v1848_v47 = vsub.f32 %v7153_v0, %v7188_v55  ;;  %v1849_v31 = vsub.f32 %v7162_v57, %v7188_v55 }
 0x183   : > { %v1850_v58 = vsub.f32 %v7159_v28, %v7188_v55  ;;  %v1851_v13 = vsub.f32 %v7168_v42, %v7188_v55  ;;  %v1852_v51 = vsub.f32 %v7165_v19, %v7188_v55  ;;  %v1853_v29 = vsub.f32 %v7174_v59, %v7188_v55 }
 0x184   : > { %v1854_v32 = vsub.f32 %v7171_v50, %v7188_v55  ;;  %v1855_v0 = vsub.f32 %v7180_v63, %v7188_v55  ;;  %v1856_v57 = vsub.f32 %v7177_v11, %v7188_v55  ;;  %v1857_v28 = vsub.f32 %v7186_v36, %v7188_v55 }
 0x185   : > { %v1858_v42 = vsub.f32 %v7183_v53, %v7188_v55  ;;  %v1859_v19 = vsub.f32 %v7194_v40, %v7188_v55  ;;  %v1860_v59 = vsub.f32 %v7191_v38, %v7188_v55  ;;  %v1861_v50 = vsub.f32 %v7200_v17, %v7188_v55 }
 0x186   : > { %v1862_v63 = vsub.f32 %v7197_v44, %v7188_v55  ;;  %v1863_v11 = vmul.f32 %v1831_v25, %v7203_v48  ;;  %v1864_v46 = vmul.f32 %v1832_v16, %v7203_v48  ;;  %v1865_v36 = vmul.f32 %v1833_v61, %v7203_v48 }
 0x187   : > { %v1866_v53 = vmul.f32 %v1834_v52, %v7203_v48  ;;  %v1867_v33 = vmul.f32 %v1835_v56, %v7203_v48  ;;  %v1868_v40 = vmul.f32 %v1836_v62, %v7203_v48  ;;  %v1869_v38 = vmul.f32 %v1837_v10, %v7203_v48 }
 0x188   : > { %v1870_v30 = vmul.f32 %v1838_v34, %v7203_v48  ;;  %v1871_v17 = vmul.f32 %v1839_v3, %v7203_v48  ;;  %v1872_v55 = vmul.f32 %v1840_v8, %v7203_v48  ;;  %v1873_v25 = vmul.f32 %v1841_v18, %v7203_v48 }
 0x189   : > { %v1874_v16 = vmul.f32 %v1842_v54, %v7203_v48  ;;  %v1875_v61 = vmul.f32 %v1843_v39, %v7203_v48  ;;  %v1876_v52 = vmul.f32 %v1844_v1, %v7203_v48  ;;  %v1877_v56 = vmul.f32 %v1845_v60, %v7203_v48 }
 0x18a   : > { %v1878_v62 = vmul.f32 %v1846_v14, %v7203_v48  ;;  %v1879_v10 = vmul.f32 %v1847_v2, %v7203_v48  ;;  %v1880_v34 = vmul.f32 %v1848_v47, %v7203_v48  ;;  %v1881_v3 = vmul.f32 %v1849_v31, %v7203_v48 }
 0x18b   : > { %v1882_v8 = vmul.f32 %v1850_v58, %v7203_v48  ;;  %v1883_v18 = vmul.f32 %v1851_v13, %v7203_v48  ;;  %v1884_v54 = vmul.f32 %v1852_v51, %v7203_v48  ;;  %v1885_v39 = vmul.f32 %v1853_v29, %v7203_v48 }
 0x18c   : > { %v1886_v1 = vmul.f32 %v1854_v32, %v7203_v48  ;;  %v1887_v60 = vmul.f32 %v1855_v0, %v7203_v48  ;;  %v1888_v14 = vmul.f32 %v1856_v57, %v7203_v48  ;;  %v1889_v2 = vmul.f32 %v1857_v28, %v7203_v48 }
 0x18d   : > { %v1890_v47 = vmul.f32 %v1858_v42, %v7203_v48  ;;  %v1891_v31 = vmul.f32 %v1859_v19, %v7203_v48  ;;  %v1892_v58 = vmul.f32 %v1860_v59, %v7203_v48  ;;  %v1893_v13 = vmul.f32 %v1861_v50, %v7203_v48 }
 0x18e   : > { %v1894_v51 = vmul.f32 %v1862_v63, %v7203_v48  ;;  %v1896_v29 = vmul.f32 %v7097_v45, %v1863_v11  ;;  %v1897_v32 = vmul.f32 %v7097_v45, %v1864_v46  ;;  %v1898_v0 = vmul.f32 %v7097_v45, %v1865_v36 }
 0x18f   : > { %v1899_v57 = vmul.f32 %v7097_v45, %v1866_v53  ;;  %v1900_v28 = vmul.f32 %v7097_v45, %v1867_v33  ;;  %v1901_v42 = vmul.f32 %v7097_v45, %v1868_v40  ;;  %v1902_v19 = vmul.f32 %v7097_v45, %v1869_v38 }
 0x190   : > { %v1903_v59 = vmul.f32 %v7097_v45, %v1870_v30  ;;  %v1904_v50 = vmul.f32 %v7097_v45, %v1871_v17  ;;  %v1905_v63 = vmul.f32 %v7097_v45, %v1872_v55  ;;  %v1906_v11 = vmul.f32 %v7097_v45, %v1873_v25 }
 0x191   : > { %v1907_v48 = vmul.f32 %v7097_v45, %v1874_v16  ;;  %v1908_v36 = vmul.f32 %v7097_v45, %v1875_v61  ;;  %v1909_v53 = vmul.f32 %v7097_v45, %v1876_v52  ;;  %v1910_v33 = vmul.f32 %v7097_v45, %v1877_v56 }
 0x192   : > { %v1911_v40 = vmul.f32 %v7097_v45, %v1878_v62  ;;  %v1912_v46 = vmul.f32 %v7097_v45, %v1879_v10  ;;  %v1913_v30 = vmul.f32 %v7097_v45, %v1880_v34  ;;  %v1914_v17 = vmul.f32 %v7097_v45, %v1881_v3 }
 0x193   : > { %v1915_v38 = vmul.f32 %v7097_v45, %v1882_v8  ;;  %v1916_v55 = vmul.f32 %v7097_v45, %v1883_v18  ;;  %v1917_v25 = vmul.f32 %v7097_v45, %v1884_v54  ;;  %v1918_v16 = vmul.f32 %v7097_v45, %v1885_v39 }
 0x194   : > { %v1919_v61 = vmul.f32 %v7097_v45, %v1886_v1  ;;  %v1920_v52 = vmul.f32 %v7097_v45, %v1887_v60  ;;  %v1921_v56 = vmul.f32 %v7097_v45, %v1888_v14  ;;  %v1922_v62 = vmul.f32 %v7097_v45, %v1889_v2 }
 0x195   : > { %v1923_v10 = vmul.f32 %v7097_v45, %v1890_v47  ;;  %v1924_v34 = vmul.f32 %v7097_v45, %v1891_v31  ;;  %v1925_v3 = vmul.f32 %v7097_v45, %v1892_v58  ;;  %v1926_v8 = vmul.f32 %v7097_v45, %v1893_v13 }
 0x196   : > { %v1927_v18 = vmul.f32 %v7097_v45, %v1894_v51  ;;  %v7334_v54 = vadd.f32 %v1896_v29, %v6819_v9  ;;  %v7337_v39 = vadd.f32 %v6814_v6, %v1897_v32  ;;  %v7340_v1 = vadd.f32 %v1898_v0, %v6833_v23  ;;  %v11381_v9 = vld [vmem:[#allocation14_spill] sm:$0xff]  ;;  %v11382_v6 = vld [vmem:[#allocation19_spill] sm:$0xff]  ;;  %v11383_v23 = vld [vmem:[#allocation17_spill] sm:$0xff] }
 0x197   : > { %v7343_v60 = vadd.f32 %v6828_v20, %v1899_v57  ;;  %v7346_v14 = vadd.f32 %v1900_v28, %v6850_v41  ;;  %v7349_v2 = vadd.f32 %v6845_v35, %v1901_v42  ;;  %v7352_v47 = vadd.f32 %v1902_v19, %v6868_v49  ;;  %v11384_v20 = vld [vmem:[#allocation23_spill] sm:$0xff]  ;;  %v11385_v41 = vld [vmem:[#allocation21_spill] sm:$0xff] }
 0x198   : > { %v7355_v31 = vadd.f32 %v11381_v9, %v1903_v59  ;;  %v7358_v58 = vadd.f32 %v1904_v50, %v11382_v6  ;;  %v7361_v13 = vadd.f32 %v11383_v23, %v1905_v63  ;;  %v7364_v51 = vadd.f32 %v1906_v11, %v11384_v20  ;;  %v11386_v35 = vld [vmem:[#allocation27_spill] sm:$0xff]  ;;  %v11387_v49 = vld [vmem:[#allocation25_spill] sm:$0xff] }
 0x199   : > { %v7367_v29 = vadd.f32 %v11385_v41, %v1907_v48  ;;  %v7370_v32 = vadd.f32 %v1908_v36, %v11386_v35  ;;  %v7373_v0 = vadd.f32 %v11387_v49, %v1909_v53  ;;  %v11388_v57 = vld [vmem:[#allocation31_spill] sm:$0xff]  ;;  %v11389_v42 = vld [vmem:[#allocation29_spill] sm:$0xff]  ;;  %vm1960_vm3 = vcmp.ge.f32.partialorder %v7334_v54, 0.0 }
 0x19a   : > { %v7376_v28 = vadd.f32 %v1910_v33, %v11388_v57  ;;  %v7379_v19 = vadd.f32 %v11389_v42, %v1911_v40  ;;  %v11390_v59 = vld [vmem:[#allocation35_spill] sm:$0xff]  ;;  %v11391_v63 = vld [vmem:[#allocation33_spill] sm:$0xff]  ;;  %vm1961_vm4 = vcmp.ge.f32.partialorder %v7337_v39, 0.0  ;;  %vm1962_vm5 = vcmp.ge.f32.partialorder %v7340_v1, 0.0 }
 0x19b   : > { %v7382_v50 = vadd.f32 %v1912_v46, %v11390_v59  ;;  %v7385_v11 = vadd.f32 %v11391_v63, %v1913_v30  ;;  %v11392_v48 = vld [vmem:[#allocation39_spill] sm:$0xff]  ;;  %v11393_v36 = vld [vmem:[#allocation37_spill] sm:$0xff]  ;;  %vm1963_vm6 = vcmp.ge.f32.partialorder %v7343_v60, 0.0  ;;  %vm1964_vm7 = vcmp.ge.f32.partialorder %v7346_v14, 0.0 }
 0x19c   : > { %v7388_v9 = vadd.f32 %v1914_v17, %v11392_v48  ;;  %v7391_v6 = vadd.f32 %v11393_v36, %v1915_v38  ;;  %v11394_v53 = vld [vmem:[#allocation43_spill] sm:$0xff]  ;;  %v11395_v33 = vld [vmem:[#allocation41_spill] sm:$0xff]  ;;  %vm1965_vm8 = vcmp.ge.f32.partialorder %v7349_v2, 0.0  ;;  %vm1966_vm9 = vcmp.ge.f32.partialorder %v7352_v47, 0.0 }
 0x19d   : > { %v7394_v23 = vadd.f32 %v1916_v55, %v11394_v53  ;;  %v7397_v20 = vadd.f32 %v11395_v33, %v1917_v25  ;;  %v11397_v40 = vld [vmem:[#allocation47_spill] sm:$0xff]  ;;  %v11399_v46 = vld [vmem:[#allocation45_spill] sm:$0xff]  ;;  %vm1967_vm10 = vcmp.ge.f32.partialorder %v7355_v31, 0.0  ;;  %vm1968_vm11 = vcmp.ge.f32.partialorder %v7358_v58, 0.0 }
 0x19e   : > { %v7400_v41 = vadd.f32 %v1918_v16, %v11397_v40  ;;  %v7403_v35 = vadd.f32 %v11399_v46, %v1919_v61  ;;  %v11401_v30 = vld [vmem:[#allocation51_spill] sm:$0xff]  ;;  %v11403_v17 = vld [vmem:[#allocation49_spill] sm:$0xff]  ;;  %vm1969_vm12 = vcmp.ge.f32.partialorder %v7361_v13, 0.0  ;;  %vm1970_vm13 = vcmp.ge.f32.partialorder %v7364_v51, 0.0 }
 0x19f   : > { %11396 = vst [vmem:[#allocation14_spill] sm:$0xff] %v7397_v20  ;;  %v7406_v49 = vadd.f32 %v1920_v52, %v11401_v30  ;;  %v7409_v57 = vadd.f32 %v11403_v17, %v1921_v56  ;;  %v11405_v38 = vld [vmem:[#allocation55_spill] sm:$0xff]  ;;  %v11407_v55 = vld [vmem:[#allocation53_spill] sm:$0xff]  ;;  %v11417_v56 = vmov 0.0   ;;  %vm1971_vm14 = vcmp.ge.f32.partialorder %v7367_v29, 0.0 }
 0x1a0   : > { %11398 = vst [vmem:[#allocation19_spill] sm:$0xff] %v7400_v41  ;;  %11400 = vst [vmem:[#allocation17_spill] sm:$0xff] %v7403_v35  ;;  %v7412_v42 = vadd.f32 %v1922_v62, %v11405_v38  ;;  %v7415_v59 = vadd.f32 %v11407_v55, %v1923_v10  ;;  %v11409_v25 = vld [vmem:[#allocation59_spill] sm:$0xff]  ;;  %v11411_v16 = vld [vmem:[#allocation57_spill] sm:$0xff]  ;;  %v5516_v62 = vsel %vm1960_vm3, 1.0, %v11417_v56  ;;  %v5517_v10 = vsel %vm1961_vm4, 1.0, %v11417_v56 }
 0x1a1   : > { %11402 = vst [vmem:[#allocation23_spill] sm:$0xff] %v7406_v49  ;;  %11404 = vst [vmem:[#allocation21_spill] sm:$0xff] %v7409_v57  ;;  %v7418_v63 = vadd.f32 %v1924_v34, %v11409_v25  ;;  %v7421_v48 = vadd.f32 %v11411_v16, %v1925_v3  ;;  %v11413_v61 = vld [vmem:[#allocation63_spill] sm:$0xff]  ;;  %v11415_v52 = vld [vmem:[#allocation61_spill] sm:$0xff]  ;;  %v2056_v34 = vadd.f32 %v5517_v10, %v5516_v62  ;;  %v5518_v3 = vsel %vm1962_vm5, 1.0, %v11417_v56 }
 0x1a2   : > { %11406 = vst [vmem:[#allocation27_spill] sm:$0xff] %v7412_v42  ;;  %11408 = vst [vmem:[#allocation25_spill] sm:$0xff] %v7415_v59  ;;  %v7424_v36 = vadd.f32 %v1926_v8, %v11413_v61  ;;  %v7427_v53 = vadd.f32 %v11415_v52, %v1927_v18  ;;  %v5519_v18 = vsel %vm1963_vm6, 1.0, %v11417_v56  ;;  %v5520_v40 = vsel %vm1964_vm7, 1.0, %v11417_v56 }
 0x1a3   : > { %11410 = vst [vmem:[#allocation31_spill] sm:$0xff] %v7418_v63  ;;  %11412 = vst [vmem:[#allocation29_spill] sm:$0xff] %v7421_v48  ;;  %v2057_v8 = vadd.f32 %v5518_v3, %v2056_v34  ;;  %v2093_v46 = vmul.f32 %v5516_v62, %v6822_v12  ;;  %v2094_v30 = vmul.f32 %v5517_v10, %v6816_v7  ;;  %v5521_v38 = vsel %vm1965_vm8, 1.0, %v11417_v56 }
 0x1a4   : > { %11414 = vst [vmem:[#allocation35_spill] sm:$0xff] %v7424_v36  ;;  %11416 = vst [vmem:[#allocation33_spill] sm:$0xff] %v7427_v53  ;;  %v5522_v25 = vsel %vm1966_vm9, 1.0, %v11417_v56  ;;  %v2095_v16 = vmul.f32 %v5518_v3, %v6837_v26  ;;  %v5523_v62 = vsel %vm1967_vm10, 1.0, %v11417_v56  ;;  %v2096_v10 = vmul.f32 %v5519_v18, %v6830_v21 }
 0x1a5   : > { %v2058_v33 = vadd.f32 %v5519_v18, %v2057_v8  ;;  %v2125_v61 = vadd.f32 %v2094_v30, %v2093_v46  ;;  %v5525_v46 = vsel %vm1969_vm12, 1.0, %v11417_v56  ;;  %v2098_v30 = vmul.f32 %v5521_v38, %v6847_v37 }
 0x1a6   : > { %vm1972_vm15 = vcmp.ge.f32.partialorder %v7370_v32, 0.0  ;;  %vm1973_vm0 = vcmp.ge.f32.partialorder %v7373_v0, 0.0  ;;  %vm1974_vm1 = vcmp.ge.f32.partialorder %v7376_v28, 0.0  ;;  %vm1975_vm2 = vcmp.ge.f32.partialorder %v7379_v19, 0.0 }
 0x1a7   : > { %v2059_v17 = vadd.f32 %v5520_v40, %v2058_v33  ;;  %v2126_v34 = vadd.f32 %v2125_v61, %v2095_v16  ;;  %v5524_v33 = vsel %vm1968_vm11, 1.0, %v11417_v56  ;;  %v5526_v16 = vsel %vm1970_vm13, 1.0, %v11417_v56 }
 0x1a8   : > { %v2099_v61 = vmul.f32 %v5522_v25, %v6871_v27  ;;  %vm1976_vm3 = vcmp.ge.f32.partialorder %v7382_v50, 0.0  ;;  %vm1977_vm4 = vcmp.ge.f32.partialorder %v7385_v11, 0.0  ;;  %vm1978_vm5 = vcmp.ge.f32.partialorder %v7388_v9, 0.0 }
 0x1a9   : > { %v2060_v55 = vadd.f32 %v5521_v38, %v2059_v17  ;;  %v2097_v17 = vmul.f32 %v5520_v40, %v6853_v4  ;;  %v2127_v44 = vadd.f32 %v2126_v34, %v2096_v10  ;;  %v5527_v10 = vsel %vm1971_vm14, 1.0, %v11417_v56 }
 0x1aa   : > { %v2100_v34 = vmul.f32 %v5523_v62, %v6865_v24  ;;  %vm1979_vm6 = vcmp.ge.f32.partialorder %v7391_v6, 0.0  ;;  %vm1980_vm7 = vcmp.ge.f32.partialorder %v7394_v23, 0.0  ;;  %vm1981_vm8 = vcmp.ge.f32.partialorder %v7397_v20, 0.0 }
 0x1ab   : > { %v2061_v52 = vadd.f32 %v5522_v25, %v2060_v55  ;;  %v2128_v55 = vadd.f32 %v2127_v44, %v2097_v17  ;;  %v5528_v44 = vsel %vm1972_vm15, 1.0, %v11417_v56  ;;  %v2101_v17 = vmul.f32 %v5524_v33, %v6889_v15 }
 0x1ac   : > { %vm1982_vm9 = vcmp.ge.f32.partialorder %v7400_v41, 0.0  ;;  %vm1983_vm10 = vcmp.ge.f32.partialorder %v7403_v35, 0.0  ;;  %vm1984_vm11 = vcmp.ge.f32.partialorder %v7406_v49, 0.0  ;;  %vm1985_vm12 = vcmp.ge.f32.partialorder %v7409_v57, 0.0 }
 0x1ad   : > { %v2062_v8 = vadd.f32 %v5523_v62, %v2061_v52  ;;  %v2129_v52 = vadd.f32 %v2128_v55, %v2098_v30  ;;  %v5529_v30 = vsel %vm1973_vm0, 1.0, %v11417_v56  ;;  %v2102_v55 = vmul.f32 %v5525_v46, %v6883_v5 }
 0x1ae   : > { %vm1986_vm13 = vcmp.ge.f32.partialorder %v7412_v42, 0.0  ;;  %vm1987_vm14 = vcmp.ge.f32.partialorder %v7415_v59, 0.0  ;;  %vm1988_vm15 = vcmp.ge.f32.partialorder %v7418_v63, 0.0  ;;  %vm1989_vm0 = vcmp.ge.f32.partialorder %v7421_v48, 0.0  ;;  %v11434_v59 = vld [vmem:[#allocation60_spill] sm:$0xff] }
 0x1af   : > { %v2063_v3 = vadd.f32 %v5524_v33, %v2062_v8  ;;  %v2130_v8 = vadd.f32 %v2129_v52, %v2099_v61  ;;  %v5530_v61 = vsel %vm1974_vm1, 1.0, %v11417_v56  ;;  %v2103_v52 = vmul.f32 %v5526_v16, %v6907_v43 }
 0x1b0   : > { %vm1990_vm1 = vcmp.ge.f32.partialorder %v7424_v36, 0.0 }
 0x1b1   : > { %v2064_v18 = vadd.f32 %v5525_v46, %v2063_v3  ;;  %v2131_v3 = vadd.f32 %v2130_v8, %v2100_v34  ;;  %v5531_v34 = vsel %vm1975_vm2, 1.0, %v11417_v56  ;;  %v11418_v8 = vld [vmem:[#allocation22_spill] sm:$0xff]  ;;  %vm1991_vm2 = vcmp.ge.f32.partialorder %v7427_v53, 0.0  ;;  %v11436_v53 = vld [vmem:[#allocation64_spill] sm:$0xff] }
 0x1b3   : > { %v2065_v40 = vadd.f32 %v5526_v16, %v2064_v18  ;;  %v2132_v18 = vadd.f32 %v2131_v3, %v2101_v17  ;;  %v5532_v17 = vsel %vm1976_vm3, 1.0, %v11417_v56  ;;  %v11419_v3 = vld [vmem:[#allocation28_spill] sm:$0xff] }
 0x1b5   : > { %v2066_v38 = vadd.f32 %v5527_v10, %v2065_v40  ;;  %v2133_v40 = vadd.f32 %v2132_v18, %v2102_v55  ;;  %v5533_v55 = vsel %vm1977_vm4, 1.0, %v11417_v56  ;;  %v11420_v18 = vld [vmem:[#allocation26_spill] sm:$0xff] }
 0x1b7   : > { %v2067_v25 = vadd.f32 %v5528_v44, %v2066_v38  ;;  %v2104_v38 = vmul.f32 %v5527_v10, %v11418_v8  ;;  %v2134_v15 = vadd.f32 %v2133_v40, %v2103_v52  ;;  %v5534_v52 = vsel %vm1978_vm5, 1.0, %v11417_v56 }
 0x1b8   : > { %v2107_v40 = vmul.f32 %v5530_v61, %v6943_v22 }
 0x1b9   : > { %v2068_v62 = vadd.f32 %v5529_v30, %v2067_v25  ;;  %v2105_v25 = vmul.f32 %v5528_v44, %v11419_v3  ;;  %v2135_v5 = vadd.f32 %v2134_v15, %v2104_v38  ;;  %v5535_v15 = vsel %vm1979_vm6, 1.0, %v11417_v56  ;;  %v11421_v38 = vld [vmem:[#allocation30_spill] sm:$0xff] }
 0x1bb   : > { %v2069_v33 = vadd.f32 %v5530_v61, %v2068_v62  ;;  %v2106_v62 = vmul.f32 %v5529_v30, %v11420_v18  ;;  %v2136_v43 = vadd.f32 %v2135_v5, %v2105_v25  ;;  %v5536_v5 = vsel %vm1980_vm7, 1.0, %v11417_v56  ;;  %v11422_v25 = vld [vmem:[#allocation36_spill] sm:$0xff] }
 0x1bd   : > { %v2070_v46 = vadd.f32 %v5531_v34, %v2069_v33  ;;  %v2137_v33 = vadd.f32 %v2136_v43, %v2106_v62  ;;  %v5537_v43 = vsel %vm1981_vm8, 1.0, %v11417_v56  ;;  %v11423_v62 = vld [vmem:[#allocation34_spill] sm:$0xff] }
 0x1bf   : > { %v2071_v16 = vadd.f32 %v5532_v17, %v2070_v46  ;;  %v2108_v46 = vmul.f32 %v5531_v34, %v11421_v38  ;;  %v2138_v3 = vadd.f32 %v2137_v33, %v2107_v40  ;;  %v5538_v40 = vsel %vm1982_vm9, 1.0, %v11417_v56  ;;  %v11424_v33 = vld [vmem:[#allocation40_spill] sm:$0xff] }
 0x1c1   : > { %v2072_v10 = vadd.f32 %v5533_v55, %v2071_v16  ;;  %v2109_v16 = vmul.f32 %v5532_v17, %v11422_v25  ;;  %v2139_v18 = vadd.f32 %v2138_v3, %v2108_v46  ;;  %v5539_v3 = vsel %vm1983_vm10, 1.0, %v11417_v56  ;;  %v11425_v46 = vld [vmem:[#allocation38_spill] sm:$0xff] }
 0x1c3   : > { %v2073_v44 = vadd.f32 %v5534_v52, %v2072_v10  ;;  %v2110_v10 = vmul.f32 %v5533_v55, %v11423_v62  ;;  %v2140_v22 = vadd.f32 %v2139_v18, %v2109_v16  ;;  %v5540_v18 = vsel %vm1984_vm11, 1.0, %v11417_v56  ;;  %v11426_v16 = vld [vmem:[#allocation44_spill] sm:$0xff] }
 0x1c5   : > { %v2074_v30 = vadd.f32 %v5535_v15, %v2073_v44  ;;  %v2111_v44 = vmul.f32 %v5534_v52, %v11424_v33  ;;  %v2141_v38 = vadd.f32 %v2140_v22, %v2110_v10  ;;  %v5541_v22 = vsel %vm1985_vm12, 1.0, %v11417_v56  ;;  %v11427_v10 = vld [vmem:[#allocation42_spill] sm:$0xff] }
 0x1c7   : > { %v2075_v61 = vadd.f32 %v5536_v5, %v2074_v30  ;;  %v2112_v30 = vmul.f32 %v5535_v15, %v11425_v46  ;;  %v2142_v25 = vadd.f32 %v2141_v38, %v2111_v44  ;;  %v5542_v38 = vsel %vm1986_vm13, 1.0, %v11417_v56  ;;  %v11428_v44 = vld [vmem:[#allocation48_spill] sm:$0xff] }
 0x1c9   : > { %v2076_v34 = vadd.f32 %v5537_v43, %v2075_v61  ;;  %v2113_v61 = vmul.f32 %v5536_v5, %v11426_v16  ;;  %v2143_v62 = vadd.f32 %v2142_v25, %v2112_v30  ;;  %v5543_v25 = vsel %vm1987_vm14, 1.0, %v11417_v56  ;;  %v11429_v30 = vld [vmem:[#allocation46_spill] sm:$0xff] }
 0x1cb   : > { %v2077_v17 = vadd.f32 %v5538_v40, %v2076_v34  ;;  %v2114_v34 = vmul.f32 %v5537_v43, %v11427_v10  ;;  %v2144_v33 = vadd.f32 %v2143_v62, %v2113_v61  ;;  %v5544_v62 = vsel %vm1988_vm15, 1.0, %v11417_v56  ;;  %v11430_v61 = vld [vmem:[#allocation52_spill] sm:$0xff] }
 0x1cd   : > { %v2078_v55 = vadd.f32 %v5539_v3, %v2077_v17  ;;  %v2115_v17 = vmul.f32 %v5538_v40, %v11428_v44  ;;  %v2145_v46 = vadd.f32 %v2144_v33, %v2114_v34  ;;  %v5545_v33 = vsel %vm1989_vm0, 1.0, %v11417_v56  ;;  %v11431_v34 = vld [vmem:[#allocation50_spill] sm:$0xff] }
 0x1cf   : > { %v2079_v52 = vadd.f32 %v5540_v18, %v2078_v55  ;;  %v2116_v55 = vmul.f32 %v5539_v3, %v11429_v30  ;;  %v2146_v16 = vadd.f32 %v2145_v46, %v2115_v17  ;;  %v5546_v3 = vsel %vm1990_vm1, 1.0, %v11417_v56 }
 0x1d1   : > { %v2080_v15 = vadd.f32 %v5541_v22, %v2079_v52  ;;  %v2117_v52 = vmul.f32 %v5540_v18, %v11430_v61  ;;  %v2147_v10 = vadd.f32 %v2146_v16, %v2116_v55  ;;  %v5547_v18 = vsel %vm1991_vm2, 1.0, %v11417_v56  ;;  %v11433_v61 = vld [vmem:[#allocation54_spill] sm:$0xff] }
 0x1d3   : > { %v2081_v5 = vadd.f32 %v5542_v38, %v2080_v15  ;;  %v2118_v15 = vmul.f32 %v5541_v22, %v11431_v34  ;;  %v2148_v44 = vadd.f32 %v2147_v10, %v2117_v52  ;;  %v2121_v22 = vmul.f32 %v5544_v62, %v11434_v59  ;;  %v11470_v59 = vld [vmem:[#allocation91_spill] sm:$0xff] }
 0x1d5   : > { %v2082_v43 = vadd.f32 %v5543_v25, %v2081_v5  ;;  %v2149_v46 = vadd.f32 %v2148_v44, %v2118_v15  ;;  %v11432_v5 = vld [vmem:[#allocation56_spill] sm:$0xff] }
 0x1d6   : > { %v2119_v30 = vmul.f32 %v5542_v38, %v11432_v5  ;;  %v11437_v5 = vld [vmem:[#allocation62_spill] sm:$0xff] }
 0x1d7   : > { %v2083_v40 = vadd.f32 %v5544_v62, %v2082_v43  ;;  %v2120_v43 = vmul.f32 %v5543_v25, %v11433_v61  ;;  %v2124_v57 = vmul.f32 %v5547_v18, %v11437_v5 }
 0x1d8   : > { %v2150_v16 = vadd.f32 %v2149_v46, %v2119_v30 }
 0x1d9   : > { %v2084_v63 = vadd.f32 %v5545_v33, %v2083_v40  ;;  %v11435_v40 = vld [vmem:[#allocation58_spill] sm:$0xff] }
 0x1da   : > { %v2151_v36 = vadd.f32 %v2150_v16, %v2120_v43  ;;  %v2122_v34 = vmul.f32 %v5545_v33, %v11435_v40 }
 0x1db   : > { %v2085_v17 = vadd.f32 %v5546_v3, %v2084_v63  ;;  %v2123_v63 = vmul.f32 %v5546_v3, %v11436_v53  ;;  %v11438_v3 = vld [vmem:[#allocation75_spill] sm:$0xff] }
 0x1dc   : > { %v2152_v10 = vadd.f32 %v2151_v36, %v2121_v22 }
 0x1dd   : > { %v2086_v55 = vadd.f32 %v5547_v18, %v2085_v17 }
 0x1de   : > { %v2153_v44 = vadd.f32 %v2152_v10, %v2122_v34 }
 0x1df   : > { %v2087_v48 = vrot.slane %v2086_v55, 4 }
 0x1e0   : > { %v2154_v42 = vadd.f32 %v2153_v44, %v2123_v63  ;;  %v11439_v44 = vld [vmem:[#allocation67_spill] sm:$0xff]  ;;  %v11440_v63 = vld [vmem:[#allocation66_spill] sm:$0xff] }
 0x1e1   : > { %v2088_v52 = vadd.f32 %v2087_v48, %v2086_v55 }
 0x1e2   : > { %v2155_v30 = vadd.f32 %v2154_v42, %v2124_v57 }
 0x1e3   : > { %v2089_v15 = vrot.slane %v2088_v52, 2 }
 0x1e4   : > { %v2156_v17 = vrot.slane %v2155_v30, 4 }
 0x1e5   : > { %v2090_v38 = vadd.f32 %v2089_v15, %v2088_v52 }
 0x1e6   : > { %v2157_v16 = vadd.f32 %v2156_v17, %v2155_v30 }
 0x1e7   : > { %v2091_v46 = vrot.slane %v2090_v38, 1 }
 0x1e8   : > { %v2158_v61 = vrot.slane %v2157_v16, 2 }
 0x1e9   : > { %v2092_v25 = vadd.f32 %v2091_v46, %v2090_v38  ;;  %v11442_v46 = vld [vmem:[#allocation69_spill] sm:$0xff] }
 0x1ea   : > { %v2159_v48 = vadd.f32 %v2158_v61, %v2157_v16  ;;  %v11441_v61 = vld [vmem:[#allocation65_spill] sm:$0xff] }
 0x1eb   : > { %v2162_v43 = vsub.f32 256.0, %v2092_v25  ;;  %v2164_v36 = vmax.f32 %v2092_v25, 1.0 }
 0x1ec   : > { %v2160_v33 = vrot.slane %v2159_v48, 1 }
 0x1ed   : > { %v2167_v62 = vmax.f32 %v2162_v43, 1.0  ;;  %v11443_v43 = vld [vmem:[#allocation68_spill] sm:$0xff] }
 0x1ee   : > { %v2161_v34 = vadd.f32 %v2160_v33, %v2159_v48 }
 0x1ef   : > { %6142 = vrcp.f32 %v2167_v62 }
 0x1f0   : > { %6144 = vrcp.f32 %v2164_v36  ;;  %v2163_v22 = vsub.f32 %v11438_v3, %v2161_v34  ;;  %v11444_v36 = vld [vmem:[#allocation71_spill] sm:$0xff] }
 0x1f9   : > { %v6143_v55 = vpop.eup %6142 }
 0x1fa   : > { %v6145_v10 = vpop.eup %6144  ;;  %v2169_v52 = vmul.f32 %v6143_v55, %v2163_v22  ;;  %v11445_v22 = vld [vmem:[#allocation70_spill] sm:$0xff] }
 0x1fb   : > { %v2166_v18 = vmul.f32 %v6145_v10, %v2161_v34 }
 0x1fd   : > { %v2170_v57 = vsub.f32 %v2166_v18, %v2169_v52  ;;  %v7526_v42 = vadd.f32 %v2169_v52, %v2166_v18  ;;  %v11446_v18 = vld [vmem:[#allocation73_spill] sm:$0xff] }
 0x1ff   : > { %v7529_v15 = vmul.f32 %v2170_v57, %v11439_v44  ;;  %v2173_v38 = vsub.f32 %v11440_v63, %v7526_v42  ;;  %v2174_v30 = vsub.f32 %v11441_v61, %v7526_v42  ;;  %v2175_v17 = vsub.f32 %v11442_v46, %v7526_v42  ;;  %v11466_v44 = vld [vmem:[#allocation90_spill] sm:$0xff] }
 0x200   : > { %v2176_v62 = vsub.f32 %v11443_v43, %v7526_v42  ;;  %v2177_v48 = vsub.f32 %v11444_v36, %v7526_v42  ;;  %v2178_v10 = vsub.f32 %v11445_v22, %v7526_v42  ;;  %v2179_v57 = vsub.f32 %v11446_v18, %v7526_v42  ;;  %v11450_v22 = vld [vmem:[#allocation76_spill] sm:$0xff]  ;;  %v11452_v18 = vld [vmem:[#allocation78_spill] sm:$0xff] }
 0x201   : > { %v2205_v25 = vmul.f32 %v2173_v38, %v7529_v15  ;;  %v2206_v16 = vmul.f32 %v2174_v30, %v7529_v15  ;;  %v2207_v33 = vmul.f32 %v2175_v17, %v7529_v15  ;;  %v2181_v43 = vsub.f32 %v11450_v22, %v7526_v42  ;;  %v11456_v22 = vld [vmem:[#allocation82_spill] sm:$0xff] }
 0x202   : > { %v2208_v52 = vmul.f32 %v2176_v62, %v7529_v15  ;;  %v2209_v38 = vmul.f32 %v2177_v48, %v7529_v15  ;;  %v11451_v62 = vld [vmem:[#allocation74_spill] sm:$0xff]  ;;  %v2183_v48 = vsub.f32 %v11452_v18, %v7526_v42  ;;  %v2211_v18 = vmul.f32 %v2179_v57, %v7529_v15  ;;  %v11462_v57 = vld [vmem:[#allocation85_spill] sm:$0xff] }
 0x203   : > { %v2237_v34 = vmul.f32 %v2205_v25, %v7097_v45  ;;  %v2238_v55 = vmul.f32 %v2206_v16, %v7097_v45  ;;  %v2239_v30 = vmul.f32 %v2207_v33, %v7097_v45  ;;  %v11449_v25 = vld [vmem:[#allocation72_spill] sm:$0xff]  ;;  %v2182_v46 = vsub.f32 %v11451_v62, %v7526_v42  ;;  %v11453_v33 = vld [vmem:[#allocation77_spill] sm:$0xff] }
 0x204   : > { %v2180_v16 = vsub.f32 %v11449_v25, %v7526_v42  ;;  %v2184_v61 = vsub.f32 %v11453_v33, %v7526_v42  ;;  %v11455_v25 = vld [vmem:[#allocation79_spill] sm:$0xff]  ;;  %v11457_v62 = vld [vmem:[#allocation81_spill] sm:$0xff]  ;;  %v2241_v33 = vmul.f32 %v2209_v38, %v7097_v45  ;;  %v11463_v38 = vld [vmem:[#allocation88_spill] sm:$0xff]  ;;  %v2213_v49 = vmul.f32 %v2181_v43, %v7529_v15 }
 0x205   : > { %v7554_v36 = vadd.f32 %v2237_v34, %v7334_v54  ;;  %v7557_v17 = vadd.f32 %v2238_v55, %v7337_v39  ;;  %v11454_v54 = vld [vmem:[#allocation80_spill] sm:$0xff]  ;;  %v2210_v39 = vmul.f32 %v2178_v10, %v7529_v15  ;;  %v2240_v55 = vmul.f32 %v2208_v52, %v7097_v45  ;;  %v11465_v52 = vld [vmem:[#allocation87_spill] sm:$0xff] }
 0x206   : > { %v2185_v34 = vsub.f32 %v11454_v54, %v7526_v42  ;;  %v2186_v63 = vsub.f32 %v11455_v25, %v7526_v42  ;;  %v7582_v5 = vadd.f32 %v2239_v30, %v7340_v1  ;;  %v11459_v10 = vld [vmem:[#allocation84_spill] sm:$0xff]  ;;  %v11460_v25 = vld [vmem:[#allocation83_spill] sm:$0xff]  ;;  %v11461_v54 = vld [vmem:[#allocation86_spill] sm:$0xff]  ;;  %v2212_v30 = vmul.f32 %v2180_v16, %v7529_v15 }
 0x207   : > { %11447 = vst [vmem:[#allocation39_spill] sm:$0xff] %v7554_v36  ;;  %11448 = vst [vmem:[#allocation37_spill] sm:$0xff] %v7557_v17  ;;  %vm2301_vm3 = vcmp.ge.f32.partialorder %v7554_v36, 0.0  ;;  %vm2302_vm4 = vcmp.ge.f32.partialorder %v7557_v17, 0.0  ;;  %v2242_v36 = vmul.f32 %v2210_v39, %v7097_v45  ;;  %v7599_v17 = vadd.f32 %v2240_v55, %v7343_v60  ;;  %v11468_v60 = vld [vmem:[#allocation89_spill] sm:$0xff]  ;;  %v11469_v55 = vld [vmem:[#allocation92_spill] sm:$0xff] }
 0x208   : > { %11458 = vst [vmem:[#allocation43_spill] sm:$0xff] %v7582_v5  ;;  %v5548_v3 = vsel %vm2301_vm3, 1.0, %v11417_v56  ;;  %v5549_v53 = vsel %vm2302_vm4, 1.0, %v11417_v56  ;;  %v2243_v1 = vmul.f32 %v2211_v18, %v7097_v45  ;;  %v7610_v16 = vadd.f32 %v2241_v33, %v7346_v14 }
 0x209   : > { %11464 = vst [vmem:[#allocation41_spill] sm:$0xff] %v7599_v17  ;;  %vm2303_vm5 = vcmp.ge.f32.partialorder %v7582_v5, 0.0  ;;  %v2214_v41 = vmul.f32 %v2182_v46, %v7529_v15  ;;  %v2244_v43 = vmul.f32 %v2212_v30, %v7097_v45  ;;  %v7622_v18 = vadd.f32 %v2242_v36, %v7349_v2  ;;  %v11474_v36 = vld [vmem:[#allocation96_spill] sm:$0xff]  ;;  %v11475_v5 = vld [vmem:[#allocation95_spill] sm:$0xff] }
 0x20a   : > { %11467 = vst [vmem:[#allocation47_spill] sm:$0xff] %v7610_v16  ;;  %vm2304_vm6 = vcmp.ge.f32.partialorder %v7599_v17, 0.0  ;;  %v2397_v14 = vadd.f32 %v5549_v53, %v5548_v3  ;;  %v2215_v40 = vmul.f32 %v2183_v48, %v7529_v15  ;;  %v5550_v35 = vsel %vm2303_vm5, 1.0, %v11417_v56 }
 0x20b   : > { %11471 = vst [vmem:[#allocation45_spill] sm:$0xff] %v7622_v18  ;;  %v2245_v46 = vmul.f32 %v2213_v49, %v7097_v45  ;;  %v7633_v30 = vadd.f32 %v2243_v1, %v7352_v47  ;;  %vm2305_vm7 = vcmp.ge.f32.partialorder %v7610_v16, 0.0  ;;  %v2216_v20 = vmul.f32 %v2184_v61, %v7529_v15 }
 0x20c   : > { %v2398_v2 = vadd.f32 %v5550_v35, %v2397_v14  ;;  %v5551_v48 = vsel %vm2304_vm6, 1.0, %v11417_v56  ;;  %v2246_v39 = vmul.f32 %v2214_v41, %v7097_v45  ;;  %v7644_v49 = vadd.f32 %v2244_v43, %v7355_v31  ;;  %v11477_v41 = vld [vmem:[#allocation98_spill] sm:$0xff] }
 0x20d   : > { %vm2306_vm8 = vcmp.ge.f32.partialorder %v7622_v18, 0.0  ;;  %v2217_v1 = vmul.f32 %v2185_v34, %v7529_v15  ;;  %v5552_v14 = vsel %vm2305_vm7, 1.0, %v11417_v56  ;;  %v2434_v17 = vmul.f32 %v5548_v3, %v6822_v12 }
 0x20e   : > { %11476 = vst [vmem:[#allocation51_spill] sm:$0xff] %v7644_v49  ;;  %v2399_v47 = vadd.f32 %v5551_v48, %v2398_v2  ;;  %v2435_v33 = vmul.f32 %v5549_v53, %v6816_v7  ;;  %v2247_v61 = vmul.f32 %v2215_v40, %v7097_v45  ;;  %v7653_v16 = vadd.f32 %v2245_v46, %v7358_v58  ;;  %v11478_v2 = vld [vmem:[#allocation97_spill] sm:$0xff] }
 0x20f   : > { %vm2307_vm9 = vcmp.ge.f32.partialorder %v7633_v30, 0.0  ;;  %v2218_v18 = vmul.f32 %v2186_v63, %v7529_v15  ;;  %v5553_v3 = vsel %vm2306_vm8, 1.0, %v11417_v56  ;;  %v2248_v53 = vmul.f32 %v2216_v20, %v7097_v45 }
 0x210   : > { %v2400_v31 = vadd.f32 %v5552_v14, %v2399_v47  ;;  %v7664_v40 = vadd.f32 %v2246_v39, %v7361_v13  ;;  %vm2308_vm10 = vcmp.ge.f32.partialorder %v7644_v49, 0.0  ;;  %v11479_v46 = vsub.f32 %v11456_v22, %v7526_v42 }
 0x211   : > { %v5554_v43 = vsel %vm2307_vm9, 1.0, %v11417_v56  ;;  %v2436_v34 = vmul.f32 %v5550_v35, %v6837_v26  ;;  %v2466_v63 = vadd.f32 %v2435_v33, %v2434_v17  ;;  %v2249_v7 = vmul.f32 %v2217_v1, %v7097_v45 }
 0x212   : > { %v2401_v58 = vadd.f32 %v5553_v3, %v2400_v31  ;;  %v2219_v47 = vmul.f32 %v11479_v46, %v7529_v15  ;;  %v7675_v20 = vadd.f32 %v2247_v61, %v7364_v51  ;;  %vm2309_vm11 = vcmp.ge.f32.partialorder %v7653_v16, 0.0 }
 0x213   : > { %v11480_v39 = vsub.f32 %v11457_v62, %v7526_v42  ;;  %v5555_v46 = vsel %vm2308_vm10, 1.0, %v11417_v56  ;;  %v2437_v12 = vmul.f32 %v5551_v48, %v6830_v21  ;;  %v2467_v49 = vadd.f32 %v2466_v63, %v2436_v34 }
 0x214   : > { %v2402_v13 = vadd.f32 %v5554_v43, %v2401_v58  ;;  %v2250_v35 = vmul.f32 %v2218_v18, %v7097_v45  ;;  %v7686_v17 = vadd.f32 %v2248_v53, %v7367_v29  ;;  %vm2310_vm12 = vcmp.ge.f32.partialorder %v7664_v40, 0.0 }
 0x215   : > { %v2220_v31 = vmul.f32 %v11480_v39, %v7529_v15  ;;  %v11481_v33 = vsub.f32 %v11459_v10, %v7526_v42  ;;  %v5556_v61 = vsel %vm2309_vm11, 1.0, %v11417_v56  ;;  %v2438_v58 = vmul.f32 %v5552_v14, %v6853_v4 }
 0x216   : > { %v2403_v51 = vadd.f32 %v5555_v46, %v2402_v13  ;;  %v2468_v39 = vadd.f32 %v2467_v49, %v2437_v12  ;;  %v2251_v48 = vmul.f32 %v2219_v47, %v7097_v45  ;;  %v7697_v18 = vadd.f32 %v2249_v7, %v7370_v32 }
 0x217   : > { %v2221_v1 = vmul.f32 %v11481_v33, %v7529_v15  ;;  %vm2311_vm13 = vcmp.ge.f32.partialorder %v7675_v20, 0.0  ;;  %v11482_v34 = vsub.f32 %v11460_v25, %v7526_v42  ;;  %v5557_v63 = vsel %vm2310_vm12, 1.0, %v11417_v56 }
 0x218   : > { %v2404_v29 = vadd.f32 %v5556_v61, %v2403_v51  ;;  %v2439_v13 = vmul.f32 %v5553_v3, %v6847_v37  ;;  %v2469_v33 = vadd.f32 %v2468_v39, %v2438_v58  ;;  %v2252_v12 = vmul.f32 %v2220_v31, %v7097_v45 }
 0x219   : > { %v2222_v53 = vmul.f32 %v11482_v34, %v7529_v15  ;;  %v7708_v49 = vadd.f32 %v2250_v35, %v7373_v0  ;;  %vm2312_vm14 = vcmp.ge.f32.partialorder %v7686_v17, 0.0  ;;  %v11483_v32 = vsub.f32 %v11461_v54, %v7526_v42 }
 0x21a   : > { %v2405_v7 = vadd.f32 %v5557_v63, %v2404_v29  ;;  %v5558_v47 = vsel %vm2311_vm13, 1.0, %v11417_v56  ;;  %v2440_v51 = vmul.f32 %v5554_v43, %v6871_v27  ;;  %v2470_v34 = vadd.f32 %v2469_v33, %v2439_v13 }
 0x21b   : > { %v2223_v14 = vmul.f32 %v11483_v32, %v7529_v15  ;;  %v2253_v3 = vmul.f32 %v2221_v1, %v7097_v45  ;;  %v7719_v31 = vadd.f32 %v2251_v48, %v7376_v28  ;;  %vm2313_vm15 = vcmp.ge.f32.partialorder %v7697_v18, 0.0 }
 0x21c   : > { %v2406_v0 = vadd.f32 %v5558_v47, %v2405_v7  ;;  %v11484_v35 = vsub.f32 %v11462_v57, %v7526_v42  ;;  %v5559_v39 = vsel %vm2312_vm14, 1.0, %v11417_v56  ;;  %v2441_v29 = vmul.f32 %v5555_v46, %v6865_v24  ;;  %v11486_v7 = vld [vmem:[#allocation20_spill] sm:$0xff] }
 0x21d   : > { %v2471_v32 = vadd.f32 %v2470_v34, %v2440_v51  ;;  %v2254_v43 = vmul.f32 %v2222_v53, %v7097_v45  ;;  %v7730_v1 = vadd.f32 %v2252_v12, %v7379_v19  ;;  %vm2314_vm0 = vcmp.ge.f32.partialorder %v7708_v49, 0.0 }
 0x21e   : > { %v2224_v58 = vmul.f32 %v11484_v35, %v7529_v15  ;;  %v2407_v28 = vadd.f32 %v5559_v39, %v2406_v0  ;;  %v11485_v48 = vsub.f32 %v11463_v38, %v7526_v42  ;;  %v5560_v33 = vsel %vm2313_vm15, 1.0, %v11417_v56  ;;  %v11489_v0 = vld [vmem:[#allocation18_spill] sm:$0xff] }
 0x21f   : > { %v2442_v35 = vmul.f32 %v5556_v61, %v11486_v7  ;;  %v2472_v27 = vadd.f32 %v2471_v32, %v2441_v29  ;;  %v2255_v46 = vmul.f32 %v2223_v14, %v7097_v45  ;;  %v7741_v53 = vadd.f32 %v2253_v3, %v7382_v50 }
 0x220   : > { %v2225_v13 = vmul.f32 %v11485_v48, %v7529_v15  ;;  %vm2315_vm1 = vcmp.ge.f32.partialorder %v7719_v31, 0.0  ;;  %v2408_v19 = vadd.f32 %v5560_v33, %v2407_v28  ;;  %v11488_v12 = vsub.f32 %v11465_v52, %v7526_v42  ;;  %v11492_v28 = vld [vmem:[#allocation24_spill] sm:$0xff] }
 0x221   : > { %11487 = vst [vmem:[#allocation49_spill] sm:$0xff] %v7741_v53  ;;  %v5561_v34 = vsel %vm2314_vm0, 1.0, %v11417_v56  ;;  %v2443_v48 = vmul.f32 %v5557_v63, %v11489_v0  ;;  %v2473_v24 = vadd.f32 %v2472_v27, %v2442_v35  ;;  %v2256_v61 = vmul.f32 %v2224_v58, %v7097_v45 }
 0x222   : > { %v2226_v51 = vmul.f32 %v11488_v12, %v7529_v15  ;;  %v7752_v14 = vadd.f32 %v2254_v43, %v7385_v11  ;;  %vm2316_vm2 = vcmp.ge.f32.partialorder %v7730_v1, 0.0  ;;  %v2409_v50 = vadd.f32 %v5561_v34, %v2408_v19 }
 0x223   : > { %v11491_v3 = vsub.f32 %v11466_v44, %v7526_v42  ;;  %v5562_v32 = vsel %vm2315_vm1, 1.0, %v11417_v56  ;;  %v2444_v12 = vmul.f32 %v5558_v47, %v11492_v28  ;;  %v2474_v7 = vadd.f32 %v2473_v24, %v2443_v48 }
 0x224   : > { %11490 = vst [vmem:[#allocation55_spill] sm:$0xff] %v7752_v14  ;;  %v2257_v27 = vmul.f32 %v2225_v13, %v7097_v45  ;;  %v7763_v63 = vadd.f32 %v2255_v46, %v7388_v9  ;;  %vm2317_vm3 = vcmp.ge.f32.partialorder %v7741_v53, 0.0  ;;  %v2410_v11 = vadd.f32 %v5562_v32, %v2409_v50  ;;  %v11497_v50 = vld [vmem:[#allocation28_spill] sm:$0xff] }
 0x225   : > { %v2227_v29 = vmul.f32 %v11491_v3, %v7529_v15  ;;  %v11494_v58 = vsub.f32 %v11468_v60, %v7526_v42  ;;  %v5563_v35 = vsel %vm2316_vm2, 1.0, %v11417_v56  ;;  %v2445_v19 = vmul.f32 %v5559_v39, %v11418_v8 }
 0x226   : > { %11493 = vst [vmem:[#allocation53_spill] sm:$0xff] %v7763_v63  ;;  %v2475_v3 = vadd.f32 %v2474_v7, %v2444_v12  ;;  %v2258_v24 = vmul.f32 %v2226_v51, %v7097_v45  ;;  %v7774_v47 = vadd.f32 %v2256_v61, %v7391_v6  ;;  %vm2318_vm4 = vcmp.ge.f32.partialorder %v7752_v14, 0.0 }
 0x227   : > { %v2228_v43 = vmul.f32 %v11494_v58, %v7529_v15  ;;  %v2411_v9 = vadd.f32 %v5563_v35, %v2410_v11  ;;  %v11496_v13 = vsub.f32 %v11469_v55, %v7526_v42  ;;  %v5564_v48 = vsel %vm2317_vm3, 1.0, %v11417_v56  ;;  %v11500_v11 = vld [vmem:[#allocation26_spill] sm:$0xff] }
 0x228   : > { %11495 = vst [vmem:[#allocation59_spill] sm:$0xff] %v7774_v47  ;;  %v2446_v58 = vmul.f32 %v5560_v33, %v11497_v50  ;;  %v2476_v28 = vadd.f32 %v2475_v3, %v2445_v19  ;;  %v2259_v39 = vmul.f32 %v2227_v29, %v7097_v45  ;;  %v7785_v7 = vadd.f32 %v2257_v27, %v7394_v23  ;;  %v11501_v19 = vld [vmem:[#allocation14_spill] sm:$0xff]  ;;  %v11505_v50 = vld [vmem:[#allocation32_spill] sm:$0xff] }
 0x229   : > { %v2229_v46 = vmul.f32 %v11496_v13, %v7529_v15  ;;  %vm2319_vm5 = vcmp.ge.f32.partialorder %v7763_v63, 0.0  ;;  %v2412_v6 = vadd.f32 %v5564_v48, %v2411_v9  ;;  %v11499_v51 = vsub.f32 %v11470_v59, %v7526_v42  ;;  %v11503_v27 = vld [vmem:[#allocation94_spill] sm:$0xff] }
 0x22a   : > { %11498 = vst [vmem:[#allocation57_spill] sm:$0xff] %v7785_v7  ;;  %v5565_v12 = vsel %vm2318_vm4, 1.0, %v11417_v56  ;;  %v2447_v13 = vmul.f32 %v5561_v34, %v11500_v11  ;;  %v2477_v8 = vadd.f32 %v2476_v28, %v2446_v58  ;;  %v2260_v33 = vmul.f32 %v2228_v43, %v7097_v45  ;;  %v11506_v28 = vld [vmem:[#allocation19_spill] sm:$0xff]  ;;  %v11508_v58 = vld [vmem:[#allocation93_spill] sm:$0xff]  ;;  %v11510_v11 = vld [vmem:[#allocation30_spill] sm:$0xff] }
 0x22b   : > { %v2230_v61 = vmul.f32 %v11499_v51, %v7529_v15  ;;  %v7796_v29 = vadd.f32 %v2258_v24, %v11501_v19  ;;  %vm2320_vm6 = vcmp.ge.f32.partialorder %v7774_v47, 0.0  ;;  %v2413_v23 = vadd.f32 %v5565_v12, %v2412_v6 }
 0x22c   : > { %v11504_v3 = vsub.f32 %v11503_v27, %v7526_v42  ;;  %v5566_v51 = vsel %vm2319_vm5, 1.0, %v11417_v56  ;;  %v2448_v63 = vmul.f32 %v5562_v32, %v11505_v50  ;;  %v2478_v14 = vadd.f32 %v2477_v8, %v2447_v13  ;;  %v11511_v32 = vld [vmem:[#allocation17_spill] sm:$0xff] }
 0x22d   : > { %11502 = vst [vmem:[#allocation63_spill] sm:$0xff] %v7796_v29  ;;  %v2261_v34 = vmul.f32 %v2229_v46, %v7097_v45  ;;  %v7807_v43 = vadd.f32 %v2259_v39, %v11506_v28  ;;  %vm2321_vm7 = vcmp.ge.f32.partialorder %v7785_v7, 0.0  ;;  %v2414_v24 = vadd.f32 %v5566_v51, %v2413_v23 }
 0x22e   : > { %v2231_v9 = vmul.f32 %v11504_v3, %v7529_v15  ;;  %v11509_v6 = vsub.f32 %v11508_v58, %v7526_v42  ;;  %v5567_v3 = vsel %vm2320_vm6, 1.0, %v11417_v56  ;;  %v2449_v47 = vmul.f32 %v5563_v35, %v11510_v11 }
 0x22f   : > { %11507 = vst [vmem:[#allocation61_spill] sm:$0xff] %v7807_v43  ;;  %v2479_v0 = vadd.f32 %v2478_v14, %v2448_v63  ;;  %v2262_v8 = vmul.f32 %v2230_v61, %v7097_v45  ;;  %v7818_v46 = vadd.f32 %v2260_v33, %v11511_v32  ;;  %vm2322_vm8 = vcmp.ge.f32.partialorder %v7796_v29, 0.0  ;;  %v11515_v63 = vld [vmem:[#allocation23_spill] sm:$0xff] }
 0x230   : > { %v2232_v19 = vmul.f32 %v11509_v6, %v7529_v15  ;;  %v2415_v39 = vadd.f32 %v5567_v3, %v2414_v24  ;;  %v11513_v13 = vsub.f32 %v11474_v36, %v7526_v42  ;;  %v5568_v28 = vsel %vm2321_vm7, 1.0, %v11417_v56  ;;  %v11514_v6 = vld [vmem:[#allocation36_spill] sm:$0xff] }
 0x231   : > { %11512 = vst [vmem:[#allocation81_spill] sm:$0xff] %v7818_v46  ;;  %v2450_v50 = vmul.f32 %v5564_v48, %v11514_v6  ;;  %v2480_v7 = vadd.f32 %v2479_v0, %v2449_v47  ;;  %v2263_v14 = vmul.f32 %v2231_v9, %v7097_v45  ;;  %v7829_v35 = vadd.f32 %v2261_v34, %v11515_v63  ;;  %v11518_v47 = vld [vmem:[#allocation21_spill] sm:$0xff] }
 0x232   : > { %v2233_v23 = vmul.f32 %v11513_v13, %v7529_v15  ;;  %vm2323_vm9 = vcmp.ge.f32.partialorder %v7807_v43, 0.0  ;;  %v2416_v61 = vadd.f32 %v5568_v28, %v2415_v39  ;;  %v11516_v33 = vsub.f32 %v11475_v5, %v7526_v42  ;;  %v11517_v13 = vld [vmem:[#allocation34_spill] sm:$0xff] }
 0x233   : > { %v5569_v32 = vsel %vm2322_vm8, 1.0, %v11417_v56  ;;  %v2451_v11 = vmul.f32 %v5565_v12, %v11517_v13  ;;  %v2481_v29 = vadd.f32 %v2480_v7, %v2450_v50  ;;  %v2264_v0 = vmul.f32 %v2232_v19, %v7097_v45  ;;  %v11521_v7 = vld [vmem:[#allocation27_spill] sm:$0xff] }
 0x234   : > { %v2234_v24 = vmul.f32 %v11516_v33, %v7529_v15  ;;  %v7840_v48 = vadd.f32 %v2262_v8, %v11518_v47  ;;  %vm2324_vm10 = vcmp.ge.f32.partialorder %v7818_v46, 0.0  ;;  %v2417_v9 = vadd.f32 %v5569_v32, %v2416_v61  ;;  %v11520_v33 = vld [vmem:[#allocation40_spill] sm:$0xff]  ;;  %v11523_v61 = vld [vmem:[#allocation38_spill] sm:$0xff]  ;;  %v11524_v46 = vld [vmem:[#allocation25_spill] sm:$0xff] }
 0x235   : > { %v11519_v34 = vsub.f32 %v11477_v41, %v7526_v42  ;;  %v5570_v63 = vsel %vm2323_vm9, 1.0, %v11417_v56  ;;  %v2452_v6 = vmul.f32 %v5566_v51, %v11520_v33  ;;  %v2482_v43 = vadd.f32 %v2481_v29, %v2451_v11 }
 0x236   : > { %v2265_v50 = vmul.f32 %v2233_v23, %v7097_v45  ;;  %v7851_v12 = vadd.f32 %v2263_v14, %v11521_v7  ;;  %vm2325_vm11 = vcmp.ge.f32.partialorder %v7829_v35, 0.0  ;;  %v2418_v19 = vadd.f32 %v5570_v63, %v2417_v9  ;;  %v11527_v14 = vld [vmem:[#allocation44_spill] sm:$0xff] }
 0x237   : > { %v2235_v39 = vmul.f32 %v11519_v34, %v7529_v15  ;;  %v5571_v8 = vsel %vm2324_vm10, 1.0, %v11417_v56  ;;  %v2453_v47 = vmul.f32 %v5567_v3, %v11523_v61  ;;  %v2483_v13 = vadd.f32 %v2482_v43, %v2452_v6  ;;  %v11528_v3 = vld [vmem:[#allocation31_spill] sm:$0xff] }
 0x238   : > { %11522 = vst [vmem:[#allocation84_spill] sm:$0xff] %v7851_v12  ;;  %v2266_v34 = vmul.f32 %v2234_v24, %v7097_v45  ;;  %v7858_v53 = vadd.f32 %v2264_v0, %v11524_v46  ;;  %vm2326_vm12 = vcmp.ge.f32.partialorder %v7840_v48, 0.0  ;;  %v2419_v11 = vadd.f32 %v5571_v8, %v2418_v19  ;;  %v11530_v0 = vld [vmem:[#allocation42_spill] sm:$0xff] }
 0x239   : > { %v11526_v29 = vsub.f32 %v11478_v2, %v7526_v42  ;;  %v5572_v23 = vsel %vm2325_vm11, 1.0, %v11417_v56  ;;  %v2454_v9 = vmul.f32 %v5568_v28, %v11527_v14  ;;  %v2484_v7 = vadd.f32 %v2483_v13, %v2453_v47  ;;  %v11531_v42 = vld [vmem:[#allocation29_spill] sm:$0xff]  ;;  %v11543_v14 = vld [vmem:[#allocation60_spill] sm:$0xff] }
 0x23a   : > { %11525 = vst [vmem:[#allocation83_spill] sm:$0xff] %v7858_v53  ;;  %v2267_v43 = vmul.f32 %v2235_v39, %v7097_v45  ;;  %v7869_v6 = vadd.f32 %v2265_v50, %v11528_v3  ;;  %vm2327_vm13 = vcmp.ge.f32.partialorder %v7851_v12, 0.0  ;;  %v2420_v46 = vadd.f32 %v5572_v23, %v2419_v11  ;;  %v11533_v39 = vld [vmem:[#allocation48_spill] sm:$0xff]  ;;  %v11534_v3 = vld [vmem:[#allocation35_spill] sm:$0xff] }
 0x23b   : > { %v2236_v51 = vmul.f32 %v11526_v29, %v7529_v15  ;;  %v5573_v24 = vsel %vm2326_vm12, 1.0, %v11417_v56  ;;  %v2455_v19 = vmul.f32 %v5569_v32, %v11530_v0  ;;  %v2485_v61 = vadd.f32 %v2484_v7, %v2454_v9 }
 0x23c   : > { %11529 = vst [vmem:[#allocation86_spill] sm:$0xff] %v7869_v6  ;;  %v7875_v15 = vadd.f32 %v2266_v34, %v11531_v42  ;;  %vm2328_vm14 = vcmp.ge.f32.partialorder %v7858_v53, 0.0  ;;  %v2421_v28 = vadd.f32 %v5573_v24, %v2420_v46  ;;  %v5574_v13 = vsel %vm2327_vm13, 1.0, %v11417_v56  ;;  %v11536_v34 = vld [vmem:[#allocation46_spill] sm:$0xff] }
 0x23d   : > { %v2456_v47 = vmul.f32 %v5570_v63, %v11533_v39  ;;  %v2486_v50 = vadd.f32 %v2485_v61, %v2455_v19  ;;  %v2268_v29 = vmul.f32 %v2236_v51, %v7097_v45  ;;  %v7882_v11 = vadd.f32 %v2267_v43, %v11534_v3  ;;  %v11537_v63 = vld [vmem:[#allocation52_spill] sm:$0xff]  ;;  %v11538_v51 = vld [vmem:[#allocation33_spill] sm:$0xff]  ;;  %v11540_v3 = vld [vmem:[#allocation50_spill] sm:$0xff] }
 0x23e   : > { %11532 = vst [vmem:[#allocation85_spill] sm:$0xff] %v7875_v15  ;;  %vm2329_vm15 = vcmp.ge.f32.partialorder %v7869_v6, 0.0  ;;  %v2422_v32 = vadd.f32 %v5574_v13, %v2421_v28  ;;  %v5575_v9 = vsel %vm2328_vm14, 1.0, %v11417_v56  ;;  %v2457_v7 = vmul.f32 %v5571_v8, %v11536_v34 }
 0x23f   : > { %11535 = vst [vmem:[#allocation88_spill] sm:$0xff] %v7882_v11  ;;  %v2487_v42 = vadd.f32 %v2486_v50, %v2456_v47  ;;  %vm2330_vm0 = vcmp.ge.f32.partialorder %v7875_v15, 0.0  ;;  %v5576_v0 = vsel %vm2329_vm15, 1.0, %v11417_v56  ;;  %v2458_v61 = vmul.f32 %v5572_v23, %v11537_v63  ;;  %v11541_v23 = vld [vmem:[#allocation56_spill] sm:$0xff]  ;;  %v11542_v63 = vld [vmem:[#allocation54_spill] sm:$0xff] }
 0x240   : > { %v2423_v46 = vadd.f32 %v5575_v9, %v2422_v32  ;;  %v7891_v39 = vadd.f32 %v2268_v29, %v11538_v51  ;;  %vm2331_vm1 = vcmp.ge.f32.partialorder %v7882_v11, 0.0  ;;  %v5577_v28 = vsel %vm2330_vm0, 1.0, %v11417_v56 }
 0x241   : > { %v2488_v19 = vadd.f32 %v2487_v42, %v2457_v7  ;;  %v2459_v6 = vmul.f32 %v5573_v24, %v11540_v3  ;;  %v5578_v50 = vsel %vm2331_vm1, 1.0, %v11417_v56  ;;  %v2460_v7 = vmul.f32 %v5574_v13, %v11541_v23  ;;  %v11546_v23 = vld [vmem:[#allocation62_spill] sm:$0xff] }
 0x242   : > { %11539 = vst [vmem:[#allocation87_spill] sm:$0xff] %v7891_v39  ;;  %v2424_v43 = vadd.f32 %v5576_v0, %v2423_v46  ;;  %vm2332_vm2 = vcmp.ge.f32.partialorder %v7891_v39, 0.0  ;;  %v2461_v46 = vmul.f32 %v5575_v9, %v11542_v63  ;;  %v2462_v24 = vmul.f32 %v5576_v0, %v11543_v14  ;;  %v11545_v39 = vld [vmem:[#allocation64_spill] sm:$0xff] }
 0x243   : > { %v2489_v8 = vadd.f32 %v2488_v19, %v2458_v61  ;;  %v5579_v29 = vsel %vm2332_vm2, 1.0, %v11417_v56 }
 0x244   : > { %v2425_v47 = vadd.f32 %v5577_v28, %v2424_v43  ;;  %v11544_v43 = vld [vmem:[#allocation58_spill] sm:$0xff]  ;;  %v2465_v12 = vmul.f32 %v5579_v29, %v11546_v23  ;;  %v11567_v23 = vld [vmem:[#allocation43_spill] sm:$0xff] }
 0x245   : > { %v2490_v32 = vadd.f32 %v2489_v8, %v2459_v6  ;;  %v2463_v3 = vmul.f32 %v5577_v28, %v11544_v43 }
 0x246   : > { %v2426_v34 = vadd.f32 %v5578_v50, %v2425_v47  ;;  %v2464_v47 = vmul.f32 %v5578_v50, %v11545_v39  ;;  %v11547_v50 = vld [vmem:[#allocation75_spill] sm:$0xff] }
 0x247   : > { %v2491_v42 = vadd.f32 %v2490_v32, %v2460_v7 }
 0x248   : > { %v2427_v51 = vadd.f32 %v5579_v29, %v2426_v34 }
 0x249   : > { %v2492_v11 = vadd.f32 %v2491_v42, %v2461_v46 }
 0x24a   : > { %v2428_v15 = vrot.slane %v2427_v51, 4 }
 0x24b   : > { %v2493_v61 = vadd.f32 %v2492_v11, %v2462_v24 }
 0x24c   : > { %v2429_v19 = vadd.f32 %v2428_v15, %v2427_v51 }
 0x24d   : > { %v2494_v6 = vadd.f32 %v2493_v61, %v2463_v3 }
 0x24e   : > { %v2430_v8 = vrot.slane %v2429_v19, 2 }
 0x24f   : > { %v2495_v53 = vadd.f32 %v2494_v6, %v2464_v47  ;;  %v11548_v6 = vld [vmem:[#allocation67_spill] sm:$0xff]  ;;  %v11549_v47 = vld [vmem:[#allocation66_spill] sm:$0xff] }
 0x250   : > { %v2431_v13 = vadd.f32 %v2430_v8, %v2429_v19 }
 0x251   : > { %v2496_v32 = vadd.f32 %v2495_v53, %v2465_v12 }
 0x252   : > { %v2432_v34 = vrot.slane %v2431_v13, 1 }
 0x253   : > { %v2497_v7 = vrot.slane %v2496_v32, 4 }
 0x254   : > { %v2433_v9 = vadd.f32 %v2432_v34, %v2431_v13  ;;  %v11551_v34 = vld [vmem:[#allocation69_spill] sm:$0xff] }
 0x255   : > { %v2498_v42 = vadd.f32 %v2497_v7, %v2496_v32 }
 0x256   : > { %v2503_v46 = vsub.f32 256.0, %v2433_v9  ;;  %v2505_v11 = vmax.f32 %v2433_v9, 1.0 }
 0x257   : > { %v2499_v63 = vrot.slane %v2498_v42, 2 }
 0x258   : > { %v2508_v0 = vmax.f32 %v2503_v46, 1.0  ;;  %v11552_v46 = vld [vmem:[#allocation68_spill] sm:$0xff] }
 0x259   : > { %v2500_v15 = vadd.f32 %v2499_v63, %v2498_v42  ;;  %v11550_v63 = vld [vmem:[#allocation65_spill] sm:$0xff] }
 0x25a   : > { %6146 = vrcp.f32 %v2508_v0 }
 0x25b   : > { %6148 = vrcp.f32 %v2505_v11  ;;  %v2501_v28 = vrot.slane %v2500_v15, 1  ;;  %v11553_v11 = vld [vmem:[#allocation71_spill] sm:$0xff] }
 0x25d   : > { %v2502_v3 = vadd.f32 %v2501_v28, %v2500_v15 }
 0x25f   : > { %v2504_v24 = vsub.f32 %v11547_v50, %v2502_v3 }
 0x264   : > { %v6147_v51 = vpop.eup %6146 }
 0x265   : > { %v6149_v61 = vpop.eup %6148  ;;  %v2510_v19 = vmul.f32 %v6147_v51, %v2504_v24  ;;  %v11554_v24 = vld [vmem:[#allocation70_spill] sm:$0xff] }
 0x266   : > { %v2507_v29 = vmul.f32 %v6149_v61, %v2502_v3 }
 0x268   : > { %v2511_v53 = vsub.f32 %v2507_v29, %v2510_v19  ;;  %v7906_v12 = vadd.f32 %v2510_v19, %v2507_v29  ;;  %v11555_v29 = vld [vmem:[#allocation73_spill] sm:$0xff] }
 0x26a   : > { %v7909_v8 = vmul.f32 %v2511_v53, %v11548_v6  ;;  %v2514_v13 = vsub.f32 %v11549_v47, %v7906_v12  ;;  %v2515_v32 = vsub.f32 %v11550_v63, %v7906_v12  ;;  %v2516_v7 = vsub.f32 %v11551_v34, %v7906_v12 }
 0x26b   : > { %v2517_v0 = vsub.f32 %v11552_v46, %v7906_v12  ;;  %v2518_v15 = vsub.f32 %v11553_v11, %v7906_v12  ;;  %v2519_v61 = vsub.f32 %v11554_v24, %v7906_v12  ;;  %v2520_v53 = vsub.f32 %v11555_v29, %v7906_v12  ;;  %v11556_v46 = vld [vmem:[#allocation39_spill] sm:$0xff]  ;;  %v11561_v24 = vld [vmem:[#allocation76_spill] sm:$0xff]  ;;  %v11563_v29 = vld [vmem:[#allocation78_spill] sm:$0xff] }
 0x26c   : > { %v2546_v9 = vmul.f32 %v2514_v13, %v7909_v8  ;;  %v2547_v42 = vmul.f32 %v2515_v32, %v7909_v8  ;;  %v2548_v28 = vmul.f32 %v2516_v7, %v7909_v8  ;;  %v11558_v7 = vld [vmem:[#allocation37_spill] sm:$0xff]  ;;  %v2522_v63 = vsub.f32 %v11561_v24, %v7906_v12 }
 0x26d   : > { %v2549_v19 = vmul.f32 %v2517_v0, %v7909_v8  ;;  %v2550_v13 = vmul.f32 %v2518_v15, %v7909_v8  ;;  %v11562_v0 = vld [vmem:[#allocation74_spill] sm:$0xff]  ;;  %v2524_v15 = vsub.f32 %v11563_v29, %v7906_v12  ;;  %v2552_v29 = vmul.f32 %v2520_v53, %v7909_v8  ;;  %v11569_v24 = vld [vmem:[#allocation41_spill] sm:$0xff] }
 0x26e   : > { %v2578_v3 = vmul.f32 %v2546_v9, %v7097_v45  ;;  %v2579_v51 = vmul.f32 %v2547_v42, %v7097_v45  ;;  %v2580_v32 = vmul.f32 %v2548_v28, %v7097_v45  ;;  %v11560_v9 = vld [vmem:[#allocation72_spill] sm:$0xff]  ;;  %v2523_v47 = vsub.f32 %v11562_v0, %v7906_v12  ;;  %v11564_v28 = vld [vmem:[#allocation77_spill] sm:$0xff] }
 0x26f   : > { %v2521_v42 = vsub.f32 %v11560_v9, %v7906_v12  ;;  %v2525_v6 = vsub.f32 %v11564_v28, %v7906_v12  ;;  %v11566_v9 = vld [vmem:[#allocation79_spill] sm:$0xff]  ;;  %v2582_v28 = vmul.f32 %v2550_v13, %v7097_v45 }
 0x270   : > { %v7934_v11 = vadd.f32 %v2578_v3, %v11556_v46  ;;  %v7937_v34 = vadd.f32 %v2579_v51, %v11558_v7  ;;  %v11565_v46 = vld [vmem:[#allocation80_spill] sm:$0xff]  ;;  %v2551_v51 = vmul.f32 %v2519_v61, %v7909_v8  ;;  %v2581_v7 = vmul.f32 %v2549_v19, %v7097_v45  ;;  %v11573_v61 = vld [vmem:[#allocation45_spill] sm:$0xff] }
 0x271   : > { %v2526_v3 = vsub.f32 %v11565_v46, %v7906_v12  ;;  %v2527_v50 = vsub.f32 %v11566_v9, %v7906_v12  ;;  %v7962_v39 = vadd.f32 %v2580_v32, %v11567_v23  ;;  %v2553_v13 = vmul.f32 %v2521_v42, %v7909_v8  ;;  %v11571_v42 = vld [vmem:[#allocation47_spill] sm:$0xff] }
 0x272   : > { %11557 = vst [vmem:[#allocation90_spill] sm:$0xff] %v7934_v11  ;;  %11559 = vst [vmem:[#allocation89_spill] sm:$0xff] %v7937_v34  ;;  %vm2642_vm3 = vcmp.ge.f32.partialorder %v7934_v11, 0.0  ;;  %vm2643_vm4 = vcmp.ge.f32.partialorder %v7937_v34, 0.0  ;;  %v2583_v32 = vmul.f32 %v2551_v51, %v7097_v45  ;;  %v7979_v9 = vadd.f32 %v2581_v7, %v11569_v24  ;;  %v11576_v11 = vld [vmem:[#allocation8_spill] sm:$0xff] }
 0x273   : > { %11568 = vst [vmem:[#allocation92_spill] sm:$0xff] %v7962_v39  ;;  %v5580_v0 = vsel %vm2642_vm3, 1.0, %v11417_v56  ;;  %v5581_v53 = vsel %vm2643_vm4, 1.0, %v11417_v56  ;;  %v2554_v46 = vmul.f32 %v2522_v63, %v7909_v8  ;;  %v2584_v23 = vmul.f32 %v2552_v29, %v7097_v45 }
 0x274   : > { %11570 = vst [vmem:[#allocation91_spill] sm:$0xff] %v7979_v9  ;;  %v7990_v34 = vadd.f32 %v2582_v28, %v11571_v42  ;;  %vm2644_vm5 = vcmp.ge.f32.partialorder %v7962_v39, 0.0  ;;  %v2555_v19 = vmul.f32 %v2523_v47, %v7909_v8  ;;  %v2585_v63 = vmul.f32 %v2553_v13, %v7097_v45  ;;  %v11574_v39 = vld [vmem:[#allocation51_spill] sm:$0xff] }
 0x275   : > { %v8002_v29 = vadd.f32 %v2583_v32, %v11573_v61  ;;  %vm2645_vm6 = vcmp.ge.f32.partialorder %v7979_v9, 0.0  ;;  %v2738_v28 = vadd.f32 %v5581_v53, %v5580_v0  ;;  %v2556_v51 = vmul.f32 %v2524_v15, %v7909_v8  ;;  %v11575_v32 = vld [vmem:[#allocation9_spill] sm:$0xff] }
 0x276   : > { %11572 = vst [vmem:[#allocation96_spill] sm:$0xff] %v7990_v34  ;;  %v5582_v7 = vsel %vm2644_vm5, 1.0, %v11417_v56  ;;  %v2586_v47 = vmul.f32 %v2554_v46, %v7097_v45  ;;  %v8013_v13 = vadd.f32 %v2584_v23, %v7633_v30  ;;  %vm2646_vm7 = vcmp.ge.f32.partialorder %v7990_v34, 0.0 }
 0x277   : > { %v2739_v61 = vadd.f32 %v5582_v7, %v2738_v28  ;;  %v2557_v24 = vmul.f32 %v2525_v6, %v7909_v8  ;;  %v5583_v15 = vsel %vm2645_vm6, 1.0, %v11417_v56  ;;  %v2587_v9 = vmul.f32 %v2555_v19, %v7097_v45 }
 0x278   : > { %v8024_v46 = vadd.f32 %v2585_v63, %v11574_v39  ;;  %vm2647_vm8 = vcmp.ge.f32.partialorder %v8002_v29, 0.0  ;;  %v2558_v23 = vmul.f32 %v2526_v3, %v7909_v8  ;;  %v5584_v28 = vsel %vm2646_vm7, 1.0, %v11417_v56 }
 0x279   : > { %v2740_v30 = vadd.f32 %v5583_v15, %v2739_v61  ;;  %v2775_v34 = vmul.f32 %v5580_v0, %v11575_v32  ;;  %v2776_v42 = vmul.f32 %v5581_v53, %v11576_v11  ;;  %v2588_v6 = vmul.f32 %v2556_v51, %v7097_v45 }
 0x27a   : > { %v8033_v43 = vadd.f32 %v2586_v47, %v7653_v16  ;;  %vm2648_vm9 = vcmp.ge.f32.partialorder %v8013_v13, 0.0  ;;  %v2559_v63 = vmul.f32 %v2527_v50, %v7909_v8  ;;  %v5585_v0 = vsel %vm2647_vm8, 1.0, %v11417_v56 }
 0x27b   : > { %v2741_v39 = vadd.f32 %v5584_v28, %v2740_v30  ;;  %v2589_v53 = vmul.f32 %v2557_v24, %v7097_v45  ;;  %v8044_v51 = vadd.f32 %v2587_v9, %v7664_v40  ;;  %vm2649_vm10 = vcmp.ge.f32.partialorder %v8024_v46, 0.0 }
 0x27c   : > { %v11577_v47 = vsub.f32 %v11456_v22, %v7906_v12  ;;  %v5586_v30 = vsel %vm2648_vm9, 1.0, %v11417_v56  ;;  %v2777_v3 = vmul.f32 %v5582_v7, %v6837_v26  ;;  %v2807_v50 = vadd.f32 %v2776_v42, %v2775_v34 }
 0x27d   : > { %v2742_v16 = vadd.f32 %v5585_v0, %v2741_v39  ;;  %v2590_v19 = vmul.f32 %v2558_v23, %v7097_v45  ;;  %v8055_v24 = vadd.f32 %v2588_v6, %v7675_v20  ;;  %vm2650_vm11 = vcmp.ge.f32.partialorder %v8033_v43, 0.0 }
 0x27e   : > { %v2560_v61 = vmul.f32 %v11577_v47, %v7909_v8  ;;  %v11578_v9 = vsub.f32 %v11457_v62, %v7906_v12  ;;  %v5587_v47 = vsel %vm2649_vm10, 1.0, %v11417_v56  ;;  %v2778_v11 = vmul.f32 %v5583_v15, %v6830_v21 }
 0x27f   : > { %v2743_v40 = vadd.f32 %v5586_v30, %v2742_v16  ;;  %v2808_v32 = vadd.f32 %v2807_v50, %v2777_v3  ;;  %v2591_v34 = vmul.f32 %v2559_v63, %v7097_v45  ;;  %v8066_v7 = vadd.f32 %v2589_v53, %v7686_v17 }
 0x280   : > { %v2561_v39 = vmul.f32 %v11578_v9, %v7909_v8  ;;  %vm2651_vm12 = vcmp.ge.f32.partialorder %v8044_v51, 0.0  ;;  %v11579_v42 = vsub.f32 %v11459_v10, %v7906_v12  ;;  %v5588_v6 = vsel %vm2650_vm11, 1.0, %v11417_v56 }
 0x281   : > { %v2744_v20 = vadd.f32 %v5587_v47, %v2743_v40  ;;  %v2779_v16 = vmul.f32 %v5584_v28, %v6853_v4  ;;  %v2809_v9 = vadd.f32 %v2808_v32, %v2778_v11  ;;  %v2592_v15 = vmul.f32 %v2560_v61, %v7097_v45 }
 0x282   : > { %v2562_v23 = vmul.f32 %v11579_v42, %v7909_v8  ;;  %v8077_v3 = vadd.f32 %v2590_v19, %v7697_v18  ;;  %vm2652_vm13 = vcmp.ge.f32.partialorder %v8055_v24, 0.0  ;;  %v11580_v63 = vsub.f32 %v11460_v25, %v7906_v12 }
 0x283   : > { %v2745_v17 = vadd.f32 %v5588_v6, %v2744_v20  ;;  %v5589_v50 = vsel %vm2651_vm12, 1.0, %v11417_v56  ;;  %v2780_v40 = vmul.f32 %v5585_v0, %v6847_v37  ;;  %v2810_v42 = vadd.f32 %v2809_v9, %v2779_v16  ;;  %v11583_v20 = vld [vmem:[#allocation16_spill] sm:$0xff] }
 0x284   : > { %v2563_v53 = vmul.f32 %v11580_v63, %v7909_v8  ;;  %v2593_v11 = vmul.f32 %v2561_v39, %v7097_v45  ;;  %v8088_v32 = vadd.f32 %v2591_v34, %v7708_v49  ;;  %vm2653_vm14 = vcmp.ge.f32.partialorder %v8066_v7, 0.0 }
 0x285   : > { %v2746_v18 = vadd.f32 %v5589_v50, %v2745_v17  ;;  %v11582_v28 = vsub.f32 %v11461_v54, %v7906_v12  ;;  %v5590_v61 = vsel %vm2652_vm13, 1.0, %v11417_v56  ;;  %v2781_v63 = vmul.f32 %v5586_v30, %v11583_v20  ;;  %v11586_v17 = vld [vmem:[#allocation15_spill] sm:$0xff] }
 0x286   : > { %11581 = vst [vmem:[#allocation95_spill] sm:$0xff] %v8088_v32  ;;  %v2811_v4 = vadd.f32 %v2810_v42, %v2780_v40  ;;  %v2594_v0 = vmul.f32 %v2562_v23, %v7097_v45  ;;  %v8099_v39 = vadd.f32 %v2592_v15, %v7719_v31  ;;  %vm2654_vm15 = vcmp.ge.f32.partialorder %v8077_v3, 0.0 }
 0x287   : > { %v2564_v19 = vmul.f32 %v11582_v28, %v7909_v8  ;;  %v2747_v49 = vadd.f32 %v5590_v61, %v2746_v18  ;;  %v11585_v34 = vsub.f32 %v11462_v57, %v7906_v12  ;;  %v5591_v9 = vsel %vm2653_vm14, 1.0, %v11417_v56  ;;  %v11589_v18 = vld [vmem:[#allocation20_spill] sm:$0xff] }
 0x288   : > { %11584 = vst [vmem:[#allocation98_spill] sm:$0xff] %v8099_v39  ;;  %v2782_v28 = vmul.f32 %v5587_v47, %v11586_v17  ;;  %v2812_v37 = vadd.f32 %v2811_v4, %v2781_v63  ;;  %v2595_v30 = vmul.f32 %v2563_v53, %v7097_v45  ;;  %v8110_v23 = vadd.f32 %v2593_v11, %v7730_v1  ;;  %v11590_v47 = vld [vmem:[#allocation49_spill] sm:$0xff] }
 0x289   : > { %v2565_v16 = vmul.f32 %v11585_v34, %v7909_v8  ;;  %vm2655_vm0 = vcmp.ge.f32.partialorder %v8088_v32, 0.0  ;;  %v2748_v31 = vadd.f32 %v5591_v9, %v2747_v49  ;;  %v11588_v15 = vsub.f32 %v11463_v38, %v7906_v12 }
 0x28a   : > { %11587 = vst [vmem:[#allocation97_spill] sm:$0xff] %v8110_v23  ;;  %v5592_v42 = vsel %vm2654_vm15, 1.0, %v11417_v56  ;;  %v2783_v34 = vmul.f32 %v5588_v6, %v11589_v18  ;;  %v2813_v20 = vadd.f32 %v2812_v37, %v2782_v28  ;;  %v2596_v4 = vmul.f32 %v2564_v19, %v7097_v45  ;;  %v11594_v6 = vld [vmem:[#allocation55_spill] sm:$0xff] }
 0x28b   : > { %v2566_v40 = vmul.f32 %v11588_v15, %v7909_v8  ;;  %v8121_v53 = vadd.f32 %v2594_v0, %v11590_v47  ;;  %vm2656_vm1 = vcmp.ge.f32.partialorder %v8099_v39, 0.0  ;;  %v2749_v1 = vadd.f32 %v5592_v42, %v2748_v31  ;;  %v11593_v15 = vld [vmem:[#allocation18_spill] sm:$0xff] }
 0x28c   : > { %v11592_v11 = vsub.f32 %v11465_v52, %v7906_v12  ;;  %v5593_v49 = vsel %vm2655_vm0, 1.0, %v11417_v56  ;;  %v2784_v17 = vmul.f32 %v5589_v50, %v11593_v15  ;;  %v2814_v32 = vadd.f32 %v2813_v20, %v2783_v34  ;;  %v11598_v20 = vld [vmem:[#allocation53_spill] sm:$0xff] }
 0x28d   : > { %11591 = vst [vmem:[#allocation14_spill] sm:$0xff] %v8121_v53  ;;  %v2597_v37 = vmul.f32 %v2565_v16, %v7097_v45  ;;  %v8132_v19 = vadd.f32 %v2595_v30, %v11594_v6  ;;  %vm2657_vm2 = vcmp.ge.f32.partialorder %v8110_v23, 0.0  ;;  %v2750_v0 = vadd.f32 %v5593_v49, %v2749_v1 }
 0x28e   : > { %v2567_v63 = vmul.f32 %v11592_v11, %v7909_v8  ;;  %v11596_v28 = vsub.f32 %v11466_v44, %v7906_v12  ;;  %v5594_v47 = vsel %vm2656_vm1, 1.0, %v11417_v56  ;;  %v11597_v11 = vld [vmem:[#allocation24_spill] sm:$0xff]  ;;  %v2815_v39 = vadd.f32 %v2814_v32, %v2784_v17 }
 0x28f   : > { %11595 = vst [vmem:[#allocation94_spill] sm:$0xff] %v8132_v19  ;;  %v2785_v18 = vmul.f32 %v5590_v61, %v11597_v11  ;;  %v2598_v50 = vmul.f32 %v2566_v40, %v7097_v45  ;;  %v8143_v16 = vadd.f32 %v2596_v4, %v11598_v20  ;;  %vm2658_vm3 = vcmp.ge.f32.partialorder %v8121_v53, 0.0  ;;  %v11602_v61 = vld [vmem:[#allocation59_spill] sm:$0xff] }
 0x290   : > { %v2568_v31 = vmul.f32 %v11596_v28, %v7909_v8  ;;  %v2751_v30 = vadd.f32 %v5594_v47, %v2750_v0  ;;  %v11600_v34 = vsub.f32 %v11468_v60, %v7906_v12  ;;  %v5595_v6 = vsel %vm2657_vm2, 1.0, %v11417_v56  ;;  %v11601_v28 = vld [vmem:[#allocation22_spill] sm:$0xff] }
 0x291   : > { %11599 = vst [vmem:[#allocation19_spill] sm:$0xff] %v8143_v16  ;;  %v2786_v15 = vmul.f32 %v5591_v9, %v11601_v28  ;;  %v2816_v23 = vadd.f32 %v2815_v39, %v2785_v18  ;;  %v2599_v32 = vmul.f32 %v2567_v63, %v7097_v45  ;;  %v8154_v17 = vadd.f32 %v2597_v37, %v11602_v61  ;;  %v11606_v9 = vld [vmem:[#allocation57_spill] sm:$0xff] }
 0x292   : > { %v2569_v1 = vmul.f32 %v11600_v34, %v7909_v8  ;;  %vm2659_vm4 = vcmp.ge.f32.partialorder %v8132_v19, 0.0  ;;  %v2752_v40 = vadd.f32 %v5595_v6, %v2751_v30  ;;  %v11604_v4 = vsub.f32 %v11469_v55, %v7906_v12  ;;  %v11605_v34 = vld [vmem:[#allocation28_spill] sm:$0xff] }
 0x293   : > { %11603 = vst [vmem:[#allocation93_spill] sm:$0xff] %v8154_v17  ;;  %v5596_v20 = vsel %vm2658_vm3, 1.0, %v11417_v56  ;;  %v2787_v11 = vmul.f32 %v5592_v42, %v11605_v34  ;;  %v2817_v53 = vadd.f32 %v2816_v23, %v2786_v15  ;;  %v2600_v39 = vmul.f32 %v2568_v31, %v7097_v45  ;;  %v11610_v42 = vld [vmem:[#allocation63_spill] sm:$0xff] }
 0x294   : > { %v2570_v0 = vmul.f32 %v11604_v4, %v7909_v8  ;;  %v8165_v18 = vadd.f32 %v2598_v50, %v11606_v9  ;;  %vm2660_vm5 = vcmp.ge.f32.partialorder %v8143_v16, 0.0  ;;  %v2753_v63 = vadd.f32 %v5596_v20, %v2752_v40  ;;  %v11609_v4 = vld [vmem:[#allocation26_spill] sm:$0xff] }
 0x295   : > { %v11608_v37 = vsub.f32 %v11470_v59, %v7906_v12  ;;  %v5597_v61 = vsel %vm2659_vm4, 1.0, %v11417_v56  ;;  %v2788_v28 = vmul.f32 %v5593_v49, %v11609_v4  ;;  %v2818_v19 = vadd.f32 %v2817_v53, %v2787_v11  ;;  %v11613_v49 = vld [vmem:[#allocation61_spill] sm:$0xff] }
 0x296   : > { %11607 = vst [vmem:[#allocation17_spill] sm:$0xff] %v8165_v18  ;;  %v2601_v23 = vmul.f32 %v2569_v1, %v7097_v45  ;;  %v8176_v15 = vadd.f32 %v2599_v32, %v11610_v42  ;;  %vm2661_vm6 = vcmp.ge.f32.partialorder %v8154_v17, 0.0  ;;  %v2754_v31 = vadd.f32 %v5597_v61, %v2753_v63 }
 0x297   : > { %v2571_v30 = vmul.f32 %v11608_v37, %v7909_v8  ;;  %v11611_v50 = vsub.f32 %v11503_v27, %v7906_v12  ;;  %v5598_v9 = vsel %vm2660_vm5, 1.0, %v11417_v56  ;;  %v11612_v37 = vld [vmem:[#allocation32_spill] sm:$0xff]  ;;  %v2819_v16 = vadd.f32 %v2818_v19, %v2788_v28 }
 0x298   : > { %v2789_v34 = vmul.f32 %v5594_v47, %v11612_v37  ;;  %v2602_v53 = vmul.f32 %v2570_v0, %v7097_v45  ;;  %v8187_v11 = vadd.f32 %v2600_v39, %v11613_v49  ;;  %vm2662_vm7 = vcmp.ge.f32.partialorder %v8165_v18, 0.0  ;;  %v11616_v47 = vld [vmem:[#allocation81_spill] sm:$0xff] }
 0x299   : > { %v2572_v40 = vmul.f32 %v11611_v50, %v7909_v8  ;;  %v2755_v1 = vadd.f32 %v5598_v9, %v2754_v31  ;;  %v11614_v32 = vsub.f32 %v11508_v58, %v7906_v12  ;;  %v5599_v42 = vsel %vm2661_vm6, 1.0, %v11417_v56  ;;  %v11615_v50 = vld [vmem:[#allocation30_spill] sm:$0xff] }
 0x29a   : > { %v2790_v4 = vmul.f32 %v5595_v6, %v11615_v50  ;;  %v2820_v17 = vadd.f32 %v2819_v16, %v2789_v34  ;;  %v2603_v19 = vmul.f32 %v2571_v30, %v7097_v45  ;;  %v8198_v28 = vadd.f32 %v2601_v23, %v11616_v47  ;;  %v11621_v47 = vld [vmem:[#allocation34_spill] sm:$0xff] }
 0x29b   : > { %v2573_v63 = vmul.f32 %v11614_v32, %v7909_v8  ;;  %vm2663_vm8 = vcmp.ge.f32.partialorder %v8176_v15, 0.0  ;;  %v2756_v0 = vadd.f32 %v5599_v42, %v2755_v1  ;;  %v11618_v39 = vsub.f32 %v11474_v36, %v7906_v12  ;;  %v11619_v32 = vld [vmem:[#allocation36_spill] sm:$0xff] }
 0x29c   : > { %11617 = vst [vmem:[#allocation23_spill] sm:$0xff] %v8198_v28  ;;  %v5600_v49 = vsel %vm2662_vm7, 1.0, %v11417_v56  ;;  %v2791_v37 = vmul.f32 %v5596_v20, %v11619_v32  ;;  %v2821_v18 = vadd.f32 %v2820_v17, %v2790_v4  ;;  %v2604_v16 = vmul.f32 %v2572_v40, %v7097_v45  ;;  %v11625_v32 = vld [vmem:[#allocation83_spill] sm:$0xff] }
 0x29d   : > { %v2574_v31 = vmul.f32 %v11618_v39, %v7909_v8  ;;  %v8209_v6 = vadd.f32 %v2602_v53, %v7829_v35  ;;  %vm2664_vm9 = vcmp.ge.f32.partialorder %v8187_v11, 0.0  ;;  %v2757_v34 = vadd.f32 %v5600_v49, %v2756_v0 }
 0x29e   : > { %v11620_v30 = vsub.f32 %v11475_v5, %v7906_v12  ;;  %v5601_v1 = vsel %vm2663_vm8, 1.0, %v11417_v56  ;;  %v2792_v39 = vmul.f32 %v5597_v61, %v11621_v47  ;;  %v2822_v50 = vadd.f32 %v2821_v18, %v2791_v37  ;;  %v11623_v61 = vld [vmem:[#allocation84_spill] sm:$0xff] }
 0x29f   : > { %v2605_v17 = vmul.f32 %v2573_v63, %v7097_v45  ;;  %v8220_v20 = vadd.f32 %v2603_v19, %v7840_v48  ;;  %vm2665_vm10 = vcmp.ge.f32.partialorder %v8198_v28, 0.0  ;;  %v2758_v35 = vadd.f32 %v5601_v1, %v2757_v34  ;;  %v11624_v19 = vld [vmem:[#allocation38_spill] sm:$0xff] }
 0x2a0   : > { %v2575_v23 = vmul.f32 %v11620_v30, %v7909_v8  ;;  %v11622_v4 = vsub.f32 %v11477_v41, %v7906_v12  ;;  %v5602_v53 = vsel %vm2664_vm9, 1.0, %v11417_v56  ;;  %v2793_v0 = vmul.f32 %v5598_v9, %v11520_v33 }
 0x2a1   : > { %v2823_v30 = vadd.f32 %v2822_v50, %v2792_v39  ;;  %v2606_v18 = vmul.f32 %v2574_v31, %v7097_v45  ;;  %v8231_v37 = vadd.f32 %v2604_v16, %v11623_v61  ;;  %vm2666_vm11 = vcmp.ge.f32.partialorder %v8209_v6, 0.0  ;;  %v11628_v39 = vld [vmem:[#allocation44_spill] sm:$0xff] }
 0x2a2   : > { %v2576_v40 = vmul.f32 %v11622_v4, %v7909_v8  ;;  %v2759_v48 = vadd.f32 %v5602_v53, %v2758_v35  ;;  %v5603_v63 = vsel %vm2665_vm10, 1.0, %v11417_v56  ;;  %v2794_v34 = vmul.f32 %v5599_v42, %v11624_v19 }
 0x2a3   : > { %v2824_v47 = vadd.f32 %v2823_v30, %v2793_v0  ;;  %v2607_v4 = vmul.f32 %v2575_v23, %v7097_v45  ;;  %v8238_v28 = vadd.f32 %v2605_v17, %v11625_v32  ;;  %vm2667_vm12 = vcmp.ge.f32.partialorder %v8220_v20, 0.0  ;;  %v11629_v0 = vld [vmem:[#allocation86_spill] sm:$0xff] }
 0x2a4   : > { %v2760_v9 = vadd.f32 %v5603_v63, %v2759_v48  ;;  %v11627_v50 = vsub.f32 %v11478_v2, %v7906_v12  ;;  %v5604_v16 = vsel %vm2666_vm11, 1.0, %v11417_v56  ;;  %v2795_v35 = vmul.f32 %v5600_v49, %v11628_v39  ;;  %v11631_v30 = vld [vmem:[#allocation42_spill] sm:$0xff]  ;;  %v11632_v12 = vld [vmem:[#allocation85_spill] sm:$0xff] }
 0x2a5   : > { %11626 = vst [vmem:[#allocation21_spill] sm:$0xff] %v8238_v28  ;;  %v2825_v61 = vadd.f32 %v2824_v47, %v2794_v34  ;;  %v2608_v42 = vmul.f32 %v2576_v40, %v7097_v45  ;;  %v8249_v23 = vadd.f32 %v2606_v18, %v11629_v0  ;;  %vm2668_vm13 = vcmp.ge.f32.partialorder %v8231_v37, 0.0  ;;  %v11634_v40 = vld [vmem:[#allocation48_spill] sm:$0xff] }
 0x2a6   : > { %v2577_v31 = vmul.f32 %v11627_v50, %v7909_v8  ;;  %v2761_v32 = vadd.f32 %v5604_v16, %v2760_v9  ;;  %v5605_v17 = vsel %vm2667_vm12, 1.0, %v11417_v56  ;;  %v2796_v48 = vmul.f32 %v5601_v1, %v11631_v30  ;;  %v11635_v0 = vld [vmem:[#allocation88_spill] sm:$0xff] }
 0x2a7   : > { %11630 = vst [vmem:[#allocation27_spill] sm:$0xff] %v8249_v23  ;;  %v2826_v19 = vadd.f32 %v2825_v61, %v2795_v35  ;;  %v8255_v8 = vadd.f32 %v2607_v4, %v11632_v12  ;;  %vm2669_vm14 = vcmp.ge.f32.partialorder %v8238_v28, 0.0  ;;  %v5606_v47 = vsel %vm2668_vm13, 1.0, %v11417_v56  ;;  %v11637_v4 = vld [vmem:[#allocation46_spill] sm:$0xff] }
 0x2a8   : > { %v2762_v49 = vadd.f32 %v5605_v17, %v2761_v32  ;;  %v2797_v34 = vmul.f32 %v5602_v53, %v11634_v40  ;;  %v2609_v50 = vmul.f32 %v2577_v31, %v7097_v45  ;;  %v8262_v9 = vadd.f32 %v2608_v42, %v11635_v0  ;;  %v11638_v53 = vld [vmem:[#allocation52_spill] sm:$0xff]  ;;  %v11639_v31 = vld [vmem:[#allocation87_spill] sm:$0xff]  ;;  %v11641_v0 = vld [vmem:[#allocation50_spill] sm:$0xff] }
 0x2a9   : > { %11633 = vst [vmem:[#allocation25_spill] sm:$0xff] %v8255_v8  ;;  %v2827_v18 = vadd.f32 %v2826_v19, %v2796_v48  ;;  %vm2670_vm15 = vcmp.ge.f32.partialorder %v8249_v23, 0.0  ;;  %v5607_v35 = vsel %vm2669_vm14, 1.0, %v11417_v56  ;;  %v2798_v61 = vmul.f32 %v5603_v63, %v11637_v4 }
 0x2aa   : > { %11636 = vst [vmem:[#allocation31_spill] sm:$0xff] %v8262_v9  ;;  %v2763_v1 = vadd.f32 %v5606_v47, %v2762_v49  ;;  %vm2671_vm0 = vcmp.ge.f32.partialorder %v8255_v8, 0.0  ;;  %v5608_v30 = vsel %vm2670_vm15, 1.0, %v11417_v56  ;;  %v2799_v19 = vmul.f32 %v5604_v16, %v11638_v53  ;;  %v11642_v16 = vld [vmem:[#allocation56_spill] sm:$0xff]  ;;  %v11643_v53 = vld [vmem:[#allocation54_spill] sm:$0xff] }
 0x2ab   : > { %v2828_v12 = vadd.f32 %v2827_v18, %v2797_v34  ;;  %v8271_v40 = vadd.f32 %v2609_v50, %v11639_v31  ;;  %vm2672_vm1 = vcmp.ge.f32.partialorder %v8262_v9, 0.0  ;;  %v5609_v49 = vsel %vm2671_vm0, 1.0, %v11417_v56 }
 0x2ac   : > { %v2764_v32 = vadd.f32 %v5607_v35, %v2763_v1  ;;  %v2800_v23 = vmul.f32 %v5605_v17, %v11641_v0  ;;  %v5610_v18 = vsel %vm2672_vm1, 1.0, %v11417_v56  ;;  %v2803_v17 = vmul.f32 %v5608_v30, %v11543_v14 }
 0x2ad   : > { %v2829_v48 = vadd.f32 %v2828_v12, %v2798_v61  ;;  %11640 = vst [vmem:[#allocation29_spill] sm:$0xff] %v8271_v40  ;;  %vm2673_vm2 = vcmp.ge.f32.partialorder %v8271_v40, 0.0  ;;  %v2801_v61 = vmul.f32 %v5606_v47, %v11642_v16  ;;  %v11645_v40 = vld [vmem:[#allocation64_spill] sm:$0xff]  ;;  %v11646_v16 = vld [vmem:[#allocation62_spill] sm:$0xff] }
 0x2ae   : > { %v2765_v42 = vadd.f32 %v5608_v30, %v2764_v32  ;;  %v5611_v50 = vsel %vm2673_vm2, 1.0, %v11417_v56  ;;  %v2802_v32 = vmul.f32 %v5607_v35, %v11643_v53 }
 0x2af   : > { %v2830_v63 = vadd.f32 %v2829_v48, %v2799_v19  ;;  %v2806_v28 = vmul.f32 %v5611_v50, %v11646_v16  ;;  %v11666_v16 = vld [vmem:[#allocation92_spill] sm:$0xff] }
 0x2b0   : > { %v2766_v34 = vadd.f32 %v5609_v49, %v2765_v42  ;;  %v11644_v42 = vld [vmem:[#allocation58_spill] sm:$0xff] }
 0x2b1   : > { %v2831_v1 = vadd.f32 %v2830_v63, %v2800_v23  ;;  %v2804_v0 = vmul.f32 %v5609_v49, %v11644_v42 }
 0x2b2   : > { %v2767_v4 = vadd.f32 %v5610_v18, %v2766_v34  ;;  %v2805_v34 = vmul.f32 %v5610_v18, %v11645_v40  ;;  %v11647_v18 = vld [vmem:[#allocation75_spill] sm:$0xff] }
 0x2b3   : > { %v2832_v12 = vadd.f32 %v2831_v1, %v2801_v61 }
 0x2b4   : > { %v2768_v31 = vadd.f32 %v5611_v50, %v2767_v4 }
 0x2b5   : > { %v2833_v9 = vadd.f32 %v2832_v12, %v2802_v32 }
 0x2b6   : > { %v2769_v8 = vrot.slane %v2768_v31, 4 }
 0x2b7   : > { %v2834_v19 = vadd.f32 %v2833_v9, %v2803_v17 }
 0x2b8   : > { %v2770_v48 = vadd.f32 %v2769_v8, %v2768_v31 }
 0x2b9   : > { %v2835_v23 = vadd.f32 %v2834_v19, %v2804_v0 }
 0x2ba   : > { %v2771_v63 = vrot.slane %v2770_v48, 2 }
 0x2bb   : > { %v2836_v39 = vadd.f32 %v2835_v23, %v2805_v34  ;;  %v11648_v23 = vld [vmem:[#allocation67_spill] sm:$0xff]  ;;  %v11649_v34 = vld [vmem:[#allocation66_spill] sm:$0xff] }
 0x2bc   : > { %v2772_v47 = vadd.f32 %v2771_v63, %v2770_v48 }
 0x2bd   : > { %v2837_v1 = vadd.f32 %v2836_v39, %v2806_v28 }
 0x2be   : > { %v2773_v4 = vrot.slane %v2772_v47, 1 }
 0x2bf   : > { %v2838_v61 = vrot.slane %v2837_v1, 4 }
 0x2c0   : > { %v2774_v35 = vadd.f32 %v2773_v4, %v2772_v47  ;;  %v11651_v4 = vld [vmem:[#allocation69_spill] sm:$0xff] }
 0x2c1   : > { %v2839_v12 = vadd.f32 %v2838_v61, %v2837_v1 }
 0x2c2   : > { %v2844_v32 = vsub.f32 256.0, %v2774_v35  ;;  %v2846_v9 = vmax.f32 %v2774_v35, 1.0 }
 0x2c3   : > { %v2840_v53 = vrot.slane %v2839_v12, 2 }
 0x2c4   : > { %v2849_v30 = vmax.f32 %v2844_v32, 1.0  ;;  %v11652_v32 = vld [vmem:[#allocation68_spill] sm:$0xff] }
 0x2c5   : > { %v2841_v8 = vadd.f32 %v2840_v53, %v2839_v12  ;;  %v11650_v53 = vld [vmem:[#allocation65_spill] sm:$0xff] }
 0x2c6   : > { %6150 = vrcp.f32 %v2849_v30 }
 0x2c7   : > { %6152 = vrcp.f32 %v2846_v9  ;;  %v2842_v49 = vrot.slane %v2841_v8, 1  ;;  %v11653_v9 = vld [vmem:[#allocation71_spill] sm:$0xff] }
 0x2c9   : > { %v2843_v0 = vadd.f32 %v2842_v49, %v2841_v8 }
 0x2cb   : > { %v2845_v17 = vsub.f32 %v11647_v18, %v2843_v0 }
 0x2d0   : > { %v6151_v31 = vpop.eup %6150 }
 0x2d1   : > { %v6153_v19 = vpop.eup %6152  ;;  %v2851_v48 = vmul.f32 %v6151_v31, %v2845_v17  ;;  %v11654_v17 = vld [vmem:[#allocation70_spill] sm:$0xff] }
 0x2d2   : > { %v2848_v50 = vmul.f32 %v6153_v19, %v2843_v0 }
 0x2d4   : > { %v2852_v28 = vsub.f32 %v2848_v50, %v2851_v48  ;;  %v8286_v39 = vadd.f32 %v2851_v48, %v2848_v50  ;;  %v11655_v50 = vld [vmem:[#allocation73_spill] sm:$0xff] }
 0x2d6   : > { %v8289_v63 = vmul.f32 %v2852_v28, %v11648_v23  ;;  %v2855_v47 = vsub.f32 %v11649_v34, %v8286_v39  ;;  %v2856_v1 = vsub.f32 %v11650_v53, %v8286_v39  ;;  %v2857_v61 = vsub.f32 %v11651_v4, %v8286_v39 }
 0x2d7   : > { %v2858_v30 = vsub.f32 %v11652_v32, %v8286_v39  ;;  %v2859_v8 = vsub.f32 %v11653_v9, %v8286_v39  ;;  %v2860_v19 = vsub.f32 %v11654_v17, %v8286_v39  ;;  %v2861_v28 = vsub.f32 %v11655_v50, %v8286_v39  ;;  %v11656_v32 = vld [vmem:[#allocation90_spill] sm:$0xff]  ;;  %v11660_v17 = vld [vmem:[#allocation76_spill] sm:$0xff] }
 0x2d8   : > { %v2887_v35 = vmul.f32 %v2855_v47, %v8289_v63  ;;  %v2888_v12 = vmul.f32 %v2856_v1, %v8289_v63  ;;  %v2889_v49 = vmul.f32 %v2857_v61, %v8289_v63  ;;  %v11657_v61 = vld [vmem:[#allocation89_spill] sm:$0xff]  ;;  %v2863_v53 = vsub.f32 %v11660_v17, %v8286_v39  ;;  %v11662_v50 = vld [vmem:[#allocation78_spill] sm:$0xff]  ;;  %v11668_v17 = vld [vmem:[#allocation91_spill] sm:$0xff] }
 0x2d9   : > { %v2890_v48 = vmul.f32 %v2858_v30, %v8289_v63  ;;  %v2891_v47 = vmul.f32 %v2859_v8, %v8289_v63  ;;  %v11661_v30 = vld [vmem:[#allocation74_spill] sm:$0xff]  ;;  %v2865_v8 = vsub.f32 %v11662_v50, %v8286_v39  ;;  %v2893_v50 = vmul.f32 %v2861_v28, %v8289_v63 }
 0x2da   : > { %v2919_v0 = vmul.f32 %v2887_v35, %v7097_v45  ;;  %v2920_v31 = vmul.f32 %v2888_v12, %v7097_v45  ;;  %v2921_v1 = vmul.f32 %v2889_v49, %v7097_v45  ;;  %v11659_v35 = vld [vmem:[#allocation72_spill] sm:$0xff]  ;;  %v2864_v34 = vsub.f32 %v11661_v30, %v8286_v39  ;;  %v11663_v49 = vld [vmem:[#allocation77_spill] sm:$0xff] }
 0x2db   : > { %v2862_v12 = vsub.f32 %v11659_v35, %v8286_v39  ;;  %v2866_v23 = vsub.f32 %v11663_v49, %v8286_v39  ;;  %v11665_v35 = vld [vmem:[#allocation79_spill] sm:$0xff]  ;;  %v2923_v49 = vmul.f32 %v2891_v47, %v7097_v45 }
 0x2dc   : > { %v8314_v9 = vadd.f32 %v2919_v0, %v11656_v32  ;;  %v8317_v4 = vadd.f32 %v2920_v31, %v11657_v61  ;;  %v11664_v32 = vld [vmem:[#allocation80_spill] sm:$0xff]  ;;  %v2892_v31 = vmul.f32 %v2860_v19, %v8289_v63  ;;  %v2922_v61 = vmul.f32 %v2890_v48, %v7097_v45 }
 0x2dd   : > { %v2867_v0 = vsub.f32 %v11664_v32, %v8286_v39  ;;  %v2868_v18 = vsub.f32 %v11665_v35, %v8286_v39  ;;  %v8342_v40 = vadd.f32 %v2921_v1, %v11666_v16  ;;  %v2894_v47 = vmul.f32 %v2862_v12, %v8289_v63  ;;  %v11670_v12 = vld [vmem:[#allocation96_spill] sm:$0xff] }
 0x2de   : > { %11658 = vst [vmem:[#allocation35_spill] sm:$0xff] %v8317_v4  ;;  %vm2983_vm3 = vcmp.ge.f32.partialorder %v8314_v9, 0.0  ;;  %vm2984_vm4 = vcmp.ge.f32.partialorder %v8317_v4, 0.0  ;;  %v2924_v1 = vmul.f32 %v2892_v31, %v7097_v45  ;;  %v8359_v35 = vadd.f32 %v2922_v61, %v11668_v17 }
 0x2df   : > { %11667 = vst [vmem:[#allocation33_spill] sm:$0xff] %v8342_v40  ;;  %v5612_v30 = vsel %vm2983_vm3, 1.0, %v11417_v56  ;;  %v5613_v28 = vsel %vm2984_vm4, 1.0, %v11417_v56  ;;  %v2895_v32 = vmul.f32 %v2863_v53, %v8289_v63  ;;  %v2925_v16 = vmul.f32 %v2893_v50, %v7097_v45 }
 0x2e0   : > { %11669 = vst [vmem:[#allocation39_spill] sm:$0xff] %v8359_v35  ;;  %v8370_v4 = vadd.f32 %v2923_v49, %v11670_v12  ;;  %vm2985_vm5 = vcmp.ge.f32.partialorder %v8342_v40, 0.0  ;;  %v2896_v48 = vmul.f32 %v2864_v34, %v8289_v63  ;;  %v2926_v53 = vmul.f32 %v2894_v47, %v7097_v45 }
 0x2e1   : > { %v8382_v50 = vadd.f32 %v2924_v1, %v8002_v29  ;;  %vm2986_vm6 = vcmp.ge.f32.partialorder %v8359_v35, 0.0  ;;  %v3079_v49 = vadd.f32 %v5613_v28, %v5612_v30  ;;  %v2897_v31 = vmul.f32 %v2865_v8, %v8289_v63  ;;  %v11672_v1 = vld [vmem:[#allocation9_spill] sm:$0xff]  ;;  %v11673_v35 = vld [vmem:[#allocation8_spill] sm:$0xff] }
 0x2e2   : > { %11671 = vst [vmem:[#allocation37_spill] sm:$0xff] %v8370_v4  ;;  %v5614_v61 = vsel %vm2985_vm5, 1.0, %v11417_v56  ;;  %v2927_v34 = vmul.f32 %v2895_v32, %v7097_v45  ;;  %v8393_v47 = vadd.f32 %v2925_v16, %v8013_v13  ;;  %vm2987_vm7 = vcmp.ge.f32.partialorder %v8370_v4, 0.0 }
 0x2e3   : > { %v3080_v29 = vadd.f32 %v5614_v61, %v3079_v49  ;;  %v2898_v17 = vmul.f32 %v2866_v23, %v8289_v63  ;;  %v5615_v8 = vsel %vm2986_vm6, 1.0, %v11417_v56  ;;  %v2928_v19 = vmul.f32 %v2896_v48, %v7097_v45 }
 0x2e4   : > { %v8404_v32 = vadd.f32 %v2926_v53, %v8024_v46  ;;  %vm2988_vm8 = vcmp.ge.f32.partialorder %v8382_v50, 0.0  ;;  %v2899_v16 = vmul.f32 %v2867_v0, %v8289_v63  ;;  %v5616_v49 = vsel %vm2987_vm7, 1.0, %v11417_v56 }
 0x2e5   : > { %v3081_v13 = vadd.f32 %v5615_v8, %v3080_v29  ;;  %v3116_v4 = vmul.f32 %v5612_v30, %v11672_v1  ;;  %v3117_v12 = vmul.f32 %v5613_v28, %v11673_v35  ;;  %v2929_v23 = vmul.f32 %v2897_v31, %v7097_v45 }
 0x2e6   : > { %v8413_v40 = vadd.f32 %v2927_v34, %v8033_v43  ;;  %vm2989_vm9 = vcmp.ge.f32.partialorder %v8393_v47, 0.0  ;;  %v2900_v53 = vmul.f32 %v2868_v18, %v8289_v63  ;;  %v5617_v30 = vsel %vm2988_vm8, 1.0, %v11417_v56 }
 0x2e7   : > { %v3082_v46 = vadd.f32 %v5616_v49, %v3081_v13  ;;  %v2930_v28 = vmul.f32 %v2898_v17, %v7097_v45  ;;  %v8424_v31 = vadd.f32 %v2928_v19, %v8044_v51  ;;  %vm2990_vm10 = vcmp.ge.f32.partialorder %v8404_v32, 0.0 }
 0x2e8   : > { %v11674_v34 = vsub.f32 %v11456_v22, %v8286_v39  ;;  %v5618_v13 = vsel %vm2989_vm9, 1.0, %v11417_v56  ;;  %v3118_v0 = vmul.f32 %v5614_v61, %v6837_v26  ;;  %v3148_v18 = vadd.f32 %v3117_v12, %v3116_v4 }
 0x2e9   : > { %v3083_v43 = vadd.f32 %v5617_v30, %v3082_v46  ;;  %v2931_v48 = vmul.f32 %v2899_v16, %v7097_v45  ;;  %v8435_v17 = vadd.f32 %v2929_v23, %v8055_v24  ;;  %vm2991_vm11 = vcmp.ge.f32.partialorder %v8413_v40, 0.0 }
 0x2ea   : > { %v2901_v29 = vmul.f32 %v11674_v34, %v8289_v63  ;;  %v11676_v19 = vsub.f32 %v11457_v62, %v8286_v39  ;;  %v5619_v34 = vsel %vm2990_vm10, 1.0, %v11417_v56  ;;  %v3119_v35 = vmul.f32 %v5615_v8, %v6830_v21 }
 0x2eb   : > { %11675 = vst [vmem:[#allocation43_spill] sm:$0xff] %v8435_v17  ;;  %v3084_v51 = vadd.f32 %v5618_v13, %v3083_v43  ;;  %v3149_v1 = vadd.f32 %v3148_v18, %v3118_v0  ;;  %v2932_v4 = vmul.f32 %v2900_v53, %v7097_v45  ;;  %v8446_v61 = vadd.f32 %v2930_v28, %v8066_v7  ;;  %v11679_v43 = vld [vmem:[#allocation13_spill] sm:$0xff] }
 0x2ec   : > { %v2902_v46 = vmul.f32 %v11676_v19, %v8289_v63  ;;  %vm2992_vm12 = vcmp.ge.f32.partialorder %v8424_v31, 0.0  ;;  %v11678_v12 = vsub.f32 %v11459_v10, %v8286_v39  ;;  %v5620_v23 = vsel %vm2991_vm11, 1.0, %v11417_v56 }
 0x2ed   : > { %11677 = vst [vmem:[#allocation41_spill] sm:$0xff] %v8446_v61  ;;  %v3085_v24 = vadd.f32 %v5619_v34, %v3084_v51  ;;  %v3120_v19 = vmul.f32 %v5616_v49, %v11679_v43  ;;  %v3150_v26 = vadd.f32 %v3149_v1, %v3119_v35  ;;  %v2933_v8 = vmul.f32 %v2901_v29, %v7097_v45  ;;  %v11682_v51 = vld [vmem:[#allocation12_spill] sm:$0xff]  ;;  %v11683_v1 = vld [vmem:[#allocation95_spill] sm:$0xff] }
 0x2ee   : > { %v2903_v16 = vmul.f32 %v11678_v12, %v8289_v63  ;;  %v8457_v0 = vadd.f32 %v2931_v48, %v8077_v3  ;;  %vm2993_vm13 = vcmp.ge.f32.partialorder %v8435_v17, 0.0  ;;  %v11681_v53 = vsub.f32 %v11460_v25, %v8286_v39 }
 0x2ef   : > { %v3086_v7 = vadd.f32 %v5620_v23, %v3085_v24  ;;  %v5621_v18 = vsel %vm2992_vm12, 1.0, %v11417_v56  ;;  %v3121_v12 = vmul.f32 %v5617_v30, %v11682_v51  ;;  %v3151_v21 = vadd.f32 %v3150_v26, %v3120_v19  ;;  %v11687_v30 = vld [vmem:[#allocation98_spill] sm:$0xff] }
 0x2f0   : > { %11680 = vst [vmem:[#allocation47_spill] sm:$0xff] %v8457_v0  ;;  %v2904_v28 = vmul.f32 %v11681_v53, %v8289_v63  ;;  %v2934_v35 = vmul.f32 %v2902_v46, %v7097_v45  ;;  %v8468_v49 = vadd.f32 %v2932_v4, %v11683_v1  ;;  %vm2994_vm14 = vcmp.ge.f32.partialorder %v8446_v61, 0.0  ;;  %v11686_v53 = vld [vmem:[#allocation16_spill] sm:$0xff] }
 0x2f1   : > { %v3087_v3 = vadd.f32 %v5621_v18, %v3086_v7  ;;  %v11685_v48 = vsub.f32 %v11461_v54, %v8286_v39  ;;  %v5622_v24 = vsel %vm2993_vm13, 1.0, %v11417_v56  ;;  %v3122_v43 = vmul.f32 %v5618_v13, %v11686_v53  ;;  %v11691_v13 = vld [vmem:[#allocation97_spill] sm:$0xff] }
 0x2f2   : > { %11684 = vst [vmem:[#allocation45_spill] sm:$0xff] %v8468_v49  ;;  %v3152_v17 = vadd.f32 %v3151_v21, %v3121_v12  ;;  %v2935_v26 = vmul.f32 %v2903_v16, %v7097_v45  ;;  %v8479_v46 = vadd.f32 %v2933_v8, %v11687_v30  ;;  %vm2995_vm15 = vcmp.ge.f32.partialorder %v8457_v0, 0.0 }
 0x2f3   : > { %v2905_v29 = vmul.f32 %v11685_v48, %v8289_v63  ;;  %v3088_v4 = vadd.f32 %v5622_v24, %v3087_v3  ;;  %v11689_v19 = vsub.f32 %v11462_v57, %v8286_v39  ;;  %v5623_v1 = vsel %vm2994_vm14, 1.0, %v11417_v56  ;;  %v11690_v48 = vld [vmem:[#allocation15_spill] sm:$0xff] }
 0x2f4   : > { %11688 = vst [vmem:[#allocation51_spill] sm:$0xff] %v8479_v46  ;;  %v3123_v51 = vmul.f32 %v5619_v34, %v11690_v48  ;;  %v3153_v61 = vadd.f32 %v3152_v17, %v3122_v43  ;;  %v2936_v21 = vmul.f32 %v2904_v28, %v7097_v45  ;;  %v8490_v16 = vadd.f32 %v2934_v35, %v11691_v13  ;;  %v11695_v34 = vld [vmem:[#allocation14_spill] sm:$0xff] }
 0x2f5   : > { %v2906_v7 = vmul.f32 %v11689_v19, %v8289_v63  ;;  %vm2996_vm0 = vcmp.ge.f32.partialorder %v8468_v49, 0.0  ;;  %v3089_v8 = vadd.f32 %v5623_v1, %v3088_v4  ;;  %v11693_v12 = vsub.f32 %v11463_v38, %v8286_v39  ;;  %v11694_v19 = vld [vmem:[#allocation20_spill] sm:$0xff] }
 0x2f6   : > { %11692 = vst [vmem:[#allocation49_spill] sm:$0xff] %v8490_v16  ;;  %v5624_v30 = vsel %vm2995_vm15, 1.0, %v11417_v56  ;;  %v3124_v53 = vmul.f32 %v5620_v23, %v11694_v19  ;;  %v3154_v0 = vadd.f32 %v3153_v61, %v3123_v51  ;;  %v2937_v17 = vmul.f32 %v2905_v29, %v7097_v45  ;;  %v11699_v23 = vld [vmem:[#allocation94_spill] sm:$0xff] }
 0x2f7   : > { %v2907_v3 = vmul.f32 %v11693_v12, %v8289_v63  ;;  %v8501_v43 = vadd.f32 %v2935_v26, %v11695_v34  ;;  %vm2997_vm1 = vcmp.ge.f32.partialorder %v8479_v46, 0.0  ;;  %v3090_v28 = vadd.f32 %v5624_v30, %v3089_v8  ;;  %v11698_v12 = vld [vmem:[#allocation18_spill] sm:$0xff] }
 0x2f8   : > { %v11697_v35 = vsub.f32 %v11465_v52, %v8286_v39  ;;  %v5625_v13 = vsel %vm2996_vm0, 1.0, %v11417_v56  ;;  %v3125_v48 = vmul.f32 %v5621_v18, %v11698_v12  ;;  %v3155_v49 = vadd.f32 %v3154_v0, %v3124_v53  ;;  %v11703_v18 = vld [vmem:[#allocation19_spill] sm:$0xff] }
 0x2f9   : > { %11696 = vst [vmem:[#allocation55_spill] sm:$0xff] %v8501_v43  ;;  %v2938_v61 = vmul.f32 %v2906_v7, %v7097_v45  ;;  %v8512_v51 = vadd.f32 %v2936_v21, %v11699_v23  ;;  %vm2998_vm2 = vcmp.ge.f32.partialorder %v8490_v16, 0.0  ;;  %v3091_v29 = vadd.f32 %v5625_v13, %v3090_v28 }
 0x2fa   : > { %v2908_v4 = vmul.f32 %v11697_v35, %v8289_v63  ;;  %v11701_v26 = vsub.f32 %v11466_v44, %v8286_v39  ;;  %v5626_v34 = vsel %vm2997_vm1, 1.0, %v11417_v56  ;;  %v11702_v35 = vld [vmem:[#allocation24_spill] sm:$0xff]  ;;  %v3156_v46 = vadd.f32 %v3155_v49, %v3125_v48 }
 0x2fb   : > { %11700 = vst [vmem:[#allocation53_spill] sm:$0xff] %v8512_v51  ;;  %v3126_v19 = vmul.f32 %v5622_v24, %v11702_v35  ;;  %v2939_v0 = vmul.f32 %v2907_v3, %v7097_v45  ;;  %v8523_v53 = vadd.f32 %v2937_v17, %v11703_v18  ;;  %vm2999_vm3 = vcmp.ge.f32.partialorder %v8501_v43, 0.0  ;;  %v11706_v24 = vld [vmem:[#allocation93_spill] sm:$0xff] }
 0x2fc   : > { %v2909_v8 = vmul.f32 %v11701_v26, %v8289_v63  ;;  %v3092_v7 = vadd.f32 %v5626_v34, %v3091_v29  ;;  %v11704_v21 = vsub.f32 %v11468_v60, %v8286_v39  ;;  %v5627_v23 = vsel %vm2998_vm2, 1.0, %v11417_v56  ;;  %v11705_v26 = vld [vmem:[#allocation22_spill] sm:$0xff] }
 0x2fd   : > { %v3127_v12 = vmul.f32 %v5623_v1, %v11705_v26  ;;  %v3157_v16 = vadd.f32 %v3156_v46, %v3126_v19  ;;  %v2940_v49 = vmul.f32 %v2908_v4, %v7097_v45  ;;  %v8534_v48 = vadd.f32 %v2938_v61, %v11706_v24  ;;  %v11709_v1 = vld [vmem:[#allocation17_spill] sm:$0xff] }
 0x2fe   : > { %v2910_v28 = vmul.f32 %v11704_v21, %v8289_v63  ;;  %vm3000_vm4 = vcmp.ge.f32.partialorder %v8512_v51, 0.0  ;;  %v3093_v3 = vadd.f32 %v5627_v23, %v3092_v7  ;;  %v11707_v17 = vsub.f32 %v11469_v55, %v8286_v39  ;;  %v11708_v21 = vld [vmem:[#allocation28_spill] sm:$0xff] }
 0x2ff   : > { %v5628_v18 = vsel %vm2999_vm3, 1.0, %v11417_v56  ;;  %v3128_v35 = vmul.f32 %v5624_v30, %v11708_v21  ;;  %v3158_v43 = vadd.f32 %v3157_v16, %v3127_v12  ;;  %v2941_v46 = vmul.f32 %v2909_v8, %v7097_v45 }
 0x300   : > { %v2911_v29 = vmul.f32 %v11707_v17, %v8289_v63  ;;  %v8545_v19 = vadd.f32 %v2939_v0, %v11709_v1  ;;  %vm3001_vm5 = vcmp.ge.f32.partialorder %v8523_v53, 0.0  ;;  %v3094_v4 = vadd.f32 %v5628_v18, %v3093_v3  ;;  %v11712_v17 = vld [vmem:[#allocation26_spill] sm:$0xff]  ;;  %v11714_v1 = vld [vmem:[#allocation32_spill] sm:$0xff] }
 0x301   : > { %v11711_v61 = vsub.f32 %v11470_v59, %v8286_v39  ;;  %v5629_v24 = vsel %vm3000_vm4, 1.0, %v11417_v56  ;;  %v3129_v26 = vmul.f32 %v5625_v13, %v11712_v17  ;;  %v3159_v51 = vadd.f32 %v3158_v43, %v3128_v35 }
 0x302   : > { %11710 = vst [vmem:[#allocation59_spill] sm:$0xff] %v8545_v19  ;;  %v2942_v16 = vmul.f32 %v2910_v28, %v7097_v45  ;;  %v8556_v30 = vadd.f32 %v2940_v49, %v8176_v15  ;;  %vm3002_vm6 = vcmp.ge.f32.partialorder %v8534_v48, 0.0  ;;  %v3095_v12 = vadd.f32 %v5629_v24, %v3094_v4  ;;  %v11716_v4 = vld [vmem:[#allocation30_spill] sm:$0xff] }
 0x303   : > { %v2912_v7 = vmul.f32 %v11711_v61, %v8289_v63  ;;  %v11713_v8 = vsub.f32 %v11503_v27, %v8286_v39  ;;  %v5630_v3 = vsel %vm3001_vm5, 1.0, %v11417_v56  ;;  %v3130_v61 = vmul.f32 %v5626_v34, %v11714_v1  ;;  %v11717_v34 = vld [vmem:[#allocation23_spill] sm:$0xff] }
 0x304   : > { %v3160_v21 = vadd.f32 %v3159_v51, %v3129_v26  ;;  %v2943_v43 = vmul.f32 %v2911_v29, %v7097_v45  ;;  %v8567_v13 = vadd.f32 %v2941_v46, %v8187_v11  ;;  %vm3003_vm7 = vcmp.ge.f32.partialorder %v8545_v19, 0.0 }
 0x305   : > { %v2913_v0 = vmul.f32 %v11713_v8, %v8289_v63  ;;  %v3096_v15 = vadd.f32 %v5630_v3, %v3095_v12  ;;  %v11715_v35 = vsub.f32 %v11508_v58, %v8286_v39  ;;  %v5631_v49 = vsel %vm3002_vm6, 1.0, %v11417_v56 }
 0x306   : > { %v3131_v8 = vmul.f32 %v5627_v23, %v11716_v4  ;;  %v3161_v17 = vadd.f32 %v3160_v21, %v3130_v61  ;;  %v2944_v51 = vmul.f32 %v2912_v7, %v7097_v45  ;;  %v8578_v26 = vadd.f32 %v2942_v16, %v11717_v34  ;;  %v11721_v34 = vld [vmem:[#allocation34_spill] sm:$0xff] }
 0x307   : > { %v2914_v28 = vmul.f32 %v11715_v35, %v8289_v63  ;;  %vm3004_vm8 = vcmp.ge.f32.partialorder %v8556_v30, 0.0  ;;  %v3097_v11 = vadd.f32 %v5631_v49, %v3096_v15  ;;  %v11718_v29 = vsub.f32 %v11474_v36, %v8286_v39  ;;  %v11719_v35 = vld [vmem:[#allocation36_spill] sm:$0xff] }
 0x308   : > { %v5632_v12 = vsel %vm3003_vm7, 1.0, %v11417_v56  ;;  %v3132_v1 = vmul.f32 %v5628_v18, %v11719_v35  ;;  %v3162_v19 = vadd.f32 %v3161_v17, %v3131_v8  ;;  %v2945_v23 = vmul.f32 %v2913_v0, %v7097_v45 }
 0x309   : > { %v2915_v46 = vmul.f32 %v11718_v29, %v8289_v63  ;;  %v8589_v21 = vadd.f32 %v2943_v43, %v8209_v6  ;;  %vm3005_vm9 = vcmp.ge.f32.partialorder %v8567_v13, 0.0  ;;  %v3098_v7 = vadd.f32 %v5632_v12, %v3097_v11 }
 0x30a   : > { %v11720_v16 = vsub.f32 %v11475_v5, %v8286_v39  ;;  %v5633_v15 = vsel %vm3004_vm8, 1.0, %v11417_v56  ;;  %v3133_v29 = vmul.f32 %v5629_v24, %v11721_v34  ;;  %v3163_v4 = vadd.f32 %v3162_v19, %v3132_v1  ;;  %v11724_v34 = vld [vmem:[#allocation21_spill] sm:$0xff] }
 0x30b   : > { %v2946_v18 = vmul.f32 %v2914_v28, %v7097_v45  ;;  %v8600_v17 = vadd.f32 %v2944_v51, %v8220_v20  ;;  %vm3006_vm10 = vcmp.ge.f32.partialorder %v8578_v26, 0.0  ;;  %v3099_v6 = vadd.f32 %v5633_v15, %v3098_v7  ;;  %v11723_v28 = vld [vmem:[#allocation38_spill] sm:$0xff] }
 0x30c   : > { %v2916_v61 = vmul.f32 %v11720_v16, %v8289_v63  ;;  %v11722_v0 = vsub.f32 %v11477_v41, %v8286_v39  ;;  %v5634_v8 = vsel %vm3005_vm9, 1.0, %v11417_v56  ;;  %v3134_v11 = vmul.f32 %v5630_v3, %v11520_v33 }
 0x30d   : > { %v3164_v16 = vadd.f32 %v3163_v4, %v3133_v29  ;;  %v2947_v19 = vmul.f32 %v2915_v46, %v7097_v45  ;;  %v8611_v24 = vadd.f32 %v2945_v23, %v8231_v37  ;;  %vm3007_vm11 = vcmp.ge.f32.partialorder %v8589_v21, 0.0  ;;  %v11726_v23 = vld [vmem:[#allocation44_spill] sm:$0xff] }
 0x30e   : > { %v2917_v43 = vmul.f32 %v11722_v0, %v8289_v63  ;;  %v3100_v20 = vadd.f32 %v5634_v8, %v3099_v6  ;;  %v5635_v1 = vsel %vm3006_vm10, 1.0, %v11417_v56  ;;  %v3135_v51 = vmul.f32 %v5631_v49, %v11723_v28 }
 0x30f   : > { %v3165_v7 = vadd.f32 %v3164_v16, %v3134_v11  ;;  %v2948_v0 = vmul.f32 %v2916_v61, %v7097_v45  ;;  %v8618_v35 = vadd.f32 %v2946_v18, %v11724_v34  ;;  %vm3008_vm12 = vcmp.ge.f32.partialorder %v8600_v17, 0.0  ;;  %v11727_v11 = vld [vmem:[#allocation27_spill] sm:$0xff]  ;;  %v11729_v16 = vld [vmem:[#allocation42_spill] sm:$0xff] }
 0x310   : > { %v3101_v3 = vadd.f32 %v5635_v1, %v3100_v20  ;;  %v11725_v37 = vsub.f32 %v11478_v2, %v8286_v39  ;;  %v5636_v46 = vsel %vm3007_vm11, 1.0, %v11417_v56  ;;  %v3136_v29 = vmul.f32 %v5632_v12, %v11726_v23  ;;  %v11730_v39 = vld [vmem:[#allocation25_spill] sm:$0xff] }
 0x311   : > { %v3166_v6 = vadd.f32 %v3165_v7, %v3135_v51  ;;  %v2949_v49 = vmul.f32 %v2917_v43, %v7097_v45  ;;  %v8629_v61 = vadd.f32 %v2947_v19, %v11727_v11  ;;  %vm3009_vm13 = vcmp.ge.f32.partialorder %v8611_v24, 0.0  ;;  %v11732_v43 = vld [vmem:[#allocation48_spill] sm:$0xff]  ;;  %v11733_v11 = vld [vmem:[#allocation31_spill] sm:$0xff] }
 0x312   : > { %v2918_v4 = vmul.f32 %v11725_v37, %v8289_v63  ;;  %v3102_v34 = vadd.f32 %v5636_v46, %v3101_v3  ;;  %v5637_v18 = vsel %vm3008_vm12, 1.0, %v11417_v56  ;;  %v3137_v20 = vmul.f32 %v5633_v15, %v11729_v16 }
 0x313   : > { %11728 = vst [vmem:[#allocation57_spill] sm:$0xff] %v8629_v61  ;;  %v3167_v28 = vadd.f32 %v3166_v6, %v3136_v29  ;;  %v8635_v63 = vadd.f32 %v2948_v0, %v11730_v39  ;;  %vm3010_vm14 = vcmp.ge.f32.partialorder %v8618_v35, 0.0  ;;  %v5638_v51 = vsel %vm3009_vm13, 1.0, %v11417_v56  ;;  %v11735_v0 = vld [vmem:[#allocation46_spill] sm:$0xff] }
 0x314   : > { %v3103_v12 = vadd.f32 %v5637_v18, %v3102_v34  ;;  %v3138_v7 = vmul.f32 %v5634_v8, %v11732_v43  ;;  %v2950_v37 = vmul.f32 %v2918_v4, %v7097_v45  ;;  %v8642_v3 = vadd.f32 %v2949_v49, %v11733_v11  ;;  %v11736_v8 = vld [vmem:[#allocation52_spill] sm:$0xff]  ;;  %v11737_v4 = vld [vmem:[#allocation29_spill] sm:$0xff]  ;;  %v11739_v11 = vld [vmem:[#allocation50_spill] sm:$0xff] }
 0x315   : > { %11731 = vst [vmem:[#allocation63_spill] sm:$0xff] %v8635_v63  ;;  %v3168_v19 = vadd.f32 %v3167_v28, %v3137_v20  ;;  %vm3011_vm15 = vcmp.ge.f32.partialorder %v8629_v61, 0.0  ;;  %v5639_v29 = vsel %vm3010_vm14, 1.0, %v11417_v56  ;;  %v3139_v6 = vmul.f32 %v5635_v1, %v11735_v0 }
 0x316   : > { %11734 = vst [vmem:[#allocation61_spill] sm:$0xff] %v8642_v3  ;;  %v3104_v15 = vadd.f32 %v5638_v51, %v3103_v12  ;;  %vm3012_vm0 = vcmp.ge.f32.partialorder %v8635_v63, 0.0  ;;  %v5640_v16 = vsel %vm3011_vm15, 1.0, %v11417_v56  ;;  %v3140_v28 = vmul.f32 %v5636_v46, %v11736_v8  ;;  %v11740_v46 = vld [vmem:[#allocation56_spill] sm:$0xff]  ;;  %v11741_v8 = vld [vmem:[#allocation54_spill] sm:$0xff] }
 0x317   : > { %v3169_v39 = vadd.f32 %v3168_v19, %v3138_v7  ;;  %v8651_v43 = vadd.f32 %v2950_v37, %v11737_v4  ;;  %vm3013_vm1 = vcmp.ge.f32.partialorder %v8642_v3, 0.0  ;;  %v5641_v12 = vsel %vm3012_vm0, 1.0, %v11417_v56 }
 0x318   : > { %v3105_v34 = vadd.f32 %v5639_v29, %v3104_v15  ;;  %v3141_v61 = vmul.f32 %v5637_v18, %v11739_v11  ;;  %v5642_v19 = vsel %vm3013_vm1, 1.0, %v11417_v56  ;;  %v3144_v18 = vmul.f32 %v5640_v16, %v11543_v14  ;;  %v11742_v11 = vld [vmem:[#allocation64_spill] sm:$0xff] }
 0x319   : > { %v3170_v20 = vadd.f32 %v3169_v39, %v3139_v6  ;;  %11738 = vst [vmem:[#allocation81_spill] sm:$0xff] %v8651_v43  ;;  %vm3014_vm2 = vcmp.ge.f32.partialorder %v8651_v43, 0.0  ;;  %v3142_v6 = vmul.f32 %v5638_v51, %v11740_v46  ;;  %v11743_v46 = vld [vmem:[#allocation62_spill] sm:$0xff] }
 0x31a   : > { %v3106_v49 = vadd.f32 %v5640_v16, %v3105_v34  ;;  %v5643_v37 = vsel %vm3014_vm2, 1.0, %v11417_v56  ;;  %v3143_v34 = vmul.f32 %v5639_v29, %v11741_v8 }
 0x31b   : > { %v3171_v1 = vadd.f32 %v3170_v20, %v3140_v28  ;;  %v3147_v23 = vmul.f32 %v5643_v37, %v11743_v46 }
 0x31c   : > { %v3107_v7 = vadd.f32 %v5641_v12, %v3106_v49  ;;  %v3145_v49 = vmul.f32 %v5641_v12, %v11644_v42 }
 0x31d   : > { %v3172_v15 = vadd.f32 %v3171_v1, %v3141_v61 }
 0x31e   : > { %v3108_v0 = vadd.f32 %v5642_v19, %v3107_v7  ;;  %v3146_v7 = vmul.f32 %v5642_v19, %v11742_v11  ;;  %v11744_v19 = vld [vmem:[#allocation75_spill] sm:$0xff] }
 0x31f   : > { %v3173_v39 = vadd.f32 %v3172_v15, %v3142_v6 }
 0x320   : > { %v3109_v4 = vadd.f32 %v5643_v37, %v3108_v0 }
 0x321   : > { %v3174_v3 = vadd.f32 %v3173_v39, %v3143_v34 }
 0x322   : > { %v3110_v63 = vrot.slane %v3109_v4, 4 }
 0x323   : > { %v3175_v28 = vadd.f32 %v3174_v3, %v3144_v18 }
 0x324   : > { %v3111_v20 = vadd.f32 %v3110_v63, %v3109_v4 }
 0x325   : > { %v3176_v61 = vadd.f32 %v3175_v28, %v3145_v49 }
 0x326   : > { %v3112_v1 = vrot.slane %v3111_v20, 2 }
 0x327   : > { %v3177_v43 = vadd.f32 %v3176_v61, %v3146_v7  ;;  %v11745_v61 = vld [vmem:[#allocation67_spill] sm:$0xff]  ;;  %v11746_v7 = vld [vmem:[#allocation66_spill] sm:$0xff] }
 0x328   : > { %v3113_v51 = vadd.f32 %v3112_v1, %v3111_v20 }
 0x329   : > { %v3178_v15 = vadd.f32 %v3177_v43, %v3147_v23 }
 0x32a   : > { %v3114_v0 = vrot.slane %v3113_v51, 1 }
 0x32b   : > { %v3179_v6 = vrot.slane %v3178_v15, 4 }
 0x32c   : > { %v3115_v29 = vadd.f32 %v3114_v0, %v3113_v51  ;;  %v11748_v0 = vld [vmem:[#allocation69_spill] sm:$0xff] }
 0x32d   : > { %v3180_v39 = vadd.f32 %v3179_v6, %v3178_v15 }
 0x32e   : > { %v3185_v34 = vsub.f32 256.0, %v3115_v29  ;;  %v3187_v3 = vmax.f32 %v3115_v29, 1.0 }
 0x32f   : > { %v3181_v8 = vrot.slane %v3180_v39, 2 }
 0x330   : > { %v3190_v16 = vmax.f32 %v3185_v34, 1.0  ;;  %v11749_v34 = vld [vmem:[#allocation68_spill] sm:$0xff] }
 0x331   : > { %v3182_v63 = vadd.f32 %v3181_v8, %v3180_v39  ;;  %v11747_v8 = vld [vmem:[#allocation65_spill] sm:$0xff] }
 0x332   : > { %6154 = vrcp.f32 %v3190_v16 }
 0x333   : > { %6156 = vrcp.f32 %v3187_v3  ;;  %v3183_v12 = vrot.slane %v3182_v63, 1  ;;  %v11750_v3 = vld [vmem:[#allocation71_spill] sm:$0xff] }
 0x335   : > { %v3184_v4 = vadd.f32 %v3183_v12, %v3182_v63 }
 0x337   : > { %v3186_v28 = vsub.f32 %v11744_v19, %v3184_v4  ;;  %v11762_v19 = vld [vmem:[#allocation33_spill] sm:$0xff] }
 0x33c   : > { %v6155_v18 = vpop.eup %6154 }
 0x33d   : > { %v6157_v20 = vpop.eup %6156  ;;  %v3192_v49 = vmul.f32 %v6155_v18, %v3186_v28  ;;  %v11751_v28 = vld [vmem:[#allocation70_spill] sm:$0xff] }
 0x33e   : > { %v3189_v37 = vmul.f32 %v6157_v20, %v3184_v4 }
 0x340   : > { %v3193_v23 = vsub.f32 %v3189_v37, %v3192_v49  ;;  %v8666_v43 = vadd.f32 %v3192_v49, %v3189_v37  ;;  %v11752_v37 = vld [vmem:[#allocation73_spill] sm:$0xff] }
 0x342   : > { %v8669_v1 = vmul.f32 %v3193_v23, %v11745_v61  ;;  %v3196_v51 = vsub.f32 %v11746_v7, %v8666_v43  ;;  %v3197_v15 = vsub.f32 %v11747_v8, %v8666_v43  ;;  %v3198_v6 = vsub.f32 %v11748_v0, %v8666_v43 }
 0x343   : > { %v3199_v16 = vsub.f32 %v11749_v34, %v8666_v43  ;;  %v3200_v63 = vsub.f32 %v11750_v3, %v8666_v43  ;;  %v3201_v20 = vsub.f32 %v11751_v28, %v8666_v43  ;;  %v3202_v23 = vsub.f32 %v11752_v37, %v8666_v43  ;;  %v11756_v28 = vld [vmem:[#allocation76_spill] sm:$0xff]  ;;  %v11758_v37 = vld [vmem:[#allocation78_spill] sm:$0xff] }
 0x344   : > { %v3228_v29 = vmul.f32 %v3196_v51, %v8669_v1  ;;  %v3229_v39 = vmul.f32 %v3197_v15, %v8669_v1  ;;  %v3230_v12 = vmul.f32 %v3198_v6, %v8669_v1  ;;  %v11753_v6 = vld [vmem:[#allocation35_spill] sm:$0xff]  ;;  %v3204_v0 = vsub.f32 %v11756_v28, %v8666_v43 }
 0x345   : > { %v3231_v49 = vmul.f32 %v3199_v16, %v8669_v1  ;;  %v3232_v51 = vmul.f32 %v3200_v63, %v8669_v1  ;;  %v11757_v16 = vld [vmem:[#allocation74_spill] sm:$0xff]  ;;  %v3206_v63 = vsub.f32 %v11758_v37, %v8666_v43  ;;  %v3234_v37 = vmul.f32 %v3202_v23, %v8669_v1  ;;  %v11764_v28 = vld [vmem:[#allocation39_spill] sm:$0xff] }
 0x346   : > { %v3260_v4 = vmul.f32 %v3228_v29, %v7097_v45  ;;  %v3261_v18 = vmul.f32 %v3229_v39, %v7097_v45  ;;  %v3262_v15 = vmul.f32 %v3230_v12, %v7097_v45  ;;  %v11755_v29 = vld [vmem:[#allocation72_spill] sm:$0xff]  ;;  %v3205_v8 = vsub.f32 %v11757_v16, %v8666_v43  ;;  %v11759_v12 = vld [vmem:[#allocation77_spill] sm:$0xff] }
 0x347   : > { %v3203_v39 = vsub.f32 %v11755_v29, %v8666_v43  ;;  %v3207_v7 = vsub.f32 %v11759_v12, %v8666_v43  ;;  %v11761_v29 = vld [vmem:[#allocation79_spill] sm:$0xff]  ;;  %v3264_v12 = vmul.f32 %v3232_v51, %v7097_v45 }
 0x348   : > { %v8694_v3 = vadd.f32 %v3260_v4, %v8314_v9  ;;  %v8697_v34 = vadd.f32 %v3261_v18, %v11753_v6  ;;  %v11760_v9 = vld [vmem:[#allocation80_spill] sm:$0xff]  ;;  %v3233_v18 = vmul.f32 %v3201_v20, %v8669_v1  ;;  %v3263_v6 = vmul.f32 %v3231_v49, %v7097_v45 }
 0x349   : > { %v3208_v4 = vsub.f32 %v11760_v9, %v8666_v43  ;;  %v3209_v61 = vsub.f32 %v11761_v29, %v8666_v43  ;;  %v8722_v46 = vadd.f32 %v3262_v15, %v11762_v19  ;;  %v3235_v51 = vmul.f32 %v3203_v39, %v8669_v1  ;;  %v11766_v39 = vld [vmem:[#allocation37_spill] sm:$0xff] }
 0x34a   : > { %11754 = vst [vmem:[#allocation84_spill] sm:$0xff] %v8697_v34  ;;  %vm3324_vm3 = vcmp.ge.f32.partialorder %v8694_v3, 0.0  ;;  %vm3325_vm4 = vcmp.ge.f32.partialorder %v8697_v34, 0.0  ;;  %v3265_v15 = vmul.f32 %v3233_v18, %v7097_v45  ;;  %v8739_v29 = vadd.f32 %v3263_v6, %v11764_v28 }
 0x34b   : > { %11763 = vst [vmem:[#allocation83_spill] sm:$0xff] %v8722_v46  ;;  %v5644_v16 = vsel %vm3324_vm3, 1.0, %v11417_v56  ;;  %v5645_v23 = vsel %vm3325_vm4, 1.0, %v11417_v56  ;;  %v3236_v9 = vmul.f32 %v3204_v0, %v8669_v1  ;;  %v3266_v19 = vmul.f32 %v3234_v37, %v7097_v45 }
 0x34c   : > { %11765 = vst [vmem:[#allocation86_spill] sm:$0xff] %v8739_v29  ;;  %v8750_v34 = vadd.f32 %v3264_v12, %v11766_v39  ;;  %vm3326_vm5 = vcmp.ge.f32.partialorder %v8722_v46, 0.0  ;;  %v3237_v49 = vmul.f32 %v3205_v8, %v8669_v1  ;;  %v3267_v0 = vmul.f32 %v3235_v51, %v7097_v45 }
 0x34d   : > { %v8762_v37 = vadd.f32 %v3265_v15, %v8382_v50  ;;  %vm3327_vm6 = vcmp.ge.f32.partialorder %v8739_v29, 0.0  ;;  %v3420_v12 = vadd.f32 %v5645_v23, %v5644_v16  ;;  %v3238_v18 = vmul.f32 %v3206_v63, %v8669_v1  ;;  %v11771_v15 = vld [vmem:[#allocation9_spill] sm:$0xff]  ;;  %v11772_v29 = vld [vmem:[#allocation8_spill] sm:$0xff] }
 0x34e   : > { %11767 = vst [vmem:[#allocation85_spill] sm:$0xff] %v8750_v34  ;;  %v5646_v6 = vsel %vm3326_vm5, 1.0, %v11417_v56  ;;  %v3268_v8 = vmul.f32 %v3236_v9, %v7097_v45  ;;  %v8773_v51 = vadd.f32 %v3266_v19, %v8393_v47  ;;  %vm3328_vm7 = vcmp.ge.f32.partialorder %v8750_v34, 0.0 }
 0x34f   : > { %11768 = vst [vmem:[#allocation88_spill] sm:$0xff] %v8762_v37  ;;  %v3421_v50 = vadd.f32 %v5646_v6, %v3420_v12  ;;  %v3239_v28 = vmul.f32 %v3207_v7, %v8669_v1  ;;  %v5647_v63 = vsel %vm3327_vm6, 1.0, %v11417_v56  ;;  %v3269_v20 = vmul.f32 %v3237_v49, %v7097_v45 }
 0x350   : > { %11769 = vst [vmem:[#allocation87_spill] sm:$0xff] %v8773_v51  ;;  %v8784_v9 = vadd.f32 %v3267_v0, %v8404_v32  ;;  %vm3329_vm8 = vcmp.ge.f32.partialorder %v8762_v37, 0.0  ;;  %v3240_v19 = vmul.f32 %v3208_v4, %v8669_v1  ;;  %v5648_v12 = vsel %vm3328_vm7, 1.0, %v11417_v56  ;;  %v11776_v4 = vld [vmem:[#allocation11_spill] sm:$0xff] }
 0x351   : > { %v3422_v47 = vadd.f32 %v5647_v63, %v3421_v50  ;;  %v3457_v34 = vmul.f32 %v5644_v16, %v11771_v15  ;;  %v3458_v39 = vmul.f32 %v5645_v23, %v11772_v29  ;;  %v3270_v7 = vmul.f32 %v3238_v18, %v7097_v45  ;;  %v11777_v15 = vld [vmem:[#allocation43_spill] sm:$0xff] }
 0x352   : > { %11770 = vst [vmem:[#allocation90_spill] sm:$0xff] %v8784_v9  ;;  %v8793_v46 = vadd.f32 %v3268_v8, %v8413_v40  ;;  %vm3330_vm9 = vcmp.ge.f32.partialorder %v8773_v51, 0.0  ;;  %v3241_v0 = vmul.f32 %v3209_v61, %v8669_v1  ;;  %v5649_v16 = vsel %vm3329_vm8, 1.0, %v11417_v56 }
 0x353   : > { %v3423_v32 = vadd.f32 %v5648_v12, %v3422_v47  ;;  %v3271_v23 = vmul.f32 %v3239_v28, %v7097_v45  ;;  %v8804_v18 = vadd.f32 %v3269_v20, %v8424_v31  ;;  %vm3331_vm10 = vcmp.ge.f32.partialorder %v8784_v9, 0.0  ;;  %v11780_v9 = vld [vmem:[#allocation10_spill] sm:$0xff] }
 0x354   : > { %11773 = vst [vmem:[#allocation89_spill] sm:$0xff] %v8793_v46  ;;  %v11775_v8 = vsub.f32 %v11456_v22, %v8666_v43  ;;  %v5650_v47 = vsel %vm3330_vm9, 1.0, %v11417_v56  ;;  %v3459_v49 = vmul.f32 %v5646_v6, %v11776_v4  ;;  %v3489_v61 = vadd.f32 %v3458_v39, %v3457_v34  ;;  %v11781_v6 = vld [vmem:[#allocation41_spill] sm:$0xff] }
 0x355   : > { %11774 = vst [vmem:[#allocation92_spill] sm:$0xff] %v8804_v18  ;;  %v3424_v40 = vadd.f32 %v5649_v16, %v3423_v32  ;;  %v3272_v29 = vmul.f32 %v3240_v19, %v7097_v45  ;;  %v8815_v28 = vadd.f32 %v3270_v7, %v11777_v15  ;;  %vm3332_vm11 = vcmp.ge.f32.partialorder %v8793_v46, 0.0 }
 0x356   : > { %v3242_v50 = vmul.f32 %v11775_v8, %v8669_v1  ;;  %v11779_v20 = vsub.f32 %v11457_v62, %v8666_v43  ;;  %v5651_v8 = vsel %vm3331_vm10, 1.0, %v11417_v56  ;;  %v3460_v51 = vmul.f32 %v5647_v63, %v11780_v9 }
 0x357   : > { %11778 = vst [vmem:[#allocation91_spill] sm:$0xff] %v8815_v28  ;;  %v3425_v31 = vadd.f32 %v5650_v47, %v3424_v40  ;;  %v3490_v37 = vadd.f32 %v3489_v61, %v3459_v49  ;;  %v3273_v34 = vmul.f32 %v3241_v0, %v7097_v45  ;;  %v8826_v39 = vadd.f32 %v3271_v23, %v11781_v6  ;;  %v11785_v49 = vld [vmem:[#allocation47_spill] sm:$0xff] }
 0x358   : > { %v3243_v32 = vmul.f32 %v11779_v20, %v8669_v1  ;;  %vm3333_vm12 = vcmp.ge.f32.partialorder %v8804_v18, 0.0  ;;  %v11783_v19 = vsub.f32 %v11459_v10, %v8666_v43  ;;  %v5652_v40 = vsel %vm3332_vm11, 1.0, %v11417_v56  ;;  %v11784_v20 = vld [vmem:[#allocation13_spill] sm:$0xff] }
 0x359   : > { %11782 = vst [vmem:[#allocation96_spill] sm:$0xff] %v8826_v39  ;;  %v3426_v15 = vadd.f32 %v5651_v8, %v3425_v31  ;;  %v3461_v4 = vmul.f32 %v5648_v12, %v11784_v20  ;;  %v3491_v46 = vadd.f32 %v3490_v37, %v3460_v51  ;;  %v3274_v63 = vmul.f32 %v3242_v50, %v7097_v45  ;;  %v11789_v51 = vld [vmem:[#allocation45_spill] sm:$0xff] }
 0x35a   : > { %v3244_v7 = vmul.f32 %v11783_v19, %v8669_v1  ;;  %v8837_v0 = vadd.f32 %v3272_v29, %v11785_v49  ;;  %vm3334_vm13 = vcmp.ge.f32.partialorder %v8815_v28, 0.0  ;;  %v11787_v61 = vsub.f32 %v11460_v25, %v8666_v43  ;;  %v11788_v19 = vld [vmem:[#allocation12_spill] sm:$0xff] }
 0x35b   : > { %v3427_v23 = vadd.f32 %v5652_v40, %v3426_v15  ;;  %v5653_v6 = vsel %vm3333_vm12, 1.0, %v11417_v56  ;;  %v3462_v9 = vmul.f32 %v5649_v16, %v11788_v19  ;;  %v3492_v18 = vadd.f32 %v3491_v46, %v3461_v4  ;;  %v11793_v4 = vld [vmem:[#allocation51_spill] sm:$0xff] }
 0x35c   : > { %11786 = vst [vmem:[#allocation95_spill] sm:$0xff] %v8837_v0  ;;  %v3245_v31 = vmul.f32 %v11787_v61, %v8669_v1  ;;  %v3275_v37 = vmul.f32 %v3243_v32, %v7097_v45  ;;  %v8848_v12 = vadd.f32 %v3273_v34, %v11789_v51  ;;  %vm3335_vm14 = vcmp.ge.f32.partialorder %v8826_v39, 0.0  ;;  %v11792_v61 = vld [vmem:[#allocation16_spill] sm:$0xff] }
 0x35d   : > { %v3428_v29 = vadd.f32 %v5653_v6, %v3427_v23  ;;  %v11791_v50 = vsub.f32 %v11461_v54, %v8666_v43  ;;  %v5654_v49 = vsel %vm3334_vm13, 1.0, %v11417_v56  ;;  %v3463_v20 = vmul.f32 %v5650_v47, %v11792_v61 }
 0x35e   : > { %11790 = vst [vmem:[#allocation98_spill] sm:$0xff] %v8848_v12  ;;  %v3493_v28 = vadd.f32 %v3492_v18, %v3462_v9  ;;  %v3276_v46 = vmul.f32 %v3244_v7, %v7097_v45  ;;  %v8859_v16 = vadd.f32 %v3274_v63, %v11793_v4  ;;  %vm3336_vm15 = vcmp.ge.f32.partialorder %v8837_v0, 0.0  ;;  %v11797_v18 = vld [vmem:[#allocation49_spill] sm:$0xff] }
 0x35f   : > { %v3246_v15 = vmul.f32 %v11791_v50, %v8669_v1  ;;  %v3429_v32 = vadd.f32 %v5654_v49, %v3428_v29  ;;  %v11795_v34 = vsub.f32 %v11462_v57, %v8666_v43  ;;  %v5655_v51 = vsel %vm3335_vm14, 1.0, %v11417_v56  ;;  %v11796_v50 = vld [vmem:[#allocation15_spill] sm:$0xff] }
 0x360   : > { %11794 = vst [vmem:[#allocation97_spill] sm:$0xff] %v8859_v16  ;;  %v3464_v19 = vmul.f32 %v5651_v8, %v11796_v50  ;;  %v3494_v39 = vadd.f32 %v3493_v28, %v3463_v20  ;;  %v3277_v9 = vmul.f32 %v3245_v31, %v7097_v45  ;;  %v8870_v47 = vadd.f32 %v3275_v37, %v11797_v18  ;;  %v11800_v8 = vld [vmem:[#allocation55_spill] sm:$0xff] }
 0x361   : > { %v3247_v23 = vmul.f32 %v11795_v34, %v8669_v1  ;;  %vm3337_vm0 = vcmp.ge.f32.partialorder %v8848_v12, 0.0  ;;  %v3430_v7 = vadd.f32 %v5655_v51, %v3429_v32  ;;  %v11798_v63 = vsub.f32 %v11463_v38, %v8666_v43  ;;  %v11799_v34 = vld [vmem:[#allocation20_spill] sm:$0xff] }
 0x362   : > { %v5656_v4 = vsel %vm3336_vm15, 1.0, %v11417_v56  ;;  %v3465_v61 = vmul.f32 %v5652_v40, %v11799_v34  ;;  %v3495_v0 = vadd.f32 %v3494_v39, %v3464_v19  ;;  %v3278_v28 = vmul.f32 %v3246_v15, %v7097_v45  ;;  %v11803_v40 = vld [vmem:[#allocation53_spill] sm:$0xff] }
 0x363   : > { %v3248_v29 = vmul.f32 %v11798_v63, %v8669_v1  ;;  %v8881_v20 = vadd.f32 %v3276_v46, %v11800_v8  ;;  %vm3338_vm1 = vcmp.ge.f32.partialorder %v8859_v16, 0.0  ;;  %v3431_v31 = vadd.f32 %v5656_v4, %v3430_v7  ;;  %v11802_v63 = vld [vmem:[#allocation18_spill] sm:$0xff] }
 0x364   : > { %v11801_v37 = vsub.f32 %v11465_v52, %v8666_v43  ;;  %v5657_v18 = vsel %vm3337_vm0, 1.0, %v11417_v56  ;;  %v3466_v50 = vmul.f32 %v5653_v6, %v11802_v63  ;;  %v3496_v12 = vadd.f32 %v3495_v0, %v3465_v61 }
 0x365   : > { %v3279_v39 = vmul.f32 %v3247_v23, %v7097_v45  ;;  %v8892_v19 = vadd.f32 %v3277_v9, %v11803_v40  ;;  %vm3339_vm2 = vcmp.ge.f32.partialorder %v8870_v47, 0.0  ;;  %v3432_v15 = vadd.f32 %v5657_v18, %v3431_v31  ;;  %v11808_v40 = vld [vmem:[#allocation22_spill] sm:$0xff] }
 0x366   : > { %v3249_v32 = vmul.f32 %v11801_v37, %v8669_v1  ;;  %v11805_v46 = vsub.f32 %v11466_v44, %v8666_v43  ;;  %v5658_v8 = vsel %vm3338_vm1, 1.0, %v11417_v56  ;;  %v11806_v37 = vld [vmem:[#allocation24_spill] sm:$0xff]  ;;  %v3497_v16 = vadd.f32 %v3496_v12, %v3466_v50 }
 0x367   : > { %11804 = vst [vmem:[#allocation14_spill] sm:$0xff] %v8892_v19  ;;  %v3467_v34 = vmul.f32 %v5654_v49, %v11806_v37  ;;  %v3280_v0 = vmul.f32 %v3248_v29, %v7097_v45  ;;  %v8903_v6 = vadd.f32 %v3278_v28, %v8523_v53  ;;  %vm3340_vm3 = vcmp.ge.f32.partialorder %v8881_v20, 0.0 }
 0x368   : > { %v3250_v7 = vmul.f32 %v11805_v46, %v8669_v1  ;;  %v3433_v61 = vadd.f32 %v5658_v8, %v3432_v15  ;;  %v11807_v23 = vsub.f32 %v11468_v60, %v8666_v43  ;;  %v5659_v31 = vsel %vm3339_vm2, 1.0, %v11417_v56  ;;  %v11810_v15 = vld [vmem:[#allocation28_spill] sm:$0xff] }
 0x369   : > { %v3468_v46 = vmul.f32 %v5655_v51, %v11808_v40  ;;  %v3498_v63 = vadd.f32 %v3497_v16, %v3467_v34  ;;  %v3281_v12 = vmul.f32 %v3249_v32, %v7097_v45  ;;  %v8914_v49 = vadd.f32 %v3279_v39, %v8534_v48  ;;  %v11811_v51 = vld [vmem:[#allocation59_spill] sm:$0xff] }
 0x36a   : > { %v3251_v9 = vmul.f32 %v11807_v23, %v8669_v1  ;;  %vm3341_vm4 = vcmp.ge.f32.partialorder %v8892_v19, 0.0  ;;  %v3434_v53 = vadd.f32 %v5659_v31, %v3433_v61  ;;  %v11809_v50 = vsub.f32 %v11469_v55, %v8666_v43 }
 0x36b   : > { %v5660_v28 = vsel %vm3340_vm3, 1.0, %v11417_v56  ;;  %v3469_v23 = vmul.f32 %v5656_v4, %v11810_v15  ;;  %v3499_v37 = vadd.f32 %v3498_v63, %v3468_v46  ;;  %v3282_v16 = vmul.f32 %v3250_v7, %v7097_v45 }
 0x36c   : > { %v3252_v29 = vmul.f32 %v11809_v50, %v8669_v1  ;;  %v8925_v34 = vadd.f32 %v3280_v0, %v11811_v51  ;;  %vm3342_vm5 = vcmp.ge.f32.partialorder %v8903_v6, 0.0  ;;  %v3435_v48 = vadd.f32 %v5660_v28, %v3434_v53  ;;  %v11813_v50 = vld [vmem:[#allocation26_spill] sm:$0xff]  ;;  %v11815_v51 = vld [vmem:[#allocation32_spill] sm:$0xff] }
 0x36d   : > { %v11812_v32 = vsub.f32 %v11470_v59, %v8666_v43  ;;  %v5661_v61 = vsel %vm3341_vm4, 1.0, %v11417_v56  ;;  %v3470_v40 = vmul.f32 %v5657_v18, %v11813_v50  ;;  %v3500_v19 = vadd.f32 %v3499_v37, %v3469_v23 }
 0x36e   : > { %v3283_v4 = vmul.f32 %v3251_v9, %v7097_v45  ;;  %v8936_v63 = vadd.f32 %v3281_v12, %v8556_v30  ;;  %vm3343_vm6 = vcmp.ge.f32.partialorder %v8914_v49, 0.0  ;;  %v3436_v7 = vadd.f32 %v5661_v61, %v3435_v48  ;;  %v11817_v48 = vld [vmem:[#allocation30_spill] sm:$0xff] }
 0x36f   : > { %v3253_v39 = vmul.f32 %v11812_v32, %v8669_v1  ;;  %v11814_v0 = vsub.f32 %v11503_v27, %v8666_v43  ;;  %v5662_v53 = vsel %vm3342_vm5, 1.0, %v11417_v56  ;;  %v3471_v32 = vmul.f32 %v5658_v8, %v11815_v51 }
 0x370   : > { %v3501_v15 = vadd.f32 %v3500_v19, %v3470_v40  ;;  %v3284_v18 = vmul.f32 %v3252_v29, %v7097_v45  ;;  %v8947_v37 = vadd.f32 %v3282_v16, %v8567_v13  ;;  %vm3344_vm7 = vcmp.ge.f32.partialorder %v8925_v34, 0.0 }
 0x371   : > { %v3254_v46 = vmul.f32 %v11814_v0, %v8669_v1  ;;  %v3437_v30 = vadd.f32 %v5662_v53, %v3436_v7  ;;  %v11816_v9 = vsub.f32 %v11508_v58, %v8666_v43  ;;  %v5663_v23 = vsel %vm3343_vm6, 1.0, %v11417_v56  ;;  %v11819_v7 = vld [vmem:[#allocation36_spill] sm:$0xff] }
 0x372   : > { %v3472_v0 = vmul.f32 %v5659_v31, %v11817_v48  ;;  %v3502_v50 = vadd.f32 %v3501_v15, %v3471_v32  ;;  %v3285_v19 = vmul.f32 %v3253_v39, %v7097_v45  ;;  %v8958_v8 = vadd.f32 %v3283_v4, %v8578_v26 }
 0x373   : > { %v3255_v12 = vmul.f32 %v11816_v9, %v8669_v1  ;;  %vm3345_vm8 = vcmp.ge.f32.partialorder %v8936_v63, 0.0  ;;  %v3438_v13 = vadd.f32 %v5663_v23, %v3437_v30  ;;  %v11818_v40 = vsub.f32 %v11474_v36, %v8666_v43  ;;  %v11821_v30 = vld [vmem:[#allocation34_spill] sm:$0xff] }
 0x374   : > { %v5664_v16 = vsel %vm3344_vm7, 1.0, %v11417_v56  ;;  %v3473_v9 = vmul.f32 %v5660_v28, %v11819_v7  ;;  %v3503_v51 = vadd.f32 %v3502_v50, %v3472_v0  ;;  %v3286_v31 = vmul.f32 %v3254_v46, %v7097_v45 }
 0x375   : > { %v3256_v29 = vmul.f32 %v11818_v40, %v8669_v1  ;;  %v8969_v15 = vadd.f32 %v3284_v18, %v8589_v21  ;;  %vm3346_vm9 = vcmp.ge.f32.partialorder %v8947_v37, 0.0  ;;  %v3439_v26 = vadd.f32 %v5664_v16, %v3438_v13 }
 0x376   : > { %v11820_v39 = vsub.f32 %v11475_v5, %v8666_v43  ;;  %v5665_v32 = vsel %vm3345_vm8, 1.0, %v11417_v56  ;;  %v3474_v40 = vmul.f32 %v5661_v61, %v11821_v30  ;;  %v3504_v48 = vadd.f32 %v3503_v51, %v3473_v9 }
 0x377   : > { %v3287_v28 = vmul.f32 %v3255_v12, %v7097_v45  ;;  %v8980_v50 = vadd.f32 %v3285_v19, %v8600_v17  ;;  %vm3347_vm10 = vcmp.ge.f32.partialorder %v8958_v8, 0.0  ;;  %v3440_v21 = vadd.f32 %v5665_v32, %v3439_v26  ;;  %v11823_v19 = vld [vmem:[#allocation38_spill] sm:$0xff] }
 0x378   : > { %v3257_v4 = vmul.f32 %v11820_v39, %v8669_v1  ;;  %v11822_v46 = vsub.f32 %v11477_v41, %v8666_v43  ;;  %v5666_v0 = vsel %vm3346_vm9, 1.0, %v11417_v56  ;;  %v3475_v13 = vmul.f32 %v5662_v53, %v11520_v33 }
 0x379   : > { %v3505_v39 = vadd.f32 %v3504_v48, %v3474_v40  ;;  %v3288_v61 = vmul.f32 %v3256_v29, %v7097_v45  ;;  %v8991_v51 = vadd.f32 %v3286_v31, %v8611_v24  ;;  %vm3348_vm11 = vcmp.ge.f32.partialorder %v8969_v15, 0.0  ;;  %v11825_v31 = vld [vmem:[#allocation44_spill] sm:$0xff] }
 0x37a   : > { %v3258_v18 = vmul.f32 %v11822_v46, %v8669_v1  ;;  %v3441_v17 = vadd.f32 %v5666_v0, %v3440_v21  ;;  %v5667_v12 = vsel %vm3347_vm10, 1.0, %v11417_v56  ;;  %v3476_v9 = vmul.f32 %v5663_v23, %v11823_v19 }
 0x37b   : > { %v3506_v26 = vadd.f32 %v3505_v39, %v3475_v13  ;;  %v3289_v46 = vmul.f32 %v3257_v4, %v7097_v45  ;;  %v8998_v30 = vadd.f32 %v3287_v28, %v8618_v35  ;;  %vm3349_vm12 = vcmp.ge.f32.partialorder %v8980_v50, 0.0  ;;  %v11826_v13 = vld [vmem:[#allocation57_spill] sm:$0xff]  ;;  %v11828_v39 = vld [vmem:[#allocation42_spill] sm:$0xff] }
 0x37c   : > { %v3442_v53 = vadd.f32 %v5667_v12, %v3441_v17  ;;  %v11824_v24 = vsub.f32 %v11478_v2, %v8666_v43  ;;  %v5668_v29 = vsel %vm3348_vm11, 1.0, %v11417_v56  ;;  %v3477_v40 = vmul.f32 %v5664_v16, %v11825_v31  ;;  %v11829_v43 = vld [vmem:[#allocation63_spill] sm:$0xff] }
 0x37d   : > { %v3507_v21 = vadd.f32 %v3506_v26, %v3476_v9  ;;  %v3290_v23 = vmul.f32 %v3258_v18, %v7097_v45  ;;  %v9009_v4 = vadd.f32 %v3288_v61, %v11826_v13  ;;  %vm3350_vm13 = vcmp.ge.f32.partialorder %v8991_v51, 0.0  ;;  %v11831_v18 = vld [vmem:[#allocation48_spill] sm:$0xff]  ;;  %v11832_v13 = vld [vmem:[#allocation61_spill] sm:$0xff] }
 0x37e   : > { %v3259_v48 = vmul.f32 %v11824_v24, %v8669_v1  ;;  %v3443_v35 = vadd.f32 %v5668_v29, %v3442_v53  ;;  %v5669_v28 = vsel %vm3349_vm12, 1.0, %v11417_v56  ;;  %v3478_v17 = vmul.f32 %v5665_v32, %v11828_v39 }
 0x37f   : > { %11827 = vst [vmem:[#allocation94_spill] sm:$0xff] %v9009_v4  ;;  %v3508_v19 = vadd.f32 %v3507_v21, %v3477_v40  ;;  %v9015_v1 = vadd.f32 %v3289_v46, %v11829_v43  ;;  %vm3351_vm14 = vcmp.ge.f32.partialorder %v8998_v30, 0.0  ;;  %v5670_v9 = vsel %vm3350_vm13, 1.0, %v11417_v56  ;;  %v11834_v46 = vld [vmem:[#allocation46_spill] sm:$0xff] }
 0x380   : > { %v3444_v16 = vadd.f32 %v5669_v28, %v3443_v35  ;;  %v3479_v26 = vmul.f32 %v5666_v0, %v11831_v18  ;;  %v3291_v24 = vmul.f32 %v3259_v48, %v7097_v45  ;;  %v9022_v53 = vadd.f32 %v3290_v23, %v11832_v13  ;;  %v11835_v0 = vld [vmem:[#allocation52_spill] sm:$0xff]  ;;  %v11836_v48 = vld [vmem:[#allocation81_spill] sm:$0xff]  ;;  %v11838_v13 = vld [vmem:[#allocation50_spill] sm:$0xff] }
 0x381   : > { %11830 = vst [vmem:[#allocation19_spill] sm:$0xff] %v9015_v1  ;;  %v3509_v61 = vadd.f32 %v3508_v19, %v3478_v17  ;;  %vm3352_vm15 = vcmp.ge.f32.partialorder %v9009_v4, 0.0  ;;  %v5671_v40 = vsel %vm3351_vm14, 1.0, %v11417_v56  ;;  %v3480_v21 = vmul.f32 %v5667_v12, %v11834_v46 }
 0x382   : > { %11833 = vst [vmem:[#allocation93_spill] sm:$0xff] %v9022_v53  ;;  %v3445_v32 = vadd.f32 %v5670_v9, %v3444_v16  ;;  %vm3353_vm0 = vcmp.ge.f32.partialorder %v9015_v1, 0.0  ;;  %v5672_v39 = vsel %vm3352_vm15, 1.0, %v11417_v56  ;;  %v3481_v19 = vmul.f32 %v5668_v29, %v11835_v0  ;;  %v11839_v29 = vld [vmem:[#allocation56_spill] sm:$0xff]  ;;  %v11840_v0 = vld [vmem:[#allocation54_spill] sm:$0xff] }
 0x383   : > { %v3510_v43 = vadd.f32 %v3509_v61, %v3479_v26  ;;  %v9031_v18 = vadd.f32 %v3291_v24, %v11836_v48  ;;  %vm3354_vm1 = vcmp.ge.f32.partialorder %v9022_v53, 0.0  ;;  %v5673_v16 = vsel %vm3353_vm0, 1.0, %v11417_v56 }
 0x384   : > { %v3446_v35 = vadd.f32 %v5671_v40, %v3445_v32  ;;  %v3482_v4 = vmul.f32 %v5669_v28, %v11838_v13  ;;  %v5674_v61 = vsel %vm3354_vm1, 1.0, %v11417_v56  ;;  %v3485_v28 = vmul.f32 %v5672_v39, %v11543_v14 }
 0x385   : > { %v3511_v17 = vadd.f32 %v3510_v43, %v3480_v21  ;;  %11837 = vst [vmem:[#allocation17_spill] sm:$0xff] %v9031_v18  ;;  %vm3355_vm2 = vcmp.ge.f32.partialorder %v9031_v18, 0.0  ;;  %v3483_v21 = vmul.f32 %v5670_v9, %v11839_v29  ;;  %v11841_v29 = vld [vmem:[#allocation62_spill] sm:$0xff] }
 0x386   : > { %v3447_v23 = vadd.f32 %v5672_v39, %v3446_v35  ;;  %v5675_v24 = vsel %vm3355_vm2, 1.0, %v11417_v56  ;;  %v3484_v35 = vmul.f32 %v5671_v40, %v11840_v0 }
 0x387   : > { %v3512_v12 = vadd.f32 %v3511_v17, %v3481_v19  ;;  %v3488_v18 = vmul.f32 %v5675_v24, %v11841_v29 }
 0x388   : > { %v3448_v26 = vadd.f32 %v5673_v16, %v3447_v23  ;;  %v3486_v23 = vmul.f32 %v5673_v16, %v11644_v42  ;;  %v11875_v42 = vld [vmem:[#allocation89_spill] sm:$0xff] }
 0x389   : > { %v3513_v32 = vadd.f32 %v3512_v12, %v3482_v4 }
 0x38a   : > { %v3449_v46 = vadd.f32 %v5674_v61, %v3448_v26  ;;  %v3487_v26 = vmul.f32 %v5674_v61, %v11742_v11  ;;  %v11842_v61 = vld [vmem:[#allocation75_spill] sm:$0xff]  ;;  %v11874_v11 = vld [vmem:[#allocation8_spill] sm:$0xff] }
 0x38b   : > { %v3514_v43 = vadd.f32 %v3513_v32, %v3483_v21 }
 0x38c   : > { %v3450_v48 = vadd.f32 %v5675_v24, %v3449_v46 }
 0x38d   : > { %v3515_v53 = vadd.f32 %v3514_v43, %v3484_v35 }
 0x38e   : > { %v3451_v1 = vrot.slane %v3450_v48, 4 }
 0x38f   : > { %v3516_v19 = vadd.f32 %v3515_v53, %v3485_v28 }
 0x390   : > { %v3452_v17 = vadd.f32 %v3451_v1, %v3450_v48 }
 0x391   : > { %v3517_v4 = vadd.f32 %v3516_v19, %v3486_v23 }
 0x392   : > { %v3453_v12 = vrot.slane %v3452_v17, 2 }
 0x393   : > { %v3518_v13 = vadd.f32 %v3517_v4, %v3487_v26  ;;  %v11843_v4 = vld [vmem:[#allocation67_spill] sm:$0xff]  ;;  %v11844_v26 = vld [vmem:[#allocation66_spill] sm:$0xff] }
 0x394   : > { %v3454_v9 = vadd.f32 %v3453_v12, %v3452_v17 }
 0x395   : > { %v3519_v32 = vadd.f32 %v3518_v13, %v3488_v18 }
 0x396   : > { %v3455_v46 = vrot.slane %v3454_v9, 1 }
 0x397   : > { %v3520_v21 = vrot.slane %v3519_v32, 4 }
 0x398   : > { %v3456_v40 = vadd.f32 %v3455_v46, %v3454_v9  ;;  %v11846_v46 = vld [vmem:[#allocation69_spill] sm:$0xff] }
 0x399   : > { %v3521_v43 = vadd.f32 %v3520_v21, %v3519_v32 }
 0x39a   : > { %v3526_v35 = vsub.f32 256.0, %v3456_v40  ;;  %v3528_v53 = vmax.f32 %v3456_v40, 1.0 }
 0x39b   : > { %v3522_v0 = vrot.slane %v3521_v43, 2 }
 0x39c   : > { %v3531_v39 = vmax.f32 %v3526_v35, 1.0  ;;  %v11847_v35 = vld [vmem:[#allocation68_spill] sm:$0xff] }
 0x39d   : > { %v3523_v1 = vadd.f32 %v3522_v0, %v3521_v43  ;;  %v11845_v0 = vld [vmem:[#allocation65_spill] sm:$0xff] }
 0x39e   : > { %6158 = vrcp.f32 %v3531_v39 }
 0x39f   : > { %6160 = vrcp.f32 %v3528_v53  ;;  %v3524_v16 = vrot.slane %v3523_v1, 1  ;;  %v11848_v53 = vld [vmem:[#allocation71_spill] sm:$0xff] }
 0x3a1   : > { %v3525_v48 = vadd.f32 %v3524_v16, %v3523_v1 }
 0x3a3   : > { %v3527_v19 = vsub.f32 %v11842_v61, %v3525_v48  ;;  %v11861_v61 = vld [vmem:[#allocation83_spill] sm:$0xff] }
 0x3a8   : > { %v6159_v28 = vpop.eup %6158 }
 0x3a9   : > { %v6161_v17 = vpop.eup %6160  ;;  %v3533_v23 = vmul.f32 %v6159_v28, %v3527_v19  ;;  %v11849_v19 = vld [vmem:[#allocation70_spill] sm:$0xff] }
 0x3aa   : > { %v3530_v24 = vmul.f32 %v6161_v17, %v3525_v48 }
 0x3ac   : > { %v3534_v18 = vsub.f32 %v3530_v24, %v3533_v23  ;;  %v9046_v13 = vadd.f32 %v3533_v23, %v3530_v24  ;;  %v11850_v24 = vld [vmem:[#allocation73_spill] sm:$0xff] }
 0x3ae   : > { %v9049_v12 = vmul.f32 %v3534_v18, %v11843_v4  ;;  %v3537_v9 = vsub.f32 %v11844_v26, %v9046_v13  ;;  %v3538_v32 = vsub.f32 %v11845_v0, %v9046_v13  ;;  %v3539_v21 = vsub.f32 %v11846_v46, %v9046_v13 }
 0x3af   : > { %v3540_v39 = vsub.f32 %v11847_v35, %v9046_v13  ;;  %v3541_v1 = vsub.f32 %v11848_v53, %v9046_v13  ;;  %v3542_v17 = vsub.f32 %v11849_v19, %v9046_v13  ;;  %v3543_v18 = vsub.f32 %v11850_v24, %v9046_v13  ;;  %v11855_v19 = vld [vmem:[#allocation76_spill] sm:$0xff]  ;;  %v11857_v24 = vld [vmem:[#allocation78_spill] sm:$0xff] }
 0x3b0   : > { %v3569_v40 = vmul.f32 %v3537_v9, %v9049_v12  ;;  %v3570_v43 = vmul.f32 %v3538_v32, %v9049_v12  ;;  %v3571_v16 = vmul.f32 %v3539_v21, %v9049_v12  ;;  %v11852_v21 = vld [vmem:[#allocation84_spill] sm:$0xff]  ;;  %v3545_v46 = vsub.f32 %v11855_v19, %v9046_v13  ;;  %v11863_v19 = vld [vmem:[#allocation86_spill] sm:$0xff] }
 0x3b1   : > { %v3572_v23 = vmul.f32 %v3540_v39, %v9049_v12  ;;  %v3573_v9 = vmul.f32 %v3541_v1, %v9049_v12  ;;  %v11856_v39 = vld [vmem:[#allocation74_spill] sm:$0xff]  ;;  %v3547_v1 = vsub.f32 %v11857_v24, %v9046_v13  ;;  %v3575_v24 = vmul.f32 %v3543_v18, %v9049_v12 }
 0x3b2   : > { %v3601_v48 = vmul.f32 %v3569_v40, %v7097_v45  ;;  %v3602_v28 = vmul.f32 %v3570_v43, %v7097_v45  ;;  %v3603_v32 = vmul.f32 %v3571_v16, %v7097_v45  ;;  %v11854_v40 = vld [vmem:[#allocation72_spill] sm:$0xff]  ;;  %v3546_v0 = vsub.f32 %v11856_v39, %v9046_v13  ;;  %v11858_v16 = vld [vmem:[#allocation77_spill] sm:$0xff] }
 0x3b3   : > { %v3544_v43 = vsub.f32 %v11854_v40, %v9046_v13  ;;  %v3548_v26 = vsub.f32 %v11858_v16, %v9046_v13  ;;  %v11860_v40 = vld [vmem:[#allocation79_spill] sm:$0xff]  ;;  %v3605_v16 = vmul.f32 %v3573_v9, %v7097_v45 }
 0x3b4   : > { %v9074_v53 = vadd.f32 %v3601_v48, %v8694_v3  ;;  %v9077_v35 = vadd.f32 %v3602_v28, %v11852_v21  ;;  %v11859_v3 = vld [vmem:[#allocation80_spill] sm:$0xff]  ;;  %v3574_v28 = vmul.f32 %v3542_v17, %v9049_v12  ;;  %v3604_v21 = vmul.f32 %v3572_v23, %v7097_v45 }
 0x3b5   : > { %v3549_v48 = vsub.f32 %v11859_v3, %v9046_v13  ;;  %v3550_v4 = vsub.f32 %v11860_v40, %v9046_v13  ;;  %v9102_v29 = vadd.f32 %v3603_v32, %v11861_v61  ;;  %v3576_v9 = vmul.f32 %v3544_v43, %v9049_v12  ;;  %v11865_v43 = vld [vmem:[#allocation85_spill] sm:$0xff]  ;;  %v11867_v17 = vld [vmem:[#allocation88_spill] sm:$0xff] }
 0x3b6   : > { %11851 = vst [vmem:[#allocation23_spill] sm:$0xff] %v9074_v53  ;;  %11853 = vst [vmem:[#allocation21_spill] sm:$0xff] %v9077_v35  ;;  %vm3665_vm3 = vcmp.ge.f32.partialorder %v9074_v53, 0.0  ;;  %vm3666_vm4 = vcmp.ge.f32.partialorder %v9077_v35, 0.0  ;;  %v3606_v32 = vmul.f32 %v3574_v28, %v7097_v45  ;;  %v9119_v40 = vadd.f32 %v3604_v21, %v11863_v19  ;;  %v11871_v53 = vld [vmem:[#allocation90_spill] sm:$0xff] }
 0x3b7   : > { %11862 = vst [vmem:[#allocation27_spill] sm:$0xff] %v9102_v29  ;;  %v5676_v39 = vsel %vm3665_vm3, 1.0, %v11417_v56  ;;  %v5677_v18 = vsel %vm3666_vm4, 1.0, %v11417_v56  ;;  %v3577_v3 = vmul.f32 %v3545_v46, %v9049_v12  ;;  %v3607_v61 = vmul.f32 %v3575_v24, %v7097_v45 }
 0x3b8   : > { %11864 = vst [vmem:[#allocation25_spill] sm:$0xff] %v9119_v40  ;;  %v9130_v35 = vadd.f32 %v3605_v16, %v11865_v43  ;;  %vm3667_vm5 = vcmp.ge.f32.partialorder %v9102_v29, 0.0  ;;  %v3578_v23 = vmul.f32 %v3546_v0, %v9049_v12  ;;  %v3608_v46 = vmul.f32 %v3576_v9, %v7097_v45  ;;  %v11869_v29 = vld [vmem:[#allocation87_spill] sm:$0xff] }
 0x3b9   : > { %v9142_v24 = vadd.f32 %v3606_v32, %v11867_v17  ;;  %vm3668_vm6 = vcmp.ge.f32.partialorder %v9119_v40, 0.0  ;;  %v3761_v16 = vadd.f32 %v5677_v18, %v5676_v39  ;;  %v3579_v28 = vmul.f32 %v3547_v1, %v9049_v12  ;;  %v11873_v32 = vld [vmem:[#allocation9_spill] sm:$0xff] }
 0x3ba   : > { %11866 = vst [vmem:[#allocation31_spill] sm:$0xff] %v9130_v35  ;;  %v5678_v21 = vsel %vm3667_vm5, 1.0, %v11417_v56  ;;  %v3609_v0 = vmul.f32 %v3577_v3, %v7097_v45  ;;  %v9153_v9 = vadd.f32 %v3607_v61, %v11869_v29  ;;  %vm3669_vm7 = vcmp.ge.f32.partialorder %v9130_v35, 0.0 }
 0x3bb   : > { %11868 = vst [vmem:[#allocation29_spill] sm:$0xff] %v9142_v24  ;;  %v3762_v17 = vadd.f32 %v5678_v21, %v3761_v16  ;;  %v3580_v19 = vmul.f32 %v3548_v26, %v9049_v12  ;;  %v5679_v1 = vsel %vm3668_vm6, 1.0, %v11417_v56  ;;  %v3610_v40 = vmul.f32 %v3578_v23, %v7097_v45 }
 0x3bc   : > { %11870 = vst [vmem:[#allocation35_spill] sm:$0xff] %v9153_v9  ;;  %v9164_v3 = vadd.f32 %v3608_v46, %v11871_v53  ;;  %vm3670_vm8 = vcmp.ge.f32.partialorder %v9142_v24, 0.0  ;;  %v3581_v61 = vmul.f32 %v3549_v48, %v9049_v12  ;;  %v5680_v16 = vsel %vm3669_vm7, 1.0, %v11417_v56  ;;  %v11880_v48 = vld [vmem:[#allocation11_spill] sm:$0xff] }
 0x3bd   : > { %v3763_v29 = vadd.f32 %v5679_v1, %v3762_v17  ;;  %v3798_v35 = vmul.f32 %v5676_v39, %v11873_v32  ;;  %v3799_v43 = vmul.f32 %v5677_v18, %v11874_v11  ;;  %v3611_v26 = vmul.f32 %v3579_v28, %v7097_v45  ;;  %v11877_v17 = vld [vmem:[#allocation92_spill] sm:$0xff] }
 0x3be   : > { %11872 = vst [vmem:[#allocation33_spill] sm:$0xff] %v9164_v3  ;;  %v9173_v14 = vadd.f32 %v3609_v0, %v11875_v42  ;;  %vm3671_vm9 = vcmp.ge.f32.partialorder %v9153_v9, 0.0  ;;  %v3582_v46 = vmul.f32 %v3550_v4, %v9049_v12  ;;  %v5681_v39 = vsel %vm3670_vm8, 1.0, %v11417_v56  ;;  %v11881_v9 = vld [vmem:[#allocation91_spill] sm:$0xff] }
 0x3bf   : > { %v3764_v53 = vadd.f32 %v5680_v16, %v3763_v29  ;;  %v3612_v18 = vmul.f32 %v3580_v19, %v7097_v45  ;;  %v9184_v28 = vadd.f32 %v3610_v40, %v11877_v17  ;;  %vm3672_vm10 = vcmp.ge.f32.partialorder %v9164_v3, 0.0  ;;  %v11884_v3 = vld [vmem:[#allocation10_spill] sm:$0xff] }
 0x3c0   : > { %11876 = vst [vmem:[#allocation39_spill] sm:$0xff] %v9173_v14  ;;  %v11879_v0 = vsub.f32 %v11456_v22, %v9046_v13  ;;  %v5682_v23 = vsel %vm3671_vm9, 1.0, %v11417_v56  ;;  %v3800_v11 = vmul.f32 %v5678_v21, %v11880_v48  ;;  %v3830_v4 = vadd.f32 %v3799_v43, %v3798_v35  ;;  %v11885_v21 = vld [vmem:[#allocation96_spill] sm:$0xff] }
 0x3c1   : > { %11878 = vst [vmem:[#allocation37_spill] sm:$0xff] %v9184_v28  ;;  %v3765_v42 = vadd.f32 %v5681_v39, %v3764_v53  ;;  %v3613_v32 = vmul.f32 %v3581_v61, %v7097_v45  ;;  %v9195_v19 = vadd.f32 %v3611_v26, %v11881_v9  ;;  %vm3673_vm11 = vcmp.ge.f32.partialorder %v9173_v14, 0.0 }
 0x3c2   : > { %v3583_v29 = vmul.f32 %v11879_v0, %v9049_v12  ;;  %v11883_v53 = vsub.f32 %v11457_v62, %v9046_v13  ;;  %v5683_v0 = vsel %vm3672_vm10, 1.0, %v11417_v56  ;;  %v3801_v24 = vmul.f32 %v5679_v1, %v11884_v3  ;;  %v11889_v1 = vld [vmem:[#allocation95_spill] sm:$0xff] }
 0x3c3   : > { %11882 = vst [vmem:[#allocation43_spill] sm:$0xff] %v9195_v19  ;;  %v3766_v40 = vadd.f32 %v5682_v23, %v3765_v42  ;;  %v3831_v22 = vadd.f32 %v3830_v4, %v3800_v11  ;;  %v3614_v35 = vmul.f32 %v3582_v46, %v7097_v45  ;;  %v9206_v43 = vadd.f32 %v3612_v18, %v11885_v21 }
 0x3c4   : > { %v3584_v17 = vmul.f32 %v11883_v53, %v9049_v12  ;;  %vm3674_vm12 = vcmp.ge.f32.partialorder %v9184_v28, 0.0  ;;  %v11887_v61 = vsub.f32 %v11459_v10, %v9046_v13  ;;  %v5684_v42 = vsel %vm3673_vm11, 1.0, %v11417_v56  ;;  %v11888_v53 = vld [vmem:[#allocation13_spill] sm:$0xff] }
 0x3c5   : > { %11886 = vst [vmem:[#allocation41_spill] sm:$0xff] %v9206_v43  ;;  %v3767_v9 = vadd.f32 %v5683_v0, %v3766_v40  ;;  %v3802_v48 = vmul.f32 %v5680_v16, %v11888_v53  ;;  %v3832_v14 = vadd.f32 %v3831_v22, %v3801_v24  ;;  %v3615_v11 = vmul.f32 %v3583_v29, %v7097_v45  ;;  %v11892_v24 = vld [vmem:[#allocation98_spill] sm:$0xff] }
 0x3c6   : > { %v3585_v26 = vmul.f32 %v11887_v61, %v9049_v12  ;;  %v9217_v46 = vadd.f32 %v3613_v32, %v11889_v1  ;;  %vm3675_vm13 = vcmp.ge.f32.partialorder %v9195_v19, 0.0  ;;  %v11890_v4 = vsub.f32 %v11460_v25, %v9046_v13  ;;  %v11891_v61 = vld [vmem:[#allocation12_spill] sm:$0xff] }
 0x3c7   : > { %v3768_v18 = vadd.f32 %v5684_v42, %v3767_v9  ;;  %v5685_v21 = vsel %vm3674_vm12, 1.0, %v11417_v56  ;;  %v3803_v3 = vmul.f32 %v5681_v39, %v11891_v61  ;;  %v3833_v28 = vadd.f32 %v3832_v14, %v3802_v48  ;;  %v11895_v48 = vld [vmem:[#allocation97_spill] sm:$0xff] }
 0x3c8   : > { %v3586_v40 = vmul.f32 %v11890_v4, %v9049_v12  ;;  %v3616_v22 = vmul.f32 %v3584_v17, %v7097_v45  ;;  %v9228_v16 = vadd.f32 %v3614_v35, %v11892_v24  ;;  %vm3676_vm14 = vcmp.ge.f32.partialorder %v9206_v43, 0.0  ;;  %v11894_v4 = vld [vmem:[#allocation16_spill] sm:$0xff] }
 0x3c9   : > { %v3769_v32 = vadd.f32 %v5685_v21, %v3768_v18  ;;  %v11893_v29 = vsub.f32 %v11461_v54, %v9046_v13  ;;  %v5686_v1 = vsel %vm3675_vm13, 1.0, %v11417_v56  ;;  %v3804_v53 = vmul.f32 %v5682_v23, %v11894_v4 }
 0x3ca   : > { %v3834_v19 = vadd.f32 %v3833_v28, %v3803_v3  ;;  %v3617_v14 = vmul.f32 %v3585_v26, %v7097_v45  ;;  %v9239_v39 = vadd.f32 %v3615_v11, %v11895_v48  ;;  %vm3677_vm15 = vcmp.ge.f32.partialorder %v9217_v46, 0.0  ;;  %v11900_v48 = vld [vmem:[#allocation20_spill] sm:$0xff] }
 0x3cb   : > { %v3587_v9 = vmul.f32 %v11893_v29, %v9049_v12  ;;  %v3770_v17 = vadd.f32 %v5686_v1, %v3769_v32  ;;  %v11897_v35 = vsub.f32 %v11462_v57, %v9046_v13  ;;  %v5687_v24 = vsel %vm3676_vm14, 1.0, %v11417_v56  ;;  %v11898_v29 = vld [vmem:[#allocation15_spill] sm:$0xff] }
 0x3cc   : > { %11896 = vst [vmem:[#allocation47_spill] sm:$0xff] %v9239_v39  ;;  %v3805_v61 = vmul.f32 %v5683_v0, %v11898_v29  ;;  %v3835_v43 = vadd.f32 %v3834_v19, %v3804_v53  ;;  %v3618_v3 = vmul.f32 %v3586_v40, %v7097_v45  ;;  %v9250_v23 = vadd.f32 %v3616_v22, %v8870_v47 }
 0x3cd   : > { %v3588_v18 = vmul.f32 %v11897_v35, %v9049_v12  ;;  %vm3678_vm0 = vcmp.ge.f32.partialorder %v9228_v16, 0.0  ;;  %v3771_v28 = vadd.f32 %v5687_v24, %v3770_v17  ;;  %v11899_v26 = vsub.f32 %v11463_v38, %v9046_v13  ;;  %v11902_v17 = vld [vmem:[#allocation18_spill] sm:$0xff] }
 0x3ce   : > { %v5688_v32 = vsel %vm3677_vm15, 1.0, %v11417_v56  ;;  %v3806_v35 = vmul.f32 %v5684_v42, %v11900_v48  ;;  %v3836_v4 = vadd.f32 %v3835_v43, %v3805_v61  ;;  %v3619_v19 = vmul.f32 %v3587_v9, %v7097_v45  ;;  %v11903_v42 = vld [vmem:[#allocation14_spill] sm:$0xff] }
 0x3cf   : > { %v3589_v11 = vmul.f32 %v11899_v26, %v9049_v12  ;;  %v9261_v0 = vadd.f32 %v3617_v14, %v8881_v20  ;;  %vm3679_vm1 = vcmp.ge.f32.partialorder %v9239_v39, 0.0  ;;  %v3772_v47 = vadd.f32 %v5688_v32, %v3771_v28 }
 0x3d0   : > { %v11901_v53 = vsub.f32 %v11465_v52, %v9046_v13  ;;  %v5689_v22 = vsel %vm3678_vm0, 1.0, %v11417_v56  ;;  %v3807_v26 = vmul.f32 %v5685_v21, %v11902_v17  ;;  %v3837_v29 = vadd.f32 %v3836_v4, %v3806_v35 }
 0x3d1   : > { %v3620_v43 = vmul.f32 %v3588_v18, %v7097_v45  ;;  %v9272_v61 = vadd.f32 %v3618_v3, %v11903_v42  ;;  %vm3680_vm2 = vcmp.ge.f32.partialorder %v9250_v23, 0.0  ;;  %v3773_v20 = vadd.f32 %v5689_v22, %v3772_v47  ;;  %v11907_v42 = vld [vmem:[#allocation22_spill] sm:$0xff] }
 0x3d2   : > { %v3590_v40 = vmul.f32 %v11901_v53, %v9049_v12  ;;  %v11904_v9 = vsub.f32 %v11466_v44, %v9046_v13  ;;  %v5690_v28 = vsel %vm3679_vm1, 1.0, %v11417_v56  ;;  %v11905_v53 = vld [vmem:[#allocation24_spill] sm:$0xff]  ;;  %v3838_v39 = vadd.f32 %v3837_v29, %v3807_v26 }
 0x3d3   : > { %v3808_v48 = vmul.f32 %v5686_v1, %v11905_v53  ;;  %v3621_v21 = vmul.f32 %v3589_v11, %v7097_v45  ;;  %v9283_v4 = vadd.f32 %v3619_v19, %v8903_v6  ;;  %vm3681_vm3 = vcmp.ge.f32.partialorder %v9261_v0, 0.0 }
 0x3d4   : > { %v3591_v14 = vmul.f32 %v11904_v9, %v9049_v12  ;;  %v3774_v18 = vadd.f32 %v5690_v28, %v3773_v20  ;;  %v11906_v3 = vsub.f32 %v11468_v60, %v9046_v13  ;;  %v5691_v47 = vsel %vm3680_vm2, 1.0, %v11417_v56  ;;  %v11909_v20 = vld [vmem:[#allocation28_spill] sm:$0xff] }
 0x3d5   : > { %v3809_v9 = vmul.f32 %v5687_v24, %v11907_v42  ;;  %v3839_v17 = vadd.f32 %v3838_v39, %v3808_v48  ;;  %v3622_v1 = vmul.f32 %v3590_v40, %v7097_v45  ;;  %v9294_v29 = vadd.f32 %v3620_v43, %v8914_v49 }
 0x3d6   : > { %v3592_v35 = vmul.f32 %v11906_v3, %v9049_v12  ;;  %vm3682_vm4 = vcmp.ge.f32.partialorder %v9272_v61, 0.0  ;;  %v3775_v6 = vadd.f32 %v5691_v47, %v3774_v18  ;;  %v11908_v11 = vsub.f32 %v11469_v55, %v9046_v13  ;;  %v11911_v18 = vld [vmem:[#allocation26_spill] sm:$0xff] }
 0x3d7   : > { %v5692_v26 = vsel %vm3681_vm3, 1.0, %v11417_v56  ;;  %v3810_v3 = vmul.f32 %v5688_v32, %v11909_v20  ;;  %v3840_v53 = vadd.f32 %v3839_v17, %v3809_v9  ;;  %v3623_v39 = vmul.f32 %v3591_v14, %v7097_v45 }
 0x3d8   : > { %v3593_v19 = vmul.f32 %v11908_v11, %v9049_v12  ;;  %v9305_v24 = vadd.f32 %v3621_v21, %v8925_v34  ;;  %vm3683_vm5 = vcmp.ge.f32.partialorder %v9283_v4, 0.0  ;;  %v3776_v49 = vadd.f32 %v5692_v26, %v3775_v6  ;;  %v11913_v6 = vld [vmem:[#allocation32_spill] sm:$0xff] }
 0x3d9   : > { %v11910_v48 = vsub.f32 %v11470_v59, %v9046_v13  ;;  %v5693_v43 = vsel %vm3682_vm4, 1.0, %v11417_v56  ;;  %v3811_v11 = vmul.f32 %v5689_v22, %v11911_v18  ;;  %v3841_v42 = vadd.f32 %v3840_v53, %v3810_v3 }
 0x3da   : > { %v3624_v32 = vmul.f32 %v3592_v35, %v7097_v45  ;;  %v9316_v17 = vadd.f32 %v3622_v1, %v8936_v63  ;;  %vm3684_vm6 = vcmp.ge.f32.partialorder %v9294_v29, 0.0  ;;  %v3777_v34 = vadd.f32 %v5693_v43, %v3776_v49  ;;  %v11915_v49 = vld [vmem:[#allocation30_spill] sm:$0xff] }
 0x3db   : > { %v3594_v40 = vmul.f32 %v11910_v48, %v9049_v12  ;;  %v11912_v14 = vsub.f32 %v11503_v27, %v9046_v13  ;;  %v5694_v9 = vsel %vm3683_vm5, 1.0, %v11417_v56  ;;  %v3812_v48 = vmul.f32 %v5690_v28, %v11913_v6 }
 0x3dc   : > { %v3842_v20 = vadd.f32 %v3841_v42, %v3811_v11  ;;  %v3625_v22 = vmul.f32 %v3593_v19, %v7097_v45  ;;  %v9327_v53 = vadd.f32 %v3623_v39, %v8947_v37  ;;  %vm3685_vm7 = vcmp.ge.f32.partialorder %v9305_v24, 0.0 }
 0x3dd   : > { %v3595_v21 = vmul.f32 %v11912_v14, %v9049_v12  ;;  %v3778_v63 = vadd.f32 %v5694_v9, %v3777_v34  ;;  %v11914_v35 = vsub.f32 %v11508_v58, %v9046_v13  ;;  %v5695_v3 = vsel %vm3684_vm6, 1.0, %v11417_v56 }
 0x3de   : > { %v3813_v14 = vmul.f32 %v5691_v47, %v11915_v49  ;;  %v3843_v18 = vadd.f32 %v3842_v20, %v3812_v48  ;;  %v3626_v28 = vmul.f32 %v3594_v40, %v7097_v45  ;;  %v9338_v42 = vadd.f32 %v3624_v32, %v8958_v8 }
 0x3df   : > { %v3596_v1 = vmul.f32 %v11914_v35, %v9049_v12  ;;  %vm3686_vm8 = vcmp.ge.f32.partialorder %v9316_v17, 0.0  ;;  %v3779_v37 = vadd.f32 %v5695_v3, %v3778_v63  ;;  %v11916_v19 = vsub.f32 %v11474_v36, %v9046_v13  ;;  %v11918_v63 = vld [vmem:[#allocation34_spill] sm:$0xff] }
 0x3e0   : > { %v5696_v11 = vsel %vm3685_vm7, 1.0, %v11417_v56  ;;  %v3814_v34 = vmul.f32 %v5692_v26, %v11819_v7  ;;  %v3844_v35 = vadd.f32 %v3843_v18, %v3813_v14  ;;  %v3627_v47 = vmul.f32 %v3595_v21, %v7097_v45 }
 0x3e1   : > { %v3597_v39 = vmul.f32 %v11916_v19, %v9049_v12  ;;  %v9349_v20 = vadd.f32 %v3625_v22, %v8969_v15  ;;  %vm3687_vm9 = vcmp.ge.f32.partialorder %v9327_v53, 0.0  ;;  %v3780_v8 = vadd.f32 %v5696_v11, %v3779_v37 }
 0x3e2   : > { %v11917_v40 = vsub.f32 %v11475_v5, %v9046_v13  ;;  %v5697_v48 = vsel %vm3686_vm8, 1.0, %v11417_v56  ;;  %v3815_v19 = vmul.f32 %v5693_v43, %v11918_v63  ;;  %v3845_v49 = vadd.f32 %v3844_v35, %v3814_v34  ;;  %v11921_v34 = vld [vmem:[#allocation38_spill] sm:$0xff] }
 0x3e3   : > { %v3628_v26 = vmul.f32 %v3596_v1, %v7097_v45  ;;  %v9360_v18 = vadd.f32 %v3626_v28, %v8980_v50  ;;  %vm3688_vm10 = vcmp.ge.f32.partialorder %v9338_v42, 0.0  ;;  %v3781_v15 = vadd.f32 %v5697_v48, %v3780_v8 }
 0x3e4   : > { %v3598_v32 = vmul.f32 %v11917_v40, %v9049_v12  ;;  %v11919_v21 = vsub.f32 %v11477_v41, %v9046_v13  ;;  %v5698_v14 = vsel %vm3687_vm9, 1.0, %v11417_v56  ;;  %v3816_v37 = vmul.f32 %v5694_v9, %v11520_v33 }
 0x3e5   : > { %v3846_v40 = vadd.f32 %v3845_v49, %v3815_v19  ;;  %v3629_v43 = vmul.f32 %v3597_v39, %v7097_v45  ;;  %v9371_v1 = vadd.f32 %v3627_v47, %v8991_v51  ;;  %vm3689_vm11 = vcmp.ge.f32.partialorder %v9349_v20, 0.0 }
 0x3e6   : > { %v3599_v22 = vmul.f32 %v11919_v21, %v9049_v12  ;;  %v3782_v50 = vadd.f32 %v5698_v14, %v3781_v15  ;;  %v5699_v28 = vsel %vm3688_vm10, 1.0, %v11417_v56  ;;  %v3817_v35 = vmul.f32 %v5695_v3, %v11921_v34  ;;  %v11924_v15 = vld [vmem:[#allocation94_spill] sm:$0xff] }
 0x3e7   : > { %11920 = vst [vmem:[#allocation45_spill] sm:$0xff] %v9371_v1  ;;  %v3847_v8 = vadd.f32 %v3846_v40, %v3816_v37  ;;  %v3630_v21 = vmul.f32 %v3598_v32, %v7097_v45  ;;  %v9378_v63 = vadd.f32 %v3628_v26, %v8998_v30  ;;  %vm3690_vm12 = vcmp.ge.f32.partialorder %v9360_v18, 0.0  ;;  %v11926_v37 = vld [vmem:[#allocation42_spill] sm:$0xff] }
 0x3e8   : > { %v3783_v9 = vadd.f32 %v5699_v28, %v3782_v50  ;;  %v11923_v51 = vsub.f32 %v11478_v2, %v9046_v13  ;;  %v5700_v39 = vsel %vm3689_vm11, 1.0, %v11417_v56  ;;  %v3818_v47 = vmul.f32 %v5696_v11, %v11825_v31  ;;  %v11927_v13 = vld [vmem:[#allocation19_spill] sm:$0xff]  ;;  %v11939_v31 = vld [vmem:[#allocation60_spill] sm:$0xff] }
 0x3e9   : > { %11922 = vst [vmem:[#allocation51_spill] sm:$0xff] %v9378_v63  ;;  %v3848_v19 = vadd.f32 %v3847_v8, %v3817_v35  ;;  %v3631_v3 = vmul.f32 %v3599_v22, %v7097_v45  ;;  %v9389_v32 = vadd.f32 %v3629_v43, %v11924_v15  ;;  %vm3691_vm13 = vcmp.ge.f32.partialorder %v9371_v1, 0.0  ;;  %v11929_v22 = vld [vmem:[#allocation48_spill] sm:$0xff]  ;;  %v11930_v15 = vld [vmem:[#allocation93_spill] sm:$0xff]  ;;  %v11978_v1 = vld [vmem:[#allocation39_spill] sm:$0xff] }
 0x3ea   : > { %v3600_v49 = vmul.f32 %v11923_v51, %v9049_v12  ;;  %v3784_v30 = vadd.f32 %v5700_v39, %v3783_v9  ;;  %v5701_v26 = vsel %vm3690_vm12, 1.0, %v11417_v56  ;;  %v3819_v40 = vmul.f32 %v5697_v48, %v11926_v37 }
 0x3eb   : > { %11925 = vst [vmem:[#allocation49_spill] sm:$0xff] %v9389_v32  ;;  %v3849_v50 = vadd.f32 %v3848_v19, %v3818_v47  ;;  %v9395_v12 = vadd.f32 %v3630_v21, %v11927_v13  ;;  %vm3692_vm14 = vcmp.ge.f32.partialorder %v9378_v63, 0.0  ;;  %v5702_v35 = vsel %vm3691_vm13, 1.0, %v11417_v56  ;;  %v11932_v21 = vld [vmem:[#allocation46_spill] sm:$0xff] }
 0x3ec   : > { %v3785_v11 = vadd.f32 %v5701_v26, %v3784_v30  ;;  %v3820_v8 = vmul.f32 %v5698_v14, %v11929_v22  ;;  %v3632_v51 = vmul.f32 %v3600_v49, %v7097_v45  ;;  %v9402_v9 = vadd.f32 %v3631_v3, %v11930_v15  ;;  %v11933_v14 = vld [vmem:[#allocation52_spill] sm:$0xff]  ;;  %v11934_v49 = vld [vmem:[#allocation17_spill] sm:$0xff]  ;;  %v11936_v15 = vld [vmem:[#allocation50_spill] sm:$0xff] }
 0x3ed   : > { %11928 = vst [vmem:[#allocation55_spill] sm:$0xff] %v9395_v12  ;;  %v3850_v43 = vadd.f32 %v3849_v50, %v3819_v40  ;;  %vm3693_vm15 = vcmp.ge.f32.partialorder %v9389_v32, 0.0  ;;  %v5703_v47 = vsel %vm3692_vm14, 1.0, %v11417_v56  ;;  %v3821_v19 = vmul.f32 %v5699_v28, %v11932_v21 }
 0x3ee   : > { %11931 = vst [vmem:[#allocation53_spill] sm:$0xff] %v9402_v9  ;;  %v3786_v48 = vadd.f32 %v5702_v35, %v3785_v11  ;;  %vm3694_vm0 = vcmp.ge.f32.partialorder %v9395_v12, 0.0  ;;  %v5704_v37 = vsel %vm3693_vm15, 1.0, %v11417_v56  ;;  %v3822_v40 = vmul.f32 %v5700_v39, %v11933_v14  ;;  %v11937_v39 = vld [vmem:[#allocation56_spill] sm:$0xff]  ;;  %v11938_v14 = vld [vmem:[#allocation54_spill] sm:$0xff] }
 0x3ef   : > { %v3851_v13 = vadd.f32 %v3850_v43, %v3820_v8  ;;  %v9411_v22 = vadd.f32 %v3632_v51, %v11934_v49  ;;  %vm3695_vm1 = vcmp.ge.f32.partialorder %v9402_v9, 0.0  ;;  %v5705_v11 = vsel %vm3694_vm0, 1.0, %v11417_v56 }
 0x3f0   : > { %v3787_v30 = vadd.f32 %v5703_v47, %v3786_v48  ;;  %v3823_v32 = vmul.f32 %v5701_v26, %v11936_v15  ;;  %v5706_v43 = vsel %vm3695_vm1, 1.0, %v11417_v56  ;;  %v3826_v26 = vmul.f32 %v5704_v37, %v11939_v31  ;;  %v11977_v31 = vld [vmem:[#allocation8_spill] sm:$0xff] }
 0x3f1   : > { %v3852_v50 = vadd.f32 %v3851_v13, %v3821_v19  ;;  %11935 = vst [vmem:[#allocation59_spill] sm:$0xff] %v9411_v22  ;;  %vm3696_vm2 = vcmp.ge.f32.partialorder %v9411_v22, 0.0  ;;  %v3824_v19 = vmul.f32 %v5702_v35, %v11937_v39  ;;  %v11941_v22 = vld [vmem:[#allocation64_spill] sm:$0xff]  ;;  %v11942_v39 = vld [vmem:[#allocation62_spill] sm:$0xff] }
 0x3f2   : > { %v3788_v3 = vadd.f32 %v5704_v37, %v3787_v30  ;;  %v5707_v51 = vsel %vm3696_vm2, 1.0, %v11417_v56  ;;  %v3825_v30 = vmul.f32 %v5703_v47, %v11938_v14 }
 0x3f3   : > { %v3853_v28 = vadd.f32 %v3852_v50, %v3822_v40  ;;  %v3829_v34 = vmul.f32 %v5707_v51, %v11942_v39  ;;  %v11966_v39 = vld [vmem:[#allocation25_spill] sm:$0xff] }
 0x3f4   : > { %v3789_v8 = vadd.f32 %v5705_v11, %v3788_v3  ;;  %v11940_v3 = vld [vmem:[#allocation58_spill] sm:$0xff] }
 0x3f5   : > { %v3854_v48 = vadd.f32 %v3853_v28, %v3823_v32  ;;  %v3827_v15 = vmul.f32 %v5705_v11, %v11940_v3 }
 0x3f6   : > { %v3790_v21 = vadd.f32 %v5706_v43, %v3789_v8  ;;  %v3828_v8 = vmul.f32 %v5706_v43, %v11941_v22  ;;  %v11943_v43 = vld [vmem:[#allocation75_spill] sm:$0xff] }
 0x3f7   : > { %v3855_v13 = vadd.f32 %v3854_v48, %v3824_v19  ;;  %v11964_v22 = vld [vmem:[#allocation27_spill] sm:$0xff] }
 0x3f8   : > { %v3791_v49 = vadd.f32 %v5707_v51, %v3790_v21 }
 0x3f9   : > { %v3856_v9 = vadd.f32 %v3855_v13, %v3825_v30 }
 0x3fa   : > { %v3792_v12 = vrot.slane %v3791_v49, 4 }
 0x3fb   : > { %v3857_v40 = vadd.f32 %v3856_v9, %v3826_v26 }
 0x3fc   : > { %v3793_v50 = vadd.f32 %v3792_v12, %v3791_v49 }
 0x3fd   : > { %v3858_v32 = vadd.f32 %v3857_v40, %v3827_v15 }
 0x3fe   : > { %v3794_v28 = vrot.slane %v3793_v50, 2 }
 0x3ff   : > { %v3859_v63 = vadd.f32 %v3858_v32, %v3828_v8  ;;  %v11944_v32 = vld [vmem:[#allocation67_spill] sm:$0xff]  ;;  %v11945_v8 = vld [vmem:[#allocation66_spill] sm:$0xff] }
 0x400   : > { %v3795_v35 = vadd.f32 %v3794_v28, %v3793_v50 }
 0x401   : > { %v3860_v48 = vadd.f32 %v3859_v63, %v3829_v34 }
 0x402   : > { %v3796_v21 = vrot.slane %v3795_v35, 1 }
 0x403   : > { %v3861_v19 = vrot.slane %v3860_v48, 4 }
 0x404   : > { %v3797_v47 = vadd.f32 %v3796_v21, %v3795_v35  ;;  %v11947_v21 = vld [vmem:[#allocation69_spill] sm:$0xff] }
 0x405   : > { %v3862_v13 = vadd.f32 %v3861_v19, %v3860_v48 }
 0x406   : > { %v3867_v30 = vsub.f32 256.0, %v3797_v47  ;;  %v3869_v9 = vmax.f32 %v3797_v47, 1.0 }
 0x407   : > { %v3863_v14 = vrot.slane %v3862_v13, 2 }
 0x408   : > { %v3872_v37 = vmax.f32 %v3867_v30, 1.0  ;;  %v11948_v30 = vld [vmem:[#allocation68_spill] sm:$0xff] }
 0x409   : > { %v3864_v12 = vadd.f32 %v3863_v14, %v3862_v13  ;;  %v11946_v14 = vld [vmem:[#allocation65_spill] sm:$0xff] }
 0x40a   : > { %6162 = vrcp.f32 %v3872_v37 }
 0x40b   : > { %6164 = vrcp.f32 %v3869_v9  ;;  %v3865_v11 = vrot.slane %v3864_v12, 1  ;;  %v11949_v9 = vld [vmem:[#allocation71_spill] sm:$0xff] }
 0x40d   : > { %v3866_v15 = vadd.f32 %v3865_v11, %v3864_v12 }
 0x40f   : > { %v3868_v26 = vsub.f32 %v11943_v43, %v3866_v15 }
 0x414   : > { %v6163_v49 = vpop.eup %6162 }
 0x415   : > { %v6165_v40 = vpop.eup %6164  ;;  %v3874_v50 = vmul.f32 %v6163_v49, %v3868_v26  ;;  %v11950_v26 = vld [vmem:[#allocation70_spill] sm:$0xff] }
 0x416   : > { %v3871_v51 = vmul.f32 %v6165_v40, %v3866_v15 }
 0x418   : > { %v3875_v63 = vsub.f32 %v3871_v51, %v3874_v50  ;;  %v9426_v34 = vadd.f32 %v3874_v50, %v3871_v51  ;;  %v11951_v51 = vld [vmem:[#allocation73_spill] sm:$0xff] }
 0x41a   : > { %v9429_v28 = vmul.f32 %v3875_v63, %v11944_v32  ;;  %v3878_v35 = vsub.f32 %v11945_v8, %v9426_v34  ;;  %v3879_v48 = vsub.f32 %v11946_v14, %v9426_v34  ;;  %v3880_v19 = vsub.f32 %v11947_v21, %v9426_v34 }
 0x41b   : > { %v3881_v37 = vsub.f32 %v11948_v30, %v9426_v34  ;;  %v3882_v12 = vsub.f32 %v11949_v9, %v9426_v34  ;;  %v3883_v40 = vsub.f32 %v11950_v26, %v9426_v34  ;;  %v3884_v63 = vsub.f32 %v11951_v51, %v9426_v34  ;;  %v11952_v30 = vld [vmem:[#allocation23_spill] sm:$0xff]  ;;  %v11957_v26 = vld [vmem:[#allocation76_spill] sm:$0xff]  ;;  %v11959_v51 = vld [vmem:[#allocation78_spill] sm:$0xff] }
 0x41c   : > { %v3910_v47 = vmul.f32 %v3878_v35, %v9429_v28  ;;  %v3911_v13 = vmul.f32 %v3879_v48, %v9429_v28  ;;  %v3912_v11 = vmul.f32 %v3880_v19, %v9429_v28  ;;  %v11954_v19 = vld [vmem:[#allocation21_spill] sm:$0xff]  ;;  %v3886_v14 = vsub.f32 %v11957_v26, %v9426_v34  ;;  %v11963_v26 = vld [vmem:[#allocation82_spill] sm:$0xff] }
 0x41d   : > { %v3913_v50 = vmul.f32 %v3881_v37, %v9429_v28  ;;  %v3914_v35 = vmul.f32 %v3882_v12, %v9429_v28  ;;  %v11958_v37 = vld [vmem:[#allocation74_spill] sm:$0xff]  ;;  %v3888_v12 = vsub.f32 %v11959_v51, %v9426_v34  ;;  %v3916_v51 = vmul.f32 %v3884_v63, %v9429_v28 }
 0x41e   : > { %v3942_v15 = vmul.f32 %v3910_v47, %v7097_v45  ;;  %v3943_v49 = vmul.f32 %v3911_v13, %v7097_v45  ;;  %v3944_v48 = vmul.f32 %v3912_v11, %v7097_v45  ;;  %v11956_v47 = vld [vmem:[#allocation72_spill] sm:$0xff]  ;;  %v3887_v8 = vsub.f32 %v11958_v37, %v9426_v34  ;;  %v11960_v11 = vld [vmem:[#allocation77_spill] sm:$0xff] }
 0x41f   : > { %v3885_v13 = vsub.f32 %v11956_v47, %v9426_v34  ;;  %v3889_v32 = vsub.f32 %v11960_v11, %v9426_v34  ;;  %v11962_v47 = vld [vmem:[#allocation79_spill] sm:$0xff]  ;;  %v3946_v11 = vmul.f32 %v3914_v35, %v7097_v45 }
 0x420   : > { %v9454_v9 = vadd.f32 %v3942_v15, %v11952_v30  ;;  %v9457_v21 = vadd.f32 %v3943_v49, %v11954_v19  ;;  %v11961_v30 = vld [vmem:[#allocation80_spill] sm:$0xff]  ;;  %v3915_v49 = vmul.f32 %v3883_v40, %v9429_v28  ;;  %v3945_v19 = vmul.f32 %v3913_v50, %v7097_v45  ;;  %v11970_v40 = vld [vmem:[#allocation29_spill] sm:$0xff] }
 0x421   : > { %v3890_v15 = vsub.f32 %v11961_v30, %v9426_v34  ;;  %v3891_v43 = vsub.f32 %v11962_v47, %v9426_v34  ;;  %v9482_v3 = vadd.f32 %v3944_v48, %v11964_v22  ;;  %v3917_v35 = vmul.f32 %v3885_v13, %v9429_v28  ;;  %v11968_v13 = vld [vmem:[#allocation31_spill] sm:$0xff] }
 0x422   : > { %11953 = vst [vmem:[#allocation57_spill] sm:$0xff] %v9454_v9  ;;  %11955 = vst [vmem:[#allocation63_spill] sm:$0xff] %v9457_v21  ;;  %vm4006_vm3 = vcmp.ge.f32.partialorder %v9454_v9, 0.0  ;;  %vm4007_vm4 = vcmp.ge.f32.partialorder %v9457_v21, 0.0  ;;  %v3947_v48 = vmul.f32 %v3915_v49, %v7097_v45  ;;  %v9499_v47 = vadd.f32 %v3945_v19, %v11966_v39  ;;  %v11974_v9 = vld [vmem:[#allocation33_spill] sm:$0xff] }
 0x423   : > { %11965 = vst [vmem:[#allocation61_spill] sm:$0xff] %v9482_v3  ;;  %v5708_v37 = vsel %vm4006_vm3, 1.0, %v11417_v56  ;;  %v5709_v63 = vsel %vm4007_vm4, 1.0, %v11417_v56  ;;  %v3918_v30 = vmul.f32 %v3886_v14, %v9429_v28  ;;  %v3948_v22 = vmul.f32 %v3916_v51, %v7097_v45 }
 0x424   : > { %11967 = vst [vmem:[#allocation81_spill] sm:$0xff] %v9499_v47  ;;  %v9510_v21 = vadd.f32 %v3946_v11, %v11968_v13  ;;  %vm4008_vm5 = vcmp.ge.f32.partialorder %v9482_v3, 0.0  ;;  %v3919_v50 = vmul.f32 %v3887_v8, %v9429_v28  ;;  %v3949_v14 = vmul.f32 %v3917_v35, %v7097_v45  ;;  %v11972_v3 = vld [vmem:[#allocation35_spill] sm:$0xff] }
 0x425   : > { %v9522_v51 = vadd.f32 %v3947_v48, %v11970_v40  ;;  %vm4009_vm6 = vcmp.ge.f32.partialorder %v9499_v47, 0.0  ;;  %v4102_v11 = vadd.f32 %v5709_v63, %v5708_v37  ;;  %v3920_v49 = vmul.f32 %v3888_v12, %v9429_v28  ;;  %v11976_v48 = vld [vmem:[#allocation9_spill] sm:$0xff] }
 0x426   : > { %11969 = vst [vmem:[#allocation84_spill] sm:$0xff] %v9510_v21  ;;  %v5710_v19 = vsel %vm4008_vm5, 1.0, %v11417_v56  ;;  %v3950_v8 = vmul.f32 %v3918_v30, %v7097_v45  ;;  %v9533_v35 = vadd.f32 %v3948_v22, %v11972_v3  ;;  %vm4010_vm7 = vcmp.ge.f32.partialorder %v9510_v21, 0.0 }
 0x427   : > { %11971 = vst [vmem:[#allocation83_spill] sm:$0xff] %v9522_v51  ;;  %v4103_v40 = vadd.f32 %v5710_v19, %v4102_v11  ;;  %v3921_v39 = vmul.f32 %v3889_v32, %v9429_v28  ;;  %v5711_v12 = vsel %vm4009_vm6, 1.0, %v11417_v56  ;;  %v3951_v47 = vmul.f32 %v3919_v50, %v7097_v45 }
 0x428   : > { %11973 = vst [vmem:[#allocation86_spill] sm:$0xff] %v9533_v35  ;;  %v9544_v30 = vadd.f32 %v3949_v14, %v11974_v9  ;;  %vm4011_vm8 = vcmp.ge.f32.partialorder %v9522_v51, 0.0  ;;  %v3922_v22 = vmul.f32 %v3890_v15, %v9429_v28  ;;  %v5712_v11 = vsel %vm4010_vm7, 1.0, %v11417_v56  ;;  %v11982_v15 = vld [vmem:[#allocation11_spill] sm:$0xff] }
 0x429   : > { %v4104_v3 = vadd.f32 %v5711_v12, %v4103_v40  ;;  %v4139_v21 = vmul.f32 %v5708_v37, %v11976_v48  ;;  %v4140_v13 = vmul.f32 %v5709_v63, %v11977_v31  ;;  %v3952_v32 = vmul.f32 %v3920_v49, %v7097_v45  ;;  %v11980_v40 = vld [vmem:[#allocation37_spill] sm:$0xff] }
 0x42a   : > { %11975 = vst [vmem:[#allocation85_spill] sm:$0xff] %v9544_v30  ;;  %v9553_v33 = vadd.f32 %v3950_v8, %v11978_v1  ;;  %vm4012_vm9 = vcmp.ge.f32.partialorder %v9533_v35, 0.0  ;;  %v3923_v14 = vmul.f32 %v3891_v43, %v9429_v28  ;;  %v5713_v37 = vsel %vm4011_vm8, 1.0, %v11417_v56  ;;  %v11983_v35 = vld [vmem:[#allocation43_spill] sm:$0xff] }
 0x42b   : > { %v4105_v9 = vadd.f32 %v5712_v11, %v4104_v3  ;;  %v3953_v63 = vmul.f32 %v3921_v39, %v7097_v45  ;;  %v9564_v49 = vadd.f32 %v3951_v47, %v11980_v40  ;;  %vm4013_vm10 = vcmp.ge.f32.partialorder %v9544_v30, 0.0  ;;  %v11985_v30 = vld [vmem:[#allocation10_spill] sm:$0xff] }
 0x42c   : > { %11979 = vst [vmem:[#allocation88_spill] sm:$0xff] %v9553_v33  ;;  %v11981_v8 = vsub.f32 %v11963_v26, %v9426_v34  ;;  %v5714_v50 = vsel %vm4012_vm9, 1.0, %v11417_v56  ;;  %v4141_v31 = vmul.f32 %v5710_v19, %v11982_v15  ;;  %v4171_v43 = vadd.f32 %v4140_v13, %v4139_v21  ;;  %v11986_v19 = vld [vmem:[#allocation41_spill] sm:$0xff] }
 0x42d   : > { %v4106_v1 = vadd.f32 %v5713_v37, %v4105_v9  ;;  %v3954_v48 = vmul.f32 %v3922_v22, %v7097_v45  ;;  %v9575_v39 = vadd.f32 %v3952_v32, %v11983_v35  ;;  %vm4014_vm11 = vcmp.ge.f32.partialorder %v9553_v33, 0.0 }
 0x42e   : > { %v3924_v3 = vmul.f32 %v11981_v8, %v9429_v28  ;;  %v11984_v9 = vsub.f32 %v11457_v62, %v9426_v34  ;;  %v5715_v8 = vsel %vm4013_vm10, 1.0, %v11417_v56  ;;  %v4142_v51 = vmul.f32 %v5711_v12, %v11985_v30 }
 0x42f   : > { %v4107_v47 = vadd.f32 %v5714_v50, %v4106_v1  ;;  %v4172_v26 = vadd.f32 %v4171_v43, %v4141_v31  ;;  %v3955_v21 = vmul.f32 %v3923_v14, %v7097_v45  ;;  %v9586_v13 = vadd.f32 %v3953_v63, %v11986_v19  ;;  %v11991_v19 = vld [vmem:[#allocation12_spill] sm:$0xff] }
 0x430   : > { %v3925_v40 = vmul.f32 %v11984_v9, %v9429_v28  ;;  %vm4015_vm12 = vcmp.ge.f32.partialorder %v9564_v49, 0.0  ;;  %v11988_v22 = vsub.f32 %v11459_v10, %v9426_v34  ;;  %v5716_v1 = vsel %vm4014_vm11, 1.0, %v11417_v56  ;;  %v11989_v9 = vld [vmem:[#allocation13_spill] sm:$0xff] }
 0x431   : > { %11987 = vst [vmem:[#allocation87_spill] sm:$0xff] %v9586_v13  ;;  %v4108_v35 = vadd.f32 %v5715_v8, %v4107_v47  ;;  %v4143_v15 = vmul.f32 %v5712_v11, %v11989_v9  ;;  %v4173_v33 = vadd.f32 %v4172_v26, %v4142_v51  ;;  %v3956_v31 = vmul.f32 %v3924_v3, %v7097_v45 }
 0x432   : > { %v3926_v32 = vmul.f32 %v11988_v22, %v9429_v28  ;;  %v9597_v12 = vadd.f32 %v3954_v48, %v9217_v46  ;;  %vm4016_vm13 = vcmp.ge.f32.partialorder %v9575_v39, 0.0  ;;  %v11990_v63 = vsub.f32 %v11460_v25, %v9426_v34 }
 0x433   : > { %v4109_v14 = vadd.f32 %v5716_v1, %v4108_v35  ;;  %v5717_v47 = vsel %vm4015_vm12, 1.0, %v11417_v56  ;;  %v4144_v22 = vmul.f32 %v5713_v37, %v11991_v19  ;;  %v4174_v30 = vadd.f32 %v4173_v33, %v4143_v15  ;;  %v11993_v35 = vld [vmem:[#allocation16_spill] sm:$0xff]  ;;  %v11994_v15 = vld [vmem:[#allocation47_spill] sm:$0xff] }
 0x434   : > { %v3927_v43 = vmul.f32 %v11990_v63, %v9429_v28  ;;  %v3957_v26 = vmul.f32 %v3925_v40, %v7097_v45  ;;  %v9608_v51 = vadd.f32 %v3955_v21, %v9228_v16  ;;  %vm4017_vm14 = vcmp.ge.f32.partialorder %v9586_v13, 0.0 }
 0x435   : > { %v4110_v46 = vadd.f32 %v5717_v47, %v4109_v14  ;;  %v11992_v48 = vsub.f32 %v11461_v54, %v9426_v34  ;;  %v5718_v3 = vsel %vm4016_vm13, 1.0, %v11417_v56  ;;  %v4145_v63 = vmul.f32 %v5714_v50, %v11993_v35 }
 0x436   : > { %v4175_v9 = vadd.f32 %v4174_v30, %v4144_v22  ;;  %v3958_v33 = vmul.f32 %v3926_v32, %v7097_v45  ;;  %v9619_v37 = vadd.f32 %v3956_v31, %v11994_v15  ;;  %vm4018_vm15 = vcmp.ge.f32.partialorder %v9597_v12, 0.0  ;;  %v11998_v15 = vld [vmem:[#allocation20_spill] sm:$0xff] }
 0x437   : > { %v3928_v11 = vmul.f32 %v11992_v48, %v9429_v28  ;;  %v4111_v16 = vadd.f32 %v5718_v3, %v4110_v46  ;;  %v11995_v40 = vsub.f32 %v11462_v57, %v9426_v34  ;;  %v5719_v14 = vsel %vm4017_vm14, 1.0, %v11417_v56  ;;  %v11996_v48 = vld [vmem:[#allocation15_spill] sm:$0xff] }
 0x438   : > { %v4146_v19 = vmul.f32 %v5715_v8, %v11996_v48  ;;  %v4176_v13 = vadd.f32 %v4175_v9, %v4145_v63  ;;  %v3959_v30 = vmul.f32 %v3927_v43, %v7097_v45  ;;  %v9630_v50 = vadd.f32 %v3957_v26, %v9250_v23 }
 0x439   : > { %v3929_v21 = vmul.f32 %v11995_v40, %v9429_v28  ;;  %vm4019_vm0 = vcmp.ge.f32.partialorder %v9608_v51, 0.0  ;;  %v4112_v32 = vadd.f32 %v5719_v14, %v4111_v16  ;;  %v11997_v31 = vsub.f32 %v11463_v38, %v9426_v34  ;;  %v12000_v16 = vld [vmem:[#allocation18_spill] sm:$0xff] }
 0x43a   : > { %v5720_v46 = vsel %vm4018_vm15, 1.0, %v11417_v56  ;;  %v4147_v40 = vmul.f32 %v5716_v1, %v11998_v15  ;;  %v4177_v35 = vadd.f32 %v4176_v13, %v4146_v19  ;;  %v3960_v8 = vmul.f32 %v3928_v11, %v7097_v45 }
 0x43b   : > { %v3930_v22 = vmul.f32 %v11997_v31, %v9429_v28  ;;  %v9641_v9 = vadd.f32 %v3958_v33, %v9261_v0  ;;  %vm4020_vm1 = vcmp.ge.f32.partialorder %v9619_v37, 0.0  ;;  %v4113_v23 = vadd.f32 %v5720_v46, %v4112_v32  ;;  %v12002_v32 = vld [vmem:[#allocation24_spill] sm:$0xff] }
 0x43c   : > { %v11999_v43 = vsub.f32 %v11465_v52, %v9426_v34  ;;  %v5721_v63 = vsel %vm4019_vm0, 1.0, %v11417_v56  ;;  %v4148_v31 = vmul.f32 %v5717_v47, %v12000_v16  ;;  %v4178_v48 = vadd.f32 %v4177_v35, %v4147_v40 }
 0x43d   : > { %v3961_v13 = vmul.f32 %v3929_v21, %v7097_v45  ;;  %v9652_v1 = vadd.f32 %v3959_v30, %v9272_v61  ;;  %vm4021_vm2 = vcmp.ge.f32.partialorder %v9630_v50, 0.0  ;;  %v4114_v0 = vadd.f32 %v5721_v63, %v4113_v23  ;;  %v12004_v23 = vld [vmem:[#allocation22_spill] sm:$0xff] }
 0x43e   : > { %v3931_v26 = vmul.f32 %v11999_v43, %v9429_v28  ;;  %v12001_v19 = vsub.f32 %v11466_v44, %v9426_v34  ;;  %v5722_v33 = vsel %vm4020_vm1, 1.0, %v11417_v56  ;;  %v4149_v43 = vmul.f32 %v5718_v3, %v12002_v32 }
 0x43f   : > { %v4179_v15 = vadd.f32 %v4178_v48, %v4148_v31  ;;  %v3962_v47 = vmul.f32 %v3930_v22, %v7097_v45  ;;  %v9663_v35 = vadd.f32 %v3960_v8, %v9283_v4  ;;  %vm4022_vm3 = vcmp.ge.f32.partialorder %v9641_v9, 0.0 }
 0x440   : > { %v3932_v11 = vmul.f32 %v12001_v19, %v9429_v28  ;;  %v4115_v61 = vadd.f32 %v5722_v33, %v4114_v0  ;;  %v12003_v21 = vsub.f32 %v11468_v60, %v9426_v34  ;;  %v5723_v40 = vsel %vm4021_vm2, 1.0, %v11417_v56  ;;  %v12006_v0 = vld [vmem:[#allocation28_spill] sm:$0xff] }
 0x441   : > { %v4150_v19 = vmul.f32 %v5719_v14, %v12004_v23  ;;  %v4180_v16 = vadd.f32 %v4179_v15, %v4149_v43  ;;  %v3963_v3 = vmul.f32 %v3931_v26, %v7097_v45  ;;  %v9674_v48 = vadd.f32 %v3961_v13, %v9294_v29 }
 0x442   : > { %v3933_v30 = vmul.f32 %v12003_v21, %v9429_v28  ;;  %vm4023_vm4 = vcmp.ge.f32.partialorder %v9652_v1, 0.0  ;;  %v4116_v4 = vadd.f32 %v5723_v40, %v4115_v61  ;;  %v12005_v22 = vsub.f32 %v11469_v55, %v9426_v34  ;;  %v12008_v61 = vld [vmem:[#allocation26_spill] sm:$0xff] }
 0x443   : > { %v5724_v31 = vsel %vm4022_vm3, 1.0, %v11417_v56  ;;  %v4151_v21 = vmul.f32 %v5720_v46, %v12006_v0  ;;  %v4181_v32 = vadd.f32 %v4180_v16, %v4150_v19  ;;  %v3964_v14 = vmul.f32 %v3932_v11, %v7097_v45 }
 0x444   : > { %v3934_v8 = vmul.f32 %v12005_v22, %v9429_v28  ;;  %v9685_v15 = vadd.f32 %v3962_v47, %v9305_v24  ;;  %vm4024_vm5 = vcmp.ge.f32.partialorder %v9663_v35, 0.0  ;;  %v4117_v29 = vadd.f32 %v5724_v31, %v4116_v4 }
 0x445   : > { %v12007_v26 = vsub.f32 %v11470_v59, %v9426_v34  ;;  %v5725_v43 = vsel %vm4023_vm4, 1.0, %v11417_v56  ;;  %v4152_v22 = vmul.f32 %v5721_v63, %v12008_v61  ;;  %v4182_v23 = vadd.f32 %v4181_v32, %v4151_v21 }
 0x446   : > { %v3965_v46 = vmul.f32 %v3933_v30, %v7097_v45  ;;  %v9696_v16 = vadd.f32 %v3963_v3, %v9316_v17  ;;  %vm4025_vm6 = vcmp.ge.f32.partialorder %v9674_v48, 0.0  ;;  %v4118_v24 = vadd.f32 %v5725_v43, %v4117_v29  ;;  %v12012_v29 = vld [vmem:[#allocation30_spill] sm:$0xff] }
 0x447   : > { %v3935_v13 = vmul.f32 %v12007_v26, %v9429_v28  ;;  %v12009_v11 = vsub.f32 %v11503_v27, %v9426_v34  ;;  %v5726_v19 = vsel %vm4024_vm5, 1.0, %v11417_v56  ;;  %v4153_v4 = vmul.f32 %v5722_v33, %v11913_v6 }
 0x448   : > { %v4183_v26 = vadd.f32 %v4182_v23, %v4152_v22  ;;  %v3966_v63 = vmul.f32 %v3934_v8, %v7097_v45  ;;  %v9707_v32 = vadd.f32 %v3964_v14, %v9327_v53  ;;  %vm4026_vm7 = vcmp.ge.f32.partialorder %v9685_v15, 0.0 }
 0x449   : > { %v3936_v47 = vmul.f32 %v12009_v11, %v9429_v28  ;;  %v4119_v17 = vadd.f32 %v5726_v19, %v4118_v24  ;;  %v12011_v30 = vsub.f32 %v11508_v58, %v9426_v34  ;;  %v5727_v21 = vsel %vm4025_vm6, 1.0, %v11417_v56 }
 0x44a   : > { %12010 = vst [vmem:[#allocation90_spill] sm:$0xff] %v9707_v32  ;;  %v4154_v11 = vmul.f32 %v5723_v40, %v12012_v29  ;;  %v4184_v61 = vadd.f32 %v4183_v26, %v4153_v4  ;;  %v3967_v33 = vmul.f32 %v3935_v13, %v7097_v45  ;;  %v9718_v23 = vadd.f32 %v3965_v46, %v9338_v42 }
 0x44b   : > { %v3937_v3 = vmul.f32 %v12011_v30, %v9429_v28  ;;  %vm4027_vm8 = vcmp.ge.f32.partialorder %v9696_v16, 0.0  ;;  %v4120_v53 = vadd.f32 %v5727_v21, %v4119_v17  ;;  %v12014_v8 = vsub.f32 %v11474_v36, %v9426_v34  ;;  %v12016_v17 = vld [vmem:[#allocation34_spill] sm:$0xff] }
 0x44c   : > { %12013 = vst [vmem:[#allocation89_spill] sm:$0xff] %v9718_v23  ;;  %v5728_v22 = vsel %vm4026_vm7, 1.0, %v11417_v56  ;;  %v4155_v24 = vmul.f32 %v5724_v31, %v11819_v7  ;;  %v4185_v30 = vadd.f32 %v4184_v61, %v4154_v11  ;;  %v3968_v40 = vmul.f32 %v3936_v47, %v7097_v45 }
 0x44d   : > { %v3938_v14 = vmul.f32 %v12014_v8, %v9429_v28  ;;  %v9729_v13 = vadd.f32 %v3966_v63, %v9349_v20  ;;  %vm4028_vm9 = vcmp.ge.f32.partialorder %v9707_v32, 0.0  ;;  %v4121_v42 = vadd.f32 %v5728_v22, %v4120_v53  ;;  %v12019_v53 = vld [vmem:[#allocation40_spill] sm:$0xff] }
 0x44e   : > { %v12015_v46 = vsub.f32 %v11475_v5, %v9426_v34  ;;  %v5729_v26 = vsel %vm4027_vm8, 1.0, %v11417_v56  ;;  %v4156_v8 = vmul.f32 %v5725_v43, %v12016_v17  ;;  %v4186_v29 = vadd.f32 %v4185_v30, %v4155_v24  ;;  %v12020_v24 = vld [vmem:[#allocation45_spill] sm:$0xff]  ;;  %v12022_v30 = vld [vmem:[#allocation38_spill] sm:$0xff] }
 0x44f   : > { %v3969_v31 = vmul.f32 %v3937_v3, %v7097_v45  ;;  %v9740_v61 = vadd.f32 %v3967_v33, %v9360_v18  ;;  %vm4029_vm10 = vcmp.ge.f32.partialorder %v9718_v23, 0.0  ;;  %v4122_v20 = vadd.f32 %v5729_v26, %v4121_v42  ;;  %v12023_v23 = vld [vmem:[#allocation51_spill] sm:$0xff] }
 0x450   : > { %v3939_v4 = vmul.f32 %v12015_v46, %v9429_v28  ;;  %v12018_v47 = vsub.f32 %v11477_v41, %v9426_v34  ;;  %v5730_v11 = vsel %vm4028_vm9, 1.0, %v11417_v56  ;;  %v4157_v46 = vmul.f32 %v5726_v19, %v12019_v53  ;;  %v12080_v53 = vld [vmem:[#allocation88_spill] sm:$0xff] }
 0x451   : > { %12017 = vst [vmem:[#allocation92_spill] sm:$0xff] %v9740_v61  ;;  %v4187_v7 = vadd.f32 %v4186_v29, %v4156_v8  ;;  %v3970_v43 = vmul.f32 %v3938_v14, %v7097_v45  ;;  %v9751_v3 = vadd.f32 %v3968_v40, %v12020_v24  ;;  %vm4030_vm11 = vcmp.ge.f32.partialorder %v9729_v13, 0.0  ;;  %v12026_v8 = vld [vmem:[#allocation44_spill] sm:$0xff] }
 0x452   : > { %v3940_v63 = vmul.f32 %v12018_v47, %v9429_v28  ;;  %v4123_v18 = vadd.f32 %v5730_v11, %v4122_v20  ;;  %v5731_v33 = vsel %vm4029_vm10, 1.0, %v11417_v56  ;;  %v4158_v42 = vmul.f32 %v5727_v21, %v12022_v30  ;;  %v12027_v21 = vld [vmem:[#allocation49_spill] sm:$0xff] }
 0x453   : > { %12021 = vst [vmem:[#allocation91_spill] sm:$0xff] %v9751_v3  ;;  %v4188_v17 = vadd.f32 %v4187_v7, %v4157_v46  ;;  %v3971_v47 = vmul.f32 %v3939_v4, %v7097_v45  ;;  %v9758_v32 = vadd.f32 %v3969_v31, %v12023_v23  ;;  %vm4031_vm12 = vcmp.ge.f32.partialorder %v9740_v61, 0.0  ;;  %v12029_v46 = vld [vmem:[#allocation42_spill] sm:$0xff] }
 0x454   : > { %v4124_v19 = vadd.f32 %v5731_v33, %v4123_v18  ;;  %v12025_v29 = vsub.f32 %v11478_v2, %v9426_v34  ;;  %v5732_v40 = vsel %vm4030_vm11, 1.0, %v11417_v56  ;;  %v4159_v20 = vmul.f32 %v5728_v22, %v12026_v8  ;;  %v12030_v34 = vld [vmem:[#allocation55_spill] sm:$0xff]  ;;  %v12042_v8 = vld [vmem:[#allocation60_spill] sm:$0xff] }
 0x455   : > { %12024 = vst [vmem:[#allocation96_spill] sm:$0xff] %v9758_v32  ;;  %v4189_v24 = vadd.f32 %v4188_v17, %v4158_v42  ;;  %v3972_v7 = vmul.f32 %v3940_v63, %v7097_v45  ;;  %v9769_v4 = vadd.f32 %v3970_v43, %v12027_v21  ;;  %vm4032_vm13 = vcmp.ge.f32.partialorder %v9751_v3, 0.0  ;;  %v12032_v63 = vld [vmem:[#allocation48_spill] sm:$0xff]  ;;  %v12033_v21 = vld [vmem:[#allocation53_spill] sm:$0xff] }
 0x456   : > { %v3941_v14 = vmul.f32 %v12025_v29, %v9429_v28  ;;  %v4125_v23 = vadd.f32 %v5732_v40, %v4124_v19  ;;  %v5733_v31 = vsel %vm4031_vm12, 1.0, %v11417_v56  ;;  %v4160_v18 = vmul.f32 %v5729_v26, %v12029_v46 }
 0x457   : > { %12028 = vst [vmem:[#allocation95_spill] sm:$0xff] %v9769_v4  ;;  %v4190_v30 = vadd.f32 %v4189_v24, %v4159_v20  ;;  %v9775_v28 = vadd.f32 %v3971_v47, %v12030_v34  ;;  %vm4033_vm14 = vcmp.ge.f32.partialorder %v9758_v32, 0.0  ;;  %v5734_v17 = vsel %vm4032_vm13, 1.0, %v11417_v56  ;;  %v12035_v47 = vld [vmem:[#allocation46_spill] sm:$0xff] }
 0x458   : > { %v4126_v22 = vadd.f32 %v5733_v31, %v4125_v23  ;;  %v4161_v42 = vmul.f32 %v5730_v11, %v12032_v63  ;;  %v3973_v29 = vmul.f32 %v3941_v14, %v7097_v45  ;;  %v9782_v19 = vadd.f32 %v3972_v7, %v12033_v21  ;;  %v12036_v11 = vld [vmem:[#allocation52_spill] sm:$0xff]  ;;  %v12037_v14 = vld [vmem:[#allocation59_spill] sm:$0xff]  ;;  %v12039_v21 = vld [vmem:[#allocation50_spill] sm:$0xff] }
 0x459   : > { %12031 = vst [vmem:[#allocation98_spill] sm:$0xff] %v9775_v28  ;;  %v4191_v43 = vadd.f32 %v4190_v30, %v4160_v18  ;;  %vm4034_vm15 = vcmp.ge.f32.partialorder %v9769_v4, 0.0  ;;  %v5735_v20 = vsel %vm4033_vm14, 1.0, %v11417_v56  ;;  %v4162_v24 = vmul.f32 %v5731_v33, %v12035_v47 }
 0x45a   : > { %12034 = vst [vmem:[#allocation97_spill] sm:$0xff] %v9782_v19  ;;  %v4127_v26 = vadd.f32 %v5734_v17, %v4126_v22  ;;  %vm4035_vm0 = vcmp.ge.f32.partialorder %v9775_v28, 0.0  ;;  %v5736_v46 = vsel %vm4034_vm15, 1.0, %v11417_v56  ;;  %v4163_v30 = vmul.f32 %v5732_v40, %v12036_v11  ;;  %v12040_v40 = vld [vmem:[#allocation56_spill] sm:$0xff]  ;;  %v12041_v11 = vld [vmem:[#allocation54_spill] sm:$0xff] }
 0x45b   : > { %v4192_v34 = vadd.f32 %v4191_v43, %v4161_v42  ;;  %v9791_v63 = vadd.f32 %v3973_v29, %v12037_v14  ;;  %vm4036_vm1 = vcmp.ge.f32.partialorder %v9782_v19, 0.0  ;;  %v5737_v22 = vsel %vm4035_vm0, 1.0, %v11417_v56 }
 0x45c   : > { %v4128_v23 = vadd.f32 %v5735_v20, %v4127_v26  ;;  %v4164_v4 = vmul.f32 %v5733_v31, %v12039_v21  ;;  %v5738_v43 = vsel %vm4036_vm1, 1.0, %v11417_v56  ;;  %v4167_v31 = vmul.f32 %v5736_v46, %v12042_v8  ;;  %v12079_v8 = vld [vmem:[#allocation8_spill] sm:$0xff] }
 0x45d   : > { %v4193_v18 = vadd.f32 %v4192_v34, %v4162_v24  ;;  %12038 = vst [vmem:[#allocation14_spill] sm:$0xff] %v9791_v63  ;;  %vm4037_vm2 = vcmp.ge.f32.partialorder %v9791_v63, 0.0  ;;  %v4165_v24 = vmul.f32 %v5734_v17, %v12040_v40  ;;  %v12044_v63 = vld [vmem:[#allocation64_spill] sm:$0xff]  ;;  %v12045_v40 = vld [vmem:[#allocation62_spill] sm:$0xff] }
 0x45e   : > { %v4129_v7 = vadd.f32 %v5736_v46, %v4128_v23  ;;  %v5739_v29 = vsel %vm4037_vm2, 1.0, %v11417_v56  ;;  %v4166_v23 = vmul.f32 %v5735_v20, %v12041_v11 }
 0x45f   : > { %v4194_v33 = vadd.f32 %v4193_v18, %v4163_v30  ;;  %v4170_v3 = vmul.f32 %v5739_v29, %v12045_v40  ;;  %v12069_v40 = vld [vmem:[#allocation81_spill] sm:$0xff] }
 0x460   : > { %v4130_v42 = vadd.f32 %v5737_v22, %v4129_v7  ;;  %v12043_v7 = vld [vmem:[#allocation58_spill] sm:$0xff] }
 0x461   : > { %v4195_v26 = vadd.f32 %v4194_v33, %v4164_v4  ;;  %v4168_v21 = vmul.f32 %v5737_v22, %v12043_v7 }
 0x462   : > { %v4131_v47 = vadd.f32 %v5738_v43, %v4130_v42  ;;  %v4169_v42 = vmul.f32 %v5738_v43, %v12044_v63  ;;  %v12046_v43 = vld [vmem:[#allocation75_spill] sm:$0xff]  ;;  %v12067_v63 = vld [vmem:[#allocation61_spill] sm:$0xff] }
 0x463   : > { %v4196_v34 = vadd.f32 %v4195_v26, %v4165_v24 }
 0x464   : > { %v4132_v14 = vadd.f32 %v5739_v29, %v4131_v47 }
 0x465   : > { %v4197_v19 = vadd.f32 %v4196_v34, %v4166_v23 }
 0x466   : > { %v4133_v28 = vrot.slane %v4132_v14, 4 }
 0x467   : > { %v4198_v30 = vadd.f32 %v4197_v19, %v4167_v31 }
 0x468   : > { %v4134_v18 = vadd.f32 %v4133_v28, %v4132_v14 }
 0x469   : > { %v4199_v4 = vadd.f32 %v4198_v30, %v4168_v21 }
 0x46a   : > { %v4135_v33 = vrot.slane %v4134_v18, 2 }
 0x46b   : > { %v4200_v32 = vadd.f32 %v4199_v4, %v4169_v42  ;;  %v12047_v4 = vld [vmem:[#allocation67_spill] sm:$0xff]  ;;  %v12048_v42 = vld [vmem:[#allocation66_spill] sm:$0xff] }
 0x46c   : > { %v4136_v17 = vadd.f32 %v4135_v33, %v4134_v18 }
 0x46d   : > { %v4201_v26 = vadd.f32 %v4200_v32, %v4170_v3 }
 0x46e   : > { %v4137_v47 = vrot.slane %v4136_v17, 1 }
 0x46f   : > { %v4202_v24 = vrot.slane %v4201_v26, 4 }
 0x470   : > { %v4138_v20 = vadd.f32 %v4137_v47, %v4136_v17  ;;  %v12050_v47 = vld [vmem:[#allocation69_spill] sm:$0xff] }
 0x471   : > { %v4203_v34 = vadd.f32 %v4202_v24, %v4201_v26 }
 0x472   : > { %v4208_v23 = vsub.f32 256.0, %v4138_v20  ;;  %v4210_v19 = vmax.f32 %v4138_v20, 1.0 }
 0x473   : > { %v4204_v11 = vrot.slane %v4203_v34, 2 }
 0x474   : > { %v4213_v46 = vmax.f32 %v4208_v23, 1.0  ;;  %v12051_v23 = vld [vmem:[#allocation68_spill] sm:$0xff] }
 0x475   : > { %v4205_v28 = vadd.f32 %v4204_v11, %v4203_v34  ;;  %v12049_v11 = vld [vmem:[#allocation65_spill] sm:$0xff] }
 0x476   : > { %6166 = vrcp.f32 %v4213_v46 }
 0x477   : > { %6168 = vrcp.f32 %v4210_v19  ;;  %v4206_v22 = vrot.slane %v4205_v28, 1  ;;  %v12052_v19 = vld [vmem:[#allocation71_spill] sm:$0xff] }
 0x479   : > { %v4207_v21 = vadd.f32 %v4206_v22, %v4205_v28 }
 0x47b   : > { %v4209_v31 = vsub.f32 %v12046_v43, %v4207_v21 }
 0x480   : > { %v6167_v14 = vpop.eup %6166 }
 0x481   : > { %v6169_v30 = vpop.eup %6168  ;;  %v4215_v18 = vmul.f32 %v6167_v14, %v4209_v31  ;;  %v12053_v31 = vld [vmem:[#allocation70_spill] sm:$0xff] }
 0x482   : > { %v4212_v29 = vmul.f32 %v6169_v30, %v4207_v21 }
 0x484   : > { %v4216_v32 = vsub.f32 %v4212_v29, %v4215_v18  ;;  %v9806_v3 = vadd.f32 %v4215_v18, %v4212_v29  ;;  %v12054_v29 = vld [vmem:[#allocation73_spill] sm:$0xff] }
 0x486   : > { %v9809_v33 = vmul.f32 %v4216_v32, %v12047_v4  ;;  %v4219_v17 = vsub.f32 %v12048_v42, %v9806_v3  ;;  %v4220_v26 = vsub.f32 %v12049_v11, %v9806_v3  ;;  %v4221_v24 = vsub.f32 %v12050_v47, %v9806_v3 }
 0x487   : > { %v4222_v46 = vsub.f32 %v12051_v23, %v9806_v3  ;;  %v4223_v28 = vsub.f32 %v12052_v19, %v9806_v3  ;;  %v4224_v30 = vsub.f32 %v12053_v31, %v9806_v3  ;;  %v4225_v32 = vsub.f32 %v12054_v29, %v9806_v3  ;;  %v12055_v23 = vld [vmem:[#allocation57_spill] sm:$0xff]  ;;  %v12060_v31 = vld [vmem:[#allocation76_spill] sm:$0xff]  ;;  %v12062_v29 = vld [vmem:[#allocation78_spill] sm:$0xff] }
 0x488   : > { %v4251_v20 = vmul.f32 %v4219_v17, %v9809_v33  ;;  %v4252_v34 = vmul.f32 %v4220_v26, %v9809_v33  ;;  %v4253_v22 = vmul.f32 %v4221_v24, %v9809_v33  ;;  %v12057_v24 = vld [vmem:[#allocation63_spill] sm:$0xff]  ;;  %v4227_v11 = vsub.f32 %v12060_v31, %v9806_v3  ;;  %v12066_v31 = vld [vmem:[#allocation82_spill] sm:$0xff] }
 0x489   : > { %v4254_v18 = vmul.f32 %v4222_v46, %v9809_v33  ;;  %v4255_v17 = vmul.f32 %v4223_v28, %v9809_v33  ;;  %v12061_v46 = vld [vmem:[#allocation74_spill] sm:$0xff]  ;;  %v4229_v28 = vsub.f32 %v12062_v29, %v9806_v3  ;;  %v4257_v29 = vmul.f32 %v4225_v32, %v9809_v33 }
 0x48a   : > { %v4283_v21 = vmul.f32 %v4251_v20, %v7097_v45  ;;  %v4284_v14 = vmul.f32 %v4252_v34, %v7097_v45  ;;  %v4285_v26 = vmul.f32 %v4253_v22, %v7097_v45  ;;  %v12059_v20 = vld [vmem:[#allocation72_spill] sm:$0xff]  ;;  %v4228_v42 = vsub.f32 %v12061_v46, %v9806_v3  ;;  %v12063_v22 = vld [vmem:[#allocation77_spill] sm:$0xff] }
 0x48b   : > { %v4226_v34 = vsub.f32 %v12059_v20, %v9806_v3  ;;  %v4230_v4 = vsub.f32 %v12063_v22, %v9806_v3  ;;  %v12065_v20 = vld [vmem:[#allocation79_spill] sm:$0xff]  ;;  %v4287_v22 = vmul.f32 %v4255_v17, %v7097_v45 }
 0x48c   : > { %v9834_v19 = vadd.f32 %v4283_v21, %v12055_v23  ;;  %v9837_v47 = vadd.f32 %v4284_v14, %v12057_v24  ;;  %v12064_v23 = vld [vmem:[#allocation80_spill] sm:$0xff]  ;;  %v4256_v14 = vmul.f32 %v4224_v30, %v9809_v33  ;;  %v4286_v24 = vmul.f32 %v4254_v18, %v7097_v45  ;;  %v12073_v30 = vld [vmem:[#allocation83_spill] sm:$0xff] }
 0x48d   : > { %v4231_v21 = vsub.f32 %v12064_v23, %v9806_v3  ;;  %v4232_v43 = vsub.f32 %v12065_v20, %v9806_v3  ;;  %v9862_v7 = vadd.f32 %v4285_v26, %v12067_v63  ;;  %v4258_v17 = vmul.f32 %v4226_v34, %v9809_v33  ;;  %v12071_v34 = vld [vmem:[#allocation84_spill] sm:$0xff] }
 0x48e   : > { %12056 = vst [vmem:[#allocation94_spill] sm:$0xff] %v9834_v19  ;;  %12058 = vst [vmem:[#allocation19_spill] sm:$0xff] %v9837_v47  ;;  %vm4347_vm3 = vcmp.ge.f32.partialorder %v9834_v19, 0.0  ;;  %vm4348_vm4 = vcmp.ge.f32.partialorder %v9837_v47, 0.0  ;;  %v4288_v26 = vmul.f32 %v4256_v14, %v7097_v45  ;;  %v9879_v20 = vadd.f32 %v4286_v24, %v12069_v40  ;;  %v12076_v19 = vld [vmem:[#allocation85_spill] sm:$0xff] }
 0x48f   : > { %12068 = vst [vmem:[#allocation93_spill] sm:$0xff] %v9862_v7  ;;  %v5740_v46 = vsel %vm4347_vm3, 1.0, %v11417_v56  ;;  %v5741_v32 = vsel %vm4348_vm4, 1.0, %v11417_v56  ;;  %v4259_v23 = vmul.f32 %v4227_v11, %v9809_v33  ;;  %v4289_v63 = vmul.f32 %v4257_v29, %v7097_v45 }
 0x490   : > { %12070 = vst [vmem:[#allocation17_spill] sm:$0xff] %v9879_v20  ;;  %v9890_v47 = vadd.f32 %v4287_v22, %v12071_v34  ;;  %vm4349_vm5 = vcmp.ge.f32.partialorder %v9862_v7, 0.0  ;;  %v4260_v18 = vmul.f32 %v4228_v42, %v9809_v33  ;;  %v4290_v11 = vmul.f32 %v4258_v17, %v7097_v45  ;;  %v12074_v7 = vld [vmem:[#allocation86_spill] sm:$0xff] }
 0x491   : > { %v9902_v29 = vadd.f32 %v4288_v26, %v12073_v30  ;;  %vm4350_vm6 = vcmp.ge.f32.partialorder %v9879_v20, 0.0  ;;  %v4443_v22 = vadd.f32 %v5741_v32, %v5740_v46  ;;  %v4261_v14 = vmul.f32 %v4229_v28, %v9809_v33  ;;  %v12078_v26 = vld [vmem:[#allocation9_spill] sm:$0xff] }
 0x492   : > { %12072 = vst [vmem:[#allocation23_spill] sm:$0xff] %v9890_v47  ;;  %v5742_v24 = vsel %vm4349_vm5, 1.0, %v11417_v56  ;;  %v4291_v42 = vmul.f32 %v4259_v23, %v7097_v45  ;;  %v9913_v17 = vadd.f32 %v4289_v63, %v12074_v7  ;;  %vm4351_vm7 = vcmp.ge.f32.partialorder %v9890_v47, 0.0 }
 0x493   : > { %v4444_v30 = vadd.f32 %v5742_v24, %v4443_v22  ;;  %v4262_v40 = vmul.f32 %v4230_v4, %v9809_v33  ;;  %v5743_v28 = vsel %vm4350_vm6, 1.0, %v11417_v56  ;;  %v4292_v20 = vmul.f32 %v4260_v18, %v7097_v45 }
 0x494   : > { %12075 = vst [vmem:[#allocation21_spill] sm:$0xff] %v9913_v17  ;;  %v9924_v23 = vadd.f32 %v4290_v11, %v12076_v19  ;;  %vm4352_vm8 = vcmp.ge.f32.partialorder %v9902_v29, 0.0  ;;  %v4263_v63 = vmul.f32 %v4231_v21, %v9809_v33  ;;  %v5744_v22 = vsel %vm4351_vm7, 1.0, %v11417_v56  ;;  %v12083_v21 = vld [vmem:[#allocation11_spill] sm:$0xff] }
 0x495   : > { %v4445_v7 = vadd.f32 %v5743_v28, %v4444_v30  ;;  %v4480_v47 = vmul.f32 %v5740_v46, %v12078_v26  ;;  %v4481_v34 = vmul.f32 %v5741_v32, %v12079_v8  ;;  %v4293_v4 = vmul.f32 %v4261_v14, %v7097_v45  ;;  %v12085_v26 = vld [vmem:[#allocation10_spill] sm:$0xff] }
 0x496   : > { %12077 = vst [vmem:[#allocation27_spill] sm:$0xff] %v9924_v23  ;;  %v9933_v61 = vadd.f32 %v4291_v42, %v12080_v53  ;;  %vm4353_vm9 = vcmp.ge.f32.partialorder %v9913_v17, 0.0  ;;  %v4264_v11 = vmul.f32 %v4232_v43, %v9809_v33  ;;  %v5745_v46 = vsel %vm4352_vm8, 1.0, %v11417_v56 }
 0x497   : > { %v4446_v19 = vadd.f32 %v5744_v22, %v4445_v7  ;;  %v4294_v32 = vmul.f32 %v4262_v40, %v7097_v45  ;;  %v9944_v14 = vadd.f32 %v4292_v20, %v9564_v49  ;;  %vm4354_vm10 = vcmp.ge.f32.partialorder %v9924_v23, 0.0 }
 0x498   : > { %12081 = vst [vmem:[#allocation25_spill] sm:$0xff] %v9933_v61  ;;  %v12082_v42 = vsub.f32 %v12066_v31, %v9806_v3  ;;  %v5746_v7 = vsel %vm4353_vm9, 1.0, %v11417_v56  ;;  %v4482_v18 = vmul.f32 %v5742_v24, %v12083_v21  ;;  %v4512_v43 = vadd.f32 %v4481_v34, %v4480_v47  ;;  %v12086_v24 = vld [vmem:[#allocation87_spill] sm:$0xff] }
 0x499   : > { %v4447_v53 = vadd.f32 %v5745_v46, %v4446_v19  ;;  %v4295_v8 = vmul.f32 %v4263_v63, %v7097_v45  ;;  %v9955_v40 = vadd.f32 %v4293_v4, %v9575_v39  ;;  %vm4355_vm11 = vcmp.ge.f32.partialorder %v9933_v61, 0.0 }
 0x49a   : > { %v4265_v30 = vmul.f32 %v12082_v42, %v9809_v33  ;;  %v12084_v20 = vsub.f32 %v11457_v62, %v9806_v3  ;;  %v5747_v42 = vsel %vm4354_vm10, 1.0, %v11417_v56  ;;  %v4483_v23 = vmul.f32 %v5743_v28, %v12085_v26 }
 0x49b   : > { %v4448_v49 = vadd.f32 %v5746_v7, %v4447_v53  ;;  %v4513_v17 = vadd.f32 %v4512_v43, %v4482_v18  ;;  %v4296_v47 = vmul.f32 %v4264_v11, %v7097_v45  ;;  %v9966_v34 = vadd.f32 %v4294_v32, %v12086_v24  ;;  %v12090_v24 = vld [vmem:[#allocation12_spill] sm:$0xff] }
 0x49c   : > { %v4266_v19 = vmul.f32 %v12084_v20, %v9809_v33  ;;  %vm4356_vm12 = vcmp.ge.f32.partialorder %v9944_v14, 0.0  ;;  %v12087_v63 = vsub.f32 %v11459_v10, %v9806_v3  ;;  %v5748_v53 = vsel %vm4355_vm11, 1.0, %v11417_v56  ;;  %v12088_v20 = vld [vmem:[#allocation13_spill] sm:$0xff] }
 0x49d   : > { %v4449_v39 = vadd.f32 %v5747_v42, %v4448_v49  ;;  %v4484_v21 = vmul.f32 %v5744_v22, %v12088_v20  ;;  %v4514_v61 = vadd.f32 %v4513_v17, %v4483_v23  ;;  %v4297_v28 = vmul.f32 %v4265_v30, %v7097_v45 }
 0x49e   : > { %v4267_v4 = vmul.f32 %v12087_v63, %v9809_v33  ;;  %v9977_v18 = vadd.f32 %v4295_v8, %v9597_v12  ;;  %vm4357_vm13 = vcmp.ge.f32.partialorder %v9955_v40, 0.0  ;;  %v12089_v32 = vsub.f32 %v11460_v25, %v9806_v3 }
 0x49f   : > { %v4450_v11 = vadd.f32 %v5748_v53, %v4449_v39  ;;  %v5749_v49 = vsel %vm4356_vm12, 1.0, %v11417_v56  ;;  %v4485_v63 = vmul.f32 %v5745_v46, %v12090_v24  ;;  %v4515_v26 = vadd.f32 %v4514_v61, %v4484_v21  ;;  %v12092_v39 = vld [vmem:[#allocation16_spill] sm:$0xff] }
 0x4a0   : > { %v4268_v43 = vmul.f32 %v12089_v32, %v9809_v33  ;;  %v4298_v17 = vmul.f32 %v4266_v19, %v7097_v45  ;;  %v9988_v23 = vadd.f32 %v4296_v47, %v9608_v51  ;;  %vm4358_vm14 = vcmp.ge.f32.partialorder %v9966_v34, 0.0 }
 0x4a1   : > { %v4451_v12 = vadd.f32 %v5749_v49, %v4450_v11  ;;  %v12091_v8 = vsub.f32 %v11461_v54, %v9806_v3  ;;  %v5750_v30 = vsel %vm4357_vm13, 1.0, %v11417_v56  ;;  %v4486_v32 = vmul.f32 %v5746_v7, %v12092_v39  ;;  %v12094_v11 = vld [vmem:[#allocation15_spill] sm:$0xff] }
 0x4a2   : > { %v4516_v20 = vadd.f32 %v4515_v26, %v4485_v63  ;;  %v4299_v61 = vmul.f32 %v4267_v4, %v7097_v45  ;;  %v9999_v21 = vadd.f32 %v4297_v28, %v9619_v37  ;;  %vm4359_vm15 = vcmp.ge.f32.partialorder %v9977_v18, 0.0 }
 0x4a3   : > { %v4269_v22 = vmul.f32 %v12091_v8, %v9809_v33  ;;  %v4452_v51 = vadd.f32 %v5750_v30, %v4451_v12  ;;  %v12093_v46 = vsub.f32 %v11462_v57, %v9806_v3  ;;  %v5751_v47 = vsel %vm4358_vm14, 1.0, %v11417_v56  ;;  %v12096_v12 = vld [vmem:[#allocation20_spill] sm:$0xff] }
 0x4a4   : > { %v4487_v8 = vmul.f32 %v5747_v42, %v12094_v11  ;;  %v4517_v24 = vadd.f32 %v4516_v20, %v4486_v32  ;;  %v4300_v26 = vmul.f32 %v4268_v43, %v7097_v45  ;;  %v10010_v7 = vadd.f32 %v4298_v17, %v9630_v50 }
 0x4a5   : > { %v4270_v19 = vmul.f32 %v12093_v46, %v9809_v33  ;;  %vm4360_vm0 = vcmp.ge.f32.partialorder %v9988_v23, 0.0  ;;  %v4453_v37 = vadd.f32 %v5751_v47, %v4452_v51  ;;  %v12095_v4 = vsub.f32 %v11463_v38, %v9806_v3  ;;  %v12098_v51 = vld [vmem:[#allocation18_spill] sm:$0xff] }
 0x4a6   : > { %v5752_v63 = vsel %vm4359_vm15, 1.0, %v11417_v56  ;;  %v4488_v46 = vmul.f32 %v5748_v53, %v12096_v12  ;;  %v4518_v39 = vadd.f32 %v4517_v24, %v4487_v8  ;;  %v4301_v42 = vmul.f32 %v4269_v22, %v7097_v45 }
 0x4a7   : > { %v4271_v28 = vmul.f32 %v12095_v4, %v9809_v33  ;;  %v10021_v20 = vadd.f32 %v4299_v61, %v9641_v9  ;;  %vm4361_vm1 = vcmp.ge.f32.partialorder %v9999_v21, 0.0  ;;  %v4454_v50 = vadd.f32 %v5752_v63, %v4453_v37  ;;  %v12100_v37 = vld [vmem:[#allocation24_spill] sm:$0xff] }
 0x4a8   : > { %v12097_v43 = vsub.f32 %v11465_v52, %v9806_v3  ;;  %v5753_v32 = vsel %vm4360_vm0, 1.0, %v11417_v56  ;;  %v4489_v4 = vmul.f32 %v5749_v49, %v12098_v51  ;;  %v4519_v11 = vadd.f32 %v4518_v39, %v4488_v46 }
 0x4a9   : > { %v4302_v53 = vmul.f32 %v4270_v19, %v7097_v45  ;;  %v10032_v24 = vadd.f32 %v4300_v26, %v9652_v1  ;;  %vm4362_vm2 = vcmp.ge.f32.partialorder %v10010_v7, 0.0  ;;  %v4455_v9 = vadd.f32 %v5753_v32, %v4454_v50  ;;  %v12102_v50 = vld [vmem:[#allocation22_spill] sm:$0xff] }
 0x4aa   : > { %v4272_v17 = vmul.f32 %v12097_v43, %v9809_v33  ;;  %v12099_v22 = vsub.f32 %v11466_v44, %v9806_v3  ;;  %v5754_v8 = vsel %vm4361_vm1, 1.0, %v11417_v56  ;;  %v4490_v43 = vmul.f32 %v5750_v30, %v12100_v37 }
 0x4ab   : > { %v4520_v12 = vadd.f32 %v4519_v11, %v4489_v4  ;;  %v4303_v49 = vmul.f32 %v4271_v28, %v7097_v45  ;;  %v10043_v39 = vadd.f32 %v4301_v42, %v9663_v35  ;;  %vm4363_vm3 = vcmp.ge.f32.partialorder %v10021_v20, 0.0 }
 0x4ac   : > { %v4273_v61 = vmul.f32 %v12099_v22, %v9809_v33  ;;  %v4456_v1 = vadd.f32 %v5754_v8, %v4455_v9  ;;  %v12101_v19 = vsub.f32 %v11468_v60, %v9806_v3  ;;  %v5755_v46 = vsel %vm4362_vm2, 1.0, %v11417_v56 }
 0x4ad   : > { %v4491_v22 = vmul.f32 %v5751_v47, %v12102_v50  ;;  %v4521_v51 = vadd.f32 %v4520_v12, %v4490_v43  ;;  %v4304_v30 = vmul.f32 %v4272_v17, %v7097_v45  ;;  %v10054_v11 = vadd.f32 %v4302_v53, %v9674_v48 }
 0x4ae   : > { %v4274_v26 = vmul.f32 %v12101_v19, %v9809_v33  ;;  %vm4364_vm4 = vcmp.ge.f32.partialorder %v10032_v24, 0.0  ;;  %v4457_v35 = vadd.f32 %v5755_v46, %v4456_v1  ;;  %v12103_v28 = vsub.f32 %v11469_v55, %v9806_v3  ;;  %v12106_v1 = vld [vmem:[#allocation26_spill] sm:$0xff] }
 0x4af   : > { %v5756_v4 = vsel %vm4363_vm3, 1.0, %v11417_v56  ;;  %v4492_v9 = vmul.f32 %v5752_v63, %v12006_v0  ;;  %v4522_v19 = vadd.f32 %v4521_v51, %v4491_v22  ;;  %v4305_v47 = vmul.f32 %v4273_v61, %v7097_v45 }
 0x4b0   : > { %v4275_v42 = vmul.f32 %v12103_v28, %v9809_v33  ;;  %v10065_v12 = vadd.f32 %v4303_v49, %v9685_v15  ;;  %vm4365_vm5 = vcmp.ge.f32.partialorder %v10043_v39, 0.0  ;;  %v4458_v48 = vadd.f32 %v5756_v4, %v4457_v35 }
 0x4b1   : > { %v12105_v17 = vsub.f32 %v11470_v59, %v9806_v3  ;;  %v5757_v43 = vsel %vm4364_vm4, 1.0, %v11417_v56  ;;  %v4493_v28 = vmul.f32 %v5753_v32, %v12106_v1  ;;  %v4523_v50 = vadd.f32 %v4522_v19, %v4492_v9  ;;  %v12109_v9 = vld [vmem:[#allocation90_spill] sm:$0xff] }
 0x4b2   : > { %12104 = vst [vmem:[#allocation31_spill] sm:$0xff] %v10065_v12  ;;  %v4306_v63 = vmul.f32 %v4274_v26, %v7097_v45  ;;  %v10076_v51 = vadd.f32 %v4304_v30, %v9696_v16  ;;  %vm4366_vm6 = vcmp.ge.f32.partialorder %v10054_v11, 0.0  ;;  %v4459_v15 = vadd.f32 %v5757_v43, %v4458_v48 }
 0x4b3   : > { %v4276_v53 = vmul.f32 %v12105_v17, %v9809_v33  ;;  %v12108_v61 = vsub.f32 %v11503_v27, %v9806_v3  ;;  %v5758_v22 = vsel %vm4365_vm5, 1.0, %v11417_v56  ;;  %v4494_v35 = vmul.f32 %v5754_v8, %v11913_v6 }
 0x4b4   : > { %12107 = vst [vmem:[#allocation29_spill] sm:$0xff] %v10076_v51  ;;  %v4524_v17 = vadd.f32 %v4523_v50, %v4493_v28  ;;  %v4307_v32 = vmul.f32 %v4275_v42, %v7097_v45  ;;  %v10087_v26 = vadd.f32 %v4305_v47, %v12109_v9  ;;  %vm4367_vm7 = vcmp.ge.f32.partialorder %v10065_v12, 0.0  ;;  %v12113_v50 = vld [vmem:[#allocation89_spill] sm:$0xff] }
 0x4b5   : > { %v4277_v49 = vmul.f32 %v12108_v61, %v9809_v33  ;;  %v4460_v16 = vadd.f32 %v5758_v22, %v4459_v15  ;;  %v12111_v30 = vsub.f32 %v11508_v58, %v9806_v3  ;;  %v5759_v48 = vsel %vm4366_vm6, 1.0, %v11417_v56  ;;  %v12112_v61 = vld [vmem:[#allocation30_spill] sm:$0xff] }
 0x4b6   : > { %12110 = vst [vmem:[#allocation35_spill] sm:$0xff] %v10087_v26  ;;  %v4495_v1 = vmul.f32 %v5755_v46, %v12112_v61  ;;  %v4525_v0 = vadd.f32 %v4524_v17, %v4494_v35  ;;  %v4308_v8 = vmul.f32 %v4276_v53, %v7097_v45  ;;  %v10098_v42 = vadd.f32 %v4306_v63, %v12113_v50  ;;  %v12118_v50 = vld [vmem:[#allocation34_spill] sm:$0xff] }
 0x4b7   : > { %v4278_v19 = vmul.f32 %v12111_v30, %v9809_v33  ;;  %vm4368_vm8 = vcmp.ge.f32.partialorder %v10076_v51, 0.0  ;;  %v4461_v47 = vadd.f32 %v5759_v48, %v4460_v16  ;;  %v12115_v28 = vsub.f32 %v11474_v36, %v9806_v3  ;;  %v12116_v30 = vld [vmem:[#allocation36_spill] sm:$0xff] }
 0x4b8   : > { %12114 = vst [vmem:[#allocation33_spill] sm:$0xff] %v10098_v42  ;;  %v5760_v9 = vsel %vm4367_vm7, 1.0, %v11417_v56  ;;  %v4496_v6 = vmul.f32 %v5756_v4, %v12116_v30  ;;  %v4526_v12 = vadd.f32 %v4525_v0, %v4495_v1  ;;  %v4309_v46 = vmul.f32 %v4277_v49, %v7097_v45  ;;  %v12119_v4 = vld [vmem:[#allocation92_spill] sm:$0xff] }
 0x4b9   : > { %v4279_v15 = vmul.f32 %v12115_v28, %v9809_v33  ;;  %v10109_v53 = vadd.f32 %v4307_v32, %v9729_v13  ;;  %vm4369_vm9 = vcmp.ge.f32.partialorder %v10087_v26, 0.0  ;;  %v4462_v63 = vadd.f32 %v5760_v9, %v4461_v47 }
 0x4ba   : > { %v12117_v35 = vsub.f32 %v11475_v5, %v9806_v3  ;;  %v5761_v16 = vsel %vm4368_vm8, 1.0, %v11417_v56  ;;  %v4497_v28 = vmul.f32 %v5757_v43, %v12118_v50  ;;  %v4527_v61 = vadd.f32 %v4526_v12, %v4496_v6  ;;  %v12122_v12 = vld [vmem:[#allocation91_spill] sm:$0xff] }
 0x4bb   : > { %v4310_v0 = vmul.f32 %v4278_v19, %v7097_v45  ;;  %v10120_v1 = vadd.f32 %v4308_v8, %v12119_v4  ;;  %vm4370_vm10 = vcmp.ge.f32.partialorder %v10098_v42, 0.0  ;;  %v4463_v13 = vadd.f32 %v5761_v16, %v4462_v63  ;;  %v12124_v63 = vld [vmem:[#allocation38_spill] sm:$0xff]  ;;  %v12125_v42 = vld [vmem:[#allocation96_spill] sm:$0xff] }
 0x4bc   : > { %v4280_v17 = vmul.f32 %v12117_v35, %v9809_v33  ;;  %v12120_v49 = vsub.f32 %v11477_v41, %v9806_v3  ;;  %v5762_v47 = vsel %vm4369_vm9, 1.0, %v11417_v56  ;;  %v12121_v35 = vld [vmem:[#allocation40_spill] sm:$0xff]  ;;  %v4528_v26 = vadd.f32 %v4527_v61, %v4497_v28 }
 0x4bd   : > { %v4498_v30 = vmul.f32 %v5758_v22, %v12121_v35  ;;  %v4311_v6 = vmul.f32 %v4279_v15, %v7097_v45  ;;  %v10131_v43 = vadd.f32 %v4309_v46, %v12122_v12  ;;  %vm4371_vm11 = vcmp.ge.f32.partialorder %v10109_v53, 0.0  ;;  %v12128_v28 = vld [vmem:[#allocation44_spill] sm:$0xff] }
 0x4be   : > { %v4281_v32 = vmul.f32 %v12120_v49, %v9809_v33  ;;  %v4464_v19 = vadd.f32 %v5762_v47, %v4463_v13  ;;  %v5763_v8 = vsel %vm4370_vm10, 1.0, %v11417_v56  ;;  %v4499_v4 = vmul.f32 %v5759_v48, %v12124_v63  ;;  %v12129_v48 = vld [vmem:[#allocation95_spill] sm:$0xff] }
 0x4bf   : > { %12123 = vst [vmem:[#allocation39_spill] sm:$0xff] %v10131_v43  ;;  %v4529_v50 = vadd.f32 %v4528_v26, %v4498_v30  ;;  %v4312_v49 = vmul.f32 %v4280_v17, %v7097_v45  ;;  %v10138_v51 = vadd.f32 %v4310_v0, %v12125_v42  ;;  %vm4372_vm12 = vcmp.ge.f32.partialorder %v10120_v1, 0.0  ;;  %v12131_v0 = vld [vmem:[#allocation42_spill] sm:$0xff] }
 0x4c0   : > { %v4465_v22 = vadd.f32 %v5763_v8, %v4464_v19  ;;  %v12127_v61 = vsub.f32 %v11478_v2, %v9806_v3  ;;  %v5764_v46 = vsel %vm4371_vm11, 1.0, %v11417_v56  ;;  %v4500_v13 = vmul.f32 %v5760_v9, %v12128_v28  ;;  %v12132_v3 = vld [vmem:[#allocation98_spill] sm:$0xff]  ;;  %v12144_v28 = vld [vmem:[#allocation60_spill] sm:$0xff] }
 0x4c1   : > { %12126 = vst [vmem:[#allocation37_spill] sm:$0xff] %v10138_v51  ;;  %v4530_v12 = vadd.f32 %v4529_v50, %v4499_v4  ;;  %v4313_v26 = vmul.f32 %v4281_v32, %v7097_v45  ;;  %v10149_v30 = vadd.f32 %v4311_v6, %v12129_v48  ;;  %vm4373_vm13 = vcmp.ge.f32.partialorder %v10131_v43, 0.0  ;;  %v12134_v32 = vld [vmem:[#allocation48_spill] sm:$0xff]  ;;  %v12135_v48 = vld [vmem:[#allocation97_spill] sm:$0xff] }
 0x4c2   : > { %v4282_v15 = vmul.f32 %v12127_v61, %v9809_v33  ;;  %v4466_v42 = vadd.f32 %v5764_v46, %v4465_v22  ;;  %v5765_v17 = vsel %vm4372_vm12, 1.0, %v11417_v56  ;;  %v4501_v19 = vmul.f32 %v5761_v16, %v12131_v0 }
 0x4c3   : > { %12130 = vst [vmem:[#allocation43_spill] sm:$0xff] %v10149_v30  ;;  %v4531_v63 = vadd.f32 %v4530_v12, %v4500_v13  ;;  %v10155_v33 = vadd.f32 %v4312_v49, %v12132_v3  ;;  %vm4374_vm14 = vcmp.ge.f32.partialorder %v10138_v51, 0.0  ;;  %v5766_v50 = vsel %vm4373_vm13, 1.0, %v11417_v56  ;;  %v12137_v49 = vld [vmem:[#allocation46_spill] sm:$0xff] }
 0x4c4   : > { %v4467_v9 = vadd.f32 %v5765_v17, %v4466_v42  ;;  %v4502_v4 = vmul.f32 %v5762_v47, %v12134_v32  ;;  %v4314_v61 = vmul.f32 %v4282_v15, %v7097_v45  ;;  %v10162_v22 = vadd.f32 %v4313_v26, %v12135_v48  ;;  %v12138_v47 = vld [vmem:[#allocation52_spill] sm:$0xff]  ;;  %v12139_v15 = vld [vmem:[#allocation14_spill] sm:$0xff] }
 0x4c5   : > { %12133 = vst [vmem:[#allocation41_spill] sm:$0xff] %v10155_v33  ;;  %v4532_v6 = vadd.f32 %v4531_v63, %v4501_v19  ;;  %vm4375_vm15 = vcmp.ge.f32.partialorder %v10149_v30, 0.0  ;;  %v5767_v13 = vsel %vm4374_vm14, 1.0, %v11417_v56  ;;  %v4503_v12 = vmul.f32 %v5763_v8, %v12137_v49  ;;  %v12141_v48 = vld [vmem:[#allocation50_spill] sm:$0xff] }
 0x4c6   : > { %12136 = vst [vmem:[#allocation47_spill] sm:$0xff] %v10162_v22  ;;  %v4468_v16 = vadd.f32 %v5766_v50, %v4467_v9  ;;  %vm4376_vm0 = vcmp.ge.f32.partialorder %v10155_v33, 0.0  ;;  %v5768_v0 = vsel %vm4375_vm15, 1.0, %v11417_v56  ;;  %v4504_v63 = vmul.f32 %v5764_v46, %v12138_v47  ;;  %v12142_v46 = vld [vmem:[#allocation56_spill] sm:$0xff]  ;;  %v12143_v47 = vld [vmem:[#allocation54_spill] sm:$0xff] }
 0x4c7   : > { %v4533_v3 = vadd.f32 %v4532_v6, %v4502_v4  ;;  %v10171_v32 = vadd.f32 %v4314_v61, %v12139_v15  ;;  %vm4377_vm1 = vcmp.ge.f32.partialorder %v10162_v22, 0.0  ;;  %v5769_v9 = vsel %vm4376_vm0, 1.0, %v11417_v56 }
 0x4c8   : > { %v4469_v42 = vadd.f32 %v5767_v13, %v4468_v16  ;;  %v4505_v30 = vmul.f32 %v5765_v17, %v12141_v48  ;;  %v5770_v6 = vsel %vm4377_vm1, 1.0, %v11417_v56  ;;  %v4508_v17 = vmul.f32 %v5768_v0, %v12144_v28 }
 0x4c9   : > { %v4534_v19 = vadd.f32 %v4533_v3, %v4503_v12  ;;  %12140 = vst [vmem:[#allocation45_spill] sm:$0xff] %v10171_v32  ;;  %vm4378_vm2 = vcmp.ge.f32.partialorder %v10171_v32, 0.0  ;;  %v4506_v12 = vmul.f32 %v5766_v50, %v12142_v46  ;;  %v12146_v32 = vld [vmem:[#allocation64_spill] sm:$0xff]  ;;  %v12147_v46 = vld [vmem:[#allocation62_spill] sm:$0xff] }
 0x4ca   : > { %v4470_v26 = vadd.f32 %v5768_v0, %v4469_v42  ;;  %v5771_v61 = vsel %vm4378_vm2, 1.0, %v11417_v56  ;;  %v4507_v42 = vmul.f32 %v5767_v13, %v12143_v47 }
 0x4cb   : > { %v4535_v8 = vadd.f32 %v4534_v19, %v4504_v63  ;;  %v4511_v43 = vmul.f32 %v5771_v61, %v12147_v46  ;;  %v12168_v46 = vld [vmem:[#allocation93_spill] sm:$0xff] }
 0x4cc   : > { %v4471_v4 = vadd.f32 %v5769_v9, %v4470_v26  ;;  %v12145_v26 = vld [vmem:[#allocation58_spill] sm:$0xff] }
 0x4cd   : > { %v4536_v16 = vadd.f32 %v4535_v8, %v4505_v30  ;;  %v4509_v48 = vmul.f32 %v5769_v9, %v12145_v26  ;;  %v12180_v26 = vld [vmem:[#allocation25_spill] sm:$0xff] }
 0x4ce   : > { %v4472_v49 = vadd.f32 %v5770_v6, %v4471_v4  ;;  %v4510_v4 = vmul.f32 %v5770_v6, %v12146_v32  ;;  %v12148_v6 = vld [vmem:[#allocation75_spill] sm:$0xff] }
 0x4cf   : > { %v4537_v3 = vadd.f32 %v4536_v16, %v4506_v12 }
 0x4d0   : > { %v4473_v15 = vadd.f32 %v5771_v61, %v4472_v49 }
 0x4d1   : > { %v4538_v22 = vadd.f32 %v4537_v3, %v4507_v42 }
 0x4d2   : > { %v4474_v33 = vrot.slane %v4473_v15, 4 }
 0x4d3   : > { %v4539_v63 = vadd.f32 %v4538_v22, %v4508_v17 }
 0x4d4   : > { %v4475_v19 = vadd.f32 %v4474_v33, %v4473_v15 }
 0x4d5   : > { %v4540_v30 = vadd.f32 %v4539_v63, %v4509_v48 }
 0x4d6   : > { %v4476_v8 = vrot.slane %v4475_v19, 2 }
 0x4d7   : > { %v4541_v51 = vadd.f32 %v4540_v30, %v4510_v4  ;;  %v12149_v30 = vld [vmem:[#allocation67_spill] sm:$0xff]  ;;  %v12150_v4 = vld [vmem:[#allocation66_spill] sm:$0xff] }
 0x4d8   : > { %v4477_v50 = vadd.f32 %v4476_v8, %v4475_v19 }
 0x4d9   : > { %v4542_v16 = vadd.f32 %v4541_v51, %v4511_v43 }
 0x4da   : > { %v4478_v49 = vrot.slane %v4477_v50, 1 }
 0x4db   : > { %v4543_v12 = vrot.slane %v4542_v16, 4 }
 0x4dc   : > { %v4479_v13 = vadd.f32 %v4478_v49, %v4477_v50  ;;  %v12152_v49 = vld [vmem:[#allocation69_spill] sm:$0xff] }
 0x4dd   : > { %v4544_v3 = vadd.f32 %v4543_v12, %v4542_v16 }
 0x4de   : > { %v4549_v42 = vsub.f32 256.0, %v4479_v13  ;;  %v4551_v22 = vmax.f32 %v4479_v13, 1.0 }
 0x4df   : > { %v4545_v47 = vrot.slane %v4544_v3, 2 }
 0x4e0   : > { %v4554_v0 = vmax.f32 %v4549_v42, 1.0  ;;  %v12153_v42 = vld [vmem:[#allocation68_spill] sm:$0xff] }
 0x4e1   : > { %v4546_v33 = vadd.f32 %v4545_v47, %v4544_v3  ;;  %v12151_v47 = vld [vmem:[#allocation65_spill] sm:$0xff] }
 0x4e2   : > { %6170 = vrcp.f32 %v4554_v0 }
 0x4e3   : > { %6172 = vrcp.f32 %v4551_v22  ;;  %v4547_v9 = vrot.slane %v4546_v33, 1  ;;  %v12154_v22 = vld [vmem:[#allocation71_spill] sm:$0xff] }
 0x4e5   : > { %v4548_v48 = vadd.f32 %v4547_v9, %v4546_v33 }
 0x4e7   : > { %v4550_v17 = vsub.f32 %v12148_v6, %v4548_v48 }
 0x4ec   : > { %v6171_v15 = vpop.eup %6170 }
 0x4ed   : > { %v6173_v63 = vpop.eup %6172  ;;  %v4556_v19 = vmul.f32 %v6171_v15, %v4550_v17  ;;  %v12155_v17 = vld [vmem:[#allocation70_spill] sm:$0xff] }
 0x4ee   : > { %v4553_v61 = vmul.f32 %v6173_v63, %v4548_v48 }
 0x4f0   : > { %v4557_v51 = vsub.f32 %v4553_v61, %v4556_v19  ;;  %v10186_v43 = vadd.f32 %v4556_v19, %v4553_v61  ;;  %v12156_v61 = vld [vmem:[#allocation73_spill] sm:$0xff] }
 0x4f2   : > { %v10189_v8 = vmul.f32 %v4557_v51, %v12149_v30  ;;  %v4560_v50 = vsub.f32 %v12150_v4, %v10186_v43  ;;  %v4561_v16 = vsub.f32 %v12151_v47, %v10186_v43  ;;  %v4562_v12 = vsub.f32 %v12152_v49, %v10186_v43 }
 0x4f3   : > { %v4563_v0 = vsub.f32 %v12153_v42, %v10186_v43  ;;  %v4564_v33 = vsub.f32 %v12154_v22, %v10186_v43  ;;  %v4565_v63 = vsub.f32 %v12155_v17, %v10186_v43  ;;  %v4566_v51 = vsub.f32 %v12156_v61, %v10186_v43  ;;  %v12157_v42 = vld [vmem:[#allocation94_spill] sm:$0xff]  ;;  %v12162_v17 = vld [vmem:[#allocation76_spill] sm:$0xff] }
 0x4f4   : > { %v4592_v13 = vmul.f32 %v4560_v50, %v10189_v8  ;;  %v4593_v3 = vmul.f32 %v4561_v16, %v10189_v8  ;;  %v4594_v9 = vmul.f32 %v4562_v12, %v10189_v8  ;;  %v12159_v12 = vld [vmem:[#allocation19_spill] sm:$0xff]  ;;  %v4568_v47 = vsub.f32 %v12162_v17, %v10186_v43  ;;  %v12164_v61 = vld [vmem:[#allocation78_spill] sm:$0xff]  ;;  %v12170_v17 = vld [vmem:[#allocation17_spill] sm:$0xff] }
 0x4f5   : > { %v4595_v19 = vmul.f32 %v4563_v0, %v10189_v8  ;;  %v4596_v50 = vmul.f32 %v4564_v33, %v10189_v8  ;;  %v12163_v0 = vld [vmem:[#allocation74_spill] sm:$0xff]  ;;  %v4570_v33 = vsub.f32 %v12164_v61, %v10186_v43  ;;  %v4598_v61 = vmul.f32 %v4566_v51, %v10189_v8 }
 0x4f6   : > { %v4624_v48 = vmul.f32 %v4592_v13, %v7097_v45  ;;  %v4625_v15 = vmul.f32 %v4593_v3, %v7097_v45  ;;  %v4626_v16 = vmul.f32 %v4594_v9, %v7097_v45  ;;  %v12161_v13 = vld [vmem:[#allocation72_spill] sm:$0xff]  ;;  %v4569_v4 = vsub.f32 %v12163_v0, %v10186_v43  ;;  %v12165_v9 = vld [vmem:[#allocation77_spill] sm:$0xff] }
 0x4f7   : > { %v4567_v3 = vsub.f32 %v12161_v13, %v10186_v43  ;;  %v4571_v30 = vsub.f32 %v12165_v9, %v10186_v43  ;;  %v12167_v13 = vld [vmem:[#allocation79_spill] sm:$0xff]  ;;  %v4628_v9 = vmul.f32 %v4596_v50, %v7097_v45 }
 0x4f8   : > { %v10214_v22 = vadd.f32 %v4624_v48, %v12157_v42  ;;  %v10217_v49 = vadd.f32 %v4625_v15, %v12159_v12  ;;  %v12166_v42 = vld [vmem:[#allocation80_spill] sm:$0xff]  ;;  %v4597_v15 = vmul.f32 %v4565_v63, %v10189_v8  ;;  %v4627_v12 = vmul.f32 %v4595_v19, %v7097_v45  ;;  %v12174_v63 = vld [vmem:[#allocation21_spill] sm:$0xff] }
 0x4f9   : > { %v4572_v48 = vsub.f32 %v12166_v42, %v10186_v43  ;;  %v4573_v6 = vsub.f32 %v12167_v13, %v10186_v43  ;;  %v10242_v32 = vadd.f32 %v4626_v16, %v12168_v46  ;;  %v4599_v50 = vmul.f32 %v4567_v3, %v10189_v8  ;;  %v12172_v3 = vld [vmem:[#allocation23_spill] sm:$0xff]  ;;  %v12179_v42 = vld [vmem:[#allocation8_spill] sm:$0xff] }
 0x4fa   : > { %12158 = vst [vmem:[#allocation51_spill] sm:$0xff] %v10214_v22  ;;  %12160 = vst [vmem:[#allocation49_spill] sm:$0xff] %v10217_v49  ;;  %vm4688_vm3 = vcmp.ge.f32.partialorder %v10214_v22, 0.0  ;;  %vm4689_vm4 = vcmp.ge.f32.partialorder %v10217_v49, 0.0  ;;  %v4629_v16 = vmul.f32 %v4597_v15, %v7097_v45  ;;  %v10259_v49 = vadd.f32 %v4627_v12, %v12170_v17 }
 0x4fb   : > { %12169 = vst [vmem:[#allocation55_spill] sm:$0xff] %v10242_v32  ;;  %v5772_v0 = vsel %vm4688_vm3, 1.0, %v11417_v56  ;;  %v5773_v51 = vsel %vm4689_vm4, 1.0, %v11417_v56  ;;  %v4600_v22 = vmul.f32 %v4568_v47, %v10189_v8  ;;  %v4630_v46 = vmul.f32 %v4598_v61, %v7097_v45 }
 0x4fc   : > { %12171 = vst [vmem:[#allocation53_spill] sm:$0xff] %v10259_v49  ;;  %v10270_v13 = vadd.f32 %v4628_v9, %v12172_v3  ;;  %vm4690_vm5 = vcmp.ge.f32.partialorder %v10242_v32, 0.0  ;;  %v4601_v19 = vmul.f32 %v4569_v4, %v10189_v8  ;;  %v4631_v47 = vmul.f32 %v4599_v50, %v7097_v45  ;;  %v12176_v32 = vld [vmem:[#allocation27_spill] sm:$0xff] }
 0x4fd   : > { %v10282_v61 = vadd.f32 %v4629_v16, %v9902_v29  ;;  %vm4691_vm6 = vcmp.ge.f32.partialorder %v10259_v49, 0.0  ;;  %v4784_v9 = vadd.f32 %v5773_v51, %v5772_v0  ;;  %v4602_v15 = vmul.f32 %v4570_v33, %v10189_v8  ;;  %v12178_v16 = vld [vmem:[#allocation9_spill] sm:$0xff] }
 0x4fe   : > { %12173 = vst [vmem:[#allocation59_spill] sm:$0xff] %v10270_v13  ;;  %v5774_v12 = vsel %vm4690_vm5, 1.0, %v11417_v56  ;;  %v4632_v4 = vmul.f32 %v4600_v22, %v7097_v45  ;;  %v10293_v50 = vadd.f32 %v4630_v46, %v12174_v63  ;;  %vm4692_vm7 = vcmp.ge.f32.partialorder %v10270_v13, 0.0 }
 0x4ff   : > { %v4785_v29 = vadd.f32 %v5774_v12, %v4784_v9  ;;  %v4603_v17 = vmul.f32 %v4571_v30, %v10189_v8  ;;  %v5775_v33 = vsel %vm4691_vm6, 1.0, %v11417_v56  ;;  %v4633_v49 = vmul.f32 %v4601_v19, %v7097_v45  ;;  %v12184_v19 = vld [vmem:[#allocation10_spill] sm:$0xff] }
 0x500   : > { %12175 = vst [vmem:[#allocation57_spill] sm:$0xff] %v10293_v50  ;;  %v10304_v22 = vadd.f32 %v4631_v47, %v12176_v32  ;;  %vm4693_vm8 = vcmp.ge.f32.partialorder %v10282_v61, 0.0  ;;  %v4604_v46 = vmul.f32 %v4572_v48, %v10189_v8  ;;  %v5776_v9 = vsel %vm4692_vm7, 1.0, %v11417_v56 }
 0x501   : > { %v4786_v63 = vadd.f32 %v5775_v33, %v4785_v29  ;;  %v4821_v13 = vmul.f32 %v5772_v0, %v12178_v16  ;;  %v4822_v3 = vmul.f32 %v5773_v51, %v12179_v42  ;;  %v4634_v30 = vmul.f32 %v4602_v15, %v7097_v45  ;;  %v12182_v16 = vld [vmem:[#allocation11_spill] sm:$0xff] }
 0x502   : > { %12177 = vst [vmem:[#allocation63_spill] sm:$0xff] %v10304_v22  ;;  %v10313_v28 = vadd.f32 %v4632_v4, %v12180_v26  ;;  %vm4694_vm9 = vcmp.ge.f32.partialorder %v10293_v50, 0.0  ;;  %v4605_v47 = vmul.f32 %v4573_v6, %v10189_v8  ;;  %v5777_v0 = vsel %vm4693_vm8, 1.0, %v11417_v56 }
 0x503   : > { %v4787_v32 = vadd.f32 %v5776_v9, %v4786_v63  ;;  %v4635_v42 = vmul.f32 %v4603_v17, %v7097_v45  ;;  %v10324_v51 = vadd.f32 %v4633_v49, %v9944_v14  ;;  %vm4695_vm10 = vcmp.ge.f32.partialorder %v10304_v22, 0.0 }
 0x504   : > { %v12181_v15 = vsub.f32 %v12066_v31, %v10186_v43  ;;  %v5778_v29 = vsel %vm4694_vm9, 1.0, %v11417_v56  ;;  %v4823_v63 = vmul.f32 %v5774_v12, %v12182_v16  ;;  %v4853_v6 = vadd.f32 %v4822_v3, %v4821_v13 }
 0x505   : > { %v4788_v26 = vadd.f32 %v5777_v0, %v4787_v32  ;;  %v4636_v48 = vmul.f32 %v4604_v46, %v7097_v45  ;;  %v10335_v17 = vadd.f32 %v4634_v30, %v9955_v40  ;;  %vm4696_vm11 = vcmp.ge.f32.partialorder %v10313_v28, 0.0 }
 0x506   : > { %v4606_v4 = vmul.f32 %v12181_v15, %v10189_v8  ;;  %v12183_v49 = vsub.f32 %v11457_v62, %v10186_v43  ;;  %v5779_v15 = vsel %vm4695_vm10, 1.0, %v11417_v56  ;;  %v4824_v22 = vmul.f32 %v5775_v33, %v12184_v19 }
 0x507   : > { %v4789_v14 = vadd.f32 %v5778_v29, %v4788_v26  ;;  %v4854_v50 = vadd.f32 %v4853_v6, %v4823_v63  ;;  %v4637_v13 = vmul.f32 %v4605_v47, %v7097_v45  ;;  %v10346_v12 = vadd.f32 %v4635_v42, %v9966_v34  ;;  %v12186_v26 = vld [vmem:[#allocation13_spill] sm:$0xff]  ;;  %v12188_v6 = vld [vmem:[#allocation12_spill] sm:$0xff] }
 0x508   : > { %v4607_v32 = vmul.f32 %v12183_v49, %v10189_v8  ;;  %vm4697_vm12 = vcmp.ge.f32.partialorder %v10324_v51, 0.0  ;;  %v12185_v3 = vsub.f32 %v11459_v10, %v10186_v43  ;;  %v5780_v30 = vsel %vm4696_vm11, 1.0, %v11417_v56 }
 0x509   : > { %v4790_v40 = vadd.f32 %v5779_v15, %v4789_v14  ;;  %v4825_v16 = vmul.f32 %v5776_v9, %v12186_v26  ;;  %v4855_v49 = vadd.f32 %v4854_v50, %v4824_v22  ;;  %v4638_v33 = vmul.f32 %v4606_v4, %v7097_v45 }
 0x50a   : > { %v4608_v46 = vmul.f32 %v12185_v3, %v10189_v8  ;;  %v10357_v19 = vadd.f32 %v4636_v48, %v9977_v18  ;;  %vm4698_vm13 = vcmp.ge.f32.partialorder %v10335_v17, 0.0  ;;  %v12187_v47 = vsub.f32 %v11460_v25, %v10186_v43 }
 0x50b   : > { %v4791_v34 = vadd.f32 %v5780_v30, %v4790_v40  ;;  %v5781_v63 = vsel %vm4697_vm12, 1.0, %v11417_v56  ;;  %v4826_v14 = vmul.f32 %v5777_v0, %v12188_v6  ;;  %v4856_v3 = vadd.f32 %v4855_v49, %v4825_v16  ;;  %v12190_v40 = vld [vmem:[#allocation16_spill] sm:$0xff] }
 0x50c   : > { %v4609_v42 = vmul.f32 %v12187_v47, %v10189_v8  ;;  %v4639_v50 = vmul.f32 %v4607_v32, %v7097_v45  ;;  %v10368_v22 = vadd.f32 %v4637_v13, %v9988_v23  ;;  %vm4699_vm14 = vcmp.ge.f32.partialorder %v10346_v12, 0.0 }
 0x50d   : > { %v4792_v18 = vadd.f32 %v5781_v63, %v4791_v34  ;;  %v12189_v9 = vsub.f32 %v11461_v54, %v10186_v43  ;;  %v5782_v4 = vsel %vm4698_vm13, 1.0, %v11417_v56  ;;  %v4827_v26 = vmul.f32 %v5778_v29, %v12190_v40  ;;  %v12192_v34 = vld [vmem:[#allocation15_spill] sm:$0xff] }
 0x50e   : > { %v4857_v47 = vadd.f32 %v4856_v3, %v4826_v14  ;;  %v4640_v0 = vmul.f32 %v4608_v46, %v7097_v45  ;;  %v10379_v32 = vadd.f32 %v4638_v33, %v9999_v21  ;;  %vm4700_vm15 = vcmp.ge.f32.partialorder %v10357_v19, 0.0 }
 0x50f   : > { %v4610_v48 = vmul.f32 %v12189_v9, %v10189_v8  ;;  %v4793_v23 = vadd.f32 %v5782_v4, %v4792_v18  ;;  %v12191_v13 = vsub.f32 %v11462_v57, %v10186_v43  ;;  %v5783_v49 = vsel %vm4699_vm14, 1.0, %v11417_v56  ;;  %v12194_v18 = vld [vmem:[#allocation20_spill] sm:$0xff] }
 0x510   : > { %v4828_v6 = vmul.f32 %v5779_v15, %v12192_v34  ;;  %v4858_v9 = vadd.f32 %v4857_v47, %v4827_v26  ;;  %v4641_v29 = vmul.f32 %v4609_v42, %v7097_v45  ;;  %v10390_v46 = vadd.f32 %v4639_v50, %v10010_v7 }
 0x511   : > { %v4611_v16 = vmul.f32 %v12191_v13, %v10189_v8  ;;  %vm4701_vm0 = vcmp.ge.f32.partialorder %v10368_v22, 0.0  ;;  %v4794_v21 = vadd.f32 %v5783_v49, %v4793_v23  ;;  %v12193_v33 = vsub.f32 %v11463_v38, %v10186_v43  ;;  %v12196_v23 = vld [vmem:[#allocation18_spill] sm:$0xff] }
 0x512   : > { %v5784_v3 = vsel %vm4700_vm15, 1.0, %v11417_v56  ;;  %v4829_v40 = vmul.f32 %v5780_v30, %v12194_v18  ;;  %v4859_v13 = vadd.f32 %v4858_v9, %v4828_v6  ;;  %v4642_v15 = vmul.f32 %v4610_v48, %v7097_v45 }
 0x513   : > { %v4612_v14 = vmul.f32 %v12193_v33, %v10189_v8  ;;  %v10401_v42 = vadd.f32 %v4640_v0, %v10021_v20  ;;  %vm4702_vm1 = vcmp.ge.f32.partialorder %v10379_v32, 0.0  ;;  %v4795_v7 = vadd.f32 %v5784_v3, %v4794_v21 }
 0x514   : > { %v12195_v50 = vsub.f32 %v11465_v52, %v10186_v43  ;;  %v5785_v47 = vsel %vm4701_vm0, 1.0, %v11417_v56  ;;  %v4830_v34 = vmul.f32 %v5781_v63, %v12196_v23  ;;  %v4860_v33 = vadd.f32 %v4859_v13, %v4829_v40 }
 0x515   : > { %v4643_v30 = vmul.f32 %v4611_v16, %v7097_v45  ;;  %v10412_v48 = vadd.f32 %v4641_v29, %v10032_v24  ;;  %vm4703_vm2 = vcmp.ge.f32.partialorder %v10390_v46, 0.0  ;;  %v4796_v20 = vadd.f32 %v5785_v47, %v4795_v7  ;;  %v12200_v7 = vld [vmem:[#allocation22_spill] sm:$0xff] }
 0x516   : > { %v4613_v26 = vmul.f32 %v12195_v50, %v10189_v8  ;;  %v12197_v0 = vsub.f32 %v11466_v44, %v10186_v43  ;;  %v5786_v9 = vsel %vm4702_vm1, 1.0, %v11417_v56  ;;  %v4831_v21 = vmul.f32 %v5782_v4, %v12100_v37 }
 0x517   : > { %v4861_v18 = vadd.f32 %v4860_v33, %v4830_v34  ;;  %v4644_v63 = vmul.f32 %v4612_v14, %v7097_v45  ;;  %v10423_v16 = vadd.f32 %v4642_v15, %v10043_v39  ;;  %vm4704_vm3 = vcmp.ge.f32.partialorder %v10401_v42, 0.0  ;;  %v12203_v33 = vld [vmem:[#allocation28_spill] sm:$0xff] }
 0x518   : > { %v4614_v6 = vmul.f32 %v12197_v0, %v10189_v8  ;;  %v4797_v24 = vadd.f32 %v5786_v9, %v4796_v20  ;;  %v12199_v29 = vsub.f32 %v11468_v60, %v10186_v43  ;;  %v5787_v13 = vsel %vm4703_vm2, 1.0, %v11417_v56 }
 0x519   : > { %12198 = vst [vmem:[#allocation82_spill] sm:$0xff] %v10423_v16  ;;  %v4832_v50 = vmul.f32 %v5783_v49, %v12200_v7  ;;  %v4862_v23 = vadd.f32 %v4861_v18, %v4831_v21  ;;  %v4645_v37 = vmul.f32 %v4613_v26, %v7097_v45  ;;  %v10434_v4 = vadd.f32 %v4643_v30, %v10054_v11  ;;  %v12204_v21 = vld [vmem:[#allocation31_spill] sm:$0xff] }
 0x51a   : > { %v4615_v40 = vmul.f32 %v12199_v29, %v10189_v8  ;;  %vm4705_vm4 = vcmp.ge.f32.partialorder %v10412_v48, 0.0  ;;  %v4798_v39 = vadd.f32 %v5787_v13, %v4797_v24  ;;  %v12202_v14 = vsub.f32 %v11469_v55, %v10186_v43  ;;  %v12207_v29 = vld [vmem:[#allocation26_spill] sm:$0xff] }
 0x51b   : > { %12201 = vst [vmem:[#allocation61_spill] sm:$0xff] %v10434_v4  ;;  %v5788_v34 = vsel %vm4704_vm3, 1.0, %v11417_v56  ;;  %v4833_v20 = vmul.f32 %v5784_v3, %v12203_v33  ;;  %v4863_v0 = vadd.f32 %v4862_v23, %v4832_v50  ;;  %v4646_v49 = vmul.f32 %v4614_v6, %v7097_v45  ;;  %v12208_v50 = vld [vmem:[#allocation29_spill] sm:$0xff] }
 0x51c   : > { %v4616_v15 = vmul.f32 %v12202_v14, %v10189_v8  ;;  %v10445_v26 = vadd.f32 %v4644_v63, %v12204_v21  ;;  %vm4706_vm5 = vcmp.ge.f32.partialorder %v10423_v16, 0.0  ;;  %v4799_v11 = vadd.f32 %v5788_v34, %v4798_v39  ;;  %v12210_v21 = vld [vmem:[#allocation32_spill] sm:$0xff] }
 0x51d   : > { %v12206_v30 = vsub.f32 %v11470_v59, %v10186_v43  ;;  %v5789_v24 = vsel %vm4705_vm4, 1.0, %v11417_v56  ;;  %v4834_v7 = vmul.f32 %v5785_v47, %v12207_v29  ;;  %v4864_v14 = vadd.f32 %v4863_v0, %v4833_v20  ;;  %v12211_v20 = vld [vmem:[#allocation35_spill] sm:$0xff] }
 0x51e   : > { %12205 = vst [vmem:[#allocation81_spill] sm:$0xff] %v10445_v26  ;;  %v4647_v3 = vmul.f32 %v4615_v40, %v7097_v45  ;;  %v10456_v6 = vadd.f32 %v4645_v37, %v12208_v50  ;;  %vm4707_vm6 = vcmp.ge.f32.partialorder %v10434_v4, 0.0  ;;  %v4800_v63 = vadd.f32 %v5789_v24, %v4799_v11  ;;  %v12213_v50 = vld [vmem:[#allocation30_spill] sm:$0xff] }
 0x51f   : > { %v4617_v18 = vmul.f32 %v12206_v30, %v10189_v8  ;;  %v12209_v23 = vsub.f32 %v11503_v27, %v10186_v43  ;;  %v5790_v33 = vsel %vm4706_vm5, 1.0, %v11417_v56  ;;  %v4835_v30 = vmul.f32 %v5786_v9, %v12210_v21 }
 0x520   : > { %v4865_v16 = vadd.f32 %v4864_v14, %v4834_v7  ;;  %v4648_v47 = vmul.f32 %v4616_v15, %v7097_v45  ;;  %v10467_v40 = vadd.f32 %v4646_v49, %v12211_v20  ;;  %vm4708_vm7 = vcmp.ge.f32.partialorder %v10445_v26, 0.0  ;;  %v12214_v7 = vld [vmem:[#allocation33_spill] sm:$0xff]  ;;  %v12216_v20 = vld [vmem:[#allocation36_spill] sm:$0xff] }
 0x521   : > { %v4618_v39 = vmul.f32 %v12209_v23, %v10189_v8  ;;  %v4801_v37 = vadd.f32 %v5790_v33, %v4800_v63  ;;  %v12212_v0 = vsub.f32 %v11508_v58, %v10186_v43  ;;  %v5791_v29 = vsel %vm4707_vm6, 1.0, %v11417_v56 }
 0x522   : > { %v4836_v23 = vmul.f32 %v5787_v13, %v12213_v50  ;;  %v4866_v4 = vadd.f32 %v4865_v16, %v4835_v30  ;;  %v4649_v9 = vmul.f32 %v4617_v18, %v7097_v45  ;;  %v10478_v15 = vadd.f32 %v4647_v3, %v12214_v7  ;;  %v12218_v50 = vld [vmem:[#allocation34_spill] sm:$0xff] }
 0x523   : > { %v4619_v11 = vmul.f32 %v12212_v0, %v10189_v8  ;;  %vm4709_vm8 = vcmp.ge.f32.partialorder %v10456_v6, 0.0  ;;  %v4802_v49 = vadd.f32 %v5791_v29, %v4801_v37  ;;  %v12215_v14 = vsub.f32 %v11474_v36, %v10186_v43 }
 0x524   : > { %v5792_v21 = vsel %vm4708_vm7, 1.0, %v11417_v56  ;;  %v4837_v0 = vmul.f32 %v5788_v34, %v12216_v20  ;;  %v4867_v26 = vadd.f32 %v4866_v4, %v4836_v23  ;;  %v4650_v16 = vmul.f32 %v4618_v39, %v7097_v45 }
 0x525   : > { %v4620_v63 = vmul.f32 %v12215_v14, %v10189_v8  ;;  %v10489_v13 = vadd.f32 %v4648_v47, %v10109_v53  ;;  %vm4710_vm9 = vcmp.ge.f32.partialorder %v10467_v40, 0.0  ;;  %v4803_v18 = vadd.f32 %v5792_v21, %v4802_v49 }
 0x526   : > { %v12217_v3 = vsub.f32 %v11475_v5, %v10186_v43  ;;  %v5793_v37 = vsel %vm4709_vm8, 1.0, %v11417_v56  ;;  %v4838_v7 = vmul.f32 %v5789_v24, %v12218_v50  ;;  %v4868_v14 = vadd.f32 %v4867_v26, %v4837_v0  ;;  %v12221_v24 = vld [vmem:[#allocation39_spill] sm:$0xff] }
 0x527   : > { %v4651_v4 = vmul.f32 %v4619_v11, %v7097_v45  ;;  %v10500_v34 = vadd.f32 %v4649_v9, %v10120_v1  ;;  %vm4711_vm10 = vcmp.ge.f32.partialorder %v10478_v15, 0.0  ;;  %v4804_v53 = vadd.f32 %v5793_v37, %v4803_v18 }
 0x528   : > { %v4621_v30 = vmul.f32 %v12217_v3, %v10189_v8  ;;  %v12220_v39 = vsub.f32 %v11477_v41, %v10186_v43  ;;  %v5794_v23 = vsel %vm4710_vm9, 1.0, %v11417_v56  ;;  %v4839_v49 = vmul.f32 %v5790_v33, %v12121_v35  ;;  %v12224_v3 = vld [vmem:[#allocation38_spill] sm:$0xff]  ;;  %v12225_v33 = vld [vmem:[#allocation37_spill] sm:$0xff] }
 0x529   : > { %12219 = vst [vmem:[#allocation84_spill] sm:$0xff] %v10500_v34  ;;  %v4869_v20 = vadd.f32 %v4868_v14, %v4838_v7  ;;  %v4652_v26 = vmul.f32 %v4620_v63, %v7097_v45  ;;  %v10511_v11 = vadd.f32 %v4650_v16, %v12221_v24  ;;  %vm4712_vm11 = vcmp.ge.f32.partialorder %v10489_v13, 0.0  ;;  %v12227_v14 = vld [vmem:[#allocation44_spill] sm:$0xff] }
 0x52a   : > { %v4622_v47 = vmul.f32 %v12220_v39, %v10189_v8  ;;  %v4805_v1 = vadd.f32 %v5794_v23, %v4804_v53  ;;  %v12223_v9 = vsub.f32 %v11478_v2, %v10186_v43  ;;  %v5795_v18 = vsel %vm4711_vm10, 1.0, %v11417_v56 }
 0x52b   : > { %12222 = vst [vmem:[#allocation83_spill] sm:$0xff] %v10511_v11  ;;  %v4840_v50 = vmul.f32 %v5791_v29, %v12224_v3  ;;  %v4870_v39 = vadd.f32 %v4869_v20, %v4839_v49  ;;  %v4653_v35 = vmul.f32 %v4621_v30, %v7097_v45  ;;  %v10522_v63 = vadd.f32 %v4651_v4, %v12225_v33  ;;  %v12230_v4 = vld [vmem:[#allocation42_spill] sm:$0xff]  ;;  %v12231_v3 = vld [vmem:[#allocation41_spill] sm:$0xff] }
 0x52c   : > { %v4623_v0 = vmul.f32 %v12223_v9, %v10189_v8  ;;  %vm4713_vm12 = vcmp.ge.f32.partialorder %v10500_v34, 0.0  ;;  %v4806_v16 = vadd.f32 %v5795_v18, %v4805_v1  ;;  %v5796_v7 = vsel %vm4712_vm11, 1.0, %v11417_v56  ;;  %v12228_v8 = vld [vmem:[#allocation43_spill] sm:$0xff] }
 0x52d   : > { %12226 = vst [vmem:[#allocation86_spill] sm:$0xff] %v10522_v63  ;;  %v4841_v53 = vmul.f32 %v5792_v21, %v12227_v14  ;;  %v4871_v24 = vadd.f32 %v4870_v39, %v4840_v50  ;;  %v4654_v43 = vmul.f32 %v4622_v47, %v7097_v45  ;;  %v10529_v9 = vadd.f32 %v4652_v26, %v12228_v8  ;;  %v12233_v26 = vld [vmem:[#allocation48_spill] sm:$0xff]  ;;  %v12234_v14 = vld [vmem:[#allocation47_spill] sm:$0xff]  ;;  %v12236_v8 = vld [vmem:[#allocation45_spill] sm:$0xff] }
 0x52e   : > { %vm4714_vm13 = vcmp.ge.f32.partialorder %v10511_v11, 0.0  ;;  %v4807_v29 = vadd.f32 %v5796_v7, %v4806_v16  ;;  %v5797_v30 = vsel %vm4713_vm12, 1.0, %v11417_v56  ;;  %v4842_v49 = vmul.f32 %v5793_v37, %v12230_v4 }
 0x52f   : > { %12229 = vst [vmem:[#allocation85_spill] sm:$0xff] %v10529_v9  ;;  %v4872_v20 = vadd.f32 %v4871_v24, %v4841_v53  ;;  %v4655_v1 = vmul.f32 %v4623_v0, %v7097_v45  ;;  %v10536_v33 = vadd.f32 %v4653_v35, %v12231_v3  ;;  %vm4715_vm14 = vcmp.ge.f32.partialorder %v10522_v63, 0.0  ;;  %v12235_v0 = vld [vmem:[#allocation46_spill] sm:$0xff] }
 0x530   : > { %v4808_v21 = vadd.f32 %v5797_v30, %v4807_v29  ;;  %v5798_v47 = vsel %vm4714_vm13, 1.0, %v11417_v56  ;;  %v4843_v50 = vmul.f32 %v5794_v23, %v12233_v26  ;;  %v10542_v16 = vadd.f32 %v4654_v43, %v12234_v14  ;;  %v12239_v26 = vld [vmem:[#allocation50_spill] sm:$0xff] }
 0x531   : > { %12232 = vst [vmem:[#allocation88_spill] sm:$0xff] %v10536_v33  ;;  %v4873_v39 = vadd.f32 %v4872_v20, %v4842_v49  ;;  %vm4716_vm15 = vcmp.ge.f32.partialorder %v10529_v9, 0.0  ;;  %v5799_v53 = vsel %vm4715_vm14, 1.0, %v11417_v56  ;;  %v4844_v24 = vmul.f32 %v5795_v18, %v12235_v0  ;;  %v12238_v49 = vld [vmem:[#allocation52_spill] sm:$0xff] }
 0x532   : > { %v4809_v37 = vadd.f32 %v5798_v47, %v4808_v21  ;;  %v10548_v4 = vadd.f32 %v4655_v1, %v12236_v8  ;;  %vm4717_vm0 = vcmp.ge.f32.partialorder %v10536_v33, 0.0  ;;  %v5800_v23 = vsel %vm4716_vm15, 1.0, %v11417_v56  ;;  %v12242_v33 = vld [vmem:[#allocation60_spill] sm:$0xff] }
 0x533   : > { %v4874_v35 = vadd.f32 %v4873_v39, %v4843_v50  ;;  %v4845_v20 = vmul.f32 %v5796_v7, %v12238_v49  ;;  %vm4718_vm1 = vcmp.ge.f32.partialorder %v10542_v16, 0.0  ;;  %v5801_v21 = vsel %vm4717_vm0, 1.0, %v11417_v56  ;;  %v12240_v39 = vld [vmem:[#allocation56_spill] sm:$0xff] }
 0x534   : > { %12237 = vst [vmem:[#allocation87_spill] sm:$0xff] %v10548_v4  ;;  %v4810_v29 = vadd.f32 %v5799_v53, %v4809_v37  ;;  %v4846_v14 = vmul.f32 %v5797_v30, %v12239_v26  ;;  %vm4719_vm2 = vcmp.ge.f32.partialorder %v10548_v4, 0.0  ;;  %v5802_v50 = vsel %vm4718_vm1, 1.0, %v11417_v56  ;;  %v12244_v4 = vld [vmem:[#allocation64_spill] sm:$0xff] }
 0x535   : > { %v4875_v43 = vadd.f32 %v4874_v35, %v4844_v24  ;;  %v4847_v37 = vmul.f32 %v5798_v47, %v12240_v39  ;;  %v5803_v7 = vsel %vm4719_vm2, 1.0, %v11417_v56  ;;  %v12241_v24 = vld [vmem:[#allocation54_spill] sm:$0xff]  ;;  %v4849_v9 = vmul.f32 %v5800_v23, %v12242_v33 }
 0x536   : > { %v4811_v3 = vadd.f32 %v5800_v23, %v4810_v29  ;;  %v4848_v35 = vmul.f32 %v5799_v53, %v12241_v24  ;;  %v4851_v11 = vmul.f32 %v5802_v50, %v12244_v4 }
 0x537   : > { %v4876_v18 = vadd.f32 %v4875_v43, %v4845_v20  ;;  %v12243_v20 = vld [vmem:[#allocation58_spill] sm:$0xff] }
 0x538   : > { %v4812_v1 = vadd.f32 %v5801_v21, %v4811_v3  ;;  %v4850_v43 = vmul.f32 %v5801_v21, %v12243_v20  ;;  %v12247_v20 = vld [vmem:[#allocation67_spill] sm:$0xff] }
 0x539   : > { %v4877_v0 = vadd.f32 %v4876_v18, %v4846_v14  ;;  %v12245_v14 = vld [vmem:[#allocation62_spill] sm:$0xff] }
 0x53a   : > { %v4813_v8 = vadd.f32 %v5802_v50, %v4812_v1  ;;  %v4852_v18 = vmul.f32 %v5803_v7, %v12245_v14 }
 0x53b   : > { %v4878_v49 = vadd.f32 %v4877_v0, %v4847_v37 }
 0x53c   : > { %v4814_v29 = vadd.f32 %v5803_v7, %v4813_v8 }
 0x53d   : > { %v4879_v63 = vadd.f32 %v4878_v49, %v4848_v35  ;;  %v12246_v35 = vld [vmem:[#allocation75_spill] sm:$0xff] }
 0x53e   : > { %v4815_v30 = vrot.slane %v4814_v29, 4 }
 0x53f   : > { %v4880_v26 = vadd.f32 %v4879_v63, %v4849_v9 }
 0x540   : > { %v4816_v3 = vadd.f32 %v4815_v30, %v4814_v29 }
 0x541   : > { %v4881_v34 = vadd.f32 %v4880_v26, %v4850_v43 }
 0x542   : > { %v4817_v47 = vrot.slane %v4816_v3, 2 }
 0x543   : > { %v4882_v1 = vadd.f32 %v4881_v34, %v4851_v11 }
 0x544   : > { %v4818_v56 = vadd.f32 %v4817_v47, %v4816_v3 }
 0x545   : > { %v4883_v39 = vadd.f32 %v4882_v1, %v4852_v18 }
 0x546   : > { %v4819_v53 = vrot.slane %v4818_v56, 1 }
 0x547   : > { %v4884_v37 = vrot.slane %v4883_v39, 4 }
 0x548   : > { %v4820_v0 = vadd.f32 %v4819_v53, %v4818_v56 }
 0x549   : > { %v4885_v8 = vadd.f32 %v4884_v37, %v4883_v39 }
 0x54a   : > { %v4890_v33 = vsub.f32 256.0, %v4820_v0  ;;  %v4892_v23 = vmax.f32 %v4820_v0, 1.0 }
 0x54b   : > { %v4886_v24 = vrot.slane %v4885_v8, 2 }
 0x54c   : > { %6174 = vrcp.f32 %v4892_v23  ;;  %v4895_v21 = vmax.f32 %v4890_v33, 1.0 }
 0x54d   : > { %v4887_v63 = vadd.f32 %v4886_v24, %v4885_v8 }
 0x54e   : > { %6176 = vrcp.f32 %v4895_v21 }
 0x54f   : > { %v4888_v9 = vrot.slane %v4887_v63, 1 }
 0x551   : > { %v4889_v4 = vadd.f32 %v4888_v9, %v4887_v63 }
 0x553   : > { %v4891_v49 = vsub.f32 %v12246_v35, %v4889_v4 }
 0x556   : > { %v6175_v50 = vpop.eup %6174 }
 0x557   : > { %v4894_v34 = vmul.f32 %v6175_v50, %v4889_v4 }
 0x558   : > { %v6177_v7 = vpop.eup %6176 }
 0x559   : > { %v4897_v11 = vmul.f32 %v6177_v7, %v4891_v49  ;;  %v12248_v49 = vld [vmem:[#allocation66_spill] sm:$0xff] }
 0x55b   : > { %v4898_v29 = vsub.f32 %v4894_v34, %v4897_v11  ;;  %v10566_v30 = vadd.f32 %v4897_v11, %v4894_v34  ;;  %v12249_v34 = vld [vmem:[#allocation65_spill] sm:$0xff] }
 0x55d   : > { %v10569_v43 = vmul.f32 %v4898_v29, %v12247_v20  ;;  %v4931_v26 = vsub.f32 %v11477_v41, %v10566_v30  ;;  %v4915_v1 = vsub.f32 %v12066_v31, %v10566_v30  ;;  %v4916_v56 = vsub.f32 %v11457_v62, %v10566_v30  ;;  %v12250_v29 = vld [vmem:[#allocation69_spill] sm:$0xff] }
 0x55e   : > { %v4917_v39 = vsub.f32 %v11459_v10, %v10566_v30  ;;  %v4918_v53 = vsub.f32 %v11460_v25, %v10566_v30  ;;  %v4919_v41 = vsub.f32 %v11461_v54, %v10566_v30  ;;  %v4920_v37 = vsub.f32 %v11462_v57, %v10566_v30 }
 0x55f   : > { %v4963_v3 = vmul.f32 %v4931_v26, %v10569_v43  ;;  %v4921_v0 = vsub.f32 %v11463_v38, %v10566_v30  ;;  %v4922_v31 = vsub.f32 %v11465_v52, %v10566_v30  ;;  %v4923_v62 = vsub.f32 %v11466_v44, %v10566_v30  ;;  %v12251_v26 = vld [vmem:[#allocation68_spill] sm:$0xff] }
 0x560   : > { %v4924_v10 = vsub.f32 %v11468_v60, %v10566_v30  ;;  %v4925_v25 = vsub.f32 %v11469_v55, %v10566_v30  ;;  %v4926_v54 = vsub.f32 %v11470_v59, %v10566_v30  ;;  %v4927_v57 = vsub.f32 %v11503_v27, %v10566_v30 }
 0x561   : > { %v4995_v47 = vmul.f32 %v4963_v3, %v7097_v45  ;;  %v4928_v38 = vsub.f32 %v11508_v58, %v10566_v30  ;;  %v4929_v52 = vsub.f32 %v11474_v36, %v10566_v30  ;;  %v4930_v44 = vsub.f32 %v11475_v5, %v10566_v30 }
 0x562   : > { %v4932_v60 = vsub.f32 %v11478_v2, %v10566_v30  ;;  %v10611_v55 = vmul.f32 %v4915_v1, %v10569_v43  ;;  %v10614_v59 = vmul.f32 %v4916_v56, %v10569_v43  ;;  %v10617_v27 = vmul.f32 %v4917_v39, %v10569_v43  ;;  %v12253_v1 = vld [vmem:[#allocation70_spill] sm:$0xff]  ;;  %v12254_v39 = vld [vmem:[#allocation73_spill] sm:$0xff] }
 0x563   : > { %v5027_v14 = vadd.f32 %v4995_v47, %v10542_v16  ;;  %v10620_v58 = vmul.f32 %v4918_v53, %v10569_v43  ;;  %v10623_v36 = vmul.f32 %v4919_v41, %v10569_v43  ;;  %v10626_v5 = vmul.f32 %v4920_v37, %v10569_v43  ;;  %v12255_v41 = vld [vmem:[#allocation72_spill] sm:$0xff] }
 0x564   : > { %v10629_v2 = vmul.f32 %v4921_v0, %v10569_v43  ;;  %v10632_v8 = vmul.f32 %v4922_v31, %v10569_v43  ;;  %v10635_v33 = vmul.f32 %v4923_v62, %v10569_v43  ;;  %v10638_v23 = vmul.f32 %v4924_v10, %v10569_v43  ;;  %v12256_v0 = vld [vmem:[#allocation76_spill] sm:$0xff]  ;;  %v12257_v62 = vld [vmem:[#allocation74_spill] sm:$0xff] }
 0x565   : > { %v5059_v18 = vsub.f32 0.0, %v5027_v14  ;;  %v10641_v24 = vmul.f32 %v4925_v25, %v10569_v43  ;;  %v10644_v21 = vmul.f32 %v4926_v54, %v10569_v43  ;;  %v10647_v63 = vmul.f32 %v4927_v57, %v10569_v43  ;;  %v12252_v14 = vld [vmem:[#allocation71_spill] sm:$0xff]  ;;  %v12258_v25 = vld [vmem:[#allocation78_spill] sm:$0xff]  ;;  %v12259_v57 = vld [vmem:[#allocation77_spill] sm:$0xff] }
 0x566   : > { %v10650_v9 = vmul.f32 %v4928_v38, %v10569_v43  ;;  %v10653_v4 = vmul.f32 %v4929_v52, %v10569_v43  ;;  %v10656_v50 = vmul.f32 %v4930_v44, %v10569_v43  ;;  %v10659_v35 = vmul.f32 %v4932_v60, %v10569_v43  ;;  %v12260_v52 = vld [vmem:[#allocation80_spill] sm:$0xff]  ;;  %v12261_v60 = vld [vmem:[#allocation79_spill] sm:$0xff] }
 0x567   : > { %v5121_v16 = vmul.f32 1.442695, %v5059_v18  ;;  %v4901_v7 = vsub.f32 %v12248_v49, %v10566_v30  ;;  %v4902_v11 = vsub.f32 %v12249_v34, %v10566_v30  ;;  %v4903_v20 = vsub.f32 %v12250_v29, %v10566_v30 }
 0x568   : > { %v4904_v3 = vsub.f32 %v12251_v26, %v10566_v30  ;;  %v4905_v18 = vsub.f32 %v12252_v14, %v10566_v30  ;;  %v4906_v56 = vsub.f32 %v12253_v1, %v10566_v30  ;;  %v4907_v53 = vsub.f32 %v12254_v39, %v10566_v30 }
 0x569   : > { %6178 = vpow2.f32 %v5121_v16  ;;  %v4908_v37 = vsub.f32 %v12255_v41, %v10566_v30  ;;  %v4909_v31 = vsub.f32 %v12256_v0, %v10566_v30  ;;  %v4910_v10 = vsub.f32 %v12257_v62, %v10566_v30 }
 0x56a   : > { %v4911_v54 = vsub.f32 %v12258_v25, %v10566_v30  ;;  %v4912_v38 = vsub.f32 %v12259_v57, %v10566_v30  ;;  %v4913_v44 = vsub.f32 %v12260_v52, %v10566_v30  ;;  %v4914_v49 = vsub.f32 %v12261_v60, %v10566_v30 }
 0x56b   : > { %v4933_v34 = vmul.f32 %v4901_v7, %v10569_v43  ;;  %v4934_v29 = vmul.f32 %v4902_v11, %v10569_v43  ;;  %v4935_v26 = vmul.f32 %v4903_v20, %v10569_v43  ;;  %v4937_v14 = vmul.f32 %v4905_v18, %v10569_v43 }
 0x56c   : > { %v4938_v1 = vmul.f32 %v4906_v56, %v10569_v43  ;;  %v4939_v39 = vmul.f32 %v4907_v53, %v10569_v43  ;;  %v4940_v41 = vmul.f32 %v4908_v37, %v10569_v43  ;;  %v4941_v30 = vmul.f32 %v4909_v31, %v10569_v43 }
 0x56d   : > { %v4942_v7 = vmul.f32 %v4910_v10, %v10569_v43  ;;  %v4943_v11 = vmul.f32 %v4911_v54, %v10569_v43  ;;  %v4944_v20 = vmul.f32 %v4912_v38, %v10569_v43  ;;  %v4965_v18 = vmul.f32 %v4933_v34, %v7097_v45  ;;  %v12262_v34 = vld [vmem:[#allocation51_spill] sm:$0xff] }
 0x56e   : > { %v4966_v56 = vmul.f32 %v4934_v29, %v7097_v45  ;;  %v4967_v53 = vmul.f32 %v4935_v26, %v7097_v45  ;;  %v4969_v0 = vmul.f32 %v4937_v14, %v7097_v45  ;;  %v4970_v31 = vmul.f32 %v4938_v1, %v7097_v45  ;;  %v12263_v26 = vld [vmem:[#allocation49_spill] sm:$0xff] }
 0x56f   : > { %v4971_v62 = vmul.f32 %v4939_v39, %v7097_v45  ;;  %v4972_v10 = vmul.f32 %v4940_v41, %v7097_v45  ;;  %v4974_v25 = vmul.f32 %v4942_v7, %v7097_v45  ;;  %v4975_v54 = vmul.f32 %v4943_v11, %v7097_v45  ;;  %v12264_v39 = vld [vmem:[#allocation55_spill] sm:$0xff] }
 0x570   : > { %v4976_v57 = vmul.f32 %v4944_v20, %v7097_v45  ;;  %v4980_v60 = vmul.f32 %v10614_v59, %v7097_v45  ;;  %v4997_v29 = vadd.f32 %v4965_v18, %v12262_v34  ;;  %v4982_v14 = vmul.f32 %v10620_v58, %v7097_v45  ;;  %v12266_v58 = vld [vmem:[#allocation59_spill] sm:$0xff] }
 0x571   : > { %v4983_v1 = vmul.f32 %v10623_v36, %v7097_v45  ;;  %v4999_v41 = vadd.f32 %v4967_v53, %v12264_v39  ;;  %v4984_v59 = vmul.f32 %v10626_v5, %v7097_v45  ;;  %v10742_v11 = vmul.f32 %v10632_v8, %v7097_v45 }
 0x572   : > { %v5001_v20 = vadd.f32 %v4969_v0, %v12266_v58  ;;  %v10750_v36 = vmul.f32 %v10635_v33, %v7097_v45  ;;  %v10754_v5 = vmul.f32 %v10638_v23, %v7097_v45  ;;  %v5002_v8 = vadd.f32 %v4970_v31, %v10282_v61  ;;  %v12268_v23 = vld [vmem:[#allocation63_spill] sm:$0xff] }
 0x573   : > { %v6179_v47 = vpop.eup %6178  ;;  %v10768_v33 = vmul.f32 %v10647_v63, %v7097_v45  ;;  %v5031_v0 = vsub.f32 0.0, %v4999_v41  ;;  %v10777_v61 = vmul.f32 %v10653_v4, %v7097_v45  ;;  %v10786_v63 = vmul.f32 %v10659_v35, %v7097_v45 }
 0x574   : > { %v5155_v16 = vadd.f32 1.0, %v6179_v47  ;;  %v4936_v47 = vmul.f32 %v4904_v3, %v10569_v43  ;;  %v4946_v3 = vmul.f32 %v4914_v49, %v10569_v43  ;;  %v4981_v49 = vmul.f32 %v10617_v27, %v7097_v45 }
 0x575   : > { %v10738_v27 = vmul.f32 %v10629_v2, %v7097_v45  ;;  %v10758_v2 = vmul.f32 %v10641_v24, %v7097_v45  ;;  %v10773_v24 = vmul.f32 %v10650_v9, %v7097_v45  ;;  %v5033_v31 = vsub.f32 0.0, %v5001_v20 }
 0x576   : > { %6180 = vrcp.f32 %v5155_v16  ;;  %v4945_v16 = vmul.f32 %v4913_v44, %v10569_v43  ;;  %v4968_v37 = vmul.f32 %v4936_v47, %v7097_v45  ;;  %v4973_v43 = vmul.f32 %v4941_v30, %v7097_v45  ;;  %v12265_v30 = vld [vmem:[#allocation53_spill] sm:$0xff] }
 0x577   : > { %v4978_v52 = vmul.f32 %v4946_v3, %v7097_v45  ;;  %v4979_v44 = vmul.f32 %v10611_v55, %v7097_v45  ;;  %v4998_v47 = vadd.f32 %v4966_v56, %v12263_v26  ;;  %v12267_v3 = vld [vmem:[#allocation57_spill] sm:$0xff]  ;;  %v5029_v56 = vsub.f32 0.0, %v4997_v29 }
 0x578   : > { %v4977_v38 = vmul.f32 %v4945_v16, %v7097_v45  ;;  %v5000_v55 = vadd.f32 %v4968_v37, %v12265_v30  ;;  %v10763_v16 = vmul.f32 %v10644_v21, %v7097_v45  ;;  %v5003_v18 = vadd.f32 %v4971_v62, %v12267_v3 }
 0x579   : > { %v5030_v53 = vsub.f32 0.0, %v4998_v47  ;;  %v5004_v37 = vadd.f32 %v4972_v10, %v12268_v23  ;;  %v5005_v21 = vadd.f32 %v4973_v43, %v10313_v28  ;;  %v10782_v62 = vmul.f32 %v10656_v50, %v7097_v45 }
 0x57a   : > { %v5032_v34 = vsub.f32 0.0, %v5000_v55  ;;  %v5006_v10 = vadd.f32 %v4974_v25, %v10324_v51  ;;  %v5034_v29 = vsub.f32 0.0, %v5002_v8  ;;  %v5007_v9 = vadd.f32 %v4975_v54, %v10335_v17  ;;  %v12269_v8 = vld [vmem:[#allocation82_spill] sm:$0xff] }
 0x57b   : > { %v5035_v26 = vsub.f32 0.0, %v5003_v18  ;;  %v5061_v47 = vmul.f32 1.442695, %v5029_v56  ;;  %v5063_v4 = vmul.f32 1.442695, %v5030_v53  ;;  %v5008_v39 = vadd.f32 %v4976_v57, %v10346_v12  ;;  %v12270_v18 = vld [vmem:[#allocation61_spill] sm:$0xff] }
 0x57c   : > { %v5036_v28 = vsub.f32 0.0, %v5004_v37  ;;  %v5065_v43 = vmul.f32 1.442695, %v5031_v0  ;;  %v5067_v41 = vmul.f32 1.442695, %v5032_v34  ;;  %v5009_v50 = vadd.f32 %v4977_v38, %v10357_v19  ;;  %v12271_v53 = vld [vmem:[#allocation81_spill] sm:$0xff] }
 0x57d   : > { %v5037_v30 = vsub.f32 0.0, %v5005_v21  ;;  %6182 = vpow2.f32 %v5061_v47  ;;  %v5069_v55 = vmul.f32 1.442695, %v5033_v31  ;;  %v5010_v45 = vadd.f32 %v4978_v52, %v10368_v22 }
 0x57e   : > { %v5038_v35 = vsub.f32 0.0, %v5006_v10  ;;  %6184 = vpow2.f32 %v5063_v4  ;;  %v5071_v51 = vmul.f32 1.442695, %v5034_v29  ;;  %v5011_v17 = vadd.f32 %v4979_v44, %v10379_v32 }
 0x57f   : > { %v5039_v25 = vsub.f32 0.0, %v5007_v9  ;;  %6186 = vpow2.f32 %v5065_v43  ;;  %v5073_v54 = vmul.f32 1.442695, %v5035_v26  ;;  %v5012_v12 = vadd.f32 %v4980_v60, %v10390_v46 }
 0x580   : > { %v6181_v7 = vpop.eup %6180  ;;  %v5040_v57 = vsub.f32 0.0, %v5008_v39  ;;  %6188 = vpow2.f32 %v5067_v41  ;;  %v5013_v19 = vadd.f32 %v4981_v49, %v10401_v42  ;;  %v5041_v38 = vsub.f32 0.0, %v5009_v50 }
 0x581   : > { %5219 = vst [vmem:[%s10745_s27 + $0xf0] sm:$0xff] %v6181_v7  ;;  %v5075_v7 = vmul.f32 1.442695, %v5036_v28  ;;  %6190 = vpow2.f32 %v5069_v55  ;;  %v5077_v58 = vmul.f32 1.442695, %v5037_v30  ;;  %v5014_v22 = vadd.f32 %v4982_v14, %v10412_v48  ;;  %v12275_v55 = vld [vmem:[#allocation85_spill] sm:$0xff] }
 0x582   : > { %v5042_v52 = vsub.f32 0.0, %v5010_v45  ;;  %6192 = vpow2.f32 %v5071_v51  ;;  %v5079_v20 = vmul.f32 1.442695, %v5038_v35  ;;  %v5015_v32 = vadd.f32 %v4983_v1, %v12269_v8 }
 0x583   : > { %v5043_v44 = vsub.f32 0.0, %v5011_v17  ;;  %6194 = vpow2.f32 %v5073_v54  ;;  %v5081_v3 = vmul.f32 1.442695, %v5039_v25  ;;  %v5016_v46 = vadd.f32 %v4984_v59, %v12270_v18 }
 0x584   : > { %v5044_v60 = vsub.f32 0.0, %v5012_v12  ;;  %6196 = vpow2.f32 %v5075_v7  ;;  %v5083_v56 = vmul.f32 1.442695, %v5040_v57  ;;  %v5017_v42 = vadd.f32 %v10738_v27, %v12271_v53  ;;  %v12277_v7 = vld [vmem:[#allocation87_spill] sm:$0xff] }
 0x585   : > { %v5045_v49 = vsub.f32 0.0, %v5013_v19  ;;  %6198 = vpow2.f32 %v5077_v58  ;;  %v5085_v23 = vmul.f32 1.442695, %v5041_v38  ;;  %v5018_v48 = vadd.f32 %v10742_v11, %v10456_v6 }
 0x586   : > { %v5046_v14 = vsub.f32 0.0, %v5014_v22  ;;  %6200 = vpow2.f32 %v5079_v20  ;;  %v5087_v1 = vmul.f32 1.442695, %v5042_v52  ;;  %v5019_v59 = vadd.f32 %v10750_v36, %v10467_v40  ;;  %v12272_v36 = vld [vmem:[#allocation84_spill] sm:$0xff] }
 0x587   : > { %v10803_v37 = vpop.eup %6182  ;;  %v5047_v0 = vsub.f32 0.0, %v5015_v32  ;;  %6202 = vpow2.f32 %v5081_v3  ;;  %v5089_v34 = vmul.f32 1.442695, %v5043_v44  ;;  %v5020_v27 = vadd.f32 %v10754_v5, %v10478_v15  ;;  %v12273_v5 = vld [vmem:[#allocation83_spill] sm:$0xff] }
 0x588   : > { %v10807_v21 = vpop.eup %6184  ;;  %v5048_v31 = vsub.f32 0.0, %v5016_v46  ;;  %6204 = vpow2.f32 %v5083_v56  ;;  %v5091_v10 = vmul.f32 1.442695, %v5044_v60  ;;  %v5021_v11 = vadd.f32 %v10758_v2, %v10489_v13  ;;  %v12274_v2 = vld [vmem:[#allocation86_spill] sm:$0xff] }
 0x589   : > { %v10811_v6 = vpop.eup %6186  ;;  %v5049_v29 = vsub.f32 0.0, %v5017_v42  ;;  %6206 = vpow2.f32 %v5085_v23  ;;  %v5093_v9 = vmul.f32 1.442695, %v5045_v49  ;;  %v5022_v26 = vadd.f32 %v10763_v16, %v12272_v36 }
 0x58a   : > { %v10815_v40 = vpop.eup %6188  ;;  %v5050_v47 = vsub.f32 0.0, %v5018_v48  ;;  %6208 = vpow2.f32 %v5087_v1  ;;  %v5095_v4 = vmul.f32 1.442695, %v5046_v14  ;;  %v5023_v39 = vadd.f32 %v10768_v33, %v12273_v5  ;;  %v12276_v33 = vld [vmem:[#allocation88_spill] sm:$0xff] }
 0x58b   : > { %v10819_v15 = vpop.eup %6190  ;;  %v5051_v28 = vsub.f32 0.0, %v5019_v59  ;;  %6210 = vpow2.f32 %v5089_v34  ;;  %v5097_v43 = vmul.f32 1.442695, %v5047_v0  ;;  %v5024_v41 = vadd.f32 %v10773_v24, %v12274_v2 }
 0x58c   : > { %v10823_v13 = vpop.eup %6192  ;;  %v5052_v50 = vsub.f32 0.0, %v5020_v27  ;;  %6212 = vpow2.f32 %v5091_v10  ;;  %v5099_v30 = vmul.f32 1.442695, %v5048_v31  ;;  %v5025_v45 = vadd.f32 %v10777_v61, %v12275_v55 }
 0x58d   : > { %v6195_v16 = vpop.eup %6194  ;;  %v5053_v35 = vsub.f32 0.0, %v5021_v11  ;;  %6214 = vpow2.f32 %v5093_v9  ;;  %v5101_v51 = vmul.f32 1.442695, %v5049_v29  ;;  %v5026_v25 = vadd.f32 %v10782_v62, %v12276_v33 }
 0x58e   : > { %v6197_v17 = vpop.eup %6196  ;;  %v5054_v54 = vsub.f32 0.0, %v5022_v26  ;;  %6216 = vpow2.f32 %v5095_v4  ;;  %v5103_v12 = vmul.f32 1.442695, %v5050_v47  ;;  %v5028_v24 = vadd.f32 %v10786_v63, %v12277_v7 }
 0x58f   : > { %v6199_v57 = vpop.eup %6198  ;;  %v5055_v19 = vsub.f32 0.0, %v5023_v39  ;;  %6218 = vpow2.f32 %v5097_v43  ;;  %v5105_v38 = vmul.f32 1.442695, %v5051_v28  ;;  %v5056_v22 = vsub.f32 0.0, %v5024_v41 }
 0x590   : > { %v6201_v58 = vpop.eup %6200  ;;  %6220 = vpow2.f32 %v5099_v30  ;;  %v5107_v61 = vmul.f32 1.442695, %v5052_v50  ;;  %v5057_v20 = vsub.f32 0.0, %v5025_v45  ;;  %v5109_v8 = vmul.f32 1.442695, %v5053_v35 }
 0x591   : > { %v6203_v52 = vpop.eup %6202  ;;  %6222 = vpow2.f32 %v5101_v51  ;;  %v5058_v62 = vsub.f32 0.0, %v5026_v25  ;;  %v5111_v44 = vmul.f32 1.442695, %v5054_v54  ;;  %v5060_v18 = vsub.f32 0.0, %v5028_v24 }
 0x592   : > { %v6205_v32 = vpop.eup %6204  ;;  %6224 = vpow2.f32 %v5103_v12  ;;  %v5113_v46 = vmul.f32 1.442695, %v5055_v19  ;;  %v5115_v60 = vmul.f32 1.442695, %v5056_v22  ;;  %v5117_v53 = vmul.f32 1.442695, %v5057_v20 }
 0x593   : > { %v6207_v3 = vpop.eup %6206  ;;  %6226 = vpow2.f32 %v5105_v38  ;;  %v5119_v49 = vmul.f32 1.442695, %v5058_v62  ;;  %v5123_v48 = vmul.f32 1.442695, %v5060_v18  ;;  %v5125_v1 = vadd.f32 1.0, %v10803_v37 }
 0x594   : > { %v6209_v63 = vpop.eup %6208  ;;  %6228 = vpow2.f32 %v5107_v61  ;;  %v5126_v0 = vadd.f32 1.0, %v10807_v21  ;;  %v5127_v27 = vadd.f32 1.0, %v10811_v6  ;;  %v5128_v10 = vadd.f32 1.0, %v10815_v40 }
 0x595   : > { %v6211_v56 = vpop.eup %6210  ;;  %6230 = vpow2.f32 %v5109_v8  ;;  %v5129_v29 = vadd.f32 1.0, %v10819_v15  ;;  %v5130_v36 = vadd.f32 1.0, %v10823_v13  ;;  %v5131_v26 = vadd.f32 1.0, %v6195_v16 }
 0x596   : > { %v6213_v42 = vpop.eup %6212  ;;  %6232 = vpow2.f32 %v5111_v44  ;;  %v5132_v47 = vadd.f32 1.0, %v6197_v17  ;;  %v5133_v6 = vadd.f32 1.0, %v6199_v57  ;;  %v5134_v39 = vadd.f32 1.0, %v6201_v58 }
 0x597   : > { %v6215_v23 = vpop.eup %6214  ;;  %6234 = vpow2.f32 %v5113_v46  ;;  %v5135_v15 = vadd.f32 1.0, %v6203_v52  ;;  %v5136_v43 = vadd.f32 1.0, %v6205_v32  ;;  %v5137_v2 = vadd.f32 1.0, %v6207_v3 }
 0x598   : > { %v6217_v14 = vpop.eup %6216  ;;  %6236 = vpow2.f32 %v5115_v60  ;;  %v5138_v50 = vadd.f32 1.0, %v6209_v63  ;;  %v5139_v16 = vadd.f32 1.0, %v6211_v56  ;;  %v5140_v45 = vadd.f32 1.0, %v6213_v42 }
 0x599   : > { %v6219_v59 = vpop.eup %6218  ;;  %6238 = vpow2.f32 %v5117_v53  ;;  %v5141_v51 = vadd.f32 1.0, %v6215_v23  ;;  %v5142_v33 = vadd.f32 1.0, %v6217_v14 }
 0x59a   : > { %v6221_v34 = vpop.eup %6220  ;;  %6240 = vpow2.f32 %v5119_v49  ;;  %v5143_v54 = vadd.f32 1.0, %v6219_v59 }
 0x59b   : > { %v6223_v31 = vpop.eup %6222  ;;  %6242 = vpow2.f32 %v5123_v48  ;;  %v5144_v57 = vadd.f32 1.0, %v6221_v34 }
 0x59c   : > { %v6225_v11 = vpop.eup %6224  ;;  %6244 = vrcp.f32 %v5125_v1  ;;  %v5145_v24 = vadd.f32 1.0, %v6223_v31 }
 0x59d   : > { %v6227_v9 = vpop.eup %6226  ;;  %6246 = vrcp.f32 %v5126_v0  ;;  %v5146_v38 = vadd.f32 1.0, %v6225_v11 }
 0x59e   : > { %v6229_v37 = vpop.eup %6228  ;;  %6248 = vrcp.f32 %v5127_v27  ;;  %v5147_v22 = vadd.f32 1.0, %v6227_v9 }
 0x59f   : > { %v6231_v21 = vpop.eup %6230  ;;  %6250 = vrcp.f32 %v5128_v10  ;;  %v5148_v52 = vadd.f32 1.0, %v6229_v37 }
 0x5a0   : > { %v6233_v4 = vpop.eup %6232  ;;  %6252 = vrcp.f32 %v5129_v29  ;;  %v5149_v8 = vadd.f32 1.0, %v6231_v21 }
 0x5a1   : > { %v6235_v5 = vpop.eup %6234  ;;  %6254 = vrcp.f32 %v5130_v36  ;;  %v5150_v62 = vadd.f32 1.0, %v6233_v4 }
 0x5a2   : > { %v10839_v40 = vpop.eup %6236  ;;  %6256 = vrcp.f32 %v5131_v26  ;;  %v5151_v3 = vadd.f32 1.0, %v6235_v5 }
 0x5a3   : > { %v10841_v28 = vpop.eup %6238  ;;  %6258 = vrcp.f32 %v5132_v47  ;;  %v5152_v46 = vadd.f32 1.0, %v10839_v40 }
 0x5a4   : > { %v10843_v13 = vpop.eup %6240  ;;  %6260 = vrcp.f32 %v5133_v6  ;;  %v5153_v60 = vadd.f32 1.0, %v10841_v28 }
 0x5a5   : > { %v10845_v41 = vpop.eup %6242  ;;  %6262 = vrcp.f32 %v5134_v39  ;;  %v5154_v53 = vadd.f32 1.0, %v10843_v13 }
 0x5a6   : > { %v6245_v30 = vpop.eup %6244  ;;  %6264 = vrcp.f32 %v5135_v15  ;;  %v5156_v49 = vadd.f32 1.0, %v10845_v41 }
 0x5a7   : > { %v6247_v55 = vpop.eup %6246  ;;  %6266 = vrcp.f32 %v5136_v43  ;;  %5189 = vst [vmem:[%s10745_s27] sm:$0xff] %v6245_v30 }
 0x5a8   : > { %v6249_v35 = vpop.eup %6248  ;;  %6268 = vrcp.f32 %v5137_v2  ;;  %5190 = vst [vmem:[%s10745_s27 + $0x8] sm:$0xff] %v6247_v55 }
 0x5a9   : > { %v6251_v17 = vpop.eup %6250  ;;  %6270 = vrcp.f32 %v5138_v50  ;;  %5191 = vst [vmem:[%s10745_s27 + $0x10] sm:$0xff] %v6249_v35 }
 0x5aa   : > { %v6253_v25 = vpop.eup %6252  ;;  %6272 = vrcp.f32 %v5139_v16  ;;  %5192 = vst [vmem:[%s10745_s27 + $0x18] sm:$0xff] %v6251_v17 }
 0x5ab   : > { %v6255_v12 = vpop.eup %6254  ;;  %6274 = vrcp.f32 %v5140_v45  ;;  %5193 = vst [vmem:[%s10745_s27 + $0x20] sm:$0xff] %v6253_v25 }
 0x5ac   : > { %v6257_v7 = vpop.eup %6256  ;;  %6276 = vrcp.f32 %v5141_v51  ;;  %5194 = vst [vmem:[%s10745_s27 + $0x28] sm:$0xff] %v6255_v12 }
 0x5ad   : > { %v6259_v19 = vpop.eup %6258  ;;  %6278 = vrcp.f32 %v5142_v33  ;;  %5195 = vst [vmem:[%s10745_s27 + $0x30] sm:$0xff] %v6257_v7 }
 0x5ae   : > { %v6261_v58 = vpop.eup %6260  ;;  %6280 = vrcp.f32 %v5143_v54  ;;  %5196 = vst [vmem:[%s10745_s27 + $0x38] sm:$0xff] %v6259_v19 }
 0x5af   : > { %v6263_v61 = vpop.eup %6262  ;;  %6282 = vrcp.f32 %v5144_v57  ;;  %5197 = vst [vmem:[%s10745_s27 + $0x40] sm:$0xff] %v6261_v58 }
 0x5b0   : > { %v6265_v20 = vpop.eup %6264  ;;  %6284 = vrcp.f32 %v5145_v24  ;;  %5198 = vst [vmem:[%s10745_s27 + $0x48] sm:$0xff] %v6263_v61 }
 0x5b1   : > { %v6267_v32 = vpop.eup %6266  ;;  %6286 = vrcp.f32 %v5146_v38  ;;  %5199 = vst [vmem:[%s10745_s27 + $0x50] sm:$0xff] %v6265_v20 }
 0x5b2   : > { %v6269_v44 = vpop.eup %6268  ;;  %6288 = vrcp.f32 %v5147_v22  ;;  %5200 = vst [vmem:[%s10745_s27 + $0x58] sm:$0xff] %v6267_v32 }
 0x5b3   : > { %v6271_v18 = vpop.eup %6270  ;;  %6290 = vrcp.f32 %v5148_v52  ;;  %5201 = vst [vmem:[%s10745_s27 + $0x60] sm:$0xff] %v6269_v44 }
 0x5b4   : > { %v6273_v63 = vpop.eup %6272  ;;  %6292 = vrcp.f32 %v5149_v8  ;;  %5202 = vst [vmem:[%s10745_s27 + $0x68] sm:$0xff] %v6271_v18 }
 0x5b5   : > { %v6275_v56 = vpop.eup %6274  ;;  %6294 = vrcp.f32 %v5150_v62  ;;  %5203 = vst [vmem:[%s10745_s27 + $0x70] sm:$0xff] %v6273_v63 }
 0x5b6   : > { %v6277_v42 = vpop.eup %6276  ;;  %6296 = vrcp.f32 %v5151_v3  ;;  %5204 = vst [vmem:[%s10745_s27 + $0x78] sm:$0xff] %v6275_v56 }
 0x5b7   : > { %v6279_v23 = vpop.eup %6278  ;;  %6298 = vrcp.f32 %v5152_v46  ;;  %5205 = vst [vmem:[%s10745_s27 + $0x80] sm:$0xff] %v6277_v42 }
 0x5b8   : > { %v6281_v48 = vpop.eup %6280  ;;  %6300 = vrcp.f32 %v5153_v60  ;;  %5206 = vst [vmem:[%s10745_s27 + $0x88] sm:$0xff] %v6279_v23 }
 0x5b9   : > { %v6283_v14 = vpop.eup %6282  ;;  %6302 = vrcp.f32 %v5154_v53  ;;  %5207 = vst [vmem:[%s10745_s27 + $0x90] sm:$0xff] %v6281_v48 }
 0x5ba   : > { %v6285_v1 = vpop.eup %6284  ;;  %6304 = vrcp.f32 %v5156_v49  ;;  %5208 = vst [vmem:[%s10745_s27 + $0x98] sm:$0xff] %v6283_v14 }
 0x5bb   : > { %v6287_v59 = vpop.eup %6286  ;;  %5209 = vst [vmem:[%s10745_s27 + $0xa0] sm:$0xff] %v6285_v1 }
 0x5bc   : > { %v6289_v0 = vpop.eup %6288  ;;  %5210 = vst [vmem:[%s10745_s27 + $0xa8] sm:$0xff] %v6287_v59 }
 0x5bd   : > { %v6291_v34 = vpop.eup %6290  ;;  %5211 = vst [vmem:[%s10745_s27 + $0xb0] sm:$0xff] %v6289_v0 }
 0x5be   : > { %v6293_v27 = vpop.eup %6292  ;;  %5212 = vst [vmem:[%s10745_s27 + $0xb8] sm:$0xff] %v6291_v34 }
 0x5bf   : > { %v6295_v31 = vpop.eup %6294  ;;  %5213 = vst [vmem:[%s10745_s27 + $0xc0] sm:$0xff] %v6293_v27 }
 0x5c0   : > { %v6297_v10 = vpop.eup %6296  ;;  %5214 = vst [vmem:[%s10745_s27 + $0xc8] sm:$0xff] %v6295_v31 }
 0x5c1   : > { %v6299_v11 = vpop.eup %6298  ;;  %5215 = vst [vmem:[%s10745_s27 + $0xd0] sm:$0xff] %v6297_v10 }
 0x5c2   : > { %v6301_v29 = vpop.eup %6300  ;;  %5216 = vst [vmem:[%s10745_s27 + $0xd8] sm:$0xff] %v6299_v11 }
 0x5c3   : > { %v6303_v9 = vpop.eup %6302  ;;  %5217 = vst [vmem:[%s10745_s27 + $0xe0] sm:$0xff] %v6301_v29 }
 0x5c4   : > { %v6305_v36 = vpop.eup %6304  ;;  %5218 = vst [vmem:[%s10745_s27 + $0xe8] sm:$0xff] %v6303_v9 }
 0x5c5   : > { %5220 = vst [vmem:[%s10745_s27 + $0xf8] sm:$0xff] %v6305_v36 }
 0x5c6   : > { %6319 = shalt.err (!%p6316_p7)
}
 0x5c7   : > { %s6320_s30 = scalar_lea.hbm %s10884_s22, 4096  ;;  %s6324_s29 = scalar_lea.hbm %s10954_s8, 32768 }
 0x5c8   : > { %p6321_p9 = scmp.ne.s32.totalorder %s10884_s22, %s6320_s30  ;;  %p6325_p12 = scmp.lt.u32.totalorder %s10884_s22, %s10954_s8 }
 0x5c9   : > { %p6326_p13 = scmp.lt.u32.totalorder %s6324_s29, %s6320_s30  ;;  %p6328_p1 = scmp.lt.u32.totalorder %s6320_s30, %s10884_s22 }
 0x5ca   : > { %p6322_p10 = pnand %p6321_p9, %p6509_p3 }
 0x5cb   : > { %p6327_p0 = por %p6326_p13, %p6325_p12 }
 0x5cc   : > { %p6323_p11 = pneg %p6322_p10 }
 0x5cd   : > { %p6329_p2 = por %p6328_p1, %p6327_p0 }
 0x5cf   : > { %p6330_p4 = pnand %p6329_p2, %p6323_p11 }
 0x5d1   : > { %6333 = shalt.err (!%p6330_p4)
}
 0x5d2   : > { %s6404_s16 = smov 128   ;;  %s6405_s26 = smov 512  }
 0x5d3   : > { %s6406_s19 = smov 8  }
 0x5d4   : > { %6063 = dma.vmem_to_hbm [thread:$0]  (%p6509_p3), %s10887_s1, 4096, %s10884_s22, %s10894_s23, %s6404_s16, %s6405_s26, %s6406_s19  }
 0x5d5 PF: > { %p6069_p5 = scmp.ge.s32.totalorder %s6400_s0, 2  ;;  %s5251_s24 = sand.u32 1, %s6372_s9  }
 0x5d6   : > { %s5252_s18 = scalar_lea.sflag [#allocation5], %s5251_s24 }
 0x5d7   : > { %p6066_p6 = pnand %p6069_p5, %p6518_p8 }
 0x5d9   : > { %6367 = dma.done.wait (!%p6066_p6), %s5252_s18, 4096  }
 0x5da   : > { %6369 = vsyncadd (!%p6066_p6), %s5252_s18, 4294963200  ;;  %s23_s0 = sadd.s32 1, %s6400_s0   ;;  %s12278_s20 = sld [smem:[#allocation7_spill]] }
 0x5db   : > { %p20_p7 = scmp.ge.s32.totalorder %s23_s0, 10   ;;  %s12279_s9 = smov %s6376_s10 }
 0x5dc   : > { %s12280_s10 = smov %s6380_s11  ;;  %s12281_s11 = smov %s6527_s25 }
 0x5dd   : > { %s12282_s12 = smov %s6392_s14  ;;  %s12283_s13 = smov %s6396_s15 }
 0x5de   : > { %s12284_s14 = smov %s12287_s17  ;;  %22 = sbr.rel (!%p20_p7) target bundleno = 8 (0x8), region = 102 }
 0x5e0   : > { %s12285_s15 = smov %s12278_s20 }
 0x5e5   :  { %5257 = vsyncpa [#allocation5], 1 }
 0x5e6   :  { %5259 = vsyncpa [#allocation5 + $0x1], 1 }

</bundles_post_ra>
